<compile_context>
chip_gen: v5e
topology: v5e:2x2
jax: 0.10.0
libtpu: 0.0.40
codegen_flags: <defaults>
</compile_context>

<pallas_src>
import functools

import jax
import jax.numpy as jnp
from jax.experimental import pallas as pl
from jax.experimental.pallas import tpu as pltpu

NEG_SLOPE = 0.01  # torch.nn.LeakyReLU default


def _leaky_relu(v):
    return jnp.where(v > 0, v, NEG_SLOPE * v)


def conv2d1x1_kernel(x_ref, w13_ref, b13_ref, w2_ref, b2_ref, o_ref, *,
                     hidden_dim, n_chunks):
    """One batch tile. Weights/biases are whole-array VMEM blocks resident across
    the grid. The row tile is processed in `n_chunks` static sub-chunks so the
    matmuls of chunk j+1 can overlap the softmax epilogue of chunk j."""
    tb = x_ref.shape[0]
    cr = tb // n_chunks

    # Hoist the resident operands once (values backed by the VMEM blocks).
    w13 = w13_ref[...]
    b13 = b13_ref[...]
    w2 = w2_ref[...]
    b2 = b2_ref[...]

    for c in range(n_chunks):                      # static -> one basic block
        rows = pl.ds(c * cr, cr)                   # static slice: zero-cost view
        x = x_ref[rows, :]

        # fc1 and fc3 fused: one MXU pass over the shared bf16 LHS, f32 accumulate.
        r = jnp.dot(x, w13, preferred_element_type=jnp.float32) + b13
        att1 = r[:, :hidden_dim]                   # lane-aligned: hidden_dim % 128 == 0
        out = r[:, hidden_dim:]                    # fc3 output

        # LeakyReLU -> fc2 (bf16-fed MXU, f32 acc) -> softmax(axis=-1).
        att2 = _leaky_relu(att1).astype(w2.dtype)
        logits = jnp.dot(att2, w2, preferred_element_type=jnp.float32) + b2
        logits = logits - jnp.max(logits, axis=-1, keepdims=True)
        e = jnp.exp(logits)
        score = e * pl.reciprocal(jnp.sum(e, axis=-1, keepdims=True), approx=True)

        # out + score*out == out * (1 + score), then LeakyReLU.
        y = out * (1.0 + score)
        o_ref[rows, :] = _leaky_relu(y).astype(o_ref.dtype)


def _vmem_capacity_bytes():
    """Physical VMEM per TensorCore; conservative default if the query fails."""
    try:
        return int(pltpu.get_tpu_info().vmem_capacity_bytes)
    except Exception:
        return 64 << 20  # v7x per-TC VMEM (smallest of the three generations)


def _pick_row_tile(batch, in_f, hidden_dim, out_f, itemsize, weight_bytes, vmem_cap):
    """Row tile sized against physical VMEM, accounting for the f32 intermediates
    and the (single-buffered) resident weights, MXU-aligned."""
    budget = (vmem_cap * 3) // 4                 # v7x: 48 MiB, v5e/v6e: 96 MiB
    max_rows = 256 if vmem_cap <= (64 << 20) else 512

    io_per_row = 2 * (in_f + out_f) * itemsize   # double-buffered bf16 x + y tiles
    # f32 temporaries (r, logits/e/score) + bf16 att2 live only for one sub-chunk.
    n_chunks_est = 4
    tmp_per_row = ((hidden_dim + out_f) * 4 + 2 * out_f * 4
                   + hidden_dim * itemsize) // n_chunks_est

    avail = max(budget - weight_bytes - (4 << 20), 1 << 20)
    tb = int(avail // max(io_per_row + tmp_per_row, 1))
    tb = min(tb, max_rows, batch)

    if batch > 256:  # keep >= 2 'parallel' grid steps so megacore can shard the batch
        tb = min(tb, max(256, ((batch // 2) // 256) * 256))

    # MXU-friendly alignment: 256 on v6e/v7x (2x256 MXU), else 128, else mult of 8.
    if tb >= 256:
        tb = (tb // 256) * 256
    elif tb >= 128:
        tb = 128
    else:
        tb = max(8, (tb // 8) * 8)
    return int(tb)


def conv2d1x1_forward(x, params, *, block_rows=None):
    """x: [B, in_f] (features-last).  params: fused, kernel-layout weights."""
    w13, b13, w2, b2 = params["w13"], params["b13"], params["w2"], params["b2"]
    B, in_f = x.shape
    hidden_plus_out = w13.shape[1]
    out_f = w2.shape[1]
    hidden_dim = hidden_plus_out - out_f

    if hidden_dim % 128 != 0 or out_f % 128 != 0:
        raise ValueError(
            "hidden_dim and out_f must be multiples of 128 so the fused r[:, :hidden] "
            "slice is lane-aligned and the output stays lane-dense "
            f"(got hidden_dim={hidden_dim}, out_f={out_f})")

    itemsize = jnp.dtype(x.dtype).itemsize
    weight_bytes = sum(int(a.size) * jnp.dtype(a.dtype).itemsize
                       for a in (w13, b13, w2, b2))
    vmem_cap = _vmem_capacity_bytes()

    if block_rows is not None:
        tb = int(block_rows)
    else:
        tb = _pick_row_tile(B, in_f, hidden_dim, out_f, itemsize, weight_bytes, vmem_cap)
    if B < 8:
        tb = B              # full-dim block: always a legal block shape
    tb = max(1, min(tb, max(B, 8)))

    # 2-4 sub-chunks of ~128 rows so the MXU overlaps the softmax epilogue.
    n_chunks = min(4, max(1, tb // 128))
    while tb % n_chunks:
        n_chunks -= 1

    # Scoped-VMEM limit: weights (worst case double-buffered for the fallback path)
    # + double-buffered x/y tiles + per-chunk f32 intermediates + headroom, capped
    # below physical VMEM.
    chunk = tb // n_chunks
    need = (2 * weight_bytes
            + 2 * tb * (in_f + out_f) * itemsize
            + chunk * (hidden_plus_out * 4 + 2 * out_f * 4 + hidden_dim * itemsize)
            + (4 << 20))
    vmem_limit = int(min(max(need, 32 << 20), max(vmem_cap - (8 << 20), 32 << 20)))

    n_steps = pl.cdiv(B, tb)
    cost = pl.CostEstimate(
        flops=int(2 * B * (in_f * hidden_plus_out + hidden_dim * out_f)),
        transcendentals=int(B * (out_f + 1)),     # exp + approx reciprocal
        bytes_accessed=int(B * (in_f + out_f) * itemsize + weight_bytes),
    )

    kernel = functools.partial(conv2d1x1_kernel, hidden_dim=hidden_dim,
                               n_chunks=n_chunks)

    def _call(single_buffer_weights):
        def w_spec(arr):
            # Constant index_map -> weights stay VMEM-resident across the batch grid;
            # Buffered(1) avoids allocating a useless second buffer for them.
            if single_buffer_weights:
                return pl.BlockSpec(arr.shape, lambda i: (0, 0),
                                    pipeline_mode=pl.Buffered(1))
            return pl.BlockSpec(arr.shape, lambda i: (0, 0))

        return pl.pallas_call(
            kernel,
            out_shape=jax.ShapeDtypeStruct((B, out_f), x.dtype),
            grid=(n_steps,),                       # no jnp.pad: last block is masked
            in_specs=[
                pl.BlockSpec((tb, in_f), lambda i: (i, 0)),   # x: batch-tiled, pipelined
                w_spec(w13), w_spec(b13), w_spec(w2), w_spec(b2),
            ],
            out_specs=pl.BlockSpec((tb, out_f), lambda i: (i, 0)),
            compiler_params=pltpu.CompilerParams(
                dimension_semantics=("parallel",),             # shard batch grid across TCs
                vmem_limit_bytes=vmem_limit,
            ),
            cost_estimate=cost,
        )(x, w13, b13, w2, b2)

    try:
        return _call(True)
    except Exception:
        # pipeline_mode=pl.Buffered(1) unsupported by this jax/Mosaic version:
        # fall back to default (double-buffered) resident weights. Perf/VMEM only.
        return _call(False)


def init_params(key, in_f, hidden_dim, out_f, dtype=jnp.bfloat16):
    """Deterministic synthetic init (PyTorch-Linear-like uniform ranges).

    Weights stored transposed vs. torch ([in, out]); fc1/fc3 share the same LHS so
    they are fused into one [in_f, hidden+out_f] matrix. Weights bf16 (MXU-native),
    biases f32 (tiny)."""
    ks = jax.random.split(key, 6)

    def lin(kw, kb, fan_in, fan_out):
        bound = 1.0 / jnp.sqrt(fan_in)
        w = jax.random.uniform(kw, (fan_in, fan_out), jnp.float32, -bound, bound)
        b = jax.random.uniform(kb, (1, fan_out), jnp.float32, -bound, bound)
        return w, b

    w1, b1 = lin(ks[0], ks[1], in_f, hidden_dim)
    w2, b2 = lin(ks[2], ks[3], hidden_dim, out_f)
    w3, b3 = lin(ks[4], ks[5], in_f, out_f)

    w13 = jnp.concatenate([w1, w3], axis=1).astype(dtype)
    b13 = jnp.concatenate([b1, b3], axis=1).astype(jnp.float32)
    return {
        "w13": w13,
        "b13": b13,
        "w2": w2.astype(dtype),
        "b2": b2.astype(jnp.float32),
    }


def reference_forward(x, params, hidden_dim):
    """Pure-JAX (f32) reference of the PyTorch forward using the exact
    (bf16-rounded) weights the kernel sees."""
    w13 = params["w13"].astype(jnp.float32)
    b13 = params["b13"].astype(jnp.float32)
    w1, w3 = w13[:, :hidden_dim], w13[:, hidden_dim:]
    b1, b3 = b13[:, :hidden_dim], b13[:, hidden_dim:]
    w2 = params["w2"].astype(jnp.float32)
    b2 = params["b2"].astype(jnp.float32)

    xf = x.astype(jnp.float32)
    att1 = xf @ w1 + b1
    att2 = jnp.where(att1 > 0, att1, NEG_SLOPE * att1)
    score = jax.nn.softmax(att2 @ w2 + b2, axis=-1)
    out = xf @ w3 + b3
    y = out + score * out
    return jnp.where(y > 0, y, NEG_SLOPE * y)


if __name__ == "__main__":
    key = jax.random.PRNGKey(0)
    k_x, k_p = jax.random.split(key)

    # Small, lane-aligned demo shapes mirroring the ODDN ratio Conv2d1x1(in, in//2, in)
    # (real ODDN: in_f=2048, hidden=1024, out_f=2048).
    B, in_f, hidden_dim, out_f = 512, 256, 128, 256
    x = jax.random.normal(k_x, (B, in_f), dtype=jnp.float32).astype(jnp.bfloat16)
    params = init_params(k_p, in_f, hidden_dim, out_f)

    y = conv2d1x1_forward(x, params)
    y = jax.block_until_ready(y)

    y_ref = reference_forward(x, params, hidden_dim)
    assert y.shape == (B, out_f)
    y_f32 = y.astype(jnp.float32)
    max_err = float(jnp.max(jnp.abs(y_f32 - y_ref)))
    # bf16 inputs/weights + approx reciprocal -> loosened tolerance vs f32 reference.
    assert jnp.allclose(y_f32, y_ref, atol=3e-2, rtol=3e-2), (
        f"mismatch vs reference (max abs err {max_err})"
    )

    print("KERNEL_OK")
</pallas_src>

<mosaic_0001>
module attributes {stable_mosaic.version = 11 : i64} {
  func.func @conv2d1x1_kernel(%arg0: i32, %arg1: memref<256x256xbf16, #tpu.memory_space<vmem>>, %arg2: memref<256x384xbf16, #tpu.memory_space<vmem>>, %arg3: memref<1x384xf32, #tpu.memory_space<vmem>>, %arg4: memref<128x256xbf16, #tpu.memory_space<vmem>>, %arg5: memref<1x256xf32, #tpu.memory_space<vmem>>, %arg6: memref<256x256xbf16, #tpu.memory_space<vmem>>) attributes {dimension_semantics = [#tpu.dimension_semantics<parallel>], iteration_bounds = array<i64: 2>, scalar_prefetch = 0 : i64, scratch_operands = 0 : i64, tpu.core_type = #tpu.core_type<tc>, window_params = [{transform_indices = @transform_0, window_bounds = array<i64: 256, 256>}, {pipeline_mode = #tpu.pipeline_mode<synchronous>, transform_indices = @transform_1, window_bounds = array<i64: 256, 384>}, {pipeline_mode = #tpu.pipeline_mode<synchronous>, transform_indices = @transform_2, window_bounds = array<i64: 1, 384>}, {pipeline_mode = #tpu.pipeline_mode<synchronous>, transform_indices = @transform_3, window_bounds = array<i64: 128, 256>}, {pipeline_mode = #tpu.pipeline_mode<synchronous>, transform_indices = @transform_4, window_bounds = array<i64: 1, 256>}, {transform_indices = @transform_5, window_bounds = array<i64: 256, 256>}]} {
    %c0 = arith.constant 0 : index
    %c0_0 = arith.constant 0 : index
    %0 = vector.load %arg2[%c0, %c0_0] : memref<256x384xbf16, #tpu.memory_space<vmem>>, vector<256x384xbf16>
    %c0_1 = arith.constant 0 : index
    %c0_2 = arith.constant 0 : index
    %1 = vector.load %arg3[%c0_1, %c0_2] : memref<1x384xf32, #tpu.memory_space<vmem>>, vector<1x384xf32>
    %c0_3 = arith.constant 0 : index
    %c0_4 = arith.constant 0 : index
    %2 = vector.load %arg4[%c0_3, %c0_4] : memref<128x256xbf16, #tpu.memory_space<vmem>>, vector<128x256xbf16>
    %c0_5 = arith.constant 0 : index
    %c0_6 = arith.constant 0 : index
    %3 = vector.load %arg5[%c0_5, %c0_6] : memref<1x256xf32, #tpu.memory_space<vmem>>, vector<1x256xf32>
    %c0_7 = arith.constant 0 : index
    %c0_8 = arith.constant 0 : index
    %4 = vector.load %arg1[%c0_7, %c0_8] : memref<256x256xbf16, #tpu.memory_space<vmem>>, vector<128x256xbf16>
    %cst = arith.constant dense<0.000000e+00> : vector<128x384xf32>
    %5 = tpu.matmul %4, %0, %cst {dimension_numbers = #tpu.dot_dimension_numbers<[1], [0], [0], [1], [0, 0, 1, 1], [], []>} : vector<128x256xbf16>, vector<256x384xbf16>, vector<128x384xf32> -> vector<128x384xf32>
    %6 = vector.broadcast %1 : vector<1x384xf32> to vector<128x384xf32>
    %7 = arith.addf %5, %6 : vector<128x384xf32>
    %8 = vector.extract_strided_slice %7 {offsets = [0, 0], sizes = [128, 128], strides = [1, 1]} : vector<128x384xf32> to vector<128x128xf32>
    %9 = vector.extract_strided_slice %7 {offsets = [0, 128], sizes = [128, 256], strides = [1, 1]} : vector<128x384xf32> to vector<128x256xf32>
    %cst_9 = arith.constant 0.000000e+00 : f32
    %10 = vector.broadcast %cst_9 : f32 to vector<128x128xf32>
    %11 = arith.cmpf ogt, %8, %10 : vector<128x128xf32>
    %cst_10 = arith.constant 0.00999999977 : f32
    %12 = vector.broadcast %cst_10 : f32 to vector<128x128xf32>
    %13 = arith.mulf %12, %8 : vector<128x128xf32>
    %14 = arith.select %11, %8, %13 : vector<128x128xi1>, vector<128x128xf32>
    %15 = arith.truncf %14 : vector<128x128xf32> to vector<128x128xbf16>
    %cst_11 = arith.constant dense<0.000000e+00> : vector<128x256xf32>
    %16 = tpu.matmul %15, %2, %cst_11 {dimension_numbers = #tpu.dot_dimension_numbers<[1], [0], [0], [1], [0, 0, 1, 1], [], []>} : vector<128x128xbf16>, vector<128x256xbf16>, vector<128x256xf32> -> vector<128x256xf32>
    %17 = vector.broadcast %3 : vector<1x256xf32> to vector<128x256xf32>
    %18 = arith.addf %16, %17 : vector<128x256xf32>
    %cst_12 = arith.constant dense<0xFF800000> : vector<128xf32>
    %19 = vector.multi_reduction <maximumf>, %18, %cst_12 [1] : vector<128x256xf32> to vector<128xf32>
    %20 = vector.shape_cast %19 : vector<128xf32> to vector<128x1xf32>
    %21 = vector.broadcast %20 : vector<128x1xf32> to vector<128x256xf32>
    %22 = arith.subf %18, %21 : vector<128x256xf32>
    %23 = math.exp %22 : vector<128x256xf32>
    %cst_13 = arith.constant dense<0.000000e+00> : vector<128xf32>
    %24 = vector.multi_reduction <add>, %23, %cst_13 [1] : vector<128x256xf32> to vector<128xf32>
    %25 = vector.shape_cast %24 : vector<128xf32> to vector<128x1xf32>
    %26 = tpu.reciprocal %25 {approx = true} : vector<128x1xf32> -> vector<128x1xf32>
    %27 = vector.broadcast %26 : vector<128x1xf32> to vector<128x256xf32>
    %28 = arith.mulf %23, %27 : vector<128x256xf32>
    %cst_14 = arith.constant 1.000000e+00 : f32
    %29 = vector.broadcast %cst_14 : f32 to vector<128x256xf32>
    %30 = arith.addf %29, %28 : vector<128x256xf32>
    %31 = arith.mulf %9, %30 : vector<128x256xf32>
    %cst_15 = arith.constant 0.000000e+00 : f32
    %32 = vector.broadcast %cst_15 : f32 to vector<128x256xf32>
    %33 = arith.cmpf ogt, %31, %32 : vector<128x256xf32>
    %cst_16 = arith.constant 0.00999999977 : f32
    %34 = vector.broadcast %cst_16 : f32 to vector<128x256xf32>
    %35 = arith.mulf %34, %31 : vector<128x256xf32>
    %36 = arith.select %33, %31, %35 : vector<128x256xi1>, vector<128x256xf32>
    %37 = arith.truncf %36 : vector<128x256xf32> to vector<128x256xbf16>
    %c0_17 = arith.constant 0 : index
    %c0_18 = arith.constant 0 : index
    %38 = vector.load %arg6[%c0_17, %c0_18] : memref<256x256xbf16, #tpu.memory_space<vmem>>, vector<128x256xbf16>
    tpu.vector_store %arg6[%c0_17, %c0_18], %37 {strides = array<i32>} : memref<256x256xbf16, #tpu.memory_space<vmem>>, vector<128x256xbf16>,
    %c128 = arith.constant 128 : index
    %c0_19 = arith.constant 0 : index
    %39 = vector.load %arg1[%c128, %c0_19] : memref<256x256xbf16, #tpu.memory_space<vmem>>, vector<128x256xbf16>
    %cst_20 = arith.constant dense<0.000000e+00> : vector<128x384xf32>
    %40 = tpu.matmul %39, %0, %cst_20 {dimension_numbers = #tpu.dot_dimension_numbers<[1], [0], [0], [1], [0, 0, 1, 1], [], []>} : vector<128x256xbf16>, vector<256x384xbf16>, vector<128x384xf32> -> vector<128x384xf32>
    %41 = vector.broadcast %1 : vector<1x384xf32> to vector<128x384xf32>
    %42 = arith.addf %40, %41 : vector<128x384xf32>
    %43 = vector.extract_strided_slice %42 {offsets = [0, 0], sizes = [128, 128], strides = [1, 1]} : vector<128x384xf32> to vector<128x128xf32>
    %44 = vector.extract_strided_slice %42 {offsets = [0, 128], sizes = [128, 256], strides = [1, 1]} : vector<128x384xf32> to vector<128x256xf32>
    %cst_21 = arith.constant 0.000000e+00 : f32
    %45 = vector.broadcast %cst_21 : f32 to vector<128x128xf32>
    %46 = arith.cmpf ogt, %43, %45 : vector<128x128xf32>
    %cst_22 = arith.constant 0.00999999977 : f32
    %47 = vector.broadcast %cst_22 : f32 to vector<128x128xf32>
    %48 = arith.mulf %47, %43 : vector<128x128xf32>
    %49 = arith.select %46, %43, %48 : vector<128x128xi1>, vector<128x128xf32>
    %50 = arith.truncf %49 : vector<128x128xf32> to vector<128x128xbf16>
    %cst_23 = arith.constant dense<0.000000e+00> : vector<128x256xf32>
    %51 = tpu.matmul %50, %2, %cst_23 {dimension_numbers = #tpu.dot_dimension_numbers<[1], [0], [0], [1], [0, 0, 1, 1], [], []>} : vector<128x128xbf16>, vector<128x256xbf16>, vector<128x256xf32> -> vector<128x256xf32>
    %52 = vector.broadcast %3 : vector<1x256xf32> to vector<128x256xf32>
    %53 = arith.addf %51, %52 : vector<128x256xf32>
    %cst_24 = arith.constant dense<0xFF800000> : vector<128xf32>
    %54 = vector.multi_reduction <maximumf>, %53, %cst_24 [1] : vector<128x256xf32> to vector<128xf32>
    %55 = vector.shape_cast %54 : vector<128xf32> to vector<128x1xf32>
    %56 = vector.broadcast %55 : vector<128x1xf32> to vector<128x256xf32>
    %57 = arith.subf %53, %56 : vector<128x256xf32>
    %58 = math.exp %57 : vector<128x256xf32>
    %cst_25 = arith.constant dense<0.000000e+00> : vector<128xf32>
    %59 = vector.multi_reduction <add>, %58, %cst_25 [1] : vector<128x256xf32> to vector<128xf32>
    %60 = vector.shape_cast %59 : vector<128xf32> to vector<128x1xf32>
    %61 = tpu.reciprocal %60 {approx = true} : vector<128x1xf32> -> vector<128x1xf32>
    %62 = vector.broadcast %61 : vector<128x1xf32> to vector<128x256xf32>
    %63 = arith.mulf %58, %62 : vector<128x256xf32>
    %cst_26 = arith.constant 1.000000e+00 : f32
    %64 = vector.broadcast %cst_26 : f32 to vector<128x256xf32>
    %65 = arith.addf %64, %63 : vector<128x256xf32>
    %66 = arith.mulf %44, %65 : vector<128x256xf32>
    %cst_27 = arith.constant 0.000000e+00 : f32
    %67 = vector.broadcast %cst_27 : f32 to vector<128x256xf32>
    %68 = arith.cmpf ogt, %66, %67 : vector<128x256xf32>
    %cst_28 = arith.constant 0.00999999977 : f32
    %69 = vector.broadcast %cst_28 : f32 to vector<128x256xf32>
    %70 = arith.mulf %69, %66 : vector<128x256xf32>
    %71 = arith.select %68, %66, %70 : vector<128x256xi1>, vector<128x256xf32>
    %72 = arith.truncf %71 : vector<128x256xf32> to vector<128x256xbf16>
    %c128_29 = arith.constant 128 : index
    %c0_30 = arith.constant 0 : index
    %73 = vector.load %arg6[%c128_29, %c0_30] : memref<256x256xbf16, #tpu.memory_space<vmem>>, vector<128x256xbf16>
    tpu.vector_store %arg6[%c128_29, %c0_30], %72 {strides = array<i32>} : memref<256x256xbf16, #tpu.memory_space<vmem>>, vector<128x256xbf16>,
    return
  }
  func.func @transform_0(%arg0: i32) -> (i32, i32) {
    %c0_i32 = arith.constant 0 : i32
    %c0_i32_0 = arith.constant 0 : i32
    return %arg0, %c0_i32 : i32, i32
  }
  func.func @transform_1(%arg0: i32) -> (i32, i32) {
    %c0_i32 = arith.constant 0 : i32
    %c0_i32_0 = arith.constant 0 : i32
    %c0_i32_1 = arith.constant 0 : i32
    return %c0_i32, %c0_i32_0 : i32, i32
  }
  func.func @transform_2(%arg0: i32) -> (i32, i32) {
    %c0_i32 = arith.constant 0 : i32
    %c0_i32_0 = arith.constant 0 : i32
    %c0_i32_1 = arith.constant 0 : i32
    return %c0_i32, %c0_i32_0 : i32, i32
  }
  func.func @transform_3(%arg0: i32) -> (i32, i32) {
    %c0_i32 = arith.constant 0 : i32
    %c0_i32_0 = arith.constant 0 : i32
    %c0_i32_1 = arith.constant 0 : i32
    return %c0_i32, %c0_i32_0 : i32, i32
  }
  func.func @transform_4(%arg0: i32) -> (i32, i32) {
    %c0_i32 = arith.constant 0 : i32
    %c0_i32_0 = arith.constant 0 : i32
    %c0_i32_1 = arith.constant 0 : i32
    return %c0_i32, %c0_i32_0 : i32, i32
  }
  func.func @transform_5(%arg0: i32) -> (i32, i32) {
    %c0_i32 = arith.constant 0 : i32
    %c0_i32_0 = arith.constant 0 : i32
    return %arg0, %c0_i32 : i32, i32
  }
}

module attributes {stable_mosaic.version = 11 : i64} {
  func.func @conv2d1x1_kernel(%arg0: i32, %arg1: memref<256x256xbf16, #tpu.memory_space<vmem>>, %arg2: memref<256x384xbf16, #tpu.memory_space<vmem>>, %arg3: memref<1x384xf32, #tpu.memory_space<vmem>>, %arg4: memref<128x256xbf16, #tpu.memory_space<vmem>>, %arg5: memref<1x256xf32, #tpu.memory_space<vmem>>, %arg6: memref<256x256xbf16, #tpu.memory_space<vmem>>) attributes {dimension_semantics = [#tpu.dimension_semantics<parallel>], iteration_bounds = array<i64: 2>, scalar_prefetch = 0 : i64, scratch_operands = 0 : i64, tpu.core_type = #tpu.core_type<tc>, window_params = [{transform_indices = @transform_0, window_bounds = array<i64: 256, 256>}, {pipeline_mode = #tpu.pipeline_mode<synchronous>, transform_indices = @transform_1, window_bounds = array<i64: 256, 384>}, {pipeline_mode = #tpu.pipeline_mode<synchronous>, transform_indices = @transform_2, window_bounds = array<i64: 1, 384>}, {pipeline_mode = #tpu.pipeline_mode<synchronous>, transform_indices = @transform_3, window_bounds = array<i64: 128, 256>}, {pipeline_mode = #tpu.pipeline_mode<synchronous>, transform_indices = @transform_4, window_bounds = array<i64: 1, 256>}, {transform_indices = @transform_5, window_bounds = array<i64: 256, 256>}]} {
    %c0 = arith.constant 0 : index
    %c0_0 = arith.constant 0 : index
    %0 = vector.load %arg2[%c0, %c0_0] : memref<256x384xbf16, #tpu.memory_space<vmem>>, vector<256x384xbf16>
    %c0_1 = arith.constant 0 : index
    %c0_2 = arith.constant 0 : index
    %1 = vector.load %arg3[%c0_1, %c0_2] : memref<1x384xf32, #tpu.memory_space<vmem>>, vector<1x384xf32>
    %c0_3 = arith.constant 0 : index
    %c0_4 = arith.constant 0 : index
    %2 = vector.load %arg4[%c0_3, %c0_4] : memref<128x256xbf16, #tpu.memory_space<vmem>>, vector<128x256xbf16>
    %c0_5 = arith.constant 0 : index
    %c0_6 = arith.constant 0 : index
    %3 = vector.load %arg5[%c0_5, %c0_6] : memref<1x256xf32, #tpu.memory_space<vmem>>, vector<1x256xf32>
    %c0_7 = arith.constant 0 : index
    %c0_8 = arith.constant 0 : index
    %4 = vector.load %arg1[%c0_7, %c0_8] : memref<256x256xbf16, #tpu.memory_space<vmem>>, vector<128x256xbf16>
    %cst = arith.constant dense<0.000000e+00> : vector<128x384xf32>
    %5 = tpu.matmul %4, %0, %cst {dimension_numbers = #tpu.dot_dimension_numbers<[1], [0], [0], [1], [0, 0, 1, 1], [], []>} : vector<128x256xbf16>, vector<256x384xbf16>, vector<128x384xf32> -> vector<128x384xf32>
    %6 = vector.broadcast %1 : vector<1x384xf32> to vector<128x384xf32>
    %7 = arith.addf %5, %6 : vector<128x384xf32>
    %8 = vector.extract_strided_slice %7 {offsets = [0, 0], sizes = [128, 128], strides = [1, 1]} : vector<128x384xf32> to vector<128x128xf32>
    %9 = vector.extract_strided_slice %7 {offsets = [0, 128], sizes = [128, 256], strides = [1, 1]} : vector<128x384xf32> to vector<128x256xf32>
    %cst_9 = arith.constant 0.000000e+00 : f32
    %10 = vector.broadcast %cst_9 : f32 to vector<128x128xf32>
    %11 = arith.cmpf ogt, %8, %10 : vector<128x128xf32>
    %cst_10 = arith.constant 0.00999999977 : f32
    %12 = vector.broadcast %cst_10 : f32 to vector<128x128xf32>
    %13 = arith.mulf %12, %8 : vector<128x128xf32>
    %14 = arith.select %11, %8, %13 : vector<128x128xi1>, vector<128x128xf32>
    %15 = arith.truncf %14 : vector<128x128xf32> to vector<128x128xbf16>
    %cst_11 = arith.constant dense<0.000000e+00> : vector<128x256xf32>
    %16 = tpu.matmul %15, %2, %cst_11 {dimension_numbers = #tpu.dot_dimension_numbers<[1], [0], [0], [1], [0, 0, 1, 1], [], []>} : vector<128x128xbf16>, vector<128x256xbf16>, vector<128x256xf32> -> vector<128x256xf32>
    %17 = vector.broadcast %3 : vector<1x256xf32> to vector<128x256xf32>
    %18 = arith.addf %16, %17 : vector<128x256xf32>
    %cst_12 = arith.constant dense<0xFF800000> : vector<128xf32>
    %19 = vector.multi_reduction <maximumf>, %18, %cst_12 [1] : vector<128x256xf32> to vector<128xf32>
    %20 = vector.shape_cast %19 : vector<128xf32> to vector<128x1xf32>
    %21 = vector.broadcast %20 : vector<128x1xf32> to vector<128x256xf32>
    %22 = arith.subf %18, %21 : vector<128x256xf32>
    %23 = math.exp %22 : vector<128x256xf32>
    %cst_13 = arith.constant dense<0.000000e+00> : vector<128xf32>
    %24 = vector.multi_reduction <add>, %23, %cst_13 [1] : vector<128x256xf32> to vector<128xf32>
    %25 = vector.shape_cast %24 : vector<128xf32> to vector<128x1xf32>
    %26 = tpu.reciprocal %25 {approx = true} : vector<128x1xf32> -> vector<128x1xf32>
    %27 = vector.broadcast %26 : vector<128x1xf32> to vector<128x256xf32>
    %28 = arith.mulf %23, %27 : vector<128x256xf32>
    %cst_14 = arith.constant 1.000000e+00 : f32
    %29 = vector.broadcast %cst_14 : f32 to vector<128x256xf32>
    %30 = arith.addf %29, %28 : vector<128x256xf32>
    %31 = arith.mulf %9, %30 : vector<128x256xf32>
    %cst_15 = arith.constant 0.000000e+00 : f32
    %32 = vector.broadcast %cst_15 : f32 to vector<128x256xf32>
    %33 = arith.cmpf ogt, %31, %32 : vector<128x256xf32>
    %cst_16 = arith.constant 0.00999999977 : f32
    %34 = vector.broadcast %cst_16 : f32 to vector<128x256xf32>
    %35 = arith.mulf %34, %31 : vector<128x256xf32>
    %36 = arith.select %33, %31, %35 : vector<128x256xi1>, vector<128x256xf32>
    %37 = arith.truncf %36 : vector<128x256xf32> to vector<128x256xbf16>
    %c0_17 = arith.constant 0 : index
    %c0_18 = arith.constant 0 : index
    %38 = vector.load %arg6[%c0_17, %c0_18] : memref<256x256xbf16, #tpu.memory_space<vmem>>, vector<128x256xbf16>
    tpu.vector_store %arg6[%c0_17, %c0_18], %37 {strides = array<i32>} : memref<256x256xbf16, #tpu.memory_space<vmem>>, vector<128x256xbf16>,
    %c128 = arith.constant 128 : index
    %c0_19 = arith.constant 0 : index
    %39 = vector.load %arg1[%c128, %c0_19] : memref<256x256xbf16, #tpu.memory_space<vmem>>, vector<128x256xbf16>
    %cst_20 = arith.constant dense<0.000000e+00> : vector<128x384xf32>
    %40 = tpu.matmul %39, %0, %cst_20 {dimension_numbers = #tpu.dot_dimension_numbers<[1], [0], [0], [1], [0, 0, 1, 1], [], []>} : vector<128x256xbf16>, vector<256x384xbf16>, vector<128x384xf32> -> vector<128x384xf32>
    %41 = vector.broadcast %1 : vector<1x384xf32> to vector<128x384xf32>
    %42 = arith.addf %40, %41 : vector<128x384xf32>
    %43 = vector.extract_strided_slice %42 {offsets = [0, 0], sizes = [128, 128], strides = [1, 1]} : vector<128x384xf32> to vector<128x128xf32>
    %44 = vector.extract_strided_slice %42 {offsets = [0, 128], sizes = [128, 256], strides = [1, 1]} : vector<128x384xf32> to vector<128x256xf32>
    %cst_21 = arith.constant 0.000000e+00 : f32
    %45 = vector.broadcast %cst_21 : f32 to vector<128x128xf32>
    %46 = arith.cmpf ogt, %43, %45 : vector<128x128xf32>
    %cst_22 = arith.constant 0.00999999977 : f32
    %47 = vector.broadcast %cst_22 : f32 to vector<128x128xf32>
    %48 = arith.mulf %47, %43 : vector<128x128xf32>
    %49 = arith.select %46, %43, %48 : vector<128x128xi1>, vector<128x128xf32>
    %50 = arith.truncf %49 : vector<128x128xf32> to vector<128x128xbf16>
    %cst_23 = arith.constant dense<0.000000e+00> : vector<128x256xf32>
    %51 = tpu.matmul %50, %2, %cst_23 {dimension_numbers = #tpu.dot_dimension_numbers<[1], [0], [0], [1], [0, 0, 1, 1], [], []>} : vector<128x128xbf16>, vector<128x256xbf16>, vector<128x256xf32> -> vector<128x256xf32>
    %52 = vector.broadcast %3 : vector<1x256xf32> to vector<128x256xf32>
    %53 = arith.addf %51, %52 : vector<128x256xf32>
    %cst_24 = arith.constant dense<0xFF800000> : vector<128xf32>
    %54 = vector.multi_reduction <maximumf>, %53, %cst_24 [1] : vector<128x256xf32> to vector<128xf32>
    %55 = vector.shape_cast %54 : vector<128xf32> to vector<128x1xf32>
    %56 = vector.broadcast %55 : vector<128x1xf32> to vector<128x256xf32>
    %57 = arith.subf %53, %56 : vector<128x256xf32>
    %58 = math.exp %57 : vector<128x256xf32>
    %cst_25 = arith.constant dense<0.000000e+00> : vector<128xf32>
    %59 = vector.multi_reduction <add>, %58, %cst_25 [1] : vector<128x256xf32> to vector<128xf32>
    %60 = vector.shape_cast %59 : vector<128xf32> to vector<128x1xf32>
    %61 = tpu.reciprocal %60 {approx = true} : vector<128x1xf32> -> vector<128x1xf32>
    %62 = vector.broadcast %61 : vector<128x1xf32> to vector<128x256xf32>
    %63 = arith.mulf %58, %62 : vector<128x256xf32>
    %cst_26 = arith.constant 1.000000e+00 : f32
    %64 = vector.broadcast %cst_26 : f32 to vector<128x256xf32>
    %65 = arith.addf %64, %63 : vector<128x256xf32>
    %66 = arith.mulf %44, %65 : vector<128x256xf32>
    %cst_27 = arith.constant 0.000000e+00 : f32
    %67 = vector.broadcast %cst_27 : f32 to vector<128x256xf32>
    %68 = arith.cmpf ogt, %66, %67 : vector<128x256xf32>
    %cst_28 = arith.constant 0.00999999977 : f32
    %69 = vector.broadcast %cst_28 : f32 to vector<128x256xf32>
    %70 = arith.mulf %69, %66 : vector<128x256xf32>
    %71 = arith.select %68, %66, %70 : vector<128x256xi1>, vector<128x256xf32>
    %72 = arith.truncf %71 : vector<128x256xf32> to vector<128x256xbf16>
    %c128_29 = arith.constant 128 : index
    %c0_30 = arith.constant 0 : index
    %73 = vector.load %arg6[%c128_29, %c0_30] : memref<256x256xbf16, #tpu.memory_space<vmem>>, vector<128x256xbf16>
    tpu.vector_store %arg6[%c128_29, %c0_30], %72 {strides = array<i32>} : memref<256x256xbf16, #tpu.memory_space<vmem>>, vector<128x256xbf16>,
    return
  }
  func.func @transform_0(%arg0: i32) -> (i32, i32) {
    %c0_i32 = arith.constant 0 : i32
    %c0_i32_0 = arith.constant 0 : i32
    return %arg0, %c0_i32 : i32, i32
  }
  func.func @transform_1(%arg0: i32) -> (i32, i32) {
    %c0_i32 = arith.constant 0 : i32
    %c0_i32_0 = arith.constant 0 : i32
    %c0_i32_1 = arith.constant 0 : i32
    return %c0_i32, %c0_i32_0 : i32, i32
  }
  func.func @transform_2(%arg0: i32) -> (i32, i32) {
    %c0_i32 = arith.constant 0 : i32
    %c0_i32_0 = arith.constant 0 : i32
    %c0_i32_1 = arith.constant 0 : i32
    return %c0_i32, %c0_i32_0 : i32, i32
  }
  func.func @transform_3(%arg0: i32) -> (i32, i32) {
    %c0_i32 = arith.constant 0 : i32
    %c0_i32_0 = arith.constant 0 : i32
    %c0_i32_1 = arith.constant 0 : i32
    return %c0_i32, %c0_i32_0 : i32, i32
  }
  func.func @transform_4(%arg0: i32) -> (i32, i32) {
    %c0_i32 = arith.constant 0 : i32
    %c0_i32_0 = arith.constant 0 : i32
    %c0_i32_1 = arith.constant 0 : i32
    return %c0_i32, %c0_i32_0 : i32, i32
  }
  func.func @transform_5(%arg0: i32) -> (i32, i32) {
    %c0_i32 = arith.constant 0 : i32
    %c0_i32_0 = arith.constant 0 : i32
    return %arg0, %c0_i32 : i32, i32
  }
}

</mosaic_0001>

<bundles_post_ra>
// kernel: tpu_custom_call.1
= control target key start
LH: loop header
LB: loop body
LE: loop exit
PB: predicated region body
PF: predicated region fallthrough
CT: control target
= control target key end

     0   :  { %10 = vsyncpa [#allocation3], 0  ;;  %s5379_s0 = inlined_call_operand.hbm [shape: bf16[512,256], index: 0, kind: input, shape index: {}]   ;;  %s5380_s1 = inlined_call_operand.hbm [shape: bf16[256,384], index: 1, kind: input, shape index: {}]   ;;  %s5381_s2 = inlined_call_operand.hbm [shape: f32[1,384], index: 2, kind: input, shape index: {}]   ;;  %s5382_s3 = inlined_call_operand.hbm [shape: bf16[128,256], index: 3, kind: input, shape index: {}]   ;;  %s5383_s4 = inlined_call_operand.vmem [shape: f32[1,256], index: 4, kind: input, shape index: {}]   ;;  %s5384_s5 = inlined_call_operand.hbm [shape: bf16[512,256], index: 5, kind: output, shape index: {}]  }
   0x1   :  { %12 = vsyncpa [#allocation3 + $0x1], 0 }
   0x2   :  { %13 = vsyncpa [#allocation6], 0 }
   0x3   :  { %14 = vsyncpa [#allocation9], 0 }
   0x4   :  { %15 = vsyncpa [#allocation4], 0 }
   0x5   :  { %17 = vsyncpa [#allocation4 + $0x1], 0  ;;  %s3813_s18 = smov 0   ;;  %s3815_s19 = smov 0  }
   0x6   :  { %s3817_s20 = smov 0   ;;  %s3819_s21 = smov 0  }
   0x7 LB: > { %s3834_s22 = sadd.s32 4294967295, %s3772_s21   ;;  %s2797_s23 = sadd.s32 4294967294, %s3772_s21   ;;  %s3772_s21 = sphi %s3819_s21, %s5580_s21   ;;  %s3768_s20 = sphi %s3817_s20, %s5579_s20   ;;  %s3764_s19 = sphi %s3815_s19, %s5578_s19   ;;  %s3760_s18 = sphi %s3813_s18, %s5577_s18  }
   0x8   : > { %p43_p0 = scmp.ne.s32.totalorder %s3764_s19, %s3760_s18  ;;  %p44_p1 = scmp.eq.s32.totalorder %s3834_s22, 0 }
   0x9   : > { %p151_p2 = scmp.eq.s32.totalorder %s3834_s22, 1  ;;  %p157_p3 = scmp.eq.s32.totalorder %s2797_s23, 1 }
   0xa   : > { %p3843_p4 = por %p44_p1, %p43_p0  ;;  %p2798_p5 = scmp.ge.s32.totalorder %s3772_s21, 1 }
   0xb   : > { %p3848_p6 = por %p157_p3, %p43_p0  ;;  %p164_p7 = scmp.lt.s32.totalorder %s3772_s21, 3 }
   0xc   : > { %s175_s28 = sshll.u32 %s5380_s1, 4  ;;  %s3774_s30 = smov [#allocation5]   ;;  %s176_s28 = int_to_ptr.hbm [resolvable:$true] %s175_s28 }
   0xd   : > { %p3856_p8 = pnand %p2798_p5, %p164_p7  ;;  %s177_s6 = sshll.u32 %s3774_s30, 4  ;;  %s178_s6 = int_to_ptr.vmem [resolvable:$true] %s177_s6 }
   0xe   : > { %s190_s10 = sshll.u32 %s5381_s2, 4  ;;  %s3775_s11 = smov 192   ;;  %s191_s10 = int_to_ptr.hbm [resolvable:$true] %s190_s10 }
   0xf   : > { %p3319_p9 = pneg %p3856_p8  ;;  %s3776_s12 = smov 12  }
  0x10   : > { %s3777_s13 = smov [#allocation7]   ;;  %s201_s17 = sshll.u32 %s5382_s3, 4  ;;  %s202_s17 = int_to_ptr.hbm [resolvable:$true] %s201_s17 }
  0x11   : > { %p3864_p10 = pnand %p3319_p9, %p44_p1  ;;  %s192_s14 = sshll.u32 %s3777_s13, 4  ;;  %s193_s14 = int_to_ptr.vmem [resolvable:$true] %s192_s14 }
  0x12   : > { %s3778_s23 = smov [#allocation8]   ;;  %s5385_s27 = smov 128  }
  0x13   : > { %3322 = dma.hbm_to_vmem [thread:$0]  (!%p3864_p10), %s176_s28, 6144, %s178_s6, [#allocation6], %s3775_s11, %s3775_s11, %s3776_s12  }
  0x14   : > { %3325 = dma.hbm_to_vmem [thread:$0]  (!%p3864_p10), %s191_s10, 48, %s193_s14, [#allocation6]  }
  0x15   : > { %s203_s26 = sshll.u32 %s3778_s23, 4  ;;  %s3780_s28 = smov 8   ;;  %s204_s26 = int_to_ptr.vmem [resolvable:$true] %s203_s26 }
  0x16   : > { %3328 = dma.hbm_to_vmem [thread:$0]  (!%p3864_p10), %s202_s17, 2048, %s204_s26, [#allocation9], %s5385_s27, %s5385_s27, %s3780_s28  }
  0x17   : > { %s3885_s30 = sadd.s32 1, %s3772_s21   ;;  %s30_s8 = sadd.s32 1, %s3768_s20 }
  0x18   : > { %s27_s6 = ssub.s32 %s3772_s21, %s3885_s30  ;;  %p37_p13 = scmp.ne.s32.totalorder %s3768_s20, %s3764_s19 }
  0x19   : > { %p28_p12 = scmp.eq.s32.totalorder %s27_s6, 0  ;;  %p38_p0 = scmp.eq.s32.totalorder %s3772_s21, 0 }
  0x1a   : > { %p3898_p3 = por %p151_p2, %p37_p13  ;;  %p3340_p5 = scmp.lt.s32.totalorder %s3772_s21, 2 }
  0x1b   : > { %s3894_s9 = scalar_select %p28_p12, %s3768_s20, %s30_s8  }
  0x1c   : > { %s220_s7 = sand.u32 1, %s3768_s20   ;;  %s3204_s11 = sshll.u32 %s3772_s21, 8 }
  0x1d   : > { %p39_p7 = por %p38_p0, %p37_p13  ;;  %s2803_s12 = sshll.u32 %s220_s7, 8 }
  0x1e   : > { %s230_s15 = scalar_lea.hbm %s5379_s0, %s3204_s11  ;;  %s224_s17 = scalar_lea.vmem [#allocation2], %s2803_s12 }
  0x1f   : > { %s231_s16 = sshll.u32 %s230_s15, 4  ;;  %s233_s23 = sshll.u32 %s224_s17, 4  ;;  %s232_s16 = int_to_ptr.hbm [resolvable:$true] %s231_s16  ;;  %s234_s23 = int_to_ptr.vmem [resolvable:$true] %s233_s23 }
  0x20   : > { %p3908_p9 = pnand %p3340_p5, %p39_p7  ;;  %s221_s6 = scalar_lea.sflag [#allocation3], %s220_s7 }
  0x21   : > { %s3668_s8 = sshra.s32 %s232_s16, 4  ;;  %s3675_s12 = scalar_lea.hbm %s5379_s0, 512  ;;  %s3669_s8 = int_to_ptr.hbm [resolvable:$true] %s3668_s8 }
  0x22   : > { %s3670_s27 = scalar_lea.hbm %s3669_s8, 256  ;;  %p3672_p10 = pneg %p3908_p9 }
  0x23   : > { %p3671_p2 = scmp.ne.s32.totalorder %s3669_s8, %s3670_s27  ;;  %p3676_p0 = scmp.lt.s32.totalorder %s3669_s8, %s5379_s0 }
  0x24   : > { %p3677_p5 = scmp.lt.s32.totalorder %s3675_s12, %s3670_s27 }
  0x25   : > { %p3673_p12 = pnand %p3672_p10, %p3671_p2 }
  0x26   : > { %p3678_p7 = por %p3677_p5, %p3676_p0 }
  0x27   : > { %p3674_p13 = pneg %p3673_p12 }
  0x29   : > { %p3679_p11 = pnand %p3678_p7, %p3674_p13 }
  0x2b   : > { %3682 = shalt.err (!%p3679_p11)
}
  0x2c   : > { %s5431_s7 = smov 128   ;;  %245 = sbr.rel (%p3856_p8) target bundleno = 1021 (0x3fd), region = 40 }
  0x2d   : > { %3332 = dma.hbm_to_vmem [thread:$0]  (!%p3908_p9), %s232_s16, 4096, %s234_s23, %s221_s6, %s5431_s7, %s5431_s7, %s3780_s28  }
  0x31   : > { %s3928_s17 = sand.u32 1, %s3764_s19  }
  0x32   : > { %s2808_s27 = sshll.u32 %s3928_s17, 8  ;;  %s248_s8 = scalar_lea.sflag [#allocation3], %s3928_s17 }
  0x33   : > { %s3934_s11 = scalar_lea.vmem [#allocation2], %s2808_s27 }
  0x34   : > { %3743 = dma.done.wait (%p3843_p4), %s248_s8, 4096  }
  0x35   : > { %3745 = vsyncadd (%p3843_p4), %s248_s8, 4294963200 }
  0x36   : > { %3747 = dma.done.wait (%p44_p1), [#allocation6], 6192  }
  0x37   : > { %3749 = vsyncadd (%p44_p1), [#allocation6], 4294961104 }
  0x38   : > { %3751 = dma.done.wait (%p44_p1), [#allocation9], 2048  }
  0x39   : > { %3753 = vsyncadd (%p44_p1), [#allocation9], 4294965248  ;;  %v2963_v0 = vld [vmem:[#allocation5 + $0xa8] sm:$0xf]  ;;  %v3227_v1 = vld [vmem:[#allocation5 + $0xb0] sm:$0xf0] }
  0x3a   : > { %v3059_v2 = vld [vmem:[#allocation5 + $0x168] sm:$0xf]  ;;  %v3948_v3 = vor.u32 %v3227_v1, %v2963_v0  ;;  %v3251_v4 = vld [vmem:[#allocation5 + $0x170] sm:$0xf0]  ;;  %v2951_v5 = vld [vmem:[#allocation5 + $0x90] sm:$0xf] }
  0x3b   : > { %v3224_v6 = vld [vmem:[#allocation5 + $0x98] sm:$0xf0]  ;;  %v3950_v7 = vor.u32 %v3251_v4, %v3059_v2  ;;  %v3047_v8 = vld [vmem:[#allocation5 + $0x150] sm:$0xf]  ;;  %v3226_v10 = vld [vmem:[#allocation5 + $0xac] sm:$0xf] }
  0x3c   : > { %v3248_v9 = vld [vmem:[#allocation5 + $0x158] sm:$0xf0]  ;;  %737 = vmatpush.bf16.msra.mxu0 %v3948_v3  ;;  %v3953_v11 = vor.u32 %v3224_v6, %v2951_v5  ;;  %v2965_v12 = vld [vmem:[#allocation5 + $0xb4] sm:$0xf0]  ;;  %v3250_v13 = vld [vmem:[#allocation5 + $0x16c] sm:$0xf] }
  0x3d   : > { %v3061_v14 = vld [vmem:[#allocation5 + $0x174] sm:$0xf0]  ;;  %786 = vmatpush.bf16.msra.mxu1 %v3950_v7  ;;  %v3956_v15 = vor.u32 %v3248_v9, %v3047_v8  ;;  %v3958_v16 = vor.u32 %v3226_v10, %v2965_v12  ;;  %v3221_v19 = vld [vmem:[#allocation5 + $0x80] sm:$0xf0]  ;;  %v3223_v22 = vld [vmem:[#allocation5 + $0x94] sm:$0xf] }
  0x3e   : > { %v3960_v17 = vor.u32 %v3250_v13, %v3061_v14  ;;  %v2939_v18 = vld [vmem:[#allocation5 + $0x78] sm:$0xf]  ;;  %v3245_v21 = vld [vmem:[#allocation5 + $0x140] sm:$0xf0]  ;;  %v2953_v23 = vld [vmem:[#allocation5 + $0x9c] sm:$0xf0] }
  0x3f   : > { %v3035_v20 = vld [vmem:[#allocation5 + $0x138] sm:$0xf]  ;;  %835 = vmatpush.bf16.msra.mxu2 %v3958_v16  ;;  %v3964_v24 = vor.u32 %v3223_v22, %v2953_v23  ;;  %v3247_v25 = vld [vmem:[#allocation5 + $0x154] sm:$0xf]  ;;  %v3049_v26 = vld [vmem:[#allocation5 + $0x15c] sm:$0xf0]  ;;  %v3967_v27 = vor.u32 %v3221_v19, %v2939_v18 }
  0x40   : > { %884 = vmatpush.bf16.msra.mxu3 %v3960_v17  ;;  %738 = vmatpush.bf16.msra.mxu0 %v3953_v11  ;;  %v3969_v28 = vor.u32 %v3247_v25, %v3049_v26  ;;  %v2927_v29 = vld [vmem:[#allocation5 + $0x60] sm:$0xf]  ;;  %v3218_v30 = vld [vmem:[#allocation5 + $0x68] sm:$0xf0]  ;;  %v3972_v31 = vor.u32 %v3245_v21, %v3035_v20  ;;  %v3220_v32 = vld [vmem:[#allocation5 + $0x7c] sm:$0xf] }
  0x41   : > { %787 = vmatpush.bf16.msra.mxu1 %v3956_v15  ;;  %v2941_v33 = vld [vmem:[#allocation5 + $0x84] sm:$0xf0]  ;;  %v3244_v34 = vld [vmem:[#allocation5 + $0x13c] sm:$0xf]  ;;  %v3023_v35 = vld [vmem:[#allocation5 + $0x120] sm:$0xf]  ;;  %v3981_v41 = vor.u32 %v3218_v30, %v2927_v29 }
  0x42   : > { %v3242_v36 = vld [vmem:[#allocation5 + $0x128] sm:$0xf0]  ;;  %v3037_v37 = vld [vmem:[#allocation5 + $0x144] sm:$0xf0]  ;;  %v3976_v38 = vor.u32 %v3220_v32, %v2941_v33  ;;  %v3217_v40 = vld [vmem:[#allocation5 + $0x64] sm:$0xf] }
  0x43   : > { %836 = vmatpush.bf16.msra.mxu2 %v3964_v24  ;;  %v3978_v39 = vor.u32 %v3244_v34, %v3037_v37  ;;  %v2929_v42 = vld [vmem:[#allocation5 + $0x6c] sm:$0xf0]  ;;  %v3241_v43 = vld [vmem:[#allocation5 + $0x124] sm:$0xf]  ;;  %v3984_v45 = vor.u32 %v3242_v36, %v3023_v35  ;;  %v2915_v46 = vld [vmem:[#allocation5 + $0x48] sm:$0xf] }
  0x44   : > { %885 = vmatpush.bf16.msra.mxu3 %v3969_v28  ;;  %739 = vmatpush.bf16.msra.mxu0 %v3967_v27  ;;  %v3025_v44 = vld [vmem:[#allocation5 + $0x12c] sm:$0xf0]  ;;  %v3215_v47 = vld [vmem:[#allocation5 + $0x50] sm:$0xf0]  ;;  %v3011_v48 = vld [vmem:[#allocation5 + $0x108] sm:$0xf]  ;;  %v3988_v50 = vor.u32 %v3217_v40, %v2929_v42 }
  0x45   : > { %788 = vmatpush.bf16.msra.mxu1 %v3972_v31  ;;  %v3239_v49 = vld [vmem:[#allocation5 + $0x110] sm:$0xf0]  ;;  %v3990_v51 = vor.u32 %v3241_v43, %v3025_v44  ;;  %v3214_v52 = vld [vmem:[#allocation5 + $0x4c] sm:$0xf]  ;;  %v3993_v53 = vor.u32 %v3215_v47, %v2915_v46  ;;  %v2917_v54 = vld [vmem:[#allocation5 + $0x54] sm:$0xf0] }
  0x46   : > { %v3238_v55 = vld [vmem:[#allocation5 + $0x10c] sm:$0xf]  ;;  %v3013_v56 = vld [vmem:[#allocation5 + $0x114] sm:$0xf0]  ;;  %v3996_v57 = vor.u32 %v3239_v49, %v3011_v48  ;;  %v2903_v58 = vld [vmem:[#allocation5 + $0x30] sm:$0xf]  ;;  %v4000_v62 = vor.u32 %v3214_v52, %v2917_v54 }
  0x47   : > { %837 = vmatpush.bf16.msra.mxu2 %v3976_v38  ;;  %v3212_v59 = vld [vmem:[#allocation5 + $0x38] sm:$0xf0]  ;;  %v2999_v60 = vld [vmem:[#allocation5 + $0xf0] sm:$0xf]  ;;  %v4002_v63 = vor.u32 %v3238_v55, %v3013_v56  ;;  %v3211_v0 = vld [vmem:[#allocation5 + $0x34] sm:$0xf] }
  0x48   : > { %886 = vmatpush.bf16.msra.mxu3 %v3978_v39  ;;  %740 = vmatpush.bf16.msra.mxu0 %v3981_v41  ;;  %v3236_v61 = vld [vmem:[#allocation5 + $0xf8] sm:$0xf0]  ;;  %v4005_v1 = vor.u32 %v3212_v59, %v2903_v58  ;;  %v2905_v2 = vld [vmem:[#allocation5 + $0x3c] sm:$0xf0]  ;;  %v3235_v4 = vld [vmem:[#allocation5 + $0xf4] sm:$0xf] }
  0x49   : > { %789 = vmatpush.bf16.msra.mxu1 %v3984_v45  ;;  %v3001_v5 = vld [vmem:[#allocation5 + $0xfc] sm:$0xf0]  ;;  %v4008_v6 = vor.u32 %v3236_v61, %v2999_v60  ;;  %v2891_v8 = vld [vmem:[#allocation5 + $0x18] sm:$0xf]  ;;  %v3209_v9 = vld [vmem:[#allocation5 + $0x20] sm:$0xf0]  ;;  %v4012_v13 = vor.u32 %v3211_v0, %v2905_v2 }
  0x4a   : > { %v2987_v10 = vld [vmem:[#allocation5 + $0xd8] sm:$0xf]  ;;  %v3233_v12 = vld [vmem:[#allocation5 + $0xe0] sm:$0xf0]  ;;  %v4014_v14 = vor.u32 %v3235_v4, %v3001_v5  ;;  %v2879_v18 = vld [vmem:[#allocation5] sm:$0xf]  ;;  %v4017_v20 = vor.u32 %v3209_v9, %v2891_v8 }
  0x4b   : > { %838 = vmatpush.bf16.msra.mxu2 %v3988_v50  ;;  %v3208_v19 = vld [vmem:[#allocation5 + $0x1c] sm:$0xf]  ;;  %v2893_v21 = vld [vmem:[#allocation5 + $0x24] sm:$0xf0]  ;;  %v4020_v25 = vor.u32 %v3233_v12, %v2987_v10  ;;  %v3206_v26 = vld [vmem:[#allocation5 + $0x8] sm:$0xf0] }
  0x4c   : > { %887 = vmatpush.bf16.msra.mxu3 %v3990_v51  ;;  %741 = vmatpush.bf16.msra.mxu0 %v3993_v53  ;;  %v3232_v22 = vld [vmem:[#allocation5 + $0xdc] sm:$0xf]  ;;  %v2989_v23 = vld [vmem:[#allocation5 + $0xe4] sm:$0xf0]  ;;  %v2975_v29 = vld [vmem:[#allocation5 + $0xc0] sm:$0xf]  ;;  %v4026_v36 = vor.u32 %v3208_v19, %v2893_v21  ;;  %v4032_v44 = vor.u32 %v3206_v26, %v2879_v18 }
  0x4d   : > { %790 = vmatpush.bf16.msra.mxu1 %v3996_v57  ;;  %v3230_v30 = vld [vmem:[#allocation5 + $0xc8] sm:$0xf0]  ;;  %v2815_v32 = vld [vmem:[%s3934_s11] sm:$0xf]  ;;  %v3270_v33 = vld [vmem:[%s3934_s11 + $0x4] sm:$0xf0]  ;;  %v4029_v40 = vor.u32 %v3232_v22, %v2989_v23 }
  0x4e   : > { %v2971_v34 = vld [vmem:[#allocation5 + $0xb0] sm:$0xf]  ;;  %v3228_v35 = vld [vmem:[#allocation5 + $0xb8] sm:$0xf0]  ;;  %v3269_v37 = vld [vmem:[%s3934_s11 + $0x4] sm:$0xf]  ;;  %v4036_v49 = vor.u32 %v3230_v30, %v2975_v29  ;;  %v4043_v0 = vor.u32 %v3270_v33, %v2815_v32 }
  0x4f   : > { %839 = vmatpush.bf16.msra.mxu2 %v4000_v62  ;;  %v3067_v42 = vld [vmem:[#allocation5 + $0x170] sm:$0xf]  ;;  %v3252_v43 = vld [vmem:[#allocation5 + $0x178] sm:$0xf0]  ;;  %v2817_v46 = vld [vmem:[%s3934_s11 + $0x8] sm:$0xf0]  ;;  %v4038_v52 = vor.u32 %v3228_v35, %v2971_v34 }
  0x50   : > { %888 = vmatpush.bf16.msra.mxu3 %v4002_v63  ;;  %742 = vmatpush.bf16.msra.mxu0 %v4005_v1  ;;  %v3205_v47 = vld [vmem:[#allocation5 + $0x4] sm:$0xf]  ;;  %v2881_v48 = vld [vmem:[#allocation5 + $0xc] sm:$0xf0]  ;;  %v3127_v56 = vld [vmem:[#allocation8 + $0x70] sm:$0xf]  ;;  %v4040_v58 = vor.u32 %v3252_v43, %v3067_v42  ;;  %v4049_v8 = vor.u32 %v3269_v37, %v2817_v46 }
  0x51   : > { %791 = vmatpush.bf16.msra.mxu1 %v4008_v6  ;;  %v3229_v54 = vld [vmem:[#allocation5 + $0xc4] sm:$0xf]  ;;  %v2977_v55 = vld [vmem:[#allocation5 + $0xcc] sm:$0xf0]  ;;  %v3268_v59 = vld [vmem:[#allocation8 + $0x74] sm:$0xf0]  ;;  %v4046_v2 = vor.u32 %v3205_v47, %v2881_v48 }
  0x52   : > { %v3267_v60 = vld [vmem:[#allocation8 + $0x74] sm:$0xf]  ;;  %v3129_v61 = vld [vmem:[#allocation8 + $0x78] sm:$0xf0]  ;;  %v3225_v5 = vld [vmem:[#allocation5 + $0xa0] sm:$0xf0]  ;;  %v4051_v9 = vor.u32 %v3229_v54, %v2977_v55  ;;  %v4055_v18 = vor.u32 %v3268_v59, %v3127_v56 }
  0x53   : > { %840 = vmatpush.bf16.msra.mxu2 %v4012_v13  ;;  %v2959_v4 = vld [vmem:[#allocation5 + $0x98] sm:$0xf]  ;;  %v3249_v12 = vld [vmem:[#allocation5 + $0x160] sm:$0xf0]  ;;  %v4057_v19 = vor.u32 %v3267_v60, %v3129_v61  ;;  %v3266_v23 = vld [vmem:[#allocation8 + $0x64] sm:$0xf0] }
  0x54   : > { %889 = vmatpush.bf16.msra.mxu3 %v4014_v14  ;;  %743 = vmatpush.bf16.msra.mxu0 %v4017_v20  ;;  %v3055_v10 = vld [vmem:[#allocation5 + $0x158] sm:$0xf]  ;;  %v3119_v21 = vld [vmem:[#allocation8 + $0x60] sm:$0xf]  ;;  %v4060_v22 = vor.u32 %v3225_v5, %v2959_v4  ;;  %v3265_v26 = vld [vmem:[#allocation8 + $0x64] sm:$0xf] }
  0x55   : > { %792 = vmatpush.bf16.msra.mxu1 %v4020_v25  ;;  %v3121_v29 = vld [vmem:[#allocation8 + $0x68] sm:$0xf0]  ;;  %v4064_v30 = vor.u32 %v3249_v12, %v3055_v10  ;;  %v2947_v32 = vld [vmem:[#allocation5 + $0x80] sm:$0xf]  ;;  %v3222_v33 = vld [vmem:[#allocation5 + $0x88] sm:$0xf0]  ;;  %v4070_v35 = vor.u32 %v3266_v23, %v3119_v21 }
  0x56   : > { %v3043_v34 = vld [vmem:[#allocation5 + $0x140] sm:$0xf]  ;;  %v4072_v37 = vor.u32 %v3265_v26, %v3121_v29  ;;  %v3246_v42 = vld [vmem:[#allocation5 + $0x148] sm:$0xf0]  ;;  %v4076_v43 = vor.u32 %v3222_v33, %v2947_v32  ;;  %v3111_v47 = vld [vmem:[#allocation8 + $0x50] sm:$0xf] }
  0x57   : > { %841 = vmatpush.bf16.msra.mxu2 %v4026_v36  ;;  %v4080_v46 = vor.u32 %v3246_v42, %v3043_v34  ;;  %v3264_v48 = vld [vmem:[#allocation8 + $0x54] sm:$0xf0]  ;;  %v3263_v54 = vld [vmem:[#allocation8 + $0x54] sm:$0xf]  ;;  %v3113_v55 = vld [vmem:[#allocation8 + $0x58] sm:$0xf0] }
  0x58   : > { %890 = vmatpush.bf16.msra.mxu3 %v4029_v40  ;;  %744 = vmatpush.bf16.msra.mxu0 %v4032_v44  ;;  %v4084_v56 = vor.u32 %v3264_v48, %v3111_v47  ;;  %v4086_v59 = vor.u32 %v3263_v54, %v3113_v55  ;;  %v2823_v60 = vld [vmem:[%s3934_s11 + $0x10] sm:$0xf]  ;;  %v3272_v61 = vld [vmem:[%s3934_s11 + $0x14] sm:$0xf0]  ;;  %v3271_v4 = vld [vmem:[%s3934_s11 + $0x14] sm:$0xf] }
  0x59   : > { %793 = vmatpush.bf16.msra.mxu1 %v4036_v49  ;;  %v2825_v5 = vld [vmem:[%s3934_s11 + $0x18] sm:$0xf0]  ;;  %v4096_v10 = vor.u32 %v3272_v61, %v2823_v60  ;;  %v2935_v21 = vld [vmem:[#allocation5 + $0x68] sm:$0xf]  ;;  %v3219_v23 = vld [vmem:[#allocation5 + $0x70] sm:$0xf0] }
  0x5a   : > { %5432 = vst [vmem:[#allocation15_spill] sm:$0xff] %v4084_v56  ;;  %v4098_v12 = vor.u32 %v3271_v4, %v2825_v5  ;;  %v3031_v26 = vld [vmem:[#allocation5 + $0x128] sm:$0xf]  ;;  %v4102_v29 = vor.u32 %v3219_v23, %v2935_v21  ;;  %v3243_v32 = vld [vmem:[#allocation5 + $0x130] sm:$0xf0]  ;;  %s4872_s28 = scalar_lea.vmem [#allocation10], %s2808_s27 }
  0x5b   : > { %745 = vmatmul.bf16.vlgmr.msra.gmra.mxu0 %v4043_v0  ;;  %842 = vmatpush.bf16.msra.mxu2 %v4046_v2  ;;  %5433 = vst [vmem:[#allocation16_spill] sm:$0xff] %v4086_v59  ;;  %v4105_v33 = vor.u32 %v3243_v32, %v3031_v26  ;;  %v3103_v34 = vld [vmem:[#allocation8 + $0x40] sm:$0xf]  ;;  %v3262_v42 = vld [vmem:[#allocation8 + $0x44] sm:$0xf0]  ;;  %s3302_s16 = sshll.u32 %s3834_s22, 8 }
  0x5c   : > { %933 = vmatpush.bf16.msrb.mxu0 %v4038_v52  ;;  %794 = vmatmul.bf16.vlgmr.msra.gmra.mxu1 %v4049_v8  ;;  %v3261_v47 = vld [vmem:[#allocation8 + $0x44] sm:$0xf]  ;;  %v4110_v48 = vor.u32 %v3262_v42, %v3103_v34  ;;  %v3105_v54 = vld [vmem:[#allocation8 + $0x48] sm:$0xf0]  ;;  %v2831_v60 = vld [vmem:[%s3934_s11 + $0x20] sm:$0xf]  ;;  %s2691_s6 = scalar_lea.hbm %s5384_s5, %s3302_s16 }
  0x5d   : > { %982 = vmatpush.bf16.msrb.mxu1 %v4040_v58  ;;  %891 = vmatpush.bf16.msra.mxu3 %v4051_v9  ;;  %v4112_v55 = vor.u32 %v3261_v47, %v3105_v54  ;;  %v3274_v61 = vld [vmem:[%s3934_s11 + $0x24] sm:$0xf0]  ;;  %v3273_v4 = vld [vmem:[%s3934_s11 + $0x24] sm:$0xf]  ;;  %v2833_v5 = vld [vmem:[%s3934_s11 + $0x28] sm:$0xf0] }
  0x5e   : > { %843 = vmatmul.bf16.vlgmr.msra.gmra.mxu2 %v4043_v0  ;;  %5434 = vst [vmem:[#allocation17_spill] sm:$0xff] %v4110_v48  ;;  %v4120_v21 = vor.u32 %v3274_v61, %v2831_v60  ;;  %v4122_v23 = vor.u32 %v3273_v4, %v2833_v5  ;;  %v2923_v26 = vld [vmem:[#allocation5 + $0x50] sm:$0xf]  ;;  %v3216_v32 = vld [vmem:[#allocation5 + $0x58] sm:$0xf0]  ;;  %s2692_s13 = sshll.u32 %s4872_s28, 4  ;;  %s2693_s13 = int_to_ptr.vmem [resolvable:$true] %s2692_s13 }
  0x5f   : > { %1172 = vmatpush.bf16.msrb.mxu2 %v4055_v18  ;;  %5435 = vst [vmem:[#allocation18_spill] sm:$0xff] %v4112_v55  ;;  %v3019_v34 = vld [vmem:[#allocation5 + $0x110] sm:$0xf]  ;;  %v4126_v42 = vor.u32 %v3216_v32, %v2923_v26  ;;  %v3240_v47 = vld [vmem:[#allocation5 + $0x118] sm:$0xf0]  ;;  %s2694_s12 = sshll.u32 %s2691_s6, 4  ;;  %s2695_s12 = int_to_ptr.hbm [resolvable:$true] %s2694_s12 }
  0x60   : > { %934 = vmatpush.bf16.msrb.mxu0 %v4060_v22  ;;  %892 = vmatmul.bf16.vlgmr.msra.gmra.mxu3 %v4049_v8  ;;  %5436 = vst [vmem:[#allocation19_spill] sm:$0xff] %v4120_v21  ;;  %v4129_v54 = vor.u32 %v3240_v47, %v3019_v34  ;;  %v3095_v60 = vld [vmem:[#allocation8 + $0x30] sm:$0xf]  ;;  %v3260_v61 = vld [vmem:[#allocation8 + $0x34] sm:$0xf0]  ;;  %s2679_s22 = scalar_lea.sflag [#allocation4], %s3928_s17 }
  0x61   : > { %1221 = vmatpush.bf16.msrb.mxu3 %v4057_v19  ;;  %983 = vmatpush.bf16.msrb.mxu1 %v4064_v30  ;;  %5437 = vst [vmem:[#allocation20_spill] sm:$0xff] %v4122_v23  ;;  %v3259_v4 = vld [vmem:[#allocation8 + $0x34] sm:$0xf]  ;;  %v4134_v5 = vor.u32 %v3260_v61, %v3095_v60  ;;  %v3097_v26 = vld [vmem:[#allocation8 + $0x38] sm:$0xf0]  ;;  %s3712_s14 = sshra.s32 %s2695_s12, 4  ;;  %s3713_s14 = int_to_ptr.hbm [resolvable:$true] %s3712_s14 }
  0x62   : > { %v4136_v32 = vor.u32 %v3259_v4, %v3097_v26  ;;  %v2839_v34 = vld [vmem:[%s3934_s11 + $0x30] sm:$0xf]  ;;  %v3276_v47 = vld [vmem:[%s3934_s11 + $0x34] sm:$0xf0]  ;;  %v3213_v61 = vld [vmem:[#allocation5 + $0x40] sm:$0xf0]  ;;  %p3719_p11 = scmp.lt.s32.totalorder %s3713_s14, %s5384_s5 }
  0x63   : > { %1173 = vmatpush.bf16.msrb.mxu2 %v4070_v35  ;;  %5438 = vst [vmem:[#allocation21_spill] sm:$0xff] %v4134_v5  ;;  %v2911_v60 = vld [vmem:[#allocation5 + $0x38] sm:$0xf]  ;;  %s3714_s15 = scalar_lea.hbm %s3713_s14, 256  ;;  %s3718_s8 = scalar_lea.hbm %s5384_s5, 512 }
  0x64   : > { %935 = vmatpush.bf16.msrb.mxu0 %v4076_v43  ;;  %5439 = vst [vmem:[#allocation22_spill] sm:$0xff] %v4136_v32  ;;  %v3007_v4 = vld [vmem:[#allocation5 + $0xf8] sm:$0xf]  ;;  %v4150_v26 = vor.u32 %v3213_v61, %v2911_v60  ;;  %v3089_v60 = vld [vmem:[#allocation8 + $0x28] sm:$0xf0]  ;;  %p3715_p1 = scmp.ne.s32.totalorder %s3713_s14, %s3714_s15  ;;  %p3720_p9 = scmp.lt.s32.totalorder %s3718_s8, %s3714_s15 }
  0x65   : > { %1222 = vmatpush.bf16.msrb.mxu3 %v4072_v37  ;;  %984 = vmatpush.bf16.msrb.mxu1 %v4080_v46 }
  0x66   : > { %p3716_p4 = pnand %p3715_p1, %p3898_p3  ;;  %p3721_p2 = por %p3720_p9, %p3719_p11 }
  0x67   : > { %1174 = vmatpush.bf16.msrb.mxu2 %v4084_v56 }
  0x68   : > { %936 = vmatpush.bf16.msrb.mxu0 %v4102_v29  ;;  %p3717_p8 = pneg %p3716_p4 }
  0x69   : > { %1223 = vmatpush.bf16.msrb.mxu3 %v4086_v59  ;;  %985 = vmatpush.bf16.msrb.mxu1 %v4105_v33 }
  0x6a   : > { %p3722_p10 = pnand %p3721_p2, %p3717_p8 }
  0x6b   : > { %750 = vmatmul.bf16.gmra.mxu0 %v4096_v10  ;;  %1175 = vmatpush.bf16.msrb.mxu2 %v4110_v48 }
  0x6c   : > { %799 = vmatmul.bf16.gmra.mxu1 %v4098_v12  ;;  %937 = vmatpush.bf16.msrb.mxu0 %v4126_v42 }
  0x6d   : > { %1224 = vmatpush.bf16.msrb.mxu3 %v4112_v55  ;;  %986 = vmatpush.bf16.msrb.mxu1 %v4129_v54  ;;  %v4144_v55 = vor.u32 %v3276_v47, %v2839_v34  ;;  %v3257_v47 = vld [vmem:[#allocation8 + $0x24] sm:$0xf] }
  0x6e   : > { %848 = vmatmul.bf16.gmra.mxu2 %v4096_v10  ;;  %v4160_v61 = vor.u32 %v3257_v47, %v3089_v60  ;;  %v2995_v47 = vld [vmem:[#allocation5 + $0xe0] sm:$0xf] }
  0x6f   : > { %1176 = vmatpush.bf16.msrb.mxu2 %v4134_v5  ;;  %5440 = vst [vmem:[#allocation23_spill] sm:$0xff] %v4144_v55 }
  0x70   : > { %897 = vmatmul.bf16.gmra.mxu3 %v4098_v12  ;;  %938 = vmatpush.bf16.msrb.mxu0 %v4150_v26  ;;  %5444 = vst [vmem:[#allocation27_spill] sm:$0xff] %v4160_v61 }
  0x71   : > { %1225 = vmatpush.bf16.msrb.mxu3 %v4136_v32  ;;  %v3237_v32 = vld [vmem:[#allocation5 + $0x100] sm:$0xf0] }
  0x72   : > { %v4153_v34 = vor.u32 %v3237_v32, %v3007_v4  ;;  %v2847_v32 = vld [vmem:[%s3934_s11 + $0x40] sm:$0xf]  ;;  %v3278_v4 = vld [vmem:[%s3934_s11 + $0x44] sm:$0xf0] }
  0x73   : > { %v4168_v59 = vor.u32 %v3278_v4, %v2847_v32  ;;  %v3255_v4 = vld [vmem:[#allocation8 + $0x14] sm:$0xf] }
  0x74   : > { %5442 = vst [vmem:[#allocation25_spill] sm:$0xff] %v4153_v34  ;;  %987 = vmatpush.bf16.msrb.mxu1 %v4153_v34 }
  0x75   : > { %1226 = vmatpush.bf16.msrb.mxu3 %v4160_v61  ;;  %5445 = vst [vmem:[#allocation28_spill] sm:$0xff] %v4168_v59  ;;  %v3234_v61 = vld [vmem:[#allocation5 + $0xe8] sm:$0xf0] }
  0x76   : > { %v4177_v32 = vor.u32 %v3234_v61, %v2995_v47  ;;  %v2855_v61 = vld [vmem:[%s3934_s11 + $0x50] sm:$0xf]  ;;  %v3280_v47 = vld [vmem:[%s3934_s11 + $0x54] sm:$0xf0] }
  0x77   : > { %v4192_v34 = vor.u32 %v3280_v47, %v2855_v61  ;;  %v3281_v47 = vld [vmem:[%s3934_s11 + $0x64] sm:$0xf] }
  0x78   : > { %988 = vmatpush.bf16.msrb.mxu1 %v4177_v32 }
  0x7b   : > { %755 = vmatmul.bf16.gmra.mxu0 %v4120_v21 }
  0x7c   : > { %804 = vmatmul.bf16.gmra.mxu1 %v4122_v23 }
  0x7e   : > { %853 = vmatmul.bf16.gmra.mxu2 %v4120_v21  ;;  %v3275_v21 = vld [vmem:[%s3934_s11 + $0x34] sm:$0xf] }
  0x80   : > { %902 = vmatmul.bf16.gmra.mxu3 %v4122_v23  ;;  %v2841_v23 = vld [vmem:[%s3934_s11 + $0x38] sm:$0xf0] }
  0x81   : > { %v4146_v48 = vor.u32 %v3275_v21, %v2841_v23  ;;  %v3087_v21 = vld [vmem:[#allocation8 + $0x20] sm:$0xf]  ;;  %v3258_v23 = vld [vmem:[#allocation8 + $0x24] sm:$0xf0] }
  0x82   : > { %v4158_v5 = vor.u32 %v3258_v23, %v3087_v21  ;;  %v2899_v21 = vld [vmem:[#allocation5 + $0x20] sm:$0xf]  ;;  %v3210_v23 = vld [vmem:[#allocation5 + $0x28] sm:$0xf0] }
  0x83   : > { %5441 = vst [vmem:[#allocation24_spill] sm:$0xff] %v4146_v48  ;;  %v4174_v60 = vor.u32 %v3210_v23, %v2899_v21  ;;  %v3081_v21 = vld [vmem:[#allocation8 + $0x18] sm:$0xf0] }
  0x84   : > { %5443 = vst [vmem:[#allocation26_spill] sm:$0xff] %v4158_v5  ;;  %1177 = vmatpush.bf16.msrb.mxu2 %v4158_v5  ;;  %v4184_v23 = vor.u32 %v3255_v4, %v3081_v21  ;;  %v2983_v4 = vld [vmem:[#allocation5 + $0xc8] sm:$0xf] }
  0x85   : > { %5447 = vst [vmem:[#allocation30_spill] sm:$0xff] %v4174_v60  ;;  %939 = vmatpush.bf16.msrb.mxu0 %v4174_v60 }
  0x86   : > { %5448 = vst [vmem:[#allocation31_spill] sm:$0xff] %v4184_v23  ;;  %1227 = vmatpush.bf16.msrb.mxu3 %v4184_v23  ;;  %v3231_v23 = vld [vmem:[#allocation5 + $0xd0] sm:$0xf0] }
  0x87   : > { %v4201_v61 = vor.u32 %v3231_v23, %v2983_v4  ;;  %v3283_v4 = vld [vmem:[%s3934_s11 + $0x74] sm:$0xf] }
  0x89   : > { %989 = vmatpush.bf16.msrb.mxu1 %v4201_v61 }
  0x8b   : > { %760 = vmatmul.bf16.gmra.mxu0 %v4144_v55 }
  0x8c   : > { %809 = vmatmul.bf16.gmra.mxu1 %v4146_v48 }
  0x8d   : > { %1847 = vmatpush.bf16.msra.mxu1 %v3950_v7  ;;  %v3254_v7 = vld [vmem:[#allocation8 + $0x4] sm:$0xf0] }
  0x8e   : > { %858 = vmatmul.bf16.gmra.mxu2 %v4144_v55  ;;  %v3277_v55 = vld [vmem:[%s3934_s11 + $0x44] sm:$0xf] }
  0x90   : > { %907 = vmatmul.bf16.gmra.mxu3 %v4146_v48  ;;  %v2849_v48 = vld [vmem:[%s3934_s11 + $0x48] sm:$0xf0] }
  0x91   : > { %v4170_v56 = vor.u32 %v3277_v55, %v2849_v48  ;;  %v3079_v48 = vld [vmem:[#allocation8 + $0x10] sm:$0xf]  ;;  %v3256_v55 = vld [vmem:[#allocation8 + $0x14] sm:$0xf0]  ;;  %1848 = vmatpush.bf16.msra.mxu1 %v3956_v15 }
  0x92   : > { %v4182_v5 = vor.u32 %v3256_v55, %v3079_v48  ;;  %v2887_v48 = vld [vmem:[#allocation5 + $0x8] sm:$0xf]  ;;  %v3207_v55 = vld [vmem:[#allocation5 + $0x10] sm:$0xf0] }
  0x93   : > { %5446 = vst [vmem:[#allocation29_spill] sm:$0xff] %v4170_v56  ;;  %v4198_v21 = vor.u32 %v3207_v55, %v2887_v48  ;;  %v2865_v48 = vld [vmem:[%s3934_s11 + $0x68] sm:$0xf0] }
  0x94   : > { %1178 = vmatpush.bf16.msrb.mxu2 %v4182_v5  ;;  %v4216_v55 = vor.u32 %v3281_v47, %v2865_v48  ;;  %v5452_v47 = vld [vmem:[#allocation30_spill] sm:$0xff] }
  0x95   : > { %940 = vmatpush.bf16.msrb.mxu0 %v4198_v21  ;;  %1849 = vmatpush.bf16.msra.mxu1 %v3972_v31 }
  0x99   : > { %1798 = vmatpush.bf16.msra.mxu0 %v3948_v3  ;;  %v3071_v3 = vld [vmem:[#allocation8] sm:$0xf]  ;;  %1850 = vmatpush.bf16.msra.mxu1 %v3984_v45  ;;  %v3284_v45 = vld [vmem:[%s3934_s11 + $0x74] sm:$0xf0] }
  0x9a   : > { %v4225_v15 = vor.u32 %v3254_v7, %v3071_v3  ;;  %v5453_v3 = vld [vmem:[#allocation17_spill] sm:$0xff] }
  0x9b   : > { %765 = vmatmul.bf16.gmra.mxu0 %v4168_v59 }
  0x9c   : > { %814 = vmatmul.bf16.gmra.mxu1 %v4170_v56  ;;  %1179 = vmatpush.bf16.msrb.mxu2 %v4225_v15 }
  0x9d   : > { %1799 = vmatpush.bf16.msra.mxu0 %v3953_v11  ;;  %v3253_v11 = vld [vmem:[#allocation8 + $0x4] sm:$0xf]  ;;  %1851 = vmatpush.bf16.msra.mxu1 %v3996_v57 }
  0x9e   : > { %863 = vmatmul.bf16.gmra.mxu2 %v4168_v59  ;;  %v3279_v59 = vld [vmem:[%s3934_s11 + $0x54] sm:$0xf] }
  0xa0   : > { %912 = vmatmul.bf16.gmra.mxu3 %v4170_v56  ;;  %v2857_v56 = vld [vmem:[%s3934_s11 + $0x58] sm:$0xf0]  ;;  %1896 = vmatpush.bf16.msra.mxu2 %v3958_v16  ;;  %v4262_v16 = vld [vmem:[#allocation7] sm:$0x7] }
  0xa1   : > { %v4194_v60 = vor.u32 %v3279_v59, %v2857_v56  ;;  %v2863_v56 = vld [vmem:[%s3934_s11 + $0x60] sm:$0xf]  ;;  %v3282_v59 = vld [vmem:[%s3934_s11 + $0x64] sm:$0xf0]  ;;  %1800 = vmatpush.bf16.msra.mxu0 %v3967_v27  ;;  %v3073_v27 = vld [vmem:[#allocation8 + $0x8] sm:$0xf0]  ;;  %1852 = vmatpush.bf16.msra.mxu1 %v4008_v6 }
  0xa2   : > { %v4214_v23 = vor.u32 %v3282_v59, %v2863_v56  ;;  %v4228_v31 = vor.u32 %v3253_v11, %v3073_v27  ;;  %v2873_v56 = vld [vmem:[%s3934_s11 + $0x78] sm:$0xf0] }
  0xa3   : > { %v4246_v59 = vor.u32 %v3283_v4, %v2873_v56  ;;  %v5454_v27 = vld [vmem:[#allocation18_spill] sm:$0xff] }
  0xa4   : > { %1228 = vmatpush.bf16.msrb.mxu3 %v4228_v31  ;;  %1897 = vmatpush.bf16.msra.mxu2 %v3964_v24 }
  0xa5   : > { %1801 = vmatpush.bf16.msra.mxu0 %v3981_v41  ;;  %v2871_v41 = vld [vmem:[%s3934_s11 + $0x70] sm:$0xf]  ;;  %1853 = vmatpush.bf16.msra.mxu1 %v4020_v25 }
  0xa8   : > { %1945 = vmatpush.bf16.msra.mxu3 %v3960_v17  ;;  %1898 = vmatpush.bf16.msra.mxu2 %v3976_v38  ;;  %v4267_v17 = vperm.slane %v4262_v16, 0 }
  0xa9   : > { %1802 = vmatpush.bf16.msra.mxu0 %v3993_v53  ;;  %v4244_v53 = vor.u32 %v3284_v45, %v2871_v41  ;;  %1854 = vmatpush.bf16.msra.mxu1 %v4036_v49 }
  0xab   : > { %770 = vmatmul.bf16.gmra.mxu0 %v4192_v34 }
  0xac   : > { %819 = vmatmul.bf16.gmra.mxu1 %v4194_v60  ;;  %1946 = vmatpush.bf16.msra.mxu3 %v3969_v28 }
  0xad   : > { %1803 = vmatpush.bf16.msra.mxu0 %v4005_v1  ;;  %1899 = vmatpush.bf16.msra.mxu2 %v3988_v50 }
  0xae   : > { %868 = vmatmul.bf16.gmra.mxu2 %v4192_v34 }
  0xb0   : > { %917 = vmatmul.bf16.gmra.mxu3 %v4194_v60 }
  0xb1   : > { %1804 = vmatpush.bf16.msra.mxu0 %v4017_v20  ;;  %1947 = vmatpush.bf16.msra.mxu3 %v3978_v39  ;;  %v4278_v39 = vperm.slane %v4262_v16, 1 }
  0xb2   : > { %1900 = vmatpush.bf16.msra.mxu2 %v4000_v62 }
  0xb5   : > { %1805 = vmatpush.bf16.msra.mxu0 %v4032_v44  ;;  %1948 = vmatpush.bf16.msra.mxu3 %v3990_v51 }
  0xb6   : > { %1901 = vmatpush.bf16.msra.mxu2 %v4012_v13 }
  0xb9   : > { %1949 = vmatpush.bf16.msra.mxu3 %v4002_v63 }
  0xba   : > { %1902 = vmatpush.bf16.msra.mxu2 %v4026_v36 }
  0xbb   : > { %775 = vmatmul.bf16.gmra.mxu0 %v4214_v23 }
  0xbc   : > { %824 = vmatmul.bf16.gmra.mxu1 %v4216_v55 }
  0xbd   : > { %1950 = vmatpush.bf16.msra.mxu3 %v4014_v14 }
  0xbe   : > { %873 = vmatmul.bf16.gmra.mxu2 %v4214_v23 }
  0xbf   : > { %1903 = vmatpush.bf16.msra.mxu2 %v4046_v2 }
  0xc0   : > { %922 = vmatmul.bf16.gmra.mxu3 %v4216_v55 }
  0xc1   : > { %1951 = vmatpush.bf16.msra.mxu3 %v4029_v40 }
  0xc5   : > { %1952 = vmatpush.bf16.msra.mxu3 %v4051_v9 }
  0xcb   : > { %780 = vmatmul.bf16.gmra.mxu0 %v4244_v53 }
  0xcc   : > { %829 = vmatmul.bf16.gmra.mxu1 %v4246_v59 }
  0xce   : > { %878 = vmatmul.bf16.gmra.mxu2 %v4244_v53 }
  0xd0   : > { %927 = vmatmul.bf16.gmra.mxu3 %v4246_v59 }
  0xd8   : > { %v746_v24 = vpop.f32.mrf.mxu0 }
  0xd9   : > { %v795_v28 = vpop.f32.mrf.mxu1  ;;  %v747_v38 = vadd.f32 %v746_v24, %v4267_v17  ;;  %v5455_v24 = vld [vmem:[#allocation19_spill] sm:$0xff] }
  0xdb   : > { %941 = vmatmul.bf16.vlgmr.msrb.gmra.mxu0 %v4043_v0  ;;  %v796_v50 = vadd.f32 %v795_v28, %v747_v38  ;;  %v5456_v28 = vld [vmem:[#allocation21_spill] sm:$0xff]  ;;  %v5457_v38 = vld [vmem:[#allocation20_spill] sm:$0xff] }
  0xdc   : > { %990 = vmatmul.bf16.vlgmr.msrb.gmra.mxu1 %v4049_v8  ;;  %1994 = vmatpush.bf16.msrb.mxu0 %v4038_v52 }
  0xdd   : > { %2043 = vmatpush.bf16.msrb.mxu1 %v4040_v58  ;;  %v1047_v13 = vmul.f32 0.01, %v796_v50  ;;  %vm1031_vm0 = vcmp.gt.f32.partialorder %v796_v50, 0.0 }
  0xdf   : > { %v1063_v36 = vsel %vm1031_vm0, %v796_v50, %v1047_v13 }
  0xe0   : > { %v748_v51 = vpop.f32.mrf.mxu0  ;;  %1995 = vmatpush.bf16.msrb.mxu0 %v4060_v22 }
  0xe1   : > { %v749_v57 = vadd.f32 %v748_v51, %v4267_v17  ;;  %v797_v62 = vpop.f32.mrf.mxu1  ;;  %v844_v63 = vpop.f32.mrf.mxu2  ;;  %2044 = vmatpush.bf16.msrb.mxu1 %v4064_v30  ;;  %v5459_v51 = vld [vmem:[#allocation22_spill] sm:$0xff] }
  0xe2   : > { %v845_v1 = vadd.f32 %v844_v63, %v4278_v39 }
  0xe3   : > { %v893_v6 = vpop.f32.mrf.mxu3  ;;  %v798_v14 = vadd.f32 %v797_v62, %v749_v57  ;;  %v5460_v57 = vld [vmem:[#allocation26_spill] sm:$0xff]  ;;  %v5461_v62 = vld [vmem:[#allocation27_spill] sm:$0xff] }
  0xe4   : > { %v4285_v20 = vadd.f32 %v893_v6, %v845_v1  ;;  %1996 = vmatpush.bf16.msrb.mxu0 %v4076_v43 }
  0xe5   : > { %vm1032_vm1 = vcmp.gt.f32.partialorder %v798_v14, 0.0  ;;  %v1048_v25 = vmul.f32 0.01, %v798_v14  ;;  %2045 = vmatpush.bf16.msrb.mxu1 %v4080_v46 }
  0xe7   : > { %v1064_v40 = vsel %vm1032_vm1, %v798_v14, %v1048_v25 }
  0xe8   : > { %v751_v44 = vpop.f32.mrf.mxu0  ;;  %v1079_v49 = vpack.c.bf16 %v1064_v40, %v1063_v36  ;;  %1997 = vmatpush.bf16.msrb.mxu0 %v4102_v29 }
  0xe9   : > { %v800_v52 = vpop.f32.mrf.mxu1  ;;  %v846_v58 = vpop.f32.mrf.mxu2  ;;  %2046 = vmatpush.bf16.msrb.mxu1 %v4105_v33  ;;  %v752_v8 = vadd.f32 %v751_v44, %v4267_v17  ;;  %v5463_v44 = vld [vmem:[#allocation31_spill] sm:$0xff] }
  0xea   : > { %1180 = vmatmul.bf16.vlgmr.msrb.gmra.mxu2 %v1079_v49  ;;  %1229 = vmatmul.bf16.vlgmr.msrb.gmra.mxu3 %v1079_v49  ;;  %v847_v0 = vadd.f32 %v846_v58, %v4278_v39 }
  0xeb   : > { %v895_v2 = vpop.f32.mrf.mxu3  ;;  %946 = vmatmul.bf16.gmra.mxu0 %v4096_v10  ;;  %2148 = vmatpush.bf16.msrb.mxu2 %v4055_v18  ;;  %v801_v22 = vadd.f32 %v800_v52, %v752_v8  ;;  %v5449_v10 = vld [vmem:[#allocation25_spill] sm:$0xff] }
  0xec   : > { %995 = vmatmul.bf16.gmra.mxu1 %v4098_v12  ;;  %v4296_v9 = vadd.f32 %v895_v2, %v847_v0  ;;  %2197 = vmatpush.bf16.msrb.mxu3 %v4057_v19 }
  0xed   : > { %1998 = vmatpush.bf16.msrb.mxu0 %v4126_v42  ;;  %2047 = vmatpush.bf16.msrb.mxu1 %v4129_v54  ;;  %v1049_v29 = vmul.f32 0.01, %v801_v22  ;;  %v5450_v42 = vld [vmem:[#allocation15_spill] sm:$0xff]  ;;  %vm1033_vm2 = vcmp.gt.f32.partialorder %v801_v22, 0.0 }
  0xef   : > { %2149 = vmatpush.bf16.msrb.mxu2 %v4070_v35  ;;  %v5451_v35 = vld [vmem:[#allocation16_spill] sm:$0xff] }
  0xf0   : > { %v753_v30 = vpop.f32.mrf.mxu0  ;;  %2198 = vmatpush.bf16.msrb.mxu3 %v4072_v37 }
  0xf1   : > { %v754_v43 = vadd.f32 %v753_v30, %v4267_v17  ;;  %v802_v46 = vpop.f32.mrf.mxu1  ;;  %v849_v18 = vpop.f32.mrf.mxu2  ;;  %1999 = vmatpush.bf16.msrb.mxu0 %v4150_v26  ;;  %2048 = vmatpush.bf16.msrb.mxu1 %v5449_v10  ;;  %v1065_v26 = vsel %vm1033_vm2, %v801_v22, %v1049_v29 }
  0xf2   : > { %v850_v19 = vadd.f32 %v849_v18, %v4278_v39  ;;  %v5465_v18 = vld [vmem:[#allocation24_spill] sm:$0xff] }
  0xf3   : > { %v898_v12 = vpop.f32.mrf.mxu3  ;;  %v803_v33 = vadd.f32 %v802_v46, %v754_v43  ;;  %2150 = vmatpush.bf16.msrb.mxu2 %v5450_v42  ;;  %v5464_v46 = vld [vmem:[#allocation23_spill] sm:$0xff] }
  0xf4   : > { %v4308_v54 = vadd.f32 %v898_v12, %v850_v19  ;;  %2199 = vmatpush.bf16.msrb.mxu3 %v5451_v35 }
  0xf5   : > { %v1050_v37 = vmul.f32 0.01, %v803_v33  ;;  %vm1034_vm3 = vcmp.gt.f32.partialorder %v803_v33, 0.0  ;;  %2000 = vmatpush.bf16.msrb.mxu0 %v5452_v47  ;;  %2049 = vmatpush.bf16.msrb.mxu1 %v4177_v32 }
  0xf7   : > { %v1066_v48 = vsel %vm1034_vm3, %v803_v33, %v1050_v37  ;;  %2151 = vmatpush.bf16.msrb.mxu2 %v5453_v3 }
  0xf8   : > { %v756_v7 = vpop.f32.mrf.mxu0  ;;  %v1080_v11 = vpack.c.bf16 %v1066_v48, %v1065_v26  ;;  %2200 = vmatpush.bf16.msrb.mxu3 %v5454_v27 }
  0xf9   : > { %v805_v41 = vpop.f32.mrf.mxu1  ;;  %v851_v45 = vpop.f32.mrf.mxu2  ;;  %2001 = vmatpush.bf16.msrb.mxu0 %v4198_v21  ;;  %2050 = vmatpush.bf16.msrb.mxu1 %v4201_v61  ;;  %v757_v32 = vadd.f32 %v756_v7, %v4267_v17 }
  0xfa   : > { %1185 = vmatmul.bf16.gmra.mxu2 %v1080_v11  ;;  %1234 = vmatmul.bf16.gmra.mxu3 %v1080_v11  ;;  %v852_v4 = vadd.f32 %v851_v45, %v4278_v39 }
  0xfb   : > { %v900_v56 = vpop.f32.mrf.mxu3  ;;  %951 = vmatmul.bf16.gmra.mxu0 %v5455_v24  ;;  %2152 = vmatpush.bf16.msrb.mxu2 %v5456_v28  ;;  %v806_v21 = vadd.f32 %v805_v41, %v757_v32  ;;  %v5468_v32 = vld [vmem:[#allocation28_spill] sm:$0xff]  ;;  %v5469_v24 = vld [vmem:[#allocation29_spill] sm:$0xff] }
  0xfc   : > { %1000 = vmatmul.bf16.gmra.mxu1 %v5457_v38  ;;  %v4322_v50 = vadd.f32 %v900_v56, %v852_v4  ;;  %2201 = vmatpush.bf16.msrb.mxu3 %v5459_v51 }
  0xfd   : > { %v1051_v25 = vmul.f32 0.01, %v806_v21  ;;  %vm1035_vm4 = vcmp.gt.f32.partialorder %v806_v21, 0.0 }
  0xfe   : > { %5458 = vst [vmem:[#allocation25_spill] sm:$0xff] %v4322_v50 }
  0xff   : > { %2153 = vmatpush.bf16.msrb.mxu2 %v5460_v57  ;;  %v1067_v52 = vsel %vm1035_vm4, %v806_v21, %v1051_v25 }
 0x100   : > { %v758_v61 = vpop.f32.mrf.mxu0  ;;  %2202 = vmatpush.bf16.msrb.mxu3 %v5461_v62 }
 0x101   : > { %v759_v63 = vadd.f32 %v758_v61, %v4267_v17  ;;  %v807_v1 = vpop.f32.mrf.mxu1  ;;  %v854_v6 = vpop.f32.mrf.mxu2 }
 0x102   : > { %v855_v13 = vadd.f32 %v854_v6, %v4278_v39 }
 0x103   : > { %v903_v14 = vpop.f32.mrf.mxu3  ;;  %v808_v36 = vadd.f32 %v807_v1, %v759_v63  ;;  %2154 = vmatpush.bf16.msrb.mxu2 %v4182_v5 }
 0x104   : > { %v4330_v40 = vadd.f32 %v903_v14, %v855_v13  ;;  %2203 = vmatpush.bf16.msrb.mxu3 %v5463_v44 }
 0x105   : > { %v1052_v49 = vmul.f32 0.01, %v808_v36  ;;  %vm1036_vm5 = vcmp.gt.f32.partialorder %v808_v36, 0.0 }
 0x106   : > { %5462 = vst [vmem:[#allocation15_spill] sm:$0xff] %v4330_v40 }
 0x107   : > { %v1068_v58 = vsel %vm1036_vm5, %v808_v36, %v1052_v49  ;;  %2155 = vmatpush.bf16.msrb.mxu2 %v4225_v15 }
 0x108   : > { %v761_v0 = vpop.f32.mrf.mxu0  ;;  %v1081_v2 = vpack.c.bf16 %v1068_v58, %v1067_v52  ;;  %2204 = vmatpush.bf16.msrb.mxu3 %v4228_v31 }
 0x109   : > { %v810_v8 = vpop.f32.mrf.mxu1  ;;  %v856_v22 = vpop.f32.mrf.mxu2  ;;  %v762_v43 = vadd.f32 %v761_v0, %v4267_v17 }
 0x10a   : > { %1190 = vmatmul.bf16.gmra.mxu2 %v1081_v2  ;;  %1239 = vmatmul.bf16.gmra.mxu3 %v1081_v2  ;;  %v857_v5 = vadd.f32 %v856_v22, %v4278_v39 }
 0x10b   : > { %v905_v30 = vpop.f32.mrf.mxu3  ;;  %956 = vmatmul.bf16.gmra.mxu0 %v5464_v46  ;;  %v811_v15 = vadd.f32 %v810_v8, %v762_v43 }
 0x10c   : > { %1005 = vmatmul.bf16.gmra.mxu1 %v5465_v18  ;;  %v4339_v10 = vadd.f32 %v905_v30, %v857_v5 }
 0x10d   : > { %v1053_v35 = vmul.f32 0.01, %v811_v15  ;;  %vm1037_vm6 = vcmp.gt.f32.partialorder %v811_v15, 0.0 }
 0x10e   : > { %5466 = vst [vmem:[#allocation16_spill] sm:$0xff] %v4339_v10 }
 0x10f   : > { %v1069_v48 = vsel %vm1037_vm6, %v811_v15, %v1053_v35 }
 0x110   : > { %v763_v19 = vpop.f32.mrf.mxu0 }
 0x111   : > { %v764_v12 = vadd.f32 %v763_v19, %v4267_v17  ;;  %v812_v31 = vpop.f32.mrf.mxu1  ;;  %v859_v29 = vpop.f32.mrf.mxu2 }
 0x112   : > { %v860_v33 = vadd.f32 %v859_v29, %v4278_v39 }
 0x113   : > { %v908_v42 = vpop.f32.mrf.mxu3  ;;  %v813_v37 = vadd.f32 %v812_v31, %v764_v12 }
 0x114   : > { %v4343_v47 = vadd.f32 %v908_v42, %v860_v33 }
 0x115   : > { %v1054_v26 = vmul.f32 0.01, %v813_v37  ;;  %vm1038_vm7 = vcmp.gt.f32.partialorder %v813_v37, 0.0 }
 0x116   : > { %5467 = vst [vmem:[#allocation30_spill] sm:$0xff] %v4343_v47 }
 0x117   : > { %v1070_v3 = vsel %vm1038_vm7, %v813_v37, %v1054_v26 }
 0x118   : > { %v766_v7 = vpop.f32.mrf.mxu0  ;;  %v1082_v11 = vpack.c.bf16 %v1070_v3, %v1069_v48 }
 0x119   : > { %v815_v27 = vpop.f32.mrf.mxu1  ;;  %v861_v41 = vpop.f32.mrf.mxu2  ;;  %v767_v56 = vadd.f32 %v766_v7, %v4267_v17 }
 0x11a   : > { %1195 = vmatmul.bf16.gmra.mxu2 %v1082_v11  ;;  %1244 = vmatmul.bf16.gmra.mxu3 %v1082_v11  ;;  %v862_v45 = vadd.f32 %v861_v41, %v4278_v39 }
 0x11b   : > { %v910_v4 = vpop.f32.mrf.mxu3  ;;  %961 = vmatmul.bf16.gmra.mxu0 %v5468_v32  ;;  %v816_v38 = vadd.f32 %v815_v27, %v767_v56 }
 0x11c   : > { %1010 = vmatmul.bf16.gmra.mxu1 %v5469_v24  ;;  %v4349_v28 = vadd.f32 %v910_v4, %v862_v45 }
 0x11d   : > { %v1055_v1 = vmul.f32 0.01, %v816_v38  ;;  %vm1039_vm8 = vcmp.gt.f32.partialorder %v816_v38, 0.0 }
 0x11e   : > { %5470 = vst [vmem:[#allocation17_spill] sm:$0xff] %v4349_v28 }
 0x11f   : > { %v1071_v25 = vsel %vm1039_vm8, %v816_v38, %v1055_v1 }
 0x120   : > { %v768_v51 = vpop.f32.mrf.mxu0 }
 0x121   : > { %v769_v21 = vadd.f32 %v768_v51, %v4267_v17  ;;  %v817_v57 = vpop.f32.mrf.mxu1  ;;  %v864_v61 = vpop.f32.mrf.mxu2 }
 0x122   : > { %v865_v62 = vadd.f32 %v864_v61, %v4278_v39 }
 0x123   : > { %v913_v63 = vpop.f32.mrf.mxu3  ;;  %v818_v6 = vadd.f32 %v817_v57, %v769_v21 }
 0x124   : > { %v4353_v13 = vadd.f32 %v913_v63, %v865_v62 }
 0x125   : > { %vm1040_vm9 = vcmp.gt.f32.partialorder %v818_v6, 0.0  ;;  %v1056_v14 = vmul.f32 0.01, %v818_v6 }
 0x126   : > { %5471 = vst [vmem:[#allocation18_spill] sm:$0xff] %v4353_v13 }
 0x127   : > { %v1072_v36 = vsel %vm1040_vm9, %v818_v6, %v1056_v14 }
 0x128   : > { %v771_v44 = vpop.f32.mrf.mxu0  ;;  %v1083_v49 = vpack.c.bf16 %v1072_v36, %v1071_v25 }
 0x129   : > { %v820_v52 = vpop.f32.mrf.mxu1  ;;  %v866_v58 = vpop.f32.mrf.mxu2  ;;  %v772_v8 = vadd.f32 %v771_v44, %v4267_v17 }
 0x12a   : > { %1200 = vmatmul.bf16.gmra.mxu2 %v1083_v49  ;;  %1249 = vmatmul.bf16.gmra.mxu3 %v1083_v49  ;;  %v867_v0 = vadd.f32 %v866_v58, %v4278_v39 }
 0x12b   : > { %v915_v2 = vpop.f32.mrf.mxu3  ;;  %966 = vmatmul.bf16.gmra.mxu0 %v4192_v34  ;;  %v821_v5 = vadd.f32 %v820_v52, %v772_v8 }
 0x12c   : > { %1015 = vmatmul.bf16.gmra.mxu1 %v4194_v60  ;;  %v4359_v22 = vadd.f32 %v915_v2, %v867_v0 }
 0x12d   : > { %v1057_v12 = vmul.f32 0.01, %v821_v5  ;;  %vm1041_vm10 = vcmp.gt.f32.partialorder %v821_v5, 0.0 }
 0x12e   : > { %5472 = vst [vmem:[#allocation19_spill] sm:$0xff] %v4359_v22 }
 0x12f   : > { %v1073_v33 = vsel %vm1041_vm10, %v821_v5, %v1057_v12 }
 0x130   : > { %v773_v30 = vpop.f32.mrf.mxu0 }
 0x131   : > { %v774_v43 = vadd.f32 %v773_v30, %v4267_v17  ;;  %v822_v46 = vpop.f32.mrf.mxu1  ;;  %v869_v18 = vpop.f32.mrf.mxu2 }
 0x132   : > { %v870_v15 = vadd.f32 %v869_v18, %v4278_v39 }
 0x133   : > { %v918_v19 = vpop.f32.mrf.mxu3  ;;  %v823_v31 = vadd.f32 %v822_v46, %v774_v43  ;;  %v3135_v43 = vld [vmem:[%s3934_s11 + $0x80] sm:$0xf]  ;;  %v3286_v46 = vld [vmem:[%s3934_s11 + $0x84] sm:$0xf0] }
 0x134   : > { %v4363_v29 = vadd.f32 %v918_v19, %v870_v15  ;;  %v4389_v15 = vperm.slane %v4262_v16, 2  ;;  %v3137_v19 = vld [vmem:[%s3934_s11 + $0x88] sm:$0xf0] }
 0x135   : > { %vm1042_vm11 = vcmp.gt.f32.partialorder %v823_v31, 0.0  ;;  %v1058_v34 = vmul.f32 0.01, %v823_v31 }
 0x136   : > { %5473 = vst [vmem:[#allocation21_spill] sm:$0xff] %v4363_v29  ;;  %v3298_v29 = vld [vmem:[%s3934_s11 + $0xe4] sm:$0xf0] }
 0x137   : > { %v1074_v60 = vsel %vm1042_vm11, %v823_v31, %v1058_v34  ;;  %5478 = vst [vmem:[#allocation31_spill] sm:$0xff] %v4389_v15  ;;  %v4392_v34 = vor.u32 %v3286_v46, %v3135_v43 }
 0x138   : > { %v776_v42 = vpop.f32.mrf.mxu0  ;;  %v1084_v35 = vpack.c.bf16 %v1074_v60, %v1073_v33 }
 0x139   : > { %v825_v37 = vpop.f32.mrf.mxu1  ;;  %v871_v26 = vpop.f32.mrf.mxu2  ;;  %v777_v7 = vadd.f32 %v776_v42, %v4267_v17 }
 0x13a   : > { %1205 = vmatmul.bf16.gmra.mxu2 %v1084_v35  ;;  %1254 = vmatmul.bf16.gmra.mxu3 %v1084_v35  ;;  %v872_v48 = vadd.f32 %v871_v26, %v4278_v39 }
 0x13b   : > { %v920_v3 = vpop.f32.mrf.mxu3  ;;  %971 = vmatmul.bf16.gmra.mxu0 %v4214_v23  ;;  %v826_v27 = vadd.f32 %v825_v37, %v777_v7 }
 0x13c   : > { %1020 = vmatmul.bf16.gmra.mxu1 %v4216_v55  ;;  %v4369_v11 = vadd.f32 %v920_v3, %v872_v48 }
 0x13d   : > { %v1059_v38 = vmul.f32 0.01, %v826_v27  ;;  %vm1043_vm12 = vcmp.gt.f32.partialorder %v826_v27, 0.0 }
 0x13e   : > { %5474 = vst [vmem:[#allocation20_spill] sm:$0xff] %v4369_v11 }
 0x13f   : > { %v1075_v57 = vsel %vm1043_vm12, %v826_v27, %v1059_v38  ;;  %v3145_v38 = vld [vmem:[%s3934_s11 + $0x98] sm:$0xf0] }
 0x140   : > { %v778_v41 = vpop.f32.mrf.mxu0 }
 0x141   : > { %v779_v45 = vadd.f32 %v778_v41, %v4267_v17  ;;  %v827_v4 = vpop.f32.mrf.mxu1  ;;  %v874_v56 = vpop.f32.mrf.mxu2 }
 0x142   : > { %v875_v32 = vadd.f32 %v874_v56, %v4278_v39  ;;  %v3143_v56 = vld [vmem:[%s3934_s11 + $0x90] sm:$0xf] }
 0x143   : > { %v923_v24 = vpop.f32.mrf.mxu3  ;;  %v828_v51 = vadd.f32 %v827_v4, %v779_v45 }
 0x144   : > { %v4373_v21 = vadd.f32 %v923_v24, %v875_v32  ;;  %v3288_v32 = vld [vmem:[%s3934_s11 + $0x94] sm:$0xf0]  ;;  %v3287_v24 = vld [vmem:[%s3934_s11 + $0x94] sm:$0xf] }
 0x145   : > { %vm1044_vm13 = vcmp.gt.f32.partialorder %v828_v51, 0.0  ;;  %v1060_v23 = vmul.f32 0.01, %v828_v51 }
 0x146   : > { %5475 = vst [vmem:[#allocation22_spill] sm:$0xff] %v4373_v21 }
 0x147   : > { %v1076_v55 = vsel %vm1044_vm13, %v828_v51, %v1060_v23  ;;  %v4411_v51 = vor.u32 %v3288_v32, %v3143_v56  ;;  %v377_v23 = vld [vmem:[%s5383_s4] sm:$0x3] }
 0x148   : > { %v781_v61 = vpop.f32.mrf.mxu0  ;;  %v1085_v62 = vpack.c.bf16 %v1076_v55, %v1075_v57  ;;  %v4416_v55 = vor.u32 %v3287_v24, %v3145_v38 }
 0x149   : > { %v830_v63 = vpop.f32.mrf.mxu1  ;;  %v876_v1 = vpop.f32.mrf.mxu2  ;;  %v782_v25 = vadd.f32 %v781_v61, %v4267_v17 }
 0x14a   : > { %1210 = vmatmul.bf16.gmra.mxu2 %v1085_v62  ;;  %1259 = vmatmul.bf16.gmra.mxu3 %v1085_v62  ;;  %v877_v6 = vadd.f32 %v876_v1, %v4278_v39  ;;  %v4423_v1 = vperm.slane %v377_v23, 1 }
 0x14b   : > { %v925_v14 = vpop.f32.mrf.mxu3  ;;  %976 = vmatmul.bf16.gmra.mxu0 %v4244_v53  ;;  %v831_v44 = vadd.f32 %v830_v63, %v782_v25  ;;  %v4421_v63 = vperm.slane %v377_v23, 0 }
 0x14c   : > { %1025 = vmatmul.bf16.gmra.mxu1 %v4246_v59  ;;  %v4379_v36 = vadd.f32 %v925_v14, %v877_v6  ;;  %v3285_v59 = vld [vmem:[%s3934_s11 + $0x84] sm:$0xf] }
 0x14d   : > { %v1061_v5 = vmul.f32 0.01, %v831_v44  ;;  %vm1045_vm14 = vcmp.gt.f32.partialorder %v831_v44, 0.0  ;;  %v4394_v42 = vor.u32 %v3285_v59, %v3137_v19  ;;  %v3289_v59 = vld [vmem:[%s3934_s11 + $0xa4] sm:$0xf] }
 0x14e   : > { %5476 = vst [vmem:[#allocation26_spill] sm:$0xff] %v4379_v36  ;;  %v3295_v36 = vld [vmem:[%s3934_s11 + $0xd4] sm:$0xf] }
 0x14f   : > { %v1077_v12 = vsel %vm1045_vm14, %v831_v44, %v1061_v5  ;;  %v3151_v5 = vld [vmem:[%s3934_s11 + $0xa0] sm:$0xf] }
 0x150   : > { %v783_v49 = vpop.f32.mrf.mxu0 }
 0x151   : > { %v784_v52 = vadd.f32 %v783_v49, %v4267_v17  ;;  %v832_v58 = vpop.f32.mrf.mxu1  ;;  %v879_v0 = vpop.f32.mrf.mxu2 }
 0x152   : > { %v880_v2 = vadd.f32 %v879_v0, %v4278_v39 }
 0x153   : > { %v928_v8 = vpop.f32.mrf.mxu3  ;;  %v833_v30 = vadd.f32 %v832_v58, %v784_v52 }
 0x154   : > { %v4384_v53 = vadd.f32 %v928_v8, %v880_v2 }
 0x155   : > { %vm1046_vm15 = vcmp.gt.f32.partialorder %v833_v30, 0.0  ;;  %v1062_v18 = vmul.f32 0.01, %v833_v30 }
 0x156   : > { %5477 = vst [vmem:[#allocation27_spill] sm:$0xff] %v4384_v53 }
 0x157   : > { %v1078_v31 = vsel %vm1046_vm15, %v833_v30, %v1062_v18  ;;  %v3290_v30 = vld [vmem:[%s3934_s11 + $0xa4] sm:$0xf0]  ;;  %v3153_v18 = vld [vmem:[%s3934_s11 + $0xa8] sm:$0xf0] }
 0x158   : > { %v942_v33 = vpop.f32.mrf.mxu0  ;;  %v1086_v60 = vpack.c.bf16 %v1078_v31, %v1077_v12  ;;  %v4450_v31 = vor.u32 %v3290_v30, %v3151_v5 }
 0x159   : > { %v943_v35 = vadd.f32 %v942_v33, %v4389_v15  ;;  %v991_v37 = vpop.f32.mrf.mxu1  ;;  %v881_v26 = vpop.f32.mrf.mxu2 }
 0x15a   : > { %1215 = vmatmul.bf16.gmra.mxu2 %v1086_v60  ;;  %1264 = vmatmul.bf16.gmra.mxu3 %v1086_v60  ;;  %v882_v16 = vadd.f32 %v881_v26, %v4278_v39 }
 0x15b   : > { %v930_v48 = vpop.f32.mrf.mxu3  ;;  %v4398_v3 = vadd.f32 %v991_v37, %v943_v35  ;;  %1806 = vmatmul.bf16.vlgmr.msra.gmra.mxu0 %v4392_v34  ;;  %v4454_v35 = vor.u32 %v3289_v59, %v3153_v18 }
 0x15c   : > { %1855 = vmatmul.bf16.vlgmr.msra.gmra.mxu1 %v4394_v42  ;;  %v4402_v7 = vadd.f32 %v930_v48, %v882_v16 }
 0x15e   : > { %5479 = vst [vmem:[#allocation23_spill] sm:$0xff] %v4402_v7 }
 0x160   : > { %v944_v27 = vpop.f32.mrf.mxu0 }
 0x161   : > { %v945_v41 = vadd.f32 %v944_v27, %v4389_v15  ;;  %v993_v45 = vpop.f32.mrf.mxu1 }
 0x163   : > { %v4405_v4 = vadd.f32 %v993_v45, %v945_v41 }
 0x168   : > { %v947_v57 = vpop.f32.mrf.mxu0 }
 0x169   : > { %v948_v61 = vadd.f32 %v947_v57, %v4389_v15  ;;  %v996_v62 = vpop.f32.mrf.mxu1  ;;  %v3159_v57 = vld [vmem:[%s3934_s11 + $0xb0] sm:$0xf] }
 0x16a   : > { %1904 = vmatmul.bf16.vlgmr.msra.gmra.mxu2 %v4392_v34  ;;  %1953 = vmatmul.bf16.vlgmr.msra.gmra.mxu3 %v4394_v42 }
 0x16b   : > { %v4425_v6 = vadd.f32 %v996_v62, %v948_v61  ;;  %1811 = vmatmul.bf16.gmra.mxu0 %v4411_v51  ;;  %v3292_v61 = vld [vmem:[%s3934_s11 + $0xb4] sm:$0xf0] }
 0x16c   : > { %1860 = vmatmul.bf16.gmra.mxu1 %v4416_v55 }
 0x16d   : > { %5480 = vst [vmem:[#allocation24_spill] sm:$0xff] %v4425_v6  ;;  %v1181_v14 = vpop.f32.mrf.mxu2  ;;  %v1230_v25 = vpop.f32.mrf.mxu3 }
 0x16e   : > { %v4430_v44 = vadd.f32 %v1181_v14, %v4421_v63  ;;  %v4433_v49 = vadd.f32 %v1230_v25, %v4423_v1  ;;  %v3291_v25 = vld [vmem:[%s3934_s11 + $0xb4] sm:$0xf] }
 0x170   : > { %v949_v52 = vpop.f32.mrf.mxu0  ;;  %v1270_v58 = vmax.f32 %v4430_v44, %v4433_v49 }
 0x171   : > { %v950_v0 = vadd.f32 %v949_v52, %v4389_v15  ;;  %v998_v2 = vpop.f32.mrf.mxu1  ;;  %v3161_v52 = vld [vmem:[%s3934_s11 + $0xb8] sm:$0xf0] }
 0x172   : > { %1271 = vmax.xlane.f32.xlu0 %v1270_v58 }
 0x173   : > { %v4438_v8 = vadd.f32 %v998_v2, %v950_v0  ;;  %v4484_v2 = vor.u32 %v3292_v61, %v3159_v57  ;;  %v3294_v57 = vld [vmem:[%s3934_s11 + $0xc4] sm:$0xf0] }
 0x175   : > { %5481 = vst [vmem:[#allocation28_spill] sm:$0xff] %v4438_v8  ;;  %v1183_v43 = vpop.f32.mrf.mxu2  ;;  %v1232_v46 = vpop.f32.mrf.mxu3 }
 0x176   : > { %v4445_v19 = vadd.f32 %v1183_v43, %v4421_v63  ;;  %v4448_v12 = vadd.f32 %v1232_v46, %v4423_v1  ;;  %v4488_v43 = vor.u32 %v3291_v25, %v3161_v52  ;;  %v3169_v25 = vld [vmem:[%s3934_s11 + $0xc8] sm:$0xf0] }
 0x178   : > { %v952_v33 = vpop.f32.mrf.mxu0  ;;  %v1273_v60 = vmax.f32 %v4445_v19, %v4448_v12 }
 0x179   : > { %v953_v37 = vadd.f32 %v952_v33, %v4389_v15  ;;  %v1001_v26 = vpop.f32.mrf.mxu1 }
 0x17a   : > { %1909 = vmatmul.bf16.gmra.mxu2 %v4411_v51  ;;  %1958 = vmatmul.bf16.gmra.mxu3 %v4416_v55 }
 0x17b   : > { %v4459_v16 = vadd.f32 %v1001_v26, %v953_v37  ;;  %1274 = vmax.xlane.f32.xlu0 %v1273_v60  ;;  %1816 = vmatmul.bf16.gmra.mxu0 %v4450_v31 }
 0x17c   : > { %1865 = vmatmul.bf16.gmra.mxu1 %v4454_v35 }
 0x17d   : > { %5482 = vst [vmem:[#allocation29_spill] sm:$0xff] %v4459_v16  ;;  %v1186_v48 = vpop.f32.mrf.mxu2  ;;  %v1235_v27 = vpop.f32.mrf.mxu3 }
 0x17e   : > { %v4464_v41 = vadd.f32 %v1186_v48, %v4421_v63  ;;  %v4467_v45 = vadd.f32 %v1235_v27, %v4423_v1 }
 0x180   : > { %v954_v56 = vpop.f32.mrf.mxu0  ;;  %v1276_v32 = vmax.f32 %v4464_v41, %v4467_v45 }
 0x181   : > { %v955_v24 = vadd.f32 %v954_v56, %v4389_v15  ;;  %v1003_v38 = vpop.f32.mrf.mxu1 }
 0x182   : > { %1277 = vmax.xlane.f32.xlu1 %v1276_v32 }
 0x183   : > { %v4472_v23 = vadd.f32 %v1003_v38, %v955_v24  ;;  %v3167_v38 = vld [vmem:[%s3934_s11 + $0xc0] sm:$0xf] }
 0x185   : > { %5483 = vst [vmem:[#allocation32_spill] sm:$0xff] %v4472_v23  ;;  %v1188_v62 = vpop.f32.mrf.mxu2  ;;  %v1237_v14 = vpop.f32.mrf.mxu3  ;;  %v3299_v23 = vld [vmem:[%s3934_s11 + $0xf4] sm:$0xf] }
 0x186   : > { %v4479_v58 = vadd.f32 %v1188_v62, %v4421_v63  ;;  %v4482_v0 = vadd.f32 %v1237_v14, %v4423_v1  ;;  %v3293_v14 = vld [vmem:[%s3934_s11 + $0xc4] sm:$0xf] }
 0x188   : > { %v957_v5 = vpop.f32.mrf.mxu0  ;;  %v1279_v30 = vmax.f32 %v4479_v58, %v4482_v0 }
 0x189   : > { %v958_v46 = vadd.f32 %v957_v5, %v4389_v15  ;;  %v1006_v59 = vpop.f32.mrf.mxu1 }
 0x18a   : > { %1914 = vmatmul.bf16.gmra.mxu2 %v4450_v31  ;;  %1963 = vmatmul.bf16.gmra.mxu3 %v4454_v35 }
 0x18b   : > { %v4493_v18 = vadd.f32 %v1006_v59, %v958_v46  ;;  %1280 = vmax.xlane.f32.xlu1 %v1279_v30  ;;  %1821 = vmatmul.bf16.gmra.mxu0 %v4484_v2  ;;  %v4518_v30 = vor.u32 %v3294_v57, %v3167_v38 }
 0x18c   : > { %1870 = vmatmul.bf16.gmra.mxu1 %v4488_v43 }
 0x18d   : > { %5484 = vst [vmem:[#allocation33_spill] sm:$0xff] %v4493_v18  ;;  %v1191_v33 = vpop.f32.mrf.mxu2  ;;  %v1240_v60 = vpop.f32.mrf.mxu3 }
 0x18e   : > { %v4498_v37 = vadd.f32 %v1191_v33, %v4421_v63  ;;  %v4501_v26 = vadd.f32 %v1240_v60, %v4423_v1  ;;  %v4522_v33 = vor.u32 %v3293_v14, %v3169_v25 }
 0x190   : > { %v959_v48 = vpop.f32.mrf.mxu0  ;;  %v1282_v27 = vmax.f32 %v4498_v37, %v4501_v26 }
 0x191   : > { %v960_v56 = vadd.f32 %v959_v48, %v4389_v15  ;;  %v1008_v32 = vpop.f32.mrf.mxu1 }
 0x192   : > { %1283 = vmax.xlane.f32.xlu2 %v1282_v27 }
 0x193   : > { %v4506_v24 = vadd.f32 %v1008_v32, %v960_v56 }
 0x195   : > { %5485 = vst [vmem:[#allocation34_spill] sm:$0xff] %v4506_v24  ;;  %v1193_v61 = vpop.f32.mrf.mxu2  ;;  %v1242_v62 = vpop.f32.mrf.mxu3 }
 0x196   : > { %v4513_v52 = vadd.f32 %v1193_v61, %v4421_v63  ;;  %v4516_v5 = vadd.f32 %v1242_v62, %v4423_v1 }
 0x198   : > { %v962_v46 = vpop.f32.mrf.mxu0  ;;  %v1285_v59 = vmax.f32 %v4513_v52, %v4516_v5 }
 0x199   : > { %v963_v60 = vadd.f32 %v962_v46, %v4389_v15  ;;  %v1011_v48 = vpop.f32.mrf.mxu1 }
 0x19a   : > { %1919 = vmatmul.bf16.gmra.mxu2 %v4484_v2  ;;  %1968 = vmatmul.bf16.gmra.mxu3 %v4488_v43 }
 0x19b   : > { %v4527_v27 = vadd.f32 %v1011_v48, %v963_v60  ;;  %1286 = vmax.xlane.f32.xlu2 %v1285_v59  ;;  %1826 = vmatmul.bf16.gmra.mxu0 %v4518_v30  ;;  %v3175_v59 = vld [vmem:[%s3934_s11 + $0xd0] sm:$0xf]  ;;  %v3296_v60 = vld [vmem:[%s3934_s11 + $0xd4] sm:$0xf0] }
 0x19c   : > { %1875 = vmatmul.bf16.gmra.mxu1 %v4522_v33  ;;  %v4552_v53 = vor.u32 %v3296_v60, %v3175_v59 }
 0x19d   : > { %5486 = vst [vmem:[#allocation35_spill] sm:$0xff] %v4527_v27  ;;  %v1196_v56 = vpop.f32.mrf.mxu2  ;;  %v1245_v32 = vpop.f32.mrf.mxu3  ;;  %v3297_v27 = vld [vmem:[%s3934_s11 + $0xe4] sm:$0xf] }
 0x19e   : > { %v4532_v38 = vadd.f32 %v1196_v56, %v4421_v63  ;;  %v4535_v57 = vadd.f32 %v1245_v32, %v4423_v1  ;;  %v3177_v56 = vld [vmem:[%s3934_s11 + $0xd8] sm:$0xf0] }
 0x1a0   : > { %v964_v61 = vpop.f32.mrf.mxu0  ;;  %v1288_v62 = vmax.f32 %v4532_v38, %v4535_v57 }
 0x1a1   : > { %v965_v14 = vadd.f32 %v964_v61, %v4389_v15  ;;  %v1013_v25 = vpop.f32.mrf.mxu1 }
 0x1a2   : > { %1289 = vmax.xlane.f32.xlu0 %v1288_v62  ;;  %v4556_v62 = vor.u32 %v3295_v36, %v3177_v56 }
 0x1a3   : > { %v4540_v46 = vadd.f32 %v1013_v25, %v965_v14 }
 0x1a5   : > { %5487 = vst [vmem:[#allocation36_spill] sm:$0xff] %v4540_v46  ;;  %v1198_v48 = vpop.f32.mrf.mxu2  ;;  %v1247_v7 = vpop.f32.mrf.mxu3 }
 0x1a6   : > { %v4547_v21 = vadd.f32 %v1198_v48, %v4421_v63  ;;  %v4550_v32 = vadd.f32 %v1247_v7, %v4423_v1 }
 0x1a8   : > { %v967_v11 = vpop.f32.mrf.mxu0  ;;  %v1291_v61 = vmax.f32 %v4547_v21, %v4550_v32 }
 0x1a9   : > { %v968_v14 = vadd.f32 %v967_v11, %v4389_v15  ;;  %v1016_v25 = vpop.f32.mrf.mxu1 }
 0x1aa   : > { %1924 = vmatmul.bf16.gmra.mxu2 %v4518_v30  ;;  %1973 = vmatmul.bf16.gmra.mxu3 %v4522_v33 }
 0x1ab   : > { %v4561_v48 = vadd.f32 %v1016_v25, %v968_v14  ;;  %1292 = vmax.xlane.f32.xlu1 %v1291_v61  ;;  %1831 = vmatmul.bf16.gmra.mxu0 %v4552_v53 }
 0x1ac   : > { %1880 = vmatmul.bf16.gmra.mxu1 %v4556_v62 }
 0x1ad   : > { %5488 = vst [vmem:[#allocation37_spill] sm:$0xff] %v4561_v48  ;;  %v1201_v36 = vpop.f32.mrf.mxu2  ;;  %v1250_v7 = vpop.f32.mrf.mxu3  ;;  %v3183_v48 = vld [vmem:[%s3934_s11 + $0xe0] sm:$0xf] }
 0x1ae   : > { %v4566_v11 = vadd.f32 %v1201_v36, %v4421_v63  ;;  %v4569_v59 = vadd.f32 %v1250_v7, %v4423_v1  ;;  %v3185_v36 = vld [vmem:[%s3934_s11 + $0xe8] sm:$0xf0]  ;;  %v4586_v24 = vor.u32 %v3298_v29, %v3183_v48 }
 0x1b0   : > { %v969_v60 = vpop.f32.mrf.mxu0  ;;  %v1294_v56 = vmax.f32 %v4566_v11, %v4569_v59 }
 0x1b1   : > { %v970_v61 = vadd.f32 %v969_v60, %v4389_v15  ;;  %v1018_v14 = vpop.f32.mrf.mxu1 }
 0x1b2   : > { %1295 = vmax.xlane.f32.xlu2 %v1294_v56  ;;  %v4590_v56 = vor.u32 %v3297_v27, %v3185_v36 }
 0x1b3   : > { %v4574_v25 = vadd.f32 %v1018_v14, %v970_v61 }
 0x1b5   : > { %5489 = vst [vmem:[#allocation38_spill] sm:$0xff] %v4574_v25  ;;  %v1203_v46 = vpop.f32.mrf.mxu2  ;;  %v1252_v22 = vpop.f32.mrf.mxu3  ;;  %v3300_v25 = vld [vmem:[%s3934_s11 + $0xf4] sm:$0xf0] }
 0x1b6   : > { %v4581_v13 = vadd.f32 %v1203_v46, %v4421_v63  ;;  %v4584_v7 = vadd.f32 %v1252_v22, %v4423_v1 }
 0x1b8   : > { %v972_v28 = vpop.f32.mrf.mxu0  ;;  %v1297_v60 = vmax.f32 %v4581_v13, %v4584_v7 }
 0x1b9   : > { %v973_v61 = vadd.f32 %v972_v28, %v4389_v15  ;;  %v1021_v14 = vpop.f32.mrf.mxu1 }
 0x1ba   : > { %1929 = vmatmul.bf16.gmra.mxu2 %v4552_v53  ;;  %1978 = vmatmul.bf16.gmra.mxu3 %v4556_v62 }
 0x1bb   : > { %v4595_v46 = vadd.f32 %v1021_v14, %v973_v61  ;;  %1298 = vmax.xlane.f32.xlu0 %v1297_v60  ;;  %1836 = vmatmul.bf16.gmra.mxu0 %v4586_v24 }
 0x1bc   : > { %1885 = vmatmul.bf16.gmra.mxu1 %v4590_v56 }
 0x1bd   : > { %5490 = vst [vmem:[#allocation39_spill] sm:$0xff] %v4595_v46  ;;  %v1206_v22 = vpop.f32.mrf.mxu2  ;;  %v1255_v29 = vpop.f32.mrf.mxu3  ;;  %v3191_v46 = vld [vmem:[%s3934_s11 + $0xf0] sm:$0xf] }
 0x1be   : > { %v4600_v28 = vadd.f32 %v1206_v22, %v4421_v63  ;;  %v4603_v27 = vadd.f32 %v1255_v29, %v4423_v1  ;;  %v3193_v22 = vld [vmem:[%s3934_s11 + $0xf8] sm:$0xf0]  ;;  %v4620_v16 = vor.u32 %v3300_v25, %v3191_v46 }
 0x1c0   : > { %v974_v48 = vpop.f32.mrf.mxu0  ;;  %v1300_v36 = vmax.f32 %v4600_v28, %v4603_v27 }
 0x1c1   : > { %v975_v60 = vadd.f32 %v974_v48, %v4389_v15  ;;  %v1023_v61 = vpop.f32.mrf.mxu1 }
 0x1c2   : > { %1301 = vmax.xlane.f32.xlu1 %v1300_v36  ;;  %v4624_v36 = vor.u32 %v3299_v23, %v3193_v22 }
 0x1c3   : > { %v4608_v14 = vadd.f32 %v1023_v61, %v975_v60 }
 0x1c5   : > { %5491 = vst [vmem:[#allocation40_spill] sm:$0xff] %v4608_v14  ;;  %v1208_v18 = vpop.f32.mrf.mxu2  ;;  %v1257_v47 = vpop.f32.mrf.mxu3 }
 0x1c6   : > { %v4615_v10 = vadd.f32 %v1208_v18, %v4421_v63  ;;  %v4618_v29 = vadd.f32 %v1257_v47, %v4423_v1 }
 0x1c8   : > { %5492 = vst [vmem:[#allocation41_spill] sm:$0xff] %v4615_v10  ;;  %v977_v40 = vpop.f32.mrf.mxu0  ;;  %v1303_v48 = vmax.f32 %v4615_v10, %v4618_v29 }
 0x1c9   : > { %5493 = vst [vmem:[#allocation42_spill] sm:$0xff] %v4618_v29  ;;  %v978_v60 = vadd.f32 %v977_v40, %v4389_v15  ;;  %v1026_v61 = vpop.f32.mrf.mxu1 }
 0x1ca   : > { %1934 = vmatmul.bf16.gmra.mxu2 %v4586_v24  ;;  %1983 = vmatmul.bf16.gmra.mxu3 %v4590_v56 }
 0x1cb   : > { %v4629_v18 = vadd.f32 %v1026_v61, %v978_v60  ;;  %1304 = vmax.xlane.f32.xlu2 %v1303_v48  ;;  %1841 = vmatmul.bf16.gmra.mxu0 %v4620_v16 }
 0x1cc   : > { %1890 = vmatmul.bf16.gmra.mxu1 %v4624_v36 }
 0x1cd   : > { %5494 = vst [vmem:[#allocation43_spill] sm:$0xff] %v4629_v18  ;;  %v1211_v47 = vpop.f32.mrf.mxu2  ;;  %v1260_v25 = vpop.f32.mrf.mxu3 }
 0x1ce   : > { %v4634_v46 = vadd.f32 %v1211_v47, %v4421_v63  ;;  %v4637_v23 = vadd.f32 %v1260_v25, %v4423_v1 }
 0x1d0   : > { %5495 = vst [vmem:[#allocation44_spill] sm:$0xff] %v4634_v46  ;;  %v979_v40 = vpop.f32.mrf.mxu0  ;;  %v1306_v22 = vmax.f32 %v4634_v46, %v4637_v23 }
 0x1d1   : > { %5496 = vst [vmem:[#allocation45_spill] sm:$0xff] %v4637_v23  ;;  %v980_v60 = vadd.f32 %v979_v40, %v4389_v15  ;;  %v1028_v61 = vpop.f32.mrf.mxu1 }
 0x1d2   : > { %1307 = vmax.xlane.f32.xlu0 %v1306_v22 }
 0x1d3   : > { %v4642_v48 = vadd.f32 %v1028_v61, %v980_v60 }
 0x1d5   : > { %5497 = vst [vmem:[#allocation46_spill] sm:$0xff] %v4642_v48  ;;  %v1213_v14 = vpop.f32.mrf.mxu2  ;;  %v1262_v18 = vpop.f32.mrf.mxu3 }
 0x1d6   : > { %v4645_v29 = vadd.f32 %v1213_v14, %v4421_v63  ;;  %v4648_v47 = vadd.f32 %v1262_v18, %v4423_v1 }
 0x1d8   : > { %5498 = vst [vmem:[#allocation47_spill] sm:$0xff] %v4645_v29  ;;  %v1807_v25 = vpop.f32.mrf.mxu0  ;;  %v1309_v10 = vmax.f32 %v4645_v29, %v4648_v47 }
 0x1d9   : > { %5499 = vst [vmem:[#allocation48_spill] sm:$0xff] %v4648_v47  ;;  %v1856_v8 = vpop.f32.mrf.mxu1  ;;  %v1808_v40 = vadd.f32 %v1807_v25, %v4267_v17 }
 0x1da   : > { %1939 = vmatmul.bf16.gmra.mxu2 %v4620_v16  ;;  %1988 = vmatmul.bf16.gmra.mxu3 %v4624_v36 }
 0x1db   : > { %1310 = vmax.xlane.f32.xlu1 %v1309_v10  ;;  %2002 = vmatmul.bf16.vlgmr.msrb.gmra.mxu0 %v4392_v34  ;;  %v1857_v61 = vadd.f32 %v1856_v8, %v1808_v40 }
 0x1dc   : > { %2051 = vmatmul.bf16.vlgmr.msrb.gmra.mxu1 %v4394_v42 }
 0x1dd   : > { %v1216_v14 = vpop.f32.mrf.mxu2  ;;  %v1265_v22 = vpop.f32.mrf.mxu3  ;;  %v2108_v34 = vmul.f32 0.01, %v1857_v61  ;;  %vm2092_vm0 = vcmp.gt.f32.partialorder %v1857_v61, 0.0 }
 0x1de   : > { %v4658_v18 = vadd.f32 %v1216_v14, %v4421_v63  ;;  %v4661_v60 = vadd.f32 %v1265_v22, %v4423_v1 }
 0x1df   : > { %v2124_v22 = vsel %vm2092_vm0, %v1857_v61, %v2108_v34 }
 0x1e0   : > { %5500 = vst [vmem:[#allocation49_spill] sm:$0xff] %v4658_v18  ;;  %v1809_v15 = vpop.f32.mrf.mxu0  ;;  %v1312_v48 = vmax.f32 %v4658_v18, %v4661_v60 }
 0x1e1   : > { %5501 = vst [vmem:[#allocation50_spill] sm:$0xff] %v4661_v60  ;;  %v1810_v25 = vadd.f32 %v1809_v15, %v4267_v17  ;;  %v1858_v10 = vpop.f32.mrf.mxu1 }
 0x1e2   : > { %1313 = vmax.xlane.f32.xlu2 %v1312_v48 }
 0x1e3   : > { %v1859_v47 = vadd.f32 %v1858_v10, %v1810_v25 }
 0x1e5   : > { %vm2093_vm1 = vcmp.gt.f32.partialorder %v1859_v47, 0.0  ;;  %v2109_v42 = vmul.f32 0.01, %v1859_v47  ;;  %v1218_v29 = vpop.f32.mrf.mxu2  ;;  %v1267_v14 = vpop.f32.mrf.mxu3 }
 0x1e6   : > { %v4667_v23 = vadd.f32 %v1218_v29, %v4421_v63  ;;  %v4670_v8 = vadd.f32 %v1267_v14, %v4423_v1  ;;  %v1272_v40 = vpop.xlane.xlu0 %1271 }
 0x1e7   : > { %v2125_v60 = vsel %vm2093_vm1, %v1859_v47, %v2109_v42  ;;  %v1318_v15 = vsub.f32 %v4430_v44, %v1272_v40  ;;  %v1319_v48 = vsub.f32 %v4433_v49, %v1272_v40 }
 0x1e8   : > { %v2140_v18 = vpack.c.bf16 %v2125_v60, %v2124_v22  ;;  %v1812_v25 = vpop.f32.mrf.mxu0  ;;  %v1315_v10 = vmax.f32 %v4667_v23, %v4670_v8 }
 0x1e9   : > { %v1350_v46 = vmul.f32 1.442695, %v1318_v15  ;;  %v1352_v50 = vmul.f32 1.442695, %v1319_v48  ;;  %v1861_v6 = vpop.f32.mrf.mxu1  ;;  %v1813_v29 = vadd.f32 %v1812_v25, %v4267_v17 }
 0x1ea   : > { %2156 = vmatmul.bf16.vlgmr.msrb.gmra.mxu2 %v2140_v18  ;;  %2205 = vmatmul.bf16.vlgmr.msrb.gmra.mxu3 %v2140_v18 }
 0x1eb   : > { %3386 = vpow2.f32 %v1350_v46  ;;  %1316 = vmax.xlane.f32.xlu0 %v1315_v10  ;;  %2007 = vmatmul.bf16.gmra.mxu0 %v4411_v51  ;;  %v1862_v61 = vadd.f32 %v1861_v6, %v1813_v29 }
 0x1ec   : > { %3388 = vpow2.f32 %v1352_v50  ;;  %2056 = vmatmul.bf16.gmra.mxu1 %v4416_v55 }
 0x1ed   : > { %v1905_v44 = vpop.f32.mrf.mxu2  ;;  %v1954_v49 = vpop.f32.mrf.mxu3  ;;  %v2110_v15 = vmul.f32 0.01, %v1862_v61  ;;  %vm2094_vm2 = vcmp.gt.f32.partialorder %v1862_v61, 0.0 }
 0x1ee   : > { %v1906_v47 = vadd.f32 %v1905_v44, %v4278_v39  ;;  %v1275_v60 = vpop.xlane.xlu0 %1274 }
 0x1ef   : > { %v1320_v34 = vsub.f32 %v4445_v19, %v1275_v60  ;;  %v1321_v42 = vsub.f32 %v4448_v12, %v1275_v60 }
 0x1f0   : > { %v4682_v18 = vadd.f32 %v1954_v49, %v1906_v47  ;;  %v1814_v46 = vpop.f32.mrf.mxu0  ;;  %v2126_v47 = vsel %vm2094_vm2, %v1862_v61, %v2110_v15 }
 0x1f1   : > { %v4684_v14 = vpop.eup %3386  ;;  %v1354_v40 = vmul.f32 1.442695, %v1320_v34  ;;  %v1356_v51 = vmul.f32 1.442695, %v1321_v42  ;;  %v1815_v50 = vadd.f32 %v1814_v46, %v4267_v17  ;;  %v1863_v55 = vpop.f32.mrf.mxu1 }
 0x1f2   : > { %v4687_v22 = vpop.eup %3388 }
 0x1f3   : > { %3390 = vpow2.f32 %v1354_v40  ;;  %v1864_v48 = vadd.f32 %v1863_v55, %v1815_v50  ;;  %v1414_v6 = vadd.f32 %v4687_v22, %v4684_v14 }
 0x1f4   : > { %3392 = vpow2.f32 %v1356_v51 }
 0x1f5   : > { %vm2095_vm3 = vcmp.gt.f32.partialorder %v1864_v48, 0.0  ;;  %v2111_v19 = vmul.f32 0.01, %v1864_v48  ;;  %1415 = vadd.xlane.f32.xlu1 %v1414_v6  ;;  %v1907_v12 = vpop.f32.mrf.mxu2  ;;  %v1956_v25 = vpop.f32.mrf.mxu3 }
 0x1f6   : > { %v1908_v10 = vadd.f32 %v1907_v12, %v4278_v39  ;;  %v1278_v29 = vpop.xlane.xlu1 %1277 }
 0x1f7   : > { %v1322_v44 = vsub.f32 %v4464_v41, %v1278_v29  ;;  %v1323_v49 = vsub.f32 %v4467_v45, %v1278_v29  ;;  %v2127_v60 = vsel %vm2095_vm3, %v1864_v48, %v2111_v19 }
 0x1f8   : > { %v4694_v34 = vadd.f32 %v1956_v25, %v1908_v10  ;;  %v1817_v42 = vpop.f32.mrf.mxu0  ;;  %v2141_v46 = vpack.c.bf16 %v2127_v60, %v2126_v47 }
 0x1f9   : > { %v4696_v40 = vpop.eup %3390  ;;  %v1358_v51 = vmul.f32 1.442695, %v1322_v44  ;;  %v1360_v50 = vmul.f32 1.442695, %v1323_v49  ;;  %v1866_v55 = vpop.f32.mrf.mxu1  ;;  %v1818_v41 = vadd.f32 %v1817_v42, %v4267_v17 }
 0x1fa   : > { %v4698_v6 = vpop.eup %3392  ;;  %2161 = vmatmul.bf16.gmra.mxu2 %v2141_v46  ;;  %2210 = vmatmul.bf16.gmra.mxu3 %v2141_v46 }
 0x1fb   : > { %3394 = vpow2.f32 %v1358_v51  ;;  %v1417_v45 = vadd.f32 %v4698_v6, %v4696_v40  ;;  %2012 = vmatmul.bf16.gmra.mxu0 %v4450_v31  ;;  %v1867_v12 = vadd.f32 %v1866_v55, %v1818_v41 }
 0x1fc   : > { %3396 = vpow2.f32 %v1360_v50  ;;  %2061 = vmatmul.bf16.gmra.mxu1 %v4454_v35 }
 0x1fd   : > { %1418 = vadd.xlane.f32.xlu2 %v1417_v45  ;;  %v1910_v61 = vpop.f32.mrf.mxu2  ;;  %v1959_v15 = vpop.f32.mrf.mxu3  ;;  %v2112_v46 = vmul.f32 0.01, %v1867_v12  ;;  %vm2096_vm4 = vcmp.gt.f32.partialorder %v1867_v12, 0.0 }
 0x1fe   : > { %v1911_v48 = vadd.f32 %v1910_v61, %v4278_v39  ;;  %v1281_v19 = vpop.xlane.xlu1 %1280 }
 0x1ff   : > { %v1324_v25 = vsub.f32 %v4479_v58, %v1281_v19  ;;  %v1325_v10 = vsub.f32 %v4482_v0, %v1281_v19 }
 0x200   : > { %v4708_v29 = vadd.f32 %v1959_v15, %v1911_v48  ;;  %v1819_v44 = vpop.f32.mrf.mxu0  ;;  %v2128_v48 = vsel %vm2096_vm4, %v1867_v12, %v2112_v46 }
 0x201   : > { %v4710_v49 = vpop.eup %3394  ;;  %v1362_v31 = vmul.f32 1.442695, %v1324_v25  ;;  %v1364_v47 = vmul.f32 1.442695, %v1325_v10  ;;  %v1820_v35 = vadd.f32 %v1819_v44, %v4267_v17  ;;  %v1868_v60 = vpop.f32.mrf.mxu1 }
 0x202   : > { %v4713_v42 = vpop.eup %3396 }
 0x203   : > { %3398 = vpow2.f32 %v1362_v31  ;;  %v1869_v51 = vadd.f32 %v1868_v60, %v1820_v35  ;;  %v1420_v58 = vadd.f32 %v4713_v42, %v4710_v49 }
 0x204   : > { %3400 = vpow2.f32 %v1364_v47 }
 0x205   : > { %vm2097_vm5 = vcmp.gt.f32.partialorder %v1869_v51, 0.0  ;;  %v2113_v0 = vmul.f32 0.01, %v1869_v51  ;;  %1421 = vadd.xlane.f32.xlu0 %v1420_v58  ;;  %v1912_v50 = vpop.f32.mrf.mxu2  ;;  %v1961_v55 = vpop.f32.mrf.mxu3 }
 0x206   : > { %v1913_v41 = vadd.f32 %v1912_v50, %v4278_v39  ;;  %v1284_v45 = vpop.xlane.xlu2 %1283 }
 0x207   : > { %v1326_v61 = vsub.f32 %v4498_v37, %v1284_v45  ;;  %v1327_v15 = vsub.f32 %v4501_v26, %v1284_v45  ;;  %v2129_v19 = vsel %vm2097_vm5, %v1869_v51, %v2113_v0 }
 0x208   : > { %v4720_v25 = vadd.f32 %v1961_v55, %v1913_v41  ;;  %v1822_v10 = vpop.f32.mrf.mxu0  ;;  %v2142_v44 = vpack.c.bf16 %v2129_v19, %v2128_v48 }
 0x209   : > { %v4722_v31 = vpop.eup %3398  ;;  %v1366_v47 = vmul.f32 1.442695, %v1326_v61  ;;  %v1368_v35 = vmul.f32 1.442695, %v1327_v15  ;;  %v1871_v60 = vpop.f32.mrf.mxu1  ;;  %v1823_v37 = vadd.f32 %v1822_v10, %v4267_v17 }
 0x20a   : > { %v4724_v58 = vpop.eup %3400  ;;  %2166 = vmatmul.bf16.gmra.mxu2 %v2142_v44  ;;  %2215 = vmatmul.bf16.gmra.mxu3 %v2142_v44 }
 0x20b   : > { %3402 = vpow2.f32 %v1366_v47  ;;  %v1423_v26 = vadd.f32 %v4724_v58, %v4722_v31  ;;  %2017 = vmatmul.bf16.gmra.mxu0 %v4484_v2  ;;  %v1872_v50 = vadd.f32 %v1871_v60, %v1823_v37 }
 0x20c   : > { %3404 = vpow2.f32 %v1368_v35  ;;  %2066 = vmatmul.bf16.gmra.mxu1 %v4488_v43 }
 0x20d   : > { %1424 = vadd.xlane.f32.xlu1 %v1423_v26  ;;  %v1915_v12 = vpop.f32.mrf.mxu2  ;;  %v1964_v46 = vpop.f32.mrf.mxu3  ;;  %v2114_v44 = vmul.f32 0.01, %v1872_v50  ;;  %vm2098_vm6 = vcmp.gt.f32.partialorder %v1872_v50, 0.0 }
 0x20e   : > { %v1916_v51 = vadd.f32 %v1915_v12, %v4278_v39  ;;  %v1287_v0 = vpop.xlane.xlu2 %1286 }
 0x20f   : > { %v1328_v55 = vsub.f32 %v4513_v52, %v1287_v0  ;;  %v1329_v41 = vsub.f32 %v4516_v5, %v1287_v0 }
 0x210   : > { %v4734_v45 = vadd.f32 %v1964_v46, %v1916_v51  ;;  %v1824_v61 = vpop.f32.mrf.mxu0  ;;  %v2130_v51 = vsel %vm2098_vm6, %v1872_v50, %v2114_v44 }
 0x211   : > { %v4736_v15 = vpop.eup %3402  ;;  %v1370_v2 = vmul.f32 1.442695, %v1328_v55  ;;  %v1372_v48 = vmul.f32 1.442695, %v1329_v41  ;;  %v1825_v43 = vadd.f32 %v1824_v61, %v4267_v17  ;;  %v1873_v19 = vpop.f32.mrf.mxu1 }
 0x212   : > { %v4739_v10 = vpop.eup %3404 }
 0x213   : > { %3406 = vpow2.f32 %v1370_v2  ;;  %v1874_v47 = vadd.f32 %v1873_v19, %v1825_v43  ;;  %v1426_v52 = vadd.f32 %v4739_v10, %v4736_v15 }
 0x214   : > { %3408 = vpow2.f32 %v1372_v48 }
 0x215   : > { %vm2099_vm7 = vcmp.gt.f32.partialorder %v1874_v47, 0.0  ;;  %v2115_v5 = vmul.f32 0.01, %v1874_v47  ;;  %1427 = vadd.xlane.f32.xlu2 %v1426_v52  ;;  %v1917_v35 = vpop.f32.mrf.mxu2  ;;  %v1966_v60 = vpop.f32.mrf.mxu3 }
 0x216   : > { %v1918_v37 = vadd.f32 %v1917_v35, %v4278_v39  ;;  %v1290_v26 = vpop.xlane.xlu0 %1289 }
 0x217   : > { %v1330_v12 = vsub.f32 %v4532_v38, %v1290_v26  ;;  %v1331_v46 = vsub.f32 %v4535_v57, %v1290_v26  ;;  %v2131_v0 = vsel %vm2099_vm7, %v1874_v47, %v2115_v5 }
 0x218   : > { %v4746_v55 = vadd.f32 %v1966_v60, %v1918_v37  ;;  %v1827_v41 = vpop.f32.mrf.mxu0  ;;  %v2143_v61 = vpack.c.bf16 %v2131_v0, %v2130_v51 }
 0x219   : > { %v4748_v2 = vpop.eup %3406  ;;  %v1374_v48 = vmul.f32 1.442695, %v1330_v12  ;;  %v1376_v43 = vmul.f32 1.442695, %v1331_v46  ;;  %v1876_v19 = vpop.f32.mrf.mxu1  ;;  %v1828_v38 = vadd.f32 %v1827_v41, %v4267_v17 }
 0x21a   : > { %v4750_v52 = vpop.eup %3408  ;;  %2171 = vmatmul.bf16.gmra.mxu2 %v2143_v61  ;;  %2220 = vmatmul.bf16.gmra.mxu3 %v2143_v61 }
 0x21b   : > { %3410 = vpow2.f32 %v1374_v48  ;;  %v1429_v57 = vadd.f32 %v4750_v52, %v4748_v2  ;;  %2022 = vmatmul.bf16.gmra.mxu0 %v4518_v30  ;;  %v1877_v35 = vadd.f32 %v1876_v19, %v1828_v38 }
 0x21c   : > { %3412 = vpow2.f32 %v1376_v43  ;;  %2071 = vmatmul.bf16.gmra.mxu1 %v4522_v33 }
 0x21d   : > { %1430 = vadd.xlane.f32.xlu0 %v1429_v57  ;;  %v1920_v50 = vpop.f32.mrf.mxu2  ;;  %v1969_v44 = vpop.f32.mrf.mxu3  ;;  %v2116_v61 = vmul.f32 0.01, %v1877_v35  ;;  %vm2100_vm8 = vcmp.gt.f32.partialorder %v1877_v35, 0.0 }
 0x21e   : > { %v1921_v47 = vadd.f32 %v1920_v50, %v4278_v39  ;;  %v1293_v5 = vpop.xlane.xlu1 %1292 }
 0x21f   : > { %v1332_v60 = vsub.f32 %v4547_v21, %v1293_v5  ;;  %v1333_v37 = vsub.f32 %v4550_v32, %v1293_v5 }
 0x220   : > { %v4760_v26 = vadd.f32 %v1969_v44, %v1921_v47  ;;  %v1829_v12 = vpop.f32.mrf.mxu0  ;;  %v2132_v47 = vsel %vm2100_vm8, %v1877_v35, %v2116_v61 }
 0x221   : > { %v4762_v46 = vpop.eup %3410  ;;  %v1378_v30 = vmul.f32 1.442695, %v1332_v60  ;;  %v1380_v51 = vmul.f32 1.442695, %v1333_v37  ;;  %v1830_v33 = vadd.f32 %v1829_v12, %v4267_v17  ;;  %v1878_v0 = vpop.f32.mrf.mxu1 }
 0x222   : > { %v4765_v41 = vpop.eup %3412 }
 0x223   : > { %3414 = vpow2.f32 %v1378_v30  ;;  %v1879_v48 = vadd.f32 %v1878_v0, %v1830_v33  ;;  %v1432_v21 = vadd.f32 %v4765_v41, %v4762_v46 }
 0x224   : > { %3416 = vpow2.f32 %v1380_v51 }
 0x225   : > { %vm2101_vm9 = vcmp.gt.f32.partialorder %v1879_v48, 0.0  ;;  %v2117_v32 = vmul.f32 0.01, %v1879_v48  ;;  %1433 = vadd.xlane.f32.xlu1 %v1432_v21  ;;  %v1922_v43 = vpop.f32.mrf.mxu2  ;;  %v1971_v19 = vpop.f32.mrf.mxu3 }
 0x226   : > { %v1923_v38 = vadd.f32 %v1922_v43, %v4278_v39  ;;  %v1296_v57 = vpop.xlane.xlu2 %1295 }
 0x227   : > { %v1334_v50 = vsub.f32 %v4566_v11, %v1296_v57  ;;  %v1335_v44 = vsub.f32 %v4569_v59, %v1296_v57  ;;  %v2133_v5 = vsel %vm2101_vm9, %v1879_v48, %v2117_v32 }
 0x228   : > { %v4772_v60 = vadd.f32 %v1971_v19, %v1923_v38  ;;  %v1832_v37 = vpop.f32.mrf.mxu0  ;;  %v2144_v12 = vpack.c.bf16 %v2133_v5, %v2132_v47 }
 0x229   : > { %v4774_v30 = vpop.eup %3414  ;;  %v1382_v51 = vmul.f32 1.442695, %v1334_v50  ;;  %v1384_v33 = vmul.f32 1.442695, %v1335_v44  ;;  %v1881_v0 = vpop.f32.mrf.mxu1  ;;  %v1833_v11 = vadd.f32 %v1832_v37, %v4267_v17 }
 0x22a   : > { %v4776_v21 = vpop.eup %3416  ;;  %2176 = vmatmul.bf16.gmra.mxu2 %v2144_v12  ;;  %2225 = vmatmul.bf16.gmra.mxu3 %v2144_v12 }
 0x22b   : > { %3418 = vpow2.f32 %v1382_v51  ;;  %v1435_v59 = vadd.f32 %v4776_v21, %v4774_v30  ;;  %2027 = vmatmul.bf16.gmra.mxu0 %v4552_v53  ;;  %v1882_v43 = vadd.f32 %v1881_v0, %v1833_v11 }
 0x22c   : > { %3420 = vpow2.f32 %v1384_v33  ;;  %2076 = vmatmul.bf16.gmra.mxu1 %v4556_v62 }
 0x22d   : > { %1436 = vadd.xlane.f32.xlu2 %v1435_v59  ;;  %v1925_v35 = vpop.f32.mrf.mxu2  ;;  %v1974_v61 = vpop.f32.mrf.mxu3  ;;  %v2118_v12 = vmul.f32 0.01, %v1882_v43  ;;  %vm2102_vm10 = vcmp.gt.f32.partialorder %v1882_v43, 0.0 }
 0x22e   : > { %v1926_v48 = vadd.f32 %v1925_v35, %v4278_v39  ;;  %v1299_v32 = vpop.xlane.xlu0 %1298 }
 0x22f   : > { %v1336_v19 = vsub.f32 %v4581_v13, %v1299_v32  ;;  %v1337_v38 = vsub.f32 %v4584_v7, %v1299_v32 }
 0x230   : > { %v4786_v57 = vadd.f32 %v1974_v61, %v1926_v48  ;;  %v1834_v50 = vpop.f32.mrf.mxu0  ;;  %v2134_v48 = vsel %vm2102_vm10, %v1882_v43, %v2118_v12 }
 0x231   : > { %v4788_v44 = vpop.eup %3418  ;;  %v1386_v53 = vmul.f32 1.442695, %v1336_v19  ;;  %v1388_v47 = vmul.f32 1.442695, %v1337_v38  ;;  %v1835_v62 = vadd.f32 %v1834_v50, %v4267_v17  ;;  %v1883_v5 = vpop.f32.mrf.mxu1 }
 0x232   : > { %v4791_v37 = vpop.eup %3420 }
 0x233   : > { %3422 = vpow2.f32 %v1386_v53  ;;  %v1884_v51 = vadd.f32 %v1883_v5, %v1835_v62  ;;  %v1438_v13 = vadd.f32 %v4791_v37, %v4788_v44 }
 0x234   : > { %3424 = vpow2.f32 %v1388_v47 }
 0x235   : > { %vm2103_vm11 = vcmp.gt.f32.partialorder %v1884_v51, 0.0  ;;  %v2119_v7 = vmul.f32 0.01, %v1884_v51  ;;  %1439 = vadd.xlane.f32.xlu0 %v1438_v13  ;;  %v1927_v33 = vpop.f32.mrf.mxu2  ;;  %v1976_v0 = vpop.f32.mrf.mxu3 }
 0x236   : > { %v1928_v11 = vadd.f32 %v1927_v33, %v4278_v39  ;;  %v1302_v59 = vpop.xlane.xlu1 %1301 }
 0x237   : > { %v1338_v35 = vsub.f32 %v4600_v28, %v1302_v59  ;;  %v1339_v61 = vsub.f32 %v4603_v27, %v1302_v59  ;;  %v2135_v32 = vsel %vm2103_vm11, %v1884_v51, %v2119_v7 }
 0x238   : > { %v4798_v19 = vadd.f32 %v1976_v0, %v1928_v11  ;;  %v1837_v38 = vpop.f32.mrf.mxu0  ;;  %v2145_v50 = vpack.c.bf16 %v2135_v32, %v2134_v48 }
 0x239   : > { %v4800_v53 = vpop.eup %3422  ;;  %v1390_v47 = vmul.f32 1.442695, %v1338_v35  ;;  %v1392_v62 = vmul.f32 1.442695, %v1339_v61  ;;  %v1886_v5 = vpop.f32.mrf.mxu1  ;;  %v1838_v28 = vadd.f32 %v1837_v38, %v4267_v17 }
 0x23a   : > { %5502 = vst [vmem:[#allocation51_spill] sm:$0xff] %v4798_v19  ;;  %v4802_v13 = vpop.eup %3424  ;;  %2181 = vmatmul.bf16.gmra.mxu2 %v2145_v50  ;;  %2230 = vmatmul.bf16.gmra.mxu3 %v2145_v50 }
 0x23b   : > { %3426 = vpow2.f32 %v1390_v47  ;;  %v1441_v27 = vadd.f32 %v4802_v13, %v4800_v53  ;;  %2032 = vmatmul.bf16.gmra.mxu0 %v4586_v24  ;;  %v1887_v7 = vadd.f32 %v1886_v5, %v1838_v28 }
 0x23c   : > { %3428 = vpow2.f32 %v1392_v62  ;;  %2081 = vmatmul.bf16.gmra.mxu1 %v4590_v56 }
 0x23d   : > { %1442 = vadd.xlane.f32.xlu1 %v1441_v27  ;;  %v1930_v43 = vpop.f32.mrf.mxu2  ;;  %v1979_v12 = vpop.f32.mrf.mxu3  ;;  %v2120_v24 = vmul.f32 0.01, %v1887_v7  ;;  %vm2104_vm12 = vcmp.gt.f32.partialorder %v1887_v7, 0.0 }
 0x23e   : > { %v1931_v51 = vadd.f32 %v1930_v43, %v4278_v39 }
 0x23f   : > { %v2136_v62 = vsel %vm2104_vm12, %v1887_v7, %v2120_v24 }
 0x240   : > { %v4810_v33 = vadd.f32 %v1979_v12, %v1931_v51  ;;  %v1839_v0 = vpop.f32.mrf.mxu0 }
 0x241   : > { %v4812_v11 = vpop.eup %3426  ;;  %v1840_v59 = vadd.f32 %v1839_v0, %v4267_v17  ;;  %v1888_v35 = vpop.f32.mrf.mxu1 }
 0x242   : > { %5503 = vst [vmem:[#allocation52_spill] sm:$0xff] %v4810_v33  ;;  %v4815_v61 = vpop.eup %3428 }
 0x243   : > { %v1889_v48 = vadd.f32 %v1888_v35, %v1840_v59  ;;  %v1444_v56 = vadd.f32 %v4815_v61, %v4812_v11 }
 0x245   : > { %vm2105_vm13 = vcmp.gt.f32.partialorder %v1889_v48, 0.0  ;;  %v2121_v32 = vmul.f32 0.01, %v1889_v48  ;;  %1445 = vadd.xlane.f32.xlu2 %v1444_v56  ;;  %v1932_v38 = vpop.f32.mrf.mxu2  ;;  %v1981_v50 = vpop.f32.mrf.mxu3 }
 0x246   : > { %v1933_v47 = vadd.f32 %v1932_v38, %v4278_v39 }
 0x247   : > { %v2137_v5 = vsel %vm2105_vm13, %v1889_v48, %v2121_v32 }
 0x248   : > { %v4820_v28 = vadd.f32 %v1981_v50, %v1933_v47  ;;  %v1842_v27 = vpop.f32.mrf.mxu0  ;;  %v2146_v43 = vpack.c.bf16 %v2137_v5, %v2136_v62 }
 0x249   : > { %v1891_v12 = vpop.f32.mrf.mxu1  ;;  %v1843_v51 = vadd.f32 %v1842_v27, %v4267_v17 }
 0x24a   : > { %5504 = vst [vmem:[#allocation53_spill] sm:$0xff] %v4820_v28  ;;  %2186 = vmatmul.bf16.gmra.mxu2 %v2146_v43  ;;  %2235 = vmatmul.bf16.gmra.mxu3 %v2146_v43 }
 0x24b   : > { %2037 = vmatmul.bf16.gmra.mxu0 %v4620_v16  ;;  %v1892_v56 = vadd.f32 %v1891_v12, %v1843_v51 }
 0x24c   : > { %2086 = vmatmul.bf16.gmra.mxu1 %v4624_v36 }
 0x24d   : > { %v1935_v0 = vpop.f32.mrf.mxu2  ;;  %v1984_v59 = vpop.f32.mrf.mxu3  ;;  %v2122_v38 = vmul.f32 0.01, %v1892_v56  ;;  %vm2106_vm14 = vcmp.gt.f32.partialorder %v1892_v56, 0.0 }
 0x24e   : > { %v1936_v35 = vadd.f32 %v1935_v0, %v4278_v39 }
 0x24f   : > { %v2138_v5 = vsel %vm2106_vm14, %v1892_v56, %v2122_v38  ;;  %v4840_v38 = vpop.xlane.xlu0 %1307 }
 0x250   : > { %v4826_v7 = vadd.f32 %v1984_v59, %v1936_v35  ;;  %v1844_v24 = vpop.f32.mrf.mxu0  ;;  %v4833_v59 = vpop.xlane.xlu2 %1304 }
 0x251   : > { %v1845_v48 = vadd.f32 %v1844_v24, %v4267_v17  ;;  %v1893_v32 = vpop.f32.mrf.mxu1  ;;  %v4835_v35 = vpop.xlane.xlu1 %1310 }
 0x252   : > { %5505 = vst [vmem:[#allocation54_spill] sm:$0xff] %v4826_v7 }
 0x253   : > { %v1894_v50 = vadd.f32 %v1893_v32, %v1845_v48 }
 0x255   : > { %vm2107_vm15 = vcmp.gt.f32.partialorder %v1894_v50, 0.0  ;;  %v2123_v47 = vmul.f32 0.01, %v1894_v50  ;;  %v1937_v62 = vpop.f32.mrf.mxu2  ;;  %v1986_v16 = vpop.f32.mrf.mxu3 }
 0x256   : > { %v1938_v36 = vadd.f32 %v1937_v62, %v4278_v39 }
 0x257   : > { %v2139_v27 = vsel %vm2107_vm15, %v1894_v50, %v2123_v47 }
 0x258   : > { %v4830_v43 = vadd.f32 %v1986_v16, %v1938_v36  ;;  %v2147_v12 = vpack.c.bf16 %v2139_v27, %v2138_v5  ;;  %v4842_v50 = vpop.xlane.xlu2 %1313 }
 0x25a   : > { %5506 = vst [vmem:[#allocation55_spill] sm:$0xff] %v4830_v43  ;;  %2191 = vmatmul.bf16.gmra.mxu2 %v2147_v12  ;;  %2240 = vmatmul.bf16.gmra.mxu3 %v2147_v12 }
 0x25d   : > { %v1940_v51 = vpop.f32.mrf.mxu2  ;;  %v1989_v0 = vpop.f32.mrf.mxu3 }
 0x25e   : > { %v1941_v17 = vadd.f32 %v1940_v51, %v4278_v39  ;;  %v4852_v51 = vpop.xlane.xlu0 %1316 }
 0x260   : > { %v4837_v24 = vadd.f32 %v1989_v0, %v1941_v17 }
 0x262   : > { %5507 = vst [vmem:[#allocation56_spill] sm:$0xff] %v4837_v24 }
 0x265   : > { %v1942_v48 = vpop.f32.mrf.mxu2  ;;  %v1991_v32 = vpop.f32.mrf.mxu3 }
 0x266   : > { %v1943_v56 = vadd.f32 %v1942_v48, %v4278_v39 }
 0x268   : > { %v4844_v47 = vadd.f32 %v1991_v32, %v1943_v56  ;;  %v1416_v62 = vpop.xlane.xlu1 %1415 }
 0x269   : > { %3430 = vrcp.f32 %v1416_v62 }
 0x26a   : > { %5508 = vst [vmem:[#allocation57_spill] sm:$0xff] %v4844_v47 }
 0x26d   : > { %v2157_v16 = vpop.f32.mrf.mxu2  ;;  %v2206_v36 = vpop.f32.mrf.mxu3 }
 0x26e   : > { %v4847_v5 = vadd.f32 %v2157_v16, %v4421_v63  ;;  %v4850_v27 = vadd.f32 %v2206_v36, %v4423_v1 }
 0x26f   : > { %v3431_v12 = vpop.eup %3430 }
 0x270   : > { %v1478_v39 = vmul.f32 %v3431_v12, %v4684_v14  ;;  %v1479_v0 = vmul.f32 %v3431_v12, %v4687_v22  ;;  %v1419_v17 = vpop.xlane.xlu2 %1418  ;;  %v2246_v48 = vmax.f32 %v4847_v5, %v4850_v27 }
 0x271   : > { %3432 = vrcp.f32 %v1419_v17 }
 0x272   : > { %v1510_v32 = vadd.f32 1.0, %v1478_v39  ;;  %v1511_v56 = vadd.f32 1.0, %v1479_v0  ;;  %2247 = vmax.xlane.f32.xlu0 %v2246_v48 }
 0x274   : > { %v1542_v62 = vmul.f32 %v1510_v32, %v4285_v20  ;;  %v1543_v16 = vmul.f32 %v1511_v56, %v4398_v3 }
 0x275   : > { %v2159_v36 = vpop.f32.mrf.mxu2  ;;  %v2208_v47 = vpop.f32.mrf.mxu3 }
 0x276   : > { %vm1574_vm0 = vcmp.gt.f32.partialorder %v1542_v62, 0.0  ;;  %vm1575_vm1 = vcmp.gt.f32.partialorder %v1543_v16, 0.0  ;;  %v1606_v14 = vmul.f32 0.01, %v1542_v62  ;;  %v1607_v24 = vmul.f32 0.01, %v1543_v16 }
 0x277   : > { %v3433_v22 = vpop.eup %3432  ;;  %v4861_v12 = vadd.f32 %v2159_v36, %v4421_v63  ;;  %v4864_v17 = vadd.f32 %v2208_v47, %v4423_v1 }
 0x278   : > { %v1638_v39 = vsel %vm1574_vm0, %v1542_v62, %v1606_v14  ;;  %v1639_v0 = vsel %vm1575_vm1, %v1543_v16, %v1607_v24  ;;  %v1480_v20 = vmul.f32 %v3433_v22, %v4696_v40  ;;  %v1481_v3 = vmul.f32 %v3433_v22, %v4698_v6  ;;  %v1422_v48 = vpop.xlane.xlu0 %1421 }
 0x279   : > { %v1670_v32 = vpack.c.bf16 %v1639_v0, %v1638_v39  ;;  %3434 = vrcp.f32 %v1422_v48  ;;  %v2249_v56 = vmax.f32 %v4861_v12, %v4864_v17 }
 0x27a   : > { %v1512_v43 = vadd.f32 1.0, %v1480_v20  ;;  %v1513_v7 = vadd.f32 1.0, %v1481_v3 }
 0x27b   : > { %1686 = vst [vmem:[%s4872_s28] sm:$0xff] %v1670_v32  ;;  %2250 = vmax.xlane.f32.xlu1 %v2249_v56  ;;  %v5509_v56 = vld [vmem:[#allocation24_spill] sm:$0xff] }
 0x27c   : > { %v1544_v24 = vmul.f32 %v1512_v43, %v4296_v9  ;;  %v1545_v40 = vmul.f32 %v1513_v7, %v4405_v4 }
 0x27d   : > { %v2162_v47 = vpop.f32.mrf.mxu2  ;;  %v2211_v6 = vpop.f32.mrf.mxu3 }
 0x27e   : > { %vm1576_vm2 = vcmp.gt.f32.partialorder %v1544_v24, 0.0  ;;  %vm1577_vm3 = vcmp.gt.f32.partialorder %v1545_v40, 0.0  ;;  %v1608_v62 = vmul.f32 0.01, %v1544_v24  ;;  %v1609_v16 = vmul.f32 0.01, %v1545_v40 }
 0x27f   : > { %v3435_v36 = vpop.eup %3434  ;;  %v4878_v14 = vadd.f32 %v2162_v47, %v4421_v63  ;;  %v4881_v22 = vadd.f32 %v2211_v6, %v4423_v1 }
 0x280   : > { %v1640_v39 = vsel %vm1576_vm2, %v1544_v24, %v1608_v62  ;;  %v1641_v0 = vsel %vm1577_vm3, %v1545_v40, %v1609_v16  ;;  %v1482_v9 = vmul.f32 %v3435_v36, %v4710_v49  ;;  %v1483_v4 = vmul.f32 %v3435_v36, %v4713_v42  ;;  %v1425_v7 = vpop.xlane.xlu1 %1424 }
 0x281   : > { %v1671_v43 = vpack.c.bf16 %v1641_v0, %v1640_v39  ;;  %3436 = vrcp.f32 %v1425_v7  ;;  %v2252_v20 = vmax.f32 %v4878_v14, %v4881_v22 }
 0x282   : > { %v1514_v3 = vadd.f32 1.0, %v1482_v9  ;;  %v1515_v48 = vadd.f32 1.0, %v1483_v4 }
 0x283   : > { %1687 = vst [vmem:[%s4872_s28 + $0x8] sm:$0xff] %v1671_v43  ;;  %2253 = vmax.xlane.f32.xlu2 %v2252_v20 }
 0x284   : > { %v1546_v32 = vmul.f32 %v1514_v3, %v4308_v54  ;;  %v1547_v47 = vmul.f32 %v1515_v48, %v5509_v56  ;;  %v5510_v3 = vld [vmem:[#allocation25_spill] sm:$0xff]  ;;  %v5511_v56 = vld [vmem:[#allocation28_spill] sm:$0xff] }
 0x285   : > { %v2164_v24 = vpop.f32.mrf.mxu2  ;;  %v2213_v40 = vpop.f32.mrf.mxu3 }
 0x286   : > { %vm1578_vm4 = vcmp.gt.f32.partialorder %v1546_v32, 0.0  ;;  %vm1579_vm5 = vcmp.gt.f32.partialorder %v1547_v47, 0.0  ;;  %v1610_v49 = vmul.f32 0.01, %v1546_v32  ;;  %v1611_v42 = vmul.f32 0.01, %v1547_v47 }
 0x287   : > { %v3437_v6 = vpop.eup %3436  ;;  %v4891_v62 = vadd.f32 %v2164_v24, %v4421_v63  ;;  %v4894_v16 = vadd.f32 %v2213_v40, %v4423_v1 }
 0x288   : > { %v1642_v36 = vsel %vm1578_vm4, %v1546_v32, %v1610_v49  ;;  %v1643_v39 = vsel %vm1579_vm5, %v1547_v47, %v1611_v42  ;;  %v1484_v54 = vmul.f32 %v3437_v6, %v4722_v31  ;;  %v1485_v0 = vmul.f32 %v3437_v6, %v4724_v58  ;;  %v1428_v9 = vpop.xlane.xlu2 %1427 }
 0x289   : > { %v1672_v4 = vpack.c.bf16 %v1643_v39, %v1642_v36  ;;  %3438 = vrcp.f32 %v1428_v9  ;;  %v2255_v7 = vmax.f32 %v4891_v62, %v4894_v16 }
 0x28a   : > { %v1516_v43 = vadd.f32 1.0, %v1484_v54  ;;  %v1517_v20 = vadd.f32 1.0, %v1485_v0 }
 0x28b   : > { %1688 = vst [vmem:[%s4872_s28 + $0x10] sm:$0xff] %v1672_v4  ;;  %2256 = vmax.xlane.f32.xlu0 %v2255_v7 }
 0x28c   : > { %v1548_v48 = vmul.f32 %v1516_v43, %v5510_v3  ;;  %v1549_v24 = vmul.f32 %v1517_v20, %v5511_v56  ;;  %v5512_v20 = vld [vmem:[#allocation15_spill] sm:$0xff]  ;;  %v5513_v56 = vld [vmem:[#allocation29_spill] sm:$0xff] }
 0x28d   : > { %v2167_v32 = vpop.f32.mrf.mxu2  ;;  %v2216_v47 = vpop.f32.mrf.mxu3 }
 0x28e   : > { %vm1580_vm6 = vcmp.gt.f32.partialorder %v1548_v48, 0.0  ;;  %vm1581_vm7 = vcmp.gt.f32.partialorder %v1549_v24, 0.0  ;;  %v1612_v31 = vmul.f32 0.01, %v1548_v48  ;;  %v1613_v58 = vmul.f32 0.01, %v1549_v24 }
 0x28f   : > { %v3439_v40 = vpop.eup %3438  ;;  %v4904_v49 = vadd.f32 %v2167_v32, %v4421_v63  ;;  %v4907_v42 = vadd.f32 %v2216_v47, %v4423_v1 }
 0x290   : > { %v1644_v6 = vsel %vm1580_vm6, %v1548_v48, %v1612_v31  ;;  %v1645_v36 = vsel %vm1581_vm7, %v1549_v24, %v1613_v58  ;;  %v1486_v39 = vmul.f32 %v3439_v40, %v4736_v15  ;;  %v1487_v54 = vmul.f32 %v3439_v40, %v4739_v10  ;;  %v1431_v0 = vpop.xlane.xlu0 %1430 }
 0x291   : > { %v1673_v9 = vpack.c.bf16 %v1645_v36, %v1644_v6  ;;  %3440 = vrcp.f32 %v1431_v0  ;;  %v2258_v4 = vmax.f32 %v4904_v49, %v4907_v42 }
 0x292   : > { %v1518_v7 = vadd.f32 1.0, %v1486_v39  ;;  %v1519_v43 = vadd.f32 1.0, %v1487_v54 }
 0x293   : > { %1689 = vst [vmem:[%s4872_s28 + $0x18] sm:$0xff] %v1673_v9  ;;  %2259 = vmax.xlane.f32.xlu1 %v2258_v4 }
 0x294   : > { %v1550_v3 = vmul.f32 %v1518_v7, %v5512_v20  ;;  %v1551_v32 = vmul.f32 %v1519_v43, %v5513_v56  ;;  %v5514_v43 = vld [vmem:[#allocation16_spill] sm:$0xff] }
 0x295   : > { %v2169_v48 = vpop.f32.mrf.mxu2  ;;  %v2218_v24 = vpop.f32.mrf.mxu3  ;;  %v5515_v56 = vld [vmem:[#allocation32_spill] sm:$0xff] }
 0x296   : > { %vm1582_vm8 = vcmp.gt.f32.partialorder %v1550_v3, 0.0  ;;  %vm1583_vm9 = vcmp.gt.f32.partialorder %v1551_v32, 0.0  ;;  %v1614_v15 = vmul.f32 0.01, %v1550_v3  ;;  %v1615_v10 = vmul.f32 0.01, %v1551_v32 }
 0x297   : > { %v3441_v47 = vpop.eup %3440  ;;  %v4917_v31 = vadd.f32 %v2169_v48, %v4421_v63  ;;  %v4920_v58 = vadd.f32 %v2218_v24, %v4423_v1 }
 0x298   : > { %v1646_v40 = vsel %vm1582_vm8, %v1550_v3, %v1614_v15  ;;  %v1647_v6 = vsel %vm1583_vm9, %v1551_v32, %v1615_v10  ;;  %v1488_v36 = vmul.f32 %v3441_v47, %v4748_v2  ;;  %v1489_v39 = vmul.f32 %v3441_v47, %v4750_v52  ;;  %v1434_v54 = vpop.xlane.xlu1 %1433 }
 0x299   : > { %v1674_v0 = vpack.c.bf16 %v1647_v6, %v1646_v40  ;;  %3442 = vrcp.f32 %v1434_v54  ;;  %v2261_v9 = vmax.f32 %v4917_v31, %v4920_v58 }
 0x29a   : > { %v1520_v4 = vadd.f32 1.0, %v1488_v36  ;;  %v1521_v7 = vadd.f32 1.0, %v1489_v39 }
 0x29b   : > { %1690 = vst [vmem:[%s4872_s28 + $0x20] sm:$0xff] %v1674_v0  ;;  %2262 = vmax.xlane.f32.xlu2 %v2261_v9 }
 0x29c   : > { %v1552_v20 = vmul.f32 %v1520_v4, %v5514_v43  ;;  %v1553_v48 = vmul.f32 %v1521_v7, %v5515_v56  ;;  %v5516_v7 = vld [vmem:[#allocation30_spill] sm:$0xff]  ;;  %v5517_v56 = vld [vmem:[#allocation33_spill] sm:$0xff] }
 0x29d   : > { %v2172_v3 = vpop.f32.mrf.mxu2  ;;  %v2221_v32 = vpop.f32.mrf.mxu3 }
 0x29e   : > { %vm1584_vm10 = vcmp.gt.f32.partialorder %v1552_v20, 0.0  ;;  %vm1585_vm11 = vcmp.gt.f32.partialorder %v1553_v48, 0.0  ;;  %v1616_v2 = vmul.f32 0.01, %v1552_v20  ;;  %v1617_v52 = vmul.f32 0.01, %v1553_v48 }
 0x29f   : > { %v3443_v24 = vpop.eup %3442  ;;  %v4930_v15 = vadd.f32 %v2172_v3, %v4421_v63  ;;  %v4933_v10 = vadd.f32 %v2221_v32, %v4423_v1 }
 0x2a0   : > { %v1648_v47 = vsel %vm1584_vm10, %v1552_v20, %v1616_v2  ;;  %v1649_v40 = vsel %vm1585_vm11, %v1553_v48, %v1617_v52  ;;  %v1490_v6 = vmul.f32 %v3443_v24, %v4762_v46  ;;  %v1491_v36 = vmul.f32 %v3443_v24, %v4765_v41  ;;  %v1437_v39 = vpop.xlane.xlu2 %1436 }
 0x2a1   : > { %v1675_v54 = vpack.c.bf16 %v1649_v40, %v1648_v47  ;;  %3444 = vrcp.f32 %v1437_v39  ;;  %v2264_v0 = vmax.f32 %v4930_v15, %v4933_v10 }
 0x2a2   : > { %v1522_v9 = vadd.f32 1.0, %v1490_v6  ;;  %v1523_v4 = vadd.f32 1.0, %v1491_v36 }
 0x2a3   : > { %1691 = vst [vmem:[%s4872_s28 + $0x28] sm:$0xff] %v1675_v54  ;;  %2265 = vmax.xlane.f32.xlu0 %v2264_v0 }
 0x2a4   : > { %v1554_v43 = vmul.f32 %v1522_v9, %v5516_v7  ;;  %v1555_v3 = vmul.f32 %v1523_v4, %v5517_v56  ;;  %v5518_v4 = vld [vmem:[#allocation17_spill] sm:$0xff]  ;;  %v5519_v56 = vld [vmem:[#allocation34_spill] sm:$0xff] }
 0x2a5   : > { %v2174_v20 = vpop.f32.mrf.mxu2  ;;  %v2223_v48 = vpop.f32.mrf.mxu3 }
 0x2a6   : > { %vm1586_vm12 = vcmp.gt.f32.partialorder %v1554_v43, 0.0  ;;  %vm1587_vm13 = vcmp.gt.f32.partialorder %v1555_v3, 0.0  ;;  %v1618_v46 = vmul.f32 0.01, %v1554_v43  ;;  %v1619_v41 = vmul.f32 0.01, %v1555_v3 }
 0x2a7   : > { %v3445_v32 = vpop.eup %3444  ;;  %v4943_v2 = vadd.f32 %v2174_v20, %v4421_v63  ;;  %v4946_v52 = vadd.f32 %v2223_v48, %v4423_v1 }
 0x2a8   : > { %v1650_v24 = vsel %vm1586_vm12, %v1554_v43, %v1618_v46  ;;  %v1651_v47 = vsel %vm1587_vm13, %v1555_v3, %v1619_v41  ;;  %v1492_v40 = vmul.f32 %v3445_v32, %v4774_v30  ;;  %v1493_v6 = vmul.f32 %v3445_v32, %v4776_v21  ;;  %v1440_v36 = vpop.xlane.xlu0 %1439 }
 0x2a9   : > { %v1676_v39 = vpack.c.bf16 %v1651_v47, %v1650_v24  ;;  %3446 = vrcp.f32 %v1440_v36  ;;  %v2267_v54 = vmax.f32 %v4943_v2, %v4946_v52 }
 0x2aa   : > { %v1524_v0 = vadd.f32 1.0, %v1492_v40  ;;  %v1525_v9 = vadd.f32 1.0, %v1493_v6 }
 0x2ab   : > { %1692 = vst [vmem:[%s4872_s28 + $0x30] sm:$0xff] %v1676_v39  ;;  %2268 = vmax.xlane.f32.xlu1 %v2267_v54 }
 0x2ac   : > { %v1556_v7 = vmul.f32 %v1524_v0, %v5518_v4  ;;  %v1557_v20 = vmul.f32 %v1525_v9, %v5519_v56  ;;  %v5520_v9 = vld [vmem:[#allocation18_spill] sm:$0xff]  ;;  %v5521_v56 = vld [vmem:[#allocation35_spill] sm:$0xff] }
 0x2ad   : > { %v2177_v43 = vpop.f32.mrf.mxu2  ;;  %v2226_v3 = vpop.f32.mrf.mxu3 }
 0x2ae   : > { %vm1588_vm14 = vcmp.gt.f32.partialorder %v1556_v7, 0.0  ;;  %vm1589_vm15 = vcmp.gt.f32.partialorder %v1557_v20, 0.0  ;;  %v1620_v30 = vmul.f32 0.01, %v1556_v7  ;;  %v1621_v21 = vmul.f32 0.01, %v1557_v20 }
 0x2af   : > { %v3447_v48 = vpop.eup %3446  ;;  %v4956_v46 = vadd.f32 %v2177_v43, %v4421_v63  ;;  %v4959_v41 = vadd.f32 %v2226_v3, %v4423_v1 }
 0x2b0   : > { %v1652_v32 = vsel %vm1588_vm14, %v1556_v7, %v1620_v30  ;;  %v1653_v24 = vsel %vm1589_vm15, %v1557_v20, %v1621_v21  ;;  %v1494_v47 = vmul.f32 %v3447_v48, %v4788_v44  ;;  %v1495_v40 = vmul.f32 %v3447_v48, %v4791_v37  ;;  %v1443_v6 = vpop.xlane.xlu1 %1442 }
 0x2b1   : > { %v1677_v36 = vpack.c.bf16 %v1653_v24, %v1652_v32  ;;  %3448 = vrcp.f32 %v1443_v6  ;;  %v2270_v39 = vmax.f32 %v4956_v46, %v4959_v41 }
 0x2b2   : > { %v1526_v54 = vadd.f32 1.0, %v1494_v47  ;;  %v1527_v0 = vadd.f32 1.0, %v1495_v40 }
 0x2b3   : > { %1693 = vst [vmem:[%s4872_s28 + $0x38] sm:$0xff] %v1677_v36  ;;  %2271 = vmax.xlane.f32.xlu2 %v2270_v39 }
 0x2b4   : > { %v1558_v4 = vmul.f32 %v1526_v54, %v5520_v9  ;;  %v1559_v43 = vmul.f32 %v1527_v0, %v5521_v56  ;;  %v5522_v0 = vld [vmem:[#allocation19_spill] sm:$0xff]  ;;  %v5523_v56 = vld [vmem:[#allocation36_spill] sm:$0xff] }
 0x2b5   : > { %v2179_v7 = vpop.f32.mrf.mxu2  ;;  %v2228_v20 = vpop.f32.mrf.mxu3 }
 0x2b6   : > { %vm1590_vm0 = vcmp.gt.f32.partialorder %v1558_v4, 0.0  ;;  %vm1591_vm1 = vcmp.gt.f32.partialorder %v1559_v43, 0.0  ;;  %v1622_v44 = vmul.f32 0.01, %v1558_v4  ;;  %v1623_v37 = vmul.f32 0.01, %v1559_v43 }
 0x2b7   : > { %v3449_v3 = vpop.eup %3448  ;;  %v4969_v30 = vadd.f32 %v2179_v7, %v4421_v63  ;;  %v4972_v21 = vadd.f32 %v2228_v20, %v4423_v1 }
 0x2b8   : > { %v1654_v48 = vsel %vm1590_vm0, %v1558_v4, %v1622_v44  ;;  %v1655_v32 = vsel %vm1591_vm1, %v1559_v43, %v1623_v37  ;;  %v1496_v24 = vmul.f32 %v3449_v3, %v4800_v53  ;;  %v1497_v47 = vmul.f32 %v3449_v3, %v4802_v13  ;;  %v1446_v40 = vpop.xlane.xlu2 %1445 }
 0x2b9   : > { %v1678_v6 = vpack.c.bf16 %v1655_v32, %v1654_v48  ;;  %3450 = vrcp.f32 %v1446_v40  ;;  %v2273_v36 = vmax.f32 %v4969_v30, %v4972_v21 }
 0x2ba   : > { %v1528_v39 = vadd.f32 1.0, %v1496_v24  ;;  %v1529_v54 = vadd.f32 1.0, %v1497_v47 }
 0x2bb   : > { %1694 = vst [vmem:[%s4872_s28 + $0x40] sm:$0xff] %v1678_v6  ;;  %2274 = vmax.xlane.f32.xlu0 %v2273_v36 }
 0x2bc   : > { %v1560_v9 = vmul.f32 %v1528_v39, %v5522_v0  ;;  %v1561_v7 = vmul.f32 %v1529_v54, %v5523_v56  ;;  %v5524_v39 = vld [vmem:[#allocation21_spill] sm:$0xff] }
 0x2bd   : > { %v2182_v4 = vpop.f32.mrf.mxu2  ;;  %v2231_v43 = vpop.f32.mrf.mxu3  ;;  %v5525_v0 = vld [vmem:[#allocation37_spill] sm:$0xff] }
 0x2be   : > { %vm1592_vm2 = vcmp.gt.f32.partialorder %v1560_v9, 0.0  ;;  %vm1593_vm3 = vcmp.gt.f32.partialorder %v1561_v7, 0.0  ;;  %v1624_v53 = vmul.f32 0.01, %v1560_v9  ;;  %v1625_v13 = vmul.f32 0.01, %v1561_v7 }
 0x2bf   : > { %v3451_v20 = vpop.eup %3450  ;;  %v4982_v44 = vadd.f32 %v2182_v4, %v4421_v63  ;;  %v4985_v37 = vadd.f32 %v2231_v43, %v4423_v1 }
 0x2c0   : > { %v1656_v3 = vsel %vm1592_vm2, %v1560_v9, %v1624_v53  ;;  %v1657_v48 = vsel %vm1593_vm3, %v1561_v7, %v1625_v13  ;;  %v1498_v32 = vmul.f32 %v3451_v20, %v4812_v11  ;;  %v1499_v24 = vmul.f32 %v3451_v20, %v4815_v61 }
 0x2c1   : > { %v1679_v47 = vpack.c.bf16 %v1657_v48, %v1656_v3  ;;  %v2276_v40 = vmax.f32 %v4982_v44, %v4985_v37 }
 0x2c2   : > { %v1530_v6 = vadd.f32 1.0, %v1498_v32  ;;  %v1531_v36 = vadd.f32 1.0, %v1499_v24  ;;  %v5526_v24 = vld [vmem:[#allocation41_spill] sm:$0xff] }
 0x2c3   : > { %1695 = vst [vmem:[%s4872_s28 + $0x48] sm:$0xff] %v1679_v47  ;;  %2277 = vmax.xlane.f32.xlu1 %v2276_v40  ;;  %v1340_v47 = vsub.f32 %v5526_v24, %v4833_v59 }
 0x2c4   : > { %v1562_v54 = vmul.f32 %v1530_v6, %v5524_v39  ;;  %v1563_v56 = vmul.f32 %v1531_v36, %v5525_v0  ;;  %v5527_v36 = vld [vmem:[#allocation42_spill] sm:$0xff] }
 0x2c5   : > { %v2184_v4 = vpop.f32.mrf.mxu2  ;;  %v2233_v9 = vpop.f32.mrf.mxu3  ;;  %v1341_v39 = vsub.f32 %v5527_v36, %v4833_v59  ;;  %v1394_v0 = vmul.f32 1.442695, %v1340_v47 }
 0x2c6   : > { %vm1594_vm4 = vcmp.gt.f32.partialorder %v1562_v54, 0.0  ;;  %vm1595_vm5 = vcmp.gt.f32.partialorder %v1563_v56, 0.0  ;;  %v1626_v11 = vmul.f32 0.01, %v1562_v54  ;;  %v1627_v7 = vmul.f32 0.01, %v1563_v56 }
 0x2c7   : > { %v4995_v61 = vadd.f32 %v2184_v4, %v4421_v63  ;;  %v4998_v43 = vadd.f32 %v2233_v9, %v4423_v1  ;;  %v5528_v4 = vld [vmem:[#allocation44_spill] sm:$0xff]  ;;  %3452 = vpow2.f32 %v1394_v0 }
 0x2c8   : > { %v1658_v53 = vsel %vm1594_vm4, %v1562_v54, %v1626_v11  ;;  %v1659_v13 = vsel %vm1595_vm5, %v1563_v56, %v1627_v7  ;;  %v1396_v56 = vmul.f32 1.442695, %v1341_v39  ;;  %v1342_v9 = vsub.f32 %v5528_v4, %v4840_v38 }
 0x2c9   : > { %v1680_v20 = vpack.c.bf16 %v1659_v13, %v1658_v53  ;;  %v2279_v3 = vmax.f32 %v4995_v61, %v4998_v43  ;;  %v5529_v53 = vld [vmem:[#allocation49_spill] sm:$0xff] }
 0x2ca   : > { %v1346_v13 = vsub.f32 %v5529_v53, %v4842_v50  ;;  %3454 = vpow2.f32 %v1396_v56  ;;  %v1398_v36 = vmul.f32 1.442695, %v1342_v9  ;;  %v5532_v56 = vld [vmem:[#allocation47_spill] sm:$0xff] }
 0x2cb   : > { %1696 = vst [vmem:[%s4872_s28 + $0x50] sm:$0xff] %v1680_v20  ;;  %2280 = vmax.xlane.f32.xlu2 %v2279_v3  ;;  %v5530_v3 = vld [vmem:[#allocation50_spill] sm:$0xff] }
 0x2cc   : > { %v1406_v39 = vmul.f32 1.442695, %v1346_v13  ;;  %3456 = vpow2.f32 %v1398_v36 }
 0x2cd   : > { %v2187_v48 = vpop.f32.mrf.mxu2  ;;  %v2236_v32 = vpop.f32.mrf.mxu3 }
 0x2ce   : > { %v5006_v40 = vadd.f32 %v2187_v48, %v4421_v63  ;;  %v5009_v6 = vadd.f32 %v2236_v32, %v4423_v1  ;;  %v1347_v48 = vsub.f32 %v5530_v3, %v4842_v50  ;;  %v5531_v32 = vld [vmem:[#allocation45_spill] sm:$0xff]  ;;  %v5031_v0 = vpop.eup %3452  ;;  %3458 = vpow2.f32 %v1406_v39 }
 0x2cf   : > { %v1343_v24 = vsub.f32 %v5531_v32, %v4840_v38  ;;  %v5533_v38 = vld [vmem:[#allocation48_spill] sm:$0xff]  ;;  %v1349_v32 = vsub.f32 %v4670_v8, %v4852_v51 }
 0x2d0   : > { %v2282_v54 = vmax.f32 %v5006_v40, %v5009_v6  ;;  %v1345_v3 = vsub.f32 %v5533_v38, %v4835_v35 }
 0x2d1   : > { %v1400_v4 = vmul.f32 1.442695, %v1343_v24 }
 0x2d2   : > { %2283 = vmax.xlane.f32.xlu0 %v2282_v54  ;;  %v1408_v54 = vmul.f32 1.442695, %v1347_v48  ;;  %v1348_v48 = vsub.f32 %v4667_v23, %v4852_v51  ;;  %v1404_v36 = vmul.f32 1.442695, %v1345_v3  ;;  %v1412_v23 = vmul.f32 1.442695, %v1349_v32 }
 0x2d4   : > { %3460 = vpow2.f32 %v1408_v54  ;;  %v1410_v54 = vmul.f32 1.442695, %v1348_v48 }
 0x2d5   : > { %v2189_v11 = vpop.f32.mrf.mxu2  ;;  %v2238_v7 = vpop.f32.mrf.mxu3  ;;  %3462 = vpow2.f32 %v1400_v4 }
 0x2d6   : > { %v5020_v20 = vadd.f32 %v2189_v11, %v4421_v63  ;;  %v5023_v59 = vadd.f32 %v2238_v7, %v4423_v1  ;;  %v5033_v11 = vpop.eup %3454  ;;  %v1344_v7 = vsub.f32 %v5532_v56, %v4835_v35 }
 0x2d7   : > { %v1447_v35 = vadd.f32 %v5033_v11, %v5031_v0  ;;  %v5053_v39 = vpop.eup %3456 }
 0x2d8   : > { %v2285_v47 = vmax.f32 %v5020_v20, %v5023_v59  ;;  %v5055_v56 = vpop.eup %3458 }
 0x2da   : > { %2286 = vmax.xlane.f32.xlu1 %v2285_v47  ;;  %v1402_v47 = vmul.f32 1.442695, %v1344_v7  ;;  %v5057_v4 = vpop.eup %3460 }
 0x2dc   : > { %3464 = vpow2.f32 %v1402_v47 }
 0x2dd   : > { %v2192_v50 = vpop.f32.mrf.mxu2  ;;  %v2241_v53 = vpop.f32.mrf.mxu3  ;;  %3466 = vpow2.f32 %v1404_v36 }
 0x2de   : > { %v5040_v9 = vadd.f32 %v2192_v50, %v4421_v63  ;;  %v5043_v13 = vadd.f32 %v2241_v53, %v4423_v1  ;;  %v5059_v50 = vpop.eup %3462  ;;  %3468 = vpow2.f32 %v1410_v54 }
 0x2df   : > { %3470 = vpow2.f32 %v1412_v23 }
 0x2e0   : > { %v2288_v24 = vmax.f32 %v5040_v9, %v5043_v13 }
 0x2e2   : > { %2289 = vmax.xlane.f32.xlu2 %v2288_v24  ;;  %1448 = vadd.xlane.f32.xlu1 %v1447_v35  ;;  %v1456_v24 = vadd.f32 %v5057_v4, %v5055_v56 }
 0x2e5   : > { %v2194_v8 = vpop.f32.mrf.mxu2  ;;  %v2243_v51 = vpop.f32.mrf.mxu3 }
 0x2e6   : > { %v5062_v53 = vadd.f32 %v2194_v8, %v4421_v63  ;;  %v5065_v7 = vadd.f32 %v2243_v51, %v4423_v1  ;;  %v2248_v38 = vpop.xlane.xlu0 %2247  ;;  %v1450_v63 = vadd.f32 %v5059_v50, %v5053_v39  ;;  %v5075_v1 = vpop.eup %3464 }
 0x2e7   : > { %v2294_v3 = vsub.f32 %v4847_v5, %v2248_v38  ;;  %v2295_v48 = vsub.f32 %v4850_v27, %v2248_v38  ;;  %v5077_v5 = vpop.eup %3466 }
 0x2e8   : > { %v2291_v32 = vmax.f32 %v5062_v53, %v5065_v7  ;;  %v5079_v27 = vpop.eup %3468  ;;  %v1453_v51 = vadd.f32 %v5077_v5, %v5075_v1 }
 0x2e9   : > { %v2326_v35 = vmul.f32 1.442695, %v2294_v3  ;;  %v2328_v47 = vmul.f32 1.442695, %v2295_v48  ;;  %v5081_v36 = vpop.eup %3470 }
 0x2ea   : > { %2292 = vmax.xlane.f32.xlu0 %v2291_v32  ;;  %1457 = vadd.xlane.f32.xlu1 %v1456_v24  ;;  %v1459_v48 = vadd.f32 %v5081_v36, %v5079_v27 }
 0x2eb   : > { %1451 = vadd.xlane.f32.xlu2 %v1450_v63  ;;  %3472 = vpow2.f32 %v2326_v35 }
 0x2ec   : > { %3474 = vpow2.f32 %v2328_v47 }
 0x2ee   : > { %v2251_v54 = vpop.xlane.xlu1 %2250 }
 0x2ef   : > { %v2296_v23 = vsub.f32 %v4861_v12, %v2251_v54  ;;  %v2297_v8 = vsub.f32 %v4864_v17, %v2251_v54 }
 0x2f1   : > { %v2330_v38 = vmul.f32 1.442695, %v2296_v23  ;;  %v2332_v3 = vmul.f32 1.442695, %v2297_v8  ;;  %v5089_v32 = vpop.eup %3472 }
 0x2f2   : > { %1454 = vadd.xlane.f32.xlu0 %v1453_v51  ;;  %v5091_v24 = vpop.eup %3474 }
 0x2f3   : > { %3476 = vpow2.f32 %v2330_v38  ;;  %1460 = vadd.xlane.f32.xlu2 %v1459_v48  ;;  %v2390_v35 = vadd.f32 %v5091_v24, %v5089_v32 }
 0x2f4   : > { %3478 = vpow2.f32 %v2332_v3 }
 0x2f6   : > { %v2254_v63 = vpop.xlane.xlu2 %2253 }
 0x2f7   : > { %v2298_v12 = vsub.f32 %v4878_v14, %v2254_v63  ;;  %v2299_v17 = vsub.f32 %v4881_v22, %v2254_v63 }
 0x2f9   : > { %v5097_v47 = vpop.eup %3476  ;;  %v2334_v54 = vmul.f32 1.442695, %v2298_v12  ;;  %v2336_v23 = vmul.f32 1.442695, %v2299_v17 }
 0x2fa   : > { %v5099_v8 = vpop.eup %3478  ;;  %2391 = vadd.xlane.f32.xlu0 %v2390_v35 }
 0x2fb   : > { %3480 = vpow2.f32 %v2334_v54  ;;  %v2393_v51 = vadd.f32 %v5099_v8, %v5097_v47 }
 0x2fc   : > { %3482 = vpow2.f32 %v2336_v23 }
 0x2fd   : > { %2394 = vadd.xlane.f32.xlu1 %v2393_v51 }
 0x2fe   : > { %v2257_v38 = vpop.xlane.xlu0 %2256 }
 0x2ff   : > { %v2300_v14 = vsub.f32 %v4891_v62, %v2257_v38  ;;  %v2301_v22 = vsub.f32 %v4894_v16, %v2257_v38 }
 0x301   : > { %v5105_v3 = vpop.eup %3480  ;;  %v2338_v48 = vmul.f32 1.442695, %v2300_v14  ;;  %v2340_v63 = vmul.f32 1.442695, %v2301_v22 }
 0x302   : > { %v5107_v12 = vpop.eup %3482 }
 0x303   : > { %3484 = vpow2.f32 %v2338_v48  ;;  %v2396_v17 = vadd.f32 %v5107_v12, %v5105_v3 }
 0x304   : > { %3486 = vpow2.f32 %v2340_v63 }
 0x305   : > { %2397 = vadd.xlane.f32.xlu2 %v2396_v17 }
 0x306   : > { %v2260_v35 = vpop.xlane.xlu1 %2259 }
 0x307   : > { %v2302_v54 = vsub.f32 %v4904_v49, %v2260_v35  ;;  %v2303_v23 = vsub.f32 %v4907_v42, %v2260_v35 }
 0x309   : > { %v5113_v62 = vpop.eup %3484  ;;  %v2342_v16 = vmul.f32 1.442695, %v2302_v54  ;;  %v2344_v51 = vmul.f32 1.442695, %v2303_v23 }
 0x30a   : > { %v5115_v38 = vpop.eup %3486 }
 0x30b   : > { %3488 = vpow2.f32 %v2342_v16  ;;  %v2399_v14 = vadd.f32 %v5115_v38, %v5113_v62 }
 0x30c   : > { %3490 = vpow2.f32 %v2344_v51 }
 0x30d   : > { %2400 = vadd.xlane.f32.xlu0 %v2399_v14 }
 0x30e   : > { %v2263_v22 = vpop.xlane.xlu2 %2262 }
 0x30f   : > { %v2304_v48 = vsub.f32 %v4917_v31, %v2263_v22  ;;  %v2305_v63 = vsub.f32 %v4920_v58, %v2263_v22 }
 0x311   : > { %v5121_v49 = vpop.eup %3488  ;;  %v2346_v42 = vmul.f32 1.442695, %v2304_v48  ;;  %v2348_v17 = vmul.f32 1.442695, %v2305_v63 }
 0x312   : > { %v5123_v35 = vpop.eup %3490 }
 0x313   : > { %3492 = vpow2.f32 %v2346_v42  ;;  %v2402_v54 = vadd.f32 %v5123_v35, %v5121_v49 }
 0x314   : > { %3494 = vpow2.f32 %v2348_v17 }
 0x315   : > { %2403 = vadd.xlane.f32.xlu1 %v2402_v54 }
 0x316   : > { %v2266_v23 = vpop.xlane.xlu0 %2265 }
 0x317   : > { %v2306_v16 = vsub.f32 %v4930_v15, %v2266_v23  ;;  %v2307_v51 = vsub.f32 %v4933_v10, %v2266_v23 }
 0x319   : > { %v5129_v31 = vpop.eup %3492  ;;  %v2350_v58 = vmul.f32 1.442695, %v2306_v16  ;;  %v2352_v14 = vmul.f32 1.442695, %v2307_v51 }
 0x31a   : > { %v5131_v22 = vpop.eup %3494 }
 0x31b   : > { %3496 = vpow2.f32 %v2350_v58  ;;  %v2405_v48 = vadd.f32 %v5131_v22, %v5129_v31 }
 0x31c   : > { %3498 = vpow2.f32 %v2352_v14 }
 0x31d   : > { %2406 = vadd.xlane.f32.xlu2 %v2405_v48 }
 0x31e   : > { %v2269_v63 = vpop.xlane.xlu1 %2268 }
 0x31f   : > { %v2308_v42 = vsub.f32 %v4943_v2, %v2269_v63  ;;  %v2309_v17 = vsub.f32 %v4946_v52, %v2269_v63 }
 0x321   : > { %v5137_v15 = vpop.eup %3496  ;;  %v2354_v10 = vmul.f32 1.442695, %v2308_v42  ;;  %v2356_v54 = vmul.f32 1.442695, %v2309_v17 }
 0x322   : > { %v5139_v23 = vpop.eup %3498 }
 0x323   : > { %3500 = vpow2.f32 %v2354_v10  ;;  %v2408_v16 = vadd.f32 %v5139_v23, %v5137_v15 }
 0x324   : > { %3502 = vpow2.f32 %v2356_v54 }
 0x325   : > { %2409 = vadd.xlane.f32.xlu0 %v2408_v16 }
 0x326   : > { %v2272_v51 = vpop.xlane.xlu2 %2271 }
 0x327   : > { %v2310_v58 = vsub.f32 %v4956_v46, %v2272_v51  ;;  %v2311_v14 = vsub.f32 %v4959_v41, %v2272_v51 }
 0x329   : > { %v5145_v2 = vpop.eup %3500  ;;  %v2358_v52 = vmul.f32 1.442695, %v2310_v58  ;;  %v2360_v48 = vmul.f32 1.442695, %v2311_v14 }
 0x32a   : > { %v5147_v63 = vpop.eup %3502 }
 0x32b   : > { %3504 = vpow2.f32 %v2358_v52  ;;  %v2411_v42 = vadd.f32 %v5147_v63, %v5145_v2 }
 0x32c   : > { %3506 = vpow2.f32 %v2360_v48 }
 0x32d   : > { %2412 = vadd.xlane.f32.xlu1 %v2411_v42 }
 0x32e   : > { %v2275_v17 = vpop.xlane.xlu0 %2274 }
 0x32f   : > { %v2312_v10 = vsub.f32 %v4969_v30, %v2275_v17  ;;  %v2313_v54 = vsub.f32 %v4972_v21, %v2275_v17 }
 0x331   : > { %v5153_v46 = vpop.eup %3504  ;;  %v2362_v41 = vmul.f32 1.442695, %v2312_v10  ;;  %v2364_v16 = vmul.f32 1.442695, %v2313_v54 }
 0x332   : > { %v5155_v51 = vpop.eup %3506 }
 0x333   : > { %3508 = vpow2.f32 %v2362_v41  ;;  %v2414_v58 = vadd.f32 %v5155_v51, %v5153_v46 }
 0x334   : > { %3510 = vpow2.f32 %v2364_v16 }
 0x335   : > { %2415 = vadd.xlane.f32.xlu2 %v2414_v58 }
 0x336   : > { %v2278_v14 = vpop.xlane.xlu1 %2277 }
 0x337   : > { %v2314_v52 = vsub.f32 %v4982_v44, %v2278_v14  ;;  %v2315_v48 = vsub.f32 %v4985_v37, %v2278_v14 }
 0x339   : > { %v5161_v30 = vpop.eup %3508  ;;  %v2366_v21 = vmul.f32 1.442695, %v2314_v52  ;;  %v2368_v42 = vmul.f32 1.442695, %v2315_v48 }
 0x33a   : > { %5534 = vst [vmem:[#allocation24_spill] sm:$0xff] %v5161_v30  ;;  %v5163_v17 = vpop.eup %3510 }
 0x33b   : > { %5535 = vst [vmem:[#allocation25_spill] sm:$0xff] %v5163_v17  ;;  %3512 = vpow2.f32 %v2366_v21  ;;  %v2417_v10 = vadd.f32 %v5163_v17, %v5161_v30 }
 0x33c   : > { %3514 = vpow2.f32 %v2368_v42 }
 0x33d   : > { %2418 = vadd.xlane.f32.xlu0 %v2417_v10 }
 0x33e   : > { %v2281_v54 = vpop.xlane.xlu2 %2280 }
 0x33f   : > { %v2316_v41 = vsub.f32 %v4995_v61, %v2281_v54  ;;  %v2317_v16 = vsub.f32 %v4998_v43, %v2281_v54 }
 0x341   : > { %v5169_v44 = vpop.eup %3512  ;;  %v2370_v37 = vmul.f32 1.442695, %v2316_v41  ;;  %v2372_v58 = vmul.f32 1.442695, %v2317_v16 }
 0x342   : > { %5536 = vst [vmem:[#allocation28_spill] sm:$0xff] %v5169_v44  ;;  %v5171_v14 = vpop.eup %3514 }
 0x343   : > { %5537 = vst [vmem:[#allocation15_spill] sm:$0xff] %v5171_v14  ;;  %3516 = vpow2.f32 %v2370_v37  ;;  %v2420_v52 = vadd.f32 %v5171_v14, %v5169_v44 }
 0x344   : > { %3518 = vpow2.f32 %v2372_v58 }
 0x345   : > { %2421 = vadd.xlane.f32.xlu1 %v2420_v52  ;;  %v2284_v48 = vpop.xlane.xlu0 %2283 }
 0x346   : > { %v2318_v21 = vsub.f32 %v5006_v40, %v2284_v48  ;;  %v2319_v42 = vsub.f32 %v5009_v6, %v2284_v48  ;;  %v5185_v40 = vpop.f32.mrf.mxu0 }
 0x348   : > { %v2374_v61 = vmul.f32 1.442695, %v2318_v21  ;;  %v2376_v10 = vmul.f32 1.442695, %v2319_v42 }
 0x349   : > { %v5177_v43 = vpop.eup %3516 }
 0x34a   : > { %5538 = vst [vmem:[#allocation29_spill] sm:$0xff] %v5177_v43  ;;  %v5179_v54 = vpop.eup %3518  ;;  %3520 = vpow2.f32 %v2374_v61  ;;  %v5193_v61 = vpop.f32.mrf.mxu1 }
 0x34b   : > { %5539 = vst [vmem:[#allocation16_spill] sm:$0xff] %v5179_v54  ;;  %3522 = vpow2.f32 %v2376_v10  ;;  %v2423_v41 = vadd.f32 %v5179_v54, %v5177_v43 }
 0x34d   : > { %2424 = vadd.xlane.f32.xlu2 %v2423_v41  ;;  %v2287_v16 = vpop.xlane.xlu1 %2286 }
 0x34e   : > { %v2320_v37 = vsub.f32 %v5020_v20, %v2287_v16  ;;  %v2321_v58 = vsub.f32 %v5023_v59, %v2287_v16  ;;  %v5199_v28 = vpop.f32.mrf.mxu0 }
 0x350   : > { %v5187_v6 = vpop.eup %3520  ;;  %v2378_v52 = vmul.f32 1.442695, %v2320_v37  ;;  %v2380_v48 = vmul.f32 1.442695, %v2321_v58 }
 0x351   : > { %5540 = vst [vmem:[#allocation32_spill] sm:$0xff] %v5187_v6  ;;  %v5189_v21 = vpop.eup %3522 }
 0x352   : > { %5541 = vst [vmem:[#allocation30_spill] sm:$0xff] %v5189_v21  ;;  %3524 = vpow2.f32 %v2378_v52  ;;  %v2426_v42 = vadd.f32 %v5189_v21, %v5187_v6  ;;  %v5205_v21 = vpop.f32.mrf.mxu1 }
 0x353   : > { %3526 = vpow2.f32 %v2380_v48 }
 0x354   : > { %2427 = vadd.xlane.f32.xlu0 %v2426_v42 }
 0x355   : > { %v2290_v10 = vpop.xlane.xlu2 %2289  ;;  %v1449_v20 = vpop.xlane.xlu1 %1448 }
 0x356   : > { %v2322_v59 = vsub.f32 %v5040_v9, %v2290_v10  ;;  %v2323_v41 = vsub.f32 %v5043_v13, %v2290_v10  ;;  %3528 = vrcp.f32 %v1449_v20 }
 0x358   : > { %v5197_v16 = vpop.eup %3524  ;;  %v2382_v37 = vmul.f32 1.442695, %v2322_v59  ;;  %v2384_v58 = vmul.f32 1.442695, %v2323_v41 }
 0x359   : > { %5542 = vst [vmem:[#allocation33_spill] sm:$0xff] %v5197_v16  ;;  %v5201_v52 = vpop.eup %3526 }
 0x35a   : > { %5543 = vst [vmem:[#allocation17_spill] sm:$0xff] %v5201_v52  ;;  %3530 = vpow2.f32 %v2382_v37  ;;  %v2429_v48 = vadd.f32 %v5201_v52, %v5197_v16 }
 0x35b   : > { %3532 = vpow2.f32 %v2384_v58 }
 0x35c   : > { %v3529_v42 = vpop.eup %3528  ;;  %2430 = vadd.xlane.f32.xlu1 %v2429_v48 }
 0x35d   : > { %v1500_v9 = vmul.f32 %v3529_v42, %v5031_v0  ;;  %v1501_v13 = vmul.f32 %v3529_v42, %v5033_v11  ;;  %v1458_v10 = vpop.xlane.xlu1 %1457  ;;  %v2293_v20 = vpop.xlane.xlu0 %2292  ;;  %v5546_v0 = vld [vmem:[#allocation20_spill] sm:$0xff]  ;;  %v5547_v11 = vld [vmem:[#allocation38_spill] sm:$0xff] }
 0x35e   : > { %3534 = vrcp.f32 %v1458_v10  ;;  %v1452_v59 = vpop.xlane.xlu2 %1451  ;;  %v2324_v41 = vsub.f32 %v5062_v53, %v2293_v20  ;;  %v2325_v37 = vsub.f32 %v5065_v7, %v2293_v20  ;;  %v5219_v53 = vpop.f32.mrf.mxu0 }
 0x35f   : > { %v1532_v6 = vadd.f32 1.0, %v1500_v9  ;;  %v1533_v54 = vadd.f32 1.0, %v1501_v13  ;;  %3536 = vrcp.f32 %v1452_v59 }
 0x360   : > { %v5211_v58 = vpop.eup %3530  ;;  %v2386_v48 = vmul.f32 1.442695, %v2324_v41  ;;  %v2388_v52 = vmul.f32 1.442695, %v2325_v37 }
 0x361   : > { %5544 = vst [vmem:[#allocation34_spill] sm:$0xff] %v5211_v58  ;;  %v5213_v16 = vpop.eup %3532  ;;  %v1564_v43 = vmul.f32 %v1532_v6, %v5546_v0  ;;  %v1565_v42 = vmul.f32 %v1533_v54, %v5547_v11 }
 0x362   : > { %5545 = vst [vmem:[#allocation18_spill] sm:$0xff] %v5213_v16  ;;  %3538 = vpow2.f32 %v2386_v48  ;;  %v2432_v10 = vadd.f32 %v5213_v16, %v5211_v58  ;;  %v5225_v58 = vpop.f32.mrf.mxu1 }
 0x363   : > { %vm1596_vm6 = vcmp.gt.f32.partialorder %v1564_v43, 0.0  ;;  %vm1597_vm7 = vcmp.gt.f32.partialorder %v1565_v42, 0.0  ;;  %v1628_v7 = vmul.f32 0.01, %v1564_v43  ;;  %v1629_v9 = vmul.f32 0.01, %v1565_v42 }
 0x364   : > { %v3535_v13 = vpop.eup %3534  ;;  %3540 = vpow2.f32 %v2388_v52  ;;  %2433 = vadd.xlane.f32.xlu2 %v2432_v10 }
 0x365   : > { %v3537_v20 = vpop.eup %3536  ;;  %v1660_v59 = vsel %vm1596_vm6, %v1564_v43, %v1628_v7  ;;  %v1661_v41 = vsel %vm1597_vm7, %v1565_v42, %v1629_v9  ;;  %v1506_v6 = vmul.f32 %v3535_v13, %v5055_v56  ;;  %v1507_v54 = vmul.f32 %v3535_v13, %v5057_v4  ;;  %v1455_v37 = vpop.xlane.xlu0 %1454  ;;  %v5548_v42 = vld [vmem:[#allocation27_spill] sm:$0xff] }
 0x366   : > { %v1681_v48 = vpack.c.bf16 %v1661_v41, %v1660_v59  ;;  %v1502_v0 = vmul.f32 %v3537_v20, %v5053_v39  ;;  %v1503_v11 = vmul.f32 %v3537_v20, %v5059_v50  ;;  %v1461_v16 = vpop.xlane.xlu2 %1460  ;;  %3542 = vrcp.f32 %v1455_v37  ;;  %v5549_v7 = vld [vmem:[#allocation43_spill] sm:$0xff]  ;;  %v5550_v39 = vld [vmem:[#allocation22_spill] sm:$0xff] }
 0x367   : > { %v1538_v52 = vadd.f32 1.0, %v1506_v6  ;;  %v1539_v10 = vadd.f32 1.0, %v1507_v54  ;;  %3544 = vrcp.f32 %v1461_v16  ;;  %v5551_v20 = vld [vmem:[#allocation39_spill] sm:$0xff] }
 0x368   : > { %v5227_v33 = vpop.eup %3538  ;;  %1697 = vst [vmem:[%s4872_s28 + $0x58] sm:$0xff] %v1681_v48  ;;  %v1534_v43 = vadd.f32 1.0, %v1502_v0  ;;  %v1535_v56 = vadd.f32 1.0, %v1503_v11  ;;  %v5236_v48 = vpop.f32.mrf.mxu0 }
 0x369   : > { %v1570_v4 = vmul.f32 %v1538_v52, %v5548_v42  ;;  %v1571_v9 = vmul.f32 %v1539_v10, %v5549_v7 }
 0x36a   : > { %v5232_v13 = vpop.eup %3540  ;;  %v1566_v50 = vmul.f32 %v1534_v43, %v5550_v39  ;;  %v1567_v59 = vmul.f32 %v1535_v56, %v5551_v20 }
 0x36b   : > { %vm1602_vm8 = vcmp.gt.f32.partialorder %v1570_v4, 0.0  ;;  %vm1603_vm9 = vcmp.gt.f32.partialorder %v1571_v9, 0.0  ;;  %v1634_v41 = vmul.f32 0.01, %v1570_v4  ;;  %v1635_v6 = vmul.f32 0.01, %v1571_v9 }
 0x36c   : > { %v3543_v16 = vpop.eup %3542  ;;  %vm1598_vm10 = vcmp.gt.f32.partialorder %v1566_v50, 0.0  ;;  %vm1599_vm11 = vcmp.gt.f32.partialorder %v1567_v59, 0.0  ;;  %v1630_v54 = vmul.f32 0.01, %v1566_v50  ;;  %v1631_v37 = vmul.f32 0.01, %v1567_v59 }
 0x36d   : > { %v3545_v0 = vpop.eup %3544  ;;  %v1666_v11 = vsel %vm1602_vm8, %v1570_v4, %v1634_v41  ;;  %v1667_v52 = vsel %vm1603_vm9, %v1571_v9, %v1635_v6  ;;  %v1504_v10 = vmul.f32 %v3543_v16, %v5075_v1  ;;  %v1505_v43 = vmul.f32 %v3543_v16, %v5077_v5  ;;  %v2392_v56 = vpop.xlane.xlu0 %2391  ;;  %v5553_v41 = vld [vmem:[#allocation40_spill] sm:$0xff]  ;;  %v5554_v6 = vld [vmem:[#allocation23_spill] sm:$0xff]  ;;  %v5555_v16 = vld [vmem:[#allocation46_spill] sm:$0xff] }
 0x36e   : > { %v1684_v42 = vpack.c.bf16 %v1667_v52, %v1666_v11  ;;  %v1662_v7 = vsel %vm1598_vm10, %v1566_v50, %v1630_v54  ;;  %v1663_v39 = vsel %vm1599_vm11, %v1567_v59, %v1631_v37  ;;  %v1508_v20 = vmul.f32 %v3545_v0, %v5079_v27  ;;  %v5245_v5 = vpop.f32.mrf.mxu1  ;;  %v5552_v50 = vld [vmem:[#allocation26_spill] sm:$0xff]  ;;  %v5556_v52 = vld [vmem:[#allocation31_spill] sm:$0xff] }
 0x36f   : > { %v1682_v14 = vpack.c.bf16 %v1663_v39, %v1662_v7  ;;  %v1509_v44 = vmul.f32 %v3545_v0, %v5081_v36  ;;  %v1536_v19 = vadd.f32 1.0, %v1504_v10  ;;  %v1537_v17 = vadd.f32 1.0, %v1505_v43 }
 0x370   : > { %1700 = vst [vmem:[%s4872_s28 + $0x70] sm:$0xff] %v1684_v42  ;;  %v1540_v30 = vadd.f32 1.0, %v1508_v20  ;;  %v2435_v4 = vadd.f32 %v5232_v13, %v5227_v33  ;;  %3546 = vrcp.f32 %v2392_v56  ;;  %v2395_v1 = vpop.xlane.xlu1 %2394  ;;  %v5256_v56 = vpop.f32.mrf.mxu0 }
 0x371   : > { %1698 = vst [vmem:[%s4872_s28 + $0x60] sm:$0xff] %v1682_v14  ;;  %v1541_v9 = vadd.f32 1.0, %v1509_v44  ;;  %v1568_v59 = vmul.f32 %v1536_v19, %v5552_v50  ;;  %v1569_v27 = vmul.f32 %v1537_v17, %v5553_v41  ;;  %3548 = vrcp.f32 %v2395_v1 }
 0x372   : > { %v1572_v36 = vmul.f32 %v1540_v30, %v5554_v6  ;;  %2436 = vadd.xlane.f32.xlu0 %v2435_v4  ;;  %v2004_v14 = vadd.f32 %v5185_v40, %v5556_v52  ;;  %v2006_v30 = vadd.f32 %v5199_v28, %v5556_v52 }
 0x373   : > { %v1573_v54 = vmul.f32 %v1541_v9, %v5555_v16  ;;  %vm1600_vm12 = vcmp.gt.f32.partialorder %v1568_v59, 0.0  ;;  %vm1601_vm13 = vcmp.gt.f32.partialorder %v1569_v27, 0.0  ;;  %v1632_v37 = vmul.f32 0.01, %v1568_v59 }
 0x374   : > { %vm1604_vm14 = vcmp.gt.f32.partialorder %v1572_v36, 0.0  ;;  %v1636_v0 = vmul.f32 0.01, %v1572_v36  ;;  %v1633_v11 = vmul.f32 0.01, %v1569_v27  ;;  %v2055_v6 = vadd.f32 %v5205_v21, %v2006_v30 }
 0x375   : > { %vm1605_vm15 = vcmp.gt.f32.partialorder %v1573_v54, 0.0  ;;  %v1637_v44 = vmul.f32 0.01, %v1573_v54  ;;  %v1664_v19 = vsel %vm1600_vm12, %v1568_v59, %v1632_v37  ;;  %v2053_v59 = vadd.f32 %v5193_v61, %v2004_v14 }
 0x376   : > { %v3547_v17 = vpop.eup %3546  ;;  %v1668_v10 = vsel %vm1604_vm14, %v1572_v36, %v1636_v0  ;;  %v1665_v43 = vsel %vm1601_vm13, %v1569_v27, %v1633_v11 }
 0x377   : > { %v3549_v42 = vpop.eup %3548  ;;  %v1669_v7 = vsel %vm1605_vm15, %v1573_v54, %v1637_v44  ;;  %v1683_v39 = vpack.c.bf16 %v1665_v43, %v1664_v19  ;;  %v2454_v20 = vmul.f32 %v3547_v17, %v5089_v32  ;;  %v2455_v40 = vmul.f32 %v3547_v17, %v5091_v24  ;;  %v2062_v32 = vpop.f32.mrf.mxu1 }
 0x378   : > { %v1685_v4 = vpack.c.bf16 %v1669_v7, %v1668_v10  ;;  %v2456_v1 = vmul.f32 %v3549_v42, %v5097_v47  ;;  %v2457_v9 = vmul.f32 %v3549_v42, %v5099_v8  ;;  %v2398_v50 = vpop.xlane.xlu2 %2397  ;;  %v2009_v8 = vadd.f32 %v5219_v53, %v5556_v52  ;;  %v2015_v53 = vpop.f32.mrf.mxu0 }
 0x379   : > { %1699 = vst [vmem:[%s4872_s28 + $0x68] sm:$0xff] %v1683_v39  ;;  %v2486_v28 = vadd.f32 1.0, %v2454_v20  ;;  %v2487_v41 = vadd.f32 1.0, %v2455_v40  ;;  %3550 = vrcp.f32 %v2398_v50 }
 0x37a   : > { %1701 = vst [vmem:[%s4872_s28 + $0x78] sm:$0xff] %v1685_v4  ;;  %v2488_v27 = vadd.f32 1.0, %v2456_v1  ;;  %v2489_v36 = vadd.f32 1.0, %v2457_v9  ;;  %v2058_v30 = vadd.f32 %v5225_v58, %v2009_v8 }
 0x37b   : > { %v2518_v24 = vmul.f32 %v2486_v28, %v4682_v18  ;;  %v2519_v16 = vmul.f32 %v2487_v41, %v2053_v59 }
 0x37c   : > { %v2520_v47 = vmul.f32 %v2488_v27, %v4694_v34  ;;  %v2521_v54 = vmul.f32 %v2489_v36, %v2055_v6 }
 0x37d   : > { %vm2550_vm0 = vcmp.gt.f32.partialorder %v2518_v24, 0.0  ;;  %vm2551_vm1 = vcmp.gt.f32.partialorder %v2519_v16, 0.0  ;;  %v2582_v61 = vmul.f32 0.01, %v2518_v24  ;;  %v2583_v37 = vmul.f32 0.01, %v2519_v16 }
 0x37e   : > { %vm2552_vm2 = vcmp.gt.f32.partialorder %v2520_v47, 0.0  ;;  %vm2553_vm3 = vcmp.gt.f32.partialorder %v2521_v54, 0.0  ;;  %v2584_v0 = vmul.f32 0.01, %v2520_v47  ;;  %v2585_v21 = vmul.f32 0.01, %v2521_v54 }
 0x37f   : > { %v3551_v11 = vpop.eup %3550  ;;  %v2614_v14 = vsel %vm2550_vm0, %v2518_v24, %v2582_v61  ;;  %v2615_v18 = vsel %vm2551_vm1, %v2519_v16, %v2583_v37  ;;  %v2064_v40 = vpop.f32.mrf.mxu1 }
 0x380   : > { %v2646_v44 = vpack.c.bf16 %v2615_v18, %v2614_v14  ;;  %v2616_v19 = vsel %vm2552_vm2, %v2520_v47, %v2584_v0  ;;  %v2617_v34 = vsel %vm2553_vm3, %v2521_v54, %v2585_v21  ;;  %v2458_v17 = vmul.f32 %v3551_v11, %v5105_v3  ;;  %v2401_v10 = vpop.xlane.xlu0 %2400  ;;  %v2018_v24 = vpop.f32.mrf.mxu0 }
 0x381   : > { %v2647_v43 = vpack.c.bf16 %v2617_v34, %v2616_v19  ;;  %v2459_v42 = vmul.f32 %v3551_v11, %v5107_v12  ;;  %3552 = vrcp.f32 %v2401_v10  ;;  %v2011_v3 = vadd.f32 %v5236_v48, %v5556_v52 }
 0x382   : > { %2662 = vst [vmem:[%s4872_s28 + $0x80] sm:$0xff] %v2646_v44  ;;  %v2490_v7 = vadd.f32 1.0, %v2458_v17  ;;  %v2014_v48 = vadd.f32 %v5256_v56, %v5556_v52  ;;  %v2016_v34 = vadd.f32 %v2015_v53, %v5556_v52  ;;  %v2019_v53 = vadd.f32 %v2018_v24, %v5556_v52 }
 0x383   : > { %2663 = vst [vmem:[%s4872_s28 + $0x88] sm:$0xff] %v2647_v43  ;;  %v2491_v39 = vadd.f32 1.0, %v2459_v42  ;;  %v2060_v6 = vadd.f32 %v5245_v5, %v2011_v3 }
 0x384   : > { %v2522_v20 = vmul.f32 %v2490_v7, %v4708_v29  ;;  %v2063_v61 = vadd.f32 %v2062_v32, %v2014_v48 }
 0x385   : > { %v2523_v4 = vmul.f32 %v2491_v39, %v2058_v30 }
 0x386   : > { %vm2554_vm4 = vcmp.gt.f32.partialorder %v2522_v20, 0.0  ;;  %v2586_v1 = vmul.f32 0.01, %v2522_v20 }
 0x387   : > { %v3553_v9 = vpop.eup %3552  ;;  %vm2555_vm5 = vcmp.gt.f32.partialorder %v2523_v4, 0.0  ;;  %v2587_v58 = vmul.f32 0.01, %v2523_v4  ;;  %v2067_v54 = vpop.f32.mrf.mxu1 }
 0x388   : > { %v2618_v50 = vsel %vm2554_vm4, %v2522_v20, %v2586_v1  ;;  %v2460_v12 = vmul.f32 %v3553_v9, %v5113_v62  ;;  %v2461_v59 = vmul.f32 %v3553_v9, %v5115_v38  ;;  %v2404_v28 = vpop.xlane.xlu1 %2403  ;;  %v2020_v19 = vpop.f32.mrf.mxu0  ;;  %v2065_v20 = vadd.f32 %v2064_v40, %v2016_v34 }
 0x389   : > { %v2619_v41 = vsel %vm2555_vm5, %v2523_v4, %v2587_v58  ;;  %3554 = vrcp.f32 %v2404_v28  ;;  %v2021_v48 = vadd.f32 %v2020_v19, %v5556_v52 }
 0x38a   : > { %v2648_v29 = vpack.c.bf16 %v2619_v41, %v2618_v50  ;;  %v2492_v27 = vadd.f32 1.0, %v2460_v12  ;;  %v2493_v36 = vadd.f32 1.0, %v2461_v59  ;;  %v2068_v50 = vadd.f32 %v2067_v54, %v2019_v53 }
 0x38c   : > { %2664 = vst [vmem:[%s4872_s28 + $0x90] sm:$0xff] %v2648_v29  ;;  %v2524_v16 = vmul.f32 %v2492_v27, %v4720_v25  ;;  %v2525_v47 = vmul.f32 %v2493_v36, %v2060_v6 }
 0x38e   : > { %vm2556_vm6 = vcmp.gt.f32.partialorder %v2524_v16, 0.0  ;;  %vm2557_vm7 = vcmp.gt.f32.partialorder %v2525_v47, 0.0  ;;  %v2588_v62 = vmul.f32 0.01, %v2524_v16  ;;  %v2589_v38 = vmul.f32 0.01, %v2525_v47 }
 0x38f   : > { %v3555_v8 = vpop.eup %3554  ;;  %v2069_v7 = vpop.f32.mrf.mxu1 }
 0x390   : > { %v2620_v37 = vsel %vm2556_vm6, %v2524_v16, %v2588_v62  ;;  %v2621_v0 = vsel %vm2557_vm7, %v2525_v47, %v2589_v38  ;;  %v2462_v5 = vmul.f32 %v3555_v8, %v5121_v49  ;;  %v2463_v21 = vmul.f32 %v3555_v8, %v5123_v35  ;;  %v2407_v11 = vpop.xlane.xlu2 %2406  ;;  %v2023_v58 = vpop.f32.mrf.mxu0 }
 0x391   : > { %v2649_v56 = vpack.c.bf16 %v2621_v0, %v2620_v37  ;;  %3556 = vrcp.f32 %v2407_v11  ;;  %v2070_v0 = vadd.f32 %v2069_v7, %v2021_v48 }
 0x392   : > { %v2494_v14 = vadd.f32 1.0, %v2462_v5  ;;  %v2495_v25 = vadd.f32 1.0, %v2463_v21  ;;  %v2024_v21 = vadd.f32 %v2023_v58, %v5556_v52 }
 0x393   : > { %2665 = vst [vmem:[%s4872_s28 + $0x98] sm:$0xff] %v2649_v56 }
 0x394   : > { %v2526_v18 = vmul.f32 %v2494_v14, %v4734_v45  ;;  %v2527_v44 = vmul.f32 %v2495_v25, %v2063_v61 }
 0x396   : > { %vm2558_vm8 = vcmp.gt.f32.partialorder %v2526_v18, 0.0  ;;  %vm2559_vm9 = vcmp.gt.f32.partialorder %v2527_v44, 0.0  ;;  %v2590_v32 = vmul.f32 0.01, %v2526_v18  ;;  %v2591_v17 = vmul.f32 0.01, %v2527_v44 }
 0x397   : > { %v3557_v49 = vpop.eup %3556  ;;  %v2072_v6 = vpop.f32.mrf.mxu1 }
 0x398   : > { %v2622_v10 = vsel %vm2558_vm8, %v2526_v18, %v2590_v32  ;;  %v2623_v35 = vsel %vm2559_vm9, %v2527_v44, %v2591_v17  ;;  %v2464_v43 = vmul.f32 %v3557_v49, %v5129_v31  ;;  %v2465_v30 = vmul.f32 %v3557_v49, %v5131_v22  ;;  %v2410_v42 = vpop.xlane.xlu0 %2409  ;;  %v2025_v61 = vpop.f32.mrf.mxu0 }
 0x399   : > { %v2650_v39 = vpack.c.bf16 %v2623_v35, %v2622_v10  ;;  %3558 = vrcp.f32 %v2410_v42  ;;  %v2073_v18 = vadd.f32 %v2072_v6, %v2024_v21  ;;  %v2026_v42 = vadd.f32 %v2025_v61, %v5556_v52 }
 0x39a   : > { %v2496_v45 = vadd.f32 1.0, %v2464_v43  ;;  %v2497_v4 = vadd.f32 1.0, %v2465_v30 }
 0x39b   : > { %2666 = vst [vmem:[%s4872_s28 + $0xa0] sm:$0xff] %v2650_v39 }
 0x39c   : > { %v2528_v1 = vmul.f32 %v2496_v45, %v4746_v55  ;;  %v2529_v3 = vmul.f32 %v2497_v4, %v2065_v20  ;;  %v5557_v4 = vld [vmem:[#allocation24_spill] sm:$0xff] }
 0x39e   : > { %vm2560_vm10 = vcmp.gt.f32.partialorder %v2528_v1, 0.0  ;;  %vm2561_vm11 = vcmp.gt.f32.partialorder %v2529_v3, 0.0  ;;  %v2592_v9 = vmul.f32 0.01, %v2528_v1  ;;  %v2593_v31 = vmul.f32 0.01, %v2529_v3 }
 0x39f   : > { %v3559_v22 = vpop.eup %3558  ;;  %v2074_v14 = vpop.f32.mrf.mxu1 }
 0x3a0   : > { %v2624_v12 = vsel %vm2560_vm10, %v2528_v1, %v2592_v9  ;;  %v2625_v59 = vsel %vm2561_vm11, %v2529_v3, %v2593_v31  ;;  %v2466_v28 = vmul.f32 %v3559_v22, %v5137_v15  ;;  %v2467_v40 = vmul.f32 %v3559_v22, %v5139_v23  ;;  %v2413_v41 = vpop.xlane.xlu1 %2412  ;;  %v2028_v35 = vpop.f32.mrf.mxu0  ;;  %v5558_v1 = vld [vmem:[#allocation25_spill] sm:$0xff] }
 0x3a1   : > { %v2651_v29 = vpack.c.bf16 %v2625_v59, %v2624_v12  ;;  %3560 = vrcp.f32 %v2413_v41  ;;  %v2075_v58 = vadd.f32 %v2074_v14, %v2026_v42  ;;  %v5559_v12 = vld [vmem:[#allocation51_spill] sm:$0xff] }
 0x3a2   : > { %v2498_v27 = vadd.f32 1.0, %v2466_v28  ;;  %v2499_v55 = vadd.f32 1.0, %v2467_v40 }
 0x3a3   : > { %2667 = vst [vmem:[%s4872_s28 + $0xa8] sm:$0xff] %v2651_v29 }
 0x3a4   : > { %v2530_v36 = vmul.f32 %v2498_v27, %v4760_v26  ;;  %v2531_v24 = vmul.f32 %v2499_v55, %v2068_v50  ;;  %v2029_v50 = vadd.f32 %v2028_v35, %v5556_v52 }
 0x3a6   : > { %vm2562_vm12 = vcmp.gt.f32.partialorder %v2530_v36, 0.0  ;;  %vm2563_vm13 = vcmp.gt.f32.partialorder %v2531_v24, 0.0  ;;  %v2594_v16 = vmul.f32 0.01, %v2530_v36  ;;  %v2595_v47 = vmul.f32 0.01, %v2531_v24 }
 0x3a7   : > { %v3561_v15 = vpop.eup %3560 }
 0x3a8   : > { %v2626_v62 = vsel %vm2562_vm12, %v2530_v36, %v2594_v16  ;;  %v2627_v23 = vsel %vm2563_vm13, %v2531_v24, %v2595_v47  ;;  %v2468_v38 = vmul.f32 %v3561_v15, %v5145_v2  ;;  %v2469_v54 = vmul.f32 %v3561_v15, %v5147_v63  ;;  %v2416_v8 = vpop.xlane.xlu2 %2415  ;;  %v2030_v40 = vpop.f32.mrf.mxu0  ;;  %v5560_v24 = vld [vmem:[#allocation28_spill] sm:$0xff]  ;;  %v5561_v16 = vld [vmem:[#allocation15_spill] sm:$0xff] }
 0x3a9   : > { %v2652_v37 = vpack.c.bf16 %v2627_v23, %v2626_v62  ;;  %3562 = vrcp.f32 %v2416_v8  ;;  %v5562_v8 = vld [vmem:[#allocation52_spill] sm:$0xff] }
 0x3aa   : > { %v2500_v26 = vadd.f32 1.0, %v2468_v38  ;;  %v2501_v5 = vadd.f32 1.0, %v2469_v54 }
 0x3ab   : > { %2668 = vst [vmem:[%s4872_s28 + $0xb0] sm:$0xff] %v2652_v37 }
 0x3ac   : > { %v2532_v11 = vmul.f32 %v2500_v26, %v4772_v60  ;;  %v2533_v56 = vmul.f32 %v2501_v5, %v2070_v0  ;;  %v2031_v26 = vadd.f32 %v2030_v40, %v5556_v52 }
 0x3ae   : > { %vm2564_vm14 = vcmp.gt.f32.partialorder %v2532_v11, 0.0  ;;  %vm2565_vm15 = vcmp.gt.f32.partialorder %v2533_v56, 0.0  ;;  %v2596_v2 = vmul.f32 0.01, %v2532_v11  ;;  %v2597_v25 = vmul.f32 0.01, %v2533_v56 }
 0x3af   : > { %v3563_v63 = vpop.eup %3562 }
 0x3b0   : > { %v2628_v44 = vsel %vm2564_vm14, %v2532_v11, %v2596_v2  ;;  %v2629_v19 = vsel %vm2565_vm15, %v2533_v56, %v2597_v25  ;;  %v2470_v34 = vmul.f32 %v3563_v63, %v5153_v46  ;;  %v2471_v32 = vmul.f32 %v3563_v63, %v5155_v51  ;;  %v2419_v17 = vpop.xlane.xlu0 %2418  ;;  %v2077_v46 = vpop.f32.mrf.mxu1  ;;  %v5563_v25 = vld [vmem:[#allocation29_spill] sm:$0xff] }
 0x3b1   : > { %v2653_v49 = vpack.c.bf16 %v2629_v19, %v2628_v44  ;;  %3564 = vrcp.f32 %v2419_v17  ;;  %v2078_v55 = vadd.f32 %v2077_v46, %v2029_v50  ;;  %v2033_v21 = vpop.f32.mrf.mxu0 }
 0x3b2   : > { %v2502_v10 = vadd.f32 1.0, %v2470_v34  ;;  %v2503_v60 = vadd.f32 1.0, %v2471_v32 }
 0x3b3   : > { %2669 = vst [vmem:[%s4872_s28 + $0xb8] sm:$0xff] %v2653_v49 }
 0x3b4   : > { %v2534_v43 = vmul.f32 %v2502_v10, %v4786_v57  ;;  %v2535_v30 = vmul.f32 %v2503_v60, %v2073_v18  ;;  %v5564_v18 = vld [vmem:[#allocation16_spill] sm:$0xff]  ;;  %v2034_v10 = vadd.f32 %v2033_v21, %v5556_v52  ;;  %v5565_v60 = vld [vmem:[#allocation53_spill] sm:$0xff] }
 0x3b6   : > { %vm2566_vm0 = vcmp.gt.f32.partialorder %v2534_v43, 0.0  ;;  %vm2567_vm1 = vcmp.gt.f32.partialorder %v2535_v30, 0.0  ;;  %v2598_v7 = vmul.f32 0.01, %v2534_v43  ;;  %v2599_v39 = vmul.f32 0.01, %v2535_v30 }
 0x3b7   : > { %v3565_v45 = vpop.eup %3564 }
 0x3b8   : > { %v2630_v51 = vsel %vm2566_vm0, %v2534_v43, %v2598_v7  ;;  %v2631_v20 = vsel %vm2567_vm1, %v2535_v30, %v2599_v39  ;;  %v2472_v53 = vmul.f32 %v3565_v45, %v5557_v4  ;;  %v2473_v3 = vmul.f32 %v3565_v45, %v5558_v1  ;;  %v2422_v9 = vpop.xlane.xlu1 %2421  ;;  %v2079_v62 = vpop.f32.mrf.mxu1 }
 0x3b9   : > { %v2654_v31 = vpack.c.bf16 %v2631_v20, %v2630_v51  ;;  %3566 = vrcp.f32 %v2422_v9  ;;  %v2080_v32 = vadd.f32 %v2079_v62, %v2031_v26  ;;  %v5566_v20 = vld [vmem:[#allocation32_spill] sm:$0xff] }
 0x3ba   : > { %v2504_v57 = vadd.f32 1.0, %v2472_v53  ;;  %v2505_v22 = vadd.f32 1.0, %v2473_v3  ;;  %v5567_v53 = vld [vmem:[#allocation30_spill] sm:$0xff]  ;;  %v2035_v3 = vpop.f32.mrf.mxu0 }
 0x3bb   : > { %2670 = vst [vmem:[%s4872_s28 + $0xc0] sm:$0xff] %v2654_v31 }
 0x3bc   : > { %v2536_v59 = vmul.f32 %v2504_v57, %v5559_v12  ;;  %v2537_v28 = vmul.f32 %v2505_v22, %v2075_v58  ;;  %v5568_v58 = vld [vmem:[#allocation54_spill] sm:$0xff] }
 0x3be   : > { %vm2568_vm2 = vcmp.gt.f32.partialorder %v2536_v59, 0.0  ;;  %vm2569_vm3 = vcmp.gt.f32.partialorder %v2537_v28, 0.0  ;;  %v2600_v41 = vmul.f32 0.01, %v2536_v59  ;;  %v2601_v29 = vmul.f32 0.01, %v2537_v28 }
 0x3bf   : > { %v3567_v27 = vpop.eup %3566 }
 0x3c0   : > { %v2632_v6 = vsel %vm2568_vm2, %v2536_v59, %v2600_v41  ;;  %v2633_v36 = vsel %vm2569_vm3, %v2537_v28, %v2601_v29  ;;  %v2474_v48 = vmul.f32 %v3567_v27, %v5560_v24  ;;  %v2475_v47 = vmul.f32 %v3567_v27, %v5561_v16  ;;  %v2425_v15 = vpop.xlane.xlu2 %2424  ;;  %v2082_v49 = vpop.f32.mrf.mxu1  ;;  %v5570_v24 = vld [vmem:[#allocation17_spill] sm:$0xff] }
 0x3c1   : > { %v2655_v23 = vpack.c.bf16 %v2633_v36, %v2632_v6  ;;  %3568 = vrcp.f32 %v2425_v15  ;;  %v2083_v39 = vadd.f32 %v2082_v49, %v2034_v10  ;;  %v2036_v59 = vadd.f32 %v2035_v3, %v5556_v52  ;;  %v5569_v6 = vld [vmem:[#allocation33_spill] sm:$0xff] }
 0x3c2   : > { %v2506_v38 = vadd.f32 1.0, %v2474_v48  ;;  %v2507_v54 = vadd.f32 1.0, %v2475_v47 }
 0x3c3   : > { %2671 = vst [vmem:[%s4872_s28 + $0xc8] sm:$0xff] %v2655_v23  ;;  %v2038_v23 = vpop.f32.mrf.mxu0 }
 0x3c4   : > { %v2538_v61 = vmul.f32 %v2506_v38, %v5562_v8  ;;  %v2539_v37 = vmul.f32 %v2507_v54, %v2078_v55  ;;  %v2039_v38 = vadd.f32 %v2038_v23, %v5556_v52  ;;  %v5571_v54 = vld [vmem:[#allocation55_spill] sm:$0xff] }
 0x3c6   : > { %vm2570_vm4 = vcmp.gt.f32.partialorder %v2538_v61, 0.0  ;;  %vm2571_vm5 = vcmp.gt.f32.partialorder %v2539_v37, 0.0  ;;  %v2602_v0 = vmul.f32 0.01, %v2538_v61  ;;  %v2603_v5 = vmul.f32 0.01, %v2539_v37 }
 0x3c7   : > { %v3569_v11 = vpop.eup %3568  ;;  %v2428_v56 = vpop.xlane.xlu0 %2427 }
 0x3c8   : > { %v2634_v14 = vsel %vm2570_vm4, %v2538_v61, %v2602_v0  ;;  %v2635_v2 = vsel %vm2571_vm5, %v2539_v37, %v2603_v5  ;;  %v2476_v63 = vmul.f32 %v3569_v11, %v5563_v25  ;;  %v2477_v44 = vmul.f32 %v3569_v11, %v5564_v18  ;;  %v2084_v12 = vpop.f32.mrf.mxu1  ;;  %v5573_v25 = vld [vmem:[#allocation18_spill] sm:$0xff] }
 0x3c9   : > { %v2656_v19 = vpack.c.bf16 %v2635_v2, %v2634_v14  ;;  %3570 = vrcp.f32 %v2428_v56  ;;  %v2085_v15 = vadd.f32 %v2084_v12, %v2036_v59  ;;  %v5572_v14 = vld [vmem:[#allocation34_spill] sm:$0xff] }
 0x3ca   : > { %v2508_v34 = vadd.f32 1.0, %v2476_v63  ;;  %v2509_v17 = vadd.f32 1.0, %v2477_v44 }
 0x3cb   : > { %2672 = vst [vmem:[%s4872_s28 + $0xd0] sm:$0xff] %v2656_v19 }
 0x3cc   : > { %v2540_v35 = vmul.f32 %v2508_v34, %v5565_v60  ;;  %v2541_v43 = vmul.f32 %v2509_v17, %v2080_v32  ;;  %v5574_v34 = vld [vmem:[#allocation56_spill] sm:$0xff] }
 0x3ce   : > { %vm2572_vm6 = vcmp.gt.f32.partialorder %v2540_v35, 0.0  ;;  %vm2573_vm7 = vcmp.gt.f32.partialorder %v2541_v43, 0.0  ;;  %v2604_v30 = vmul.f32 0.01, %v2540_v35  ;;  %v2605_v42 = vmul.f32 0.01, %v2541_v43 }
 0x3cf   : > { %v3571_v7 = vpop.eup %3570  ;;  %v2431_v46 = vpop.xlane.xlu1 %2430 }
 0x3d0   : > { %v2636_v45 = vsel %vm2572_vm6, %v2540_v35, %v2604_v30  ;;  %v2637_v51 = vsel %vm2573_vm7, %v2541_v43, %v2605_v42  ;;  %v2478_v4 = vmul.f32 %v3571_v7, %v5566_v20  ;;  %v2479_v1 = vmul.f32 %v3571_v7, %v5567_v53  ;;  %v2087_v0 = vpop.f32.mrf.mxu1  ;;  %v2040_v42 = vpop.f32.mrf.mxu0 }
 0x3d1   : > { %v2657_v9 = vpack.c.bf16 %v2637_v51, %v2636_v45  ;;  %3572 = vrcp.f32 %v2431_v46  ;;  %v2088_v21 = vadd.f32 %v2087_v0, %v2039_v38  ;;  %v2041_v7 = vadd.f32 %v2040_v42, %v5556_v52 }
 0x3d2   : > { %v2510_v31 = vadd.f32 1.0, %v2478_v4  ;;  %v2511_v57 = vadd.f32 1.0, %v2479_v1  ;;  %v5575_v1 = vld [vmem:[#allocation57_spill] sm:$0xff] }
 0x3d3   : > { %2673 = vst [vmem:[%s4872_s28 + $0xd8] sm:$0xff] %v2657_v9 }
 0x3d4   : > { %v2542_v22 = vmul.f32 %v2510_v31, %v5568_v58  ;;  %v2543_v50 = vmul.f32 %v2511_v57, %v2083_v39 }
 0x3d6   : > { %vm2574_vm8 = vcmp.gt.f32.partialorder %v2542_v22, 0.0  ;;  %vm2575_vm9 = vcmp.gt.f32.partialorder %v2543_v50, 0.0  ;;  %v2606_v28 = vmul.f32 0.01, %v2542_v22  ;;  %v2607_v40 = vmul.f32 0.01, %v2543_v50 }
 0x3d7   : > { %v3573_v41 = vpop.eup %3572  ;;  %v2434_v29 = vpop.xlane.xlu2 %2433 }
 0x3d8   : > { %v2638_v27 = vsel %vm2574_vm8, %v2542_v22, %v2606_v28  ;;  %v2639_v55 = vsel %vm2575_vm9, %v2543_v50, %v2607_v40  ;;  %v2480_v36 = vmul.f32 %v3573_v41, %v5569_v6  ;;  %v2481_v48 = vmul.f32 %v3573_v41, %v5570_v24  ;;  %v2089_v46 = vpop.f32.mrf.mxu1 }
 0x3d9   : > { %v2658_v16 = vpack.c.bf16 %v2639_v55, %v2638_v27  ;;  %3574 = vrcp.f32 %v2434_v29  ;;  %v2090_v4 = vadd.f32 %v2089_v46, %v2041_v7 }
 0x3da   : > { %v2512_v47 = vadd.f32 1.0, %v2480_v36  ;;  %v2513_v62 = vadd.f32 1.0, %v2481_v48 }
 0x3db   : > { %2674 = vst [vmem:[%s4872_s28 + $0xe0] sm:$0xff] %v2658_v16 }
 0x3dc   : > { %v2544_v8 = vmul.f32 %v2512_v47, %v5571_v54  ;;  %v2545_v61 = vmul.f32 %v2513_v62, %v2085_v15 }
 0x3de   : > { %vm2576_vm10 = vcmp.gt.f32.partialorder %v2544_v8, 0.0  ;;  %vm2577_vm11 = vcmp.gt.f32.partialorder %v2545_v61, 0.0  ;;  %v2608_v37 = vmul.f32 0.01, %v2544_v8  ;;  %v2609_v26 = vmul.f32 0.01, %v2545_v61 }
 0x3df   : > { %v3575_v5 = vpop.eup %3574 }
 0x3e0   : > { %v2640_v11 = vsel %vm2576_vm10, %v2544_v8, %v2608_v37  ;;  %v2641_v56 = vsel %vm2577_vm11, %v2545_v61, %v2609_v26  ;;  %v2482_v2 = vmul.f32 %v3575_v5, %v5572_v14  ;;  %v2483_v63 = vmul.f32 %v3575_v5, %v5573_v25 }
 0x3e1   : > { %v2659_v18 = vpack.c.bf16 %v2641_v56, %v2640_v11 }
 0x3e2   : > { %v2514_v44 = vadd.f32 1.0, %v2482_v2  ;;  %v2515_v19 = vadd.f32 1.0, %v2483_v63 }
 0x3e3   : > { %2675 = vst [vmem:[%s4872_s28 + $0xe8] sm:$0xff] %v2659_v18 }
 0x3e4   : > { %v2546_v32 = vmul.f32 %v2514_v44, %v5574_v34  ;;  %v2547_v17 = vmul.f32 %v2515_v19, %v2088_v21 }
 0x3e5   : > { %v2437_v49 = vpop.xlane.xlu0 %2436 }
 0x3e6   : > { %vm2578_vm12 = vcmp.gt.f32.partialorder %v2546_v32, 0.0  ;;  %vm2579_vm13 = vcmp.gt.f32.partialorder %v2547_v17, 0.0  ;;  %v2610_v10 = vmul.f32 0.01, %v2546_v32  ;;  %v2611_v60 = vmul.f32 0.01, %v2547_v17 }
 0x3e7   : > { %3576 = vrcp.f32 %v2437_v49 }
 0x3e8   : > { %v2642_v35 = vsel %vm2578_vm12, %v2546_v32, %v2610_v10  ;;  %v2643_v43 = vsel %vm2579_vm13, %v2547_v17, %v2611_v60 }
 0x3e9   : > { %v2660_v30 = vpack.c.bf16 %v2643_v43, %v2642_v35 }
 0x3eb   : > { %2676 = vst [vmem:[%s4872_s28 + $0xf0] sm:$0xff] %v2660_v30 }
 0x3ed   : > { %v3577_v39 = vpop.eup %3576 }
 0x3ee   : > { %v2484_v45 = vmul.f32 %v3577_v39, %v5227_v33  ;;  %v2485_v51 = vmul.f32 %v3577_v39, %v5232_v13 }
 0x3f0   : > { %v2516_v20 = vadd.f32 1.0, %v2484_v45  ;;  %v2517_v53 = vadd.f32 1.0, %v2485_v51 }
 0x3f2   : > { %v2548_v3 = vmul.f32 %v2516_v20, %v5575_v1  ;;  %v2549_v9 = vmul.f32 %v2517_v53, %v2090_v4 }
 0x3f4   : > { %vm2580_vm14 = vcmp.gt.f32.partialorder %v2548_v3, 0.0  ;;  %vm2581_vm15 = vcmp.gt.f32.partialorder %v2549_v9, 0.0  ;;  %v2612_v33 = vmul.f32 0.01, %v2548_v3  ;;  %v2613_v52 = vmul.f32 0.01, %v2549_v9 }
 0x3f6   : > { %v2644_v13 = vsel %vm2580_vm14, %v2548_v3, %v2612_v33  ;;  %v2645_v31 = vsel %vm2581_vm15, %v2549_v9, %v2613_v52 }
 0x3f7   : > { %v2661_v57 = vpack.c.bf16 %v2645_v31, %v2644_v13 }
 0x3f9   : > { %2677 = vst [vmem:[%s4872_s28 + $0xf8] sm:$0xff] %v2661_v57 }
 0x3fa   : > { %3725 = shalt.err (!%p3722_p10)
}
 0x3fb   : > { %s3781_s17 = smov 128   ;;  %s3782_s29 = smov 8  }
 0x3fc   : > { %3317 = dma.vmem_to_hbm [thread:$0]  (%p3898_p3), %s2693_s13, 4096, %s2695_s12, %s2679_s22, %s3781_s17, %s3781_s17, %s3782_s29  }
 0x3fd PF: > { %s2709_s28 = sand.u32 1, %s3760_s18   ;;  %p5576_p12 = scmp.ge.s32.totalorder %s3772_s21, 2 }
 0x3fe   : > { %s2710_s16 = scalar_lea.sflag [#allocation4], %s2709_s28 }
 0x3ff   : > { %p3334_p13 = pnand %p5576_p12, %p3848_p6 }
 0x401   : > { %p3335_p0 = pneg %p3334_p13 }
 0x403   : > { %3755 = dma.done.wait (%p3335_p0), %s2710_s16, 4096  }
 0x404   : > { %3757 = vsyncadd (%p3335_p0), %s2710_s16, 4294963200  ;;  %p20_p5 = scmp.ge.s32.totalorder %s3885_s30, 4   ;;  %s5577_s18 = smov %s3764_s19 }
 0x405   : > { %s5578_s19 = smov %s3768_s20  ;;  %s5579_s20 = smov %s3894_s9 }
 0x406   : > { %s5580_s21 = smov %s3885_s30  ;;  %22 = sbr.rel (!%p20_p5) target bundleno = 7 (0x7), region = 97 }
 0x40b   :  { %2716 = vsyncpa [#allocation3], 1 }
 0x40c   :  { %2718 = vsyncpa [#allocation3 + $0x1], 1 }
 0x40d   :  { %2719 = vsyncpa [#allocation6], 1 }
 0x40e   :  { %2720 = vsyncpa [#allocation9], 1 }
 0x40f   :  { %2721 = vsyncpa [#allocation4], 1 }
 0x410   :  { %2723 = vsyncpa [#allocation4 + $0x1], 1 }

// kernel: tpu_custom_call.1
= control target key start
LH: loop header
LB: loop body
LE: loop exit
PB: predicated region body
PF: predicated region fallthrough
CT: control target
= control target key end

     0   :  { %10 = vsyncpa [#allocation3], 0  ;;  %s5379_s0 = inlined_call_operand.hbm [shape: bf16[512,256], index: 0, kind: input, shape index: {}]   ;;  %s5380_s1 = inlined_call_operand.hbm [shape: bf16[256,384], index: 1, kind: input, shape index: {}]   ;;  %s5381_s2 = inlined_call_operand.hbm [shape: f32[1,384], index: 2, kind: input, shape index: {}]   ;;  %s5382_s3 = inlined_call_operand.hbm [shape: bf16[128,256], index: 3, kind: input, shape index: {}]   ;;  %s5383_s4 = inlined_call_operand.vmem [shape: f32[1,256], index: 4, kind: input, shape index: {}]   ;;  %s5384_s5 = inlined_call_operand.hbm [shape: bf16[512,256], index: 5, kind: output, shape index: {}]  }
   0x1   :  { %12 = vsyncpa [#allocation3 + $0x1], 0 }
   0x2   :  { %13 = vsyncpa [#allocation6], 0 }
   0x3   :  { %14 = vsyncpa [#allocation9], 0 }
   0x4   :  { %15 = vsyncpa [#allocation4], 0 }
   0x5   :  { %17 = vsyncpa [#allocation4 + $0x1], 0  ;;  %s3813_s18 = smov 0   ;;  %s3815_s19 = smov 0  }
   0x6   :  { %s3817_s20 = smov 0   ;;  %s3819_s21 = smov 0  }
   0x7 LB: > { %s3834_s22 = sadd.s32 4294967295, %s3772_s21   ;;  %s2797_s23 = sadd.s32 4294967294, %s3772_s21   ;;  %s3772_s21 = sphi %s3819_s21, %s5580_s21   ;;  %s3768_s20 = sphi %s3817_s20, %s5579_s20   ;;  %s3764_s19 = sphi %s3815_s19, %s5578_s19   ;;  %s3760_s18 = sphi %s3813_s18, %s5577_s18  }
   0x8   : > { %p43_p0 = scmp.ne.s32.totalorder %s3764_s19, %s3760_s18  ;;  %p44_p1 = scmp.eq.s32.totalorder %s3834_s22, 0 }
   0x9   : > { %p151_p2 = scmp.eq.s32.totalorder %s3834_s22, 1  ;;  %p157_p3 = scmp.eq.s32.totalorder %s2797_s23, 1 }
   0xa   : > { %p3843_p4 = por %p44_p1, %p43_p0  ;;  %p2798_p5 = scmp.ge.s32.totalorder %s3772_s21, 1 }
   0xb   : > { %p3848_p6 = por %p157_p3, %p43_p0  ;;  %p164_p7 = scmp.lt.s32.totalorder %s3772_s21, 3 }
   0xc   : > { %s175_s28 = sshll.u32 %s5380_s1, 4  ;;  %s3774_s30 = smov [#allocation5]   ;;  %s176_s28 = int_to_ptr.hbm [resolvable:$true] %s175_s28 }
   0xd   : > { %p3856_p8 = pnand %p2798_p5, %p164_p7  ;;  %s177_s6 = sshll.u32 %s3774_s30, 4  ;;  %s178_s6 = int_to_ptr.vmem [resolvable:$true] %s177_s6 }
   0xe   : > { %s190_s10 = sshll.u32 %s5381_s2, 4  ;;  %s3775_s11 = smov 192   ;;  %s191_s10 = int_to_ptr.hbm [resolvable:$true] %s190_s10 }
   0xf   : > { %p3319_p9 = pneg %p3856_p8  ;;  %s3776_s12 = smov 12  }
  0x10   : > { %s3777_s13 = smov [#allocation7]   ;;  %s201_s17 = sshll.u32 %s5382_s3, 4  ;;  %s202_s17 = int_to_ptr.hbm [resolvable:$true] %s201_s17 }
  0x11   : > { %p3864_p10 = pnand %p3319_p9, %p44_p1  ;;  %s192_s14 = sshll.u32 %s3777_s13, 4  ;;  %s193_s14 = int_to_ptr.vmem [resolvable:$true] %s192_s14 }
  0x12   : > { %s3778_s23 = smov [#allocation8]   ;;  %s5385_s27 = smov 128  }
  0x13   : > { %3322 = dma.hbm_to_vmem [thread:$0]  (!%p3864_p10), %s176_s28, 6144, %s178_s6, [#allocation6], %s3775_s11, %s3775_s11, %s3776_s12  }
  0x14   : > { %3325 = dma.hbm_to_vmem [thread:$0]  (!%p3864_p10), %s191_s10, 48, %s193_s14, [#allocation6]  }
  0x15   : > { %s203_s26 = sshll.u32 %s3778_s23, 4  ;;  %s3780_s28 = smov 8   ;;  %s204_s26 = int_to_ptr.vmem [resolvable:$true] %s203_s26 }
  0x16   : > { %3328 = dma.hbm_to_vmem [thread:$0]  (!%p3864_p10), %s202_s17, 2048, %s204_s26, [#allocation9], %s5385_s27, %s5385_s27, %s3780_s28  }
  0x17   : > { %s3885_s30 = sadd.s32 1, %s3772_s21   ;;  %s30_s8 = sadd.s32 1, %s3768_s20 }
  0x18   : > { %s27_s6 = ssub.s32 %s3772_s21, %s3885_s30  ;;  %p37_p13 = scmp.ne.s32.totalorder %s3768_s20, %s3764_s19 }
  0x19   : > { %p28_p12 = scmp.eq.s32.totalorder %s27_s6, 0  ;;  %p38_p0 = scmp.eq.s32.totalorder %s3772_s21, 0 }
  0x1a   : > { %p3898_p3 = por %p151_p2, %p37_p13  ;;  %p3340_p5 = scmp.lt.s32.totalorder %s3772_s21, 2 }
  0x1b   : > { %s3894_s9 = scalar_select %p28_p12, %s3768_s20, %s30_s8  }
  0x1c   : > { %s220_s7 = sand.u32 1, %s3768_s20   ;;  %s3204_s11 = sshll.u32 %s3772_s21, 8 }
  0x1d   : > { %p39_p7 = por %p38_p0, %p37_p13  ;;  %s2803_s12 = sshll.u32 %s220_s7, 8 }
  0x1e   : > { %s230_s15 = scalar_lea.hbm %s5379_s0, %s3204_s11  ;;  %s224_s17 = scalar_lea.vmem [#allocation2], %s2803_s12 }
  0x1f   : > { %s231_s16 = sshll.u32 %s230_s15, 4  ;;  %s233_s23 = sshll.u32 %s224_s17, 4  ;;  %s232_s16 = int_to_ptr.hbm [resolvable:$true] %s231_s16  ;;  %s234_s23 = int_to_ptr.vmem [resolvable:$true] %s233_s23 }
  0x20   : > { %p3908_p9 = pnand %p3340_p5, %p39_p7  ;;  %s221_s6 = scalar_lea.sflag [#allocation3], %s220_s7 }
  0x21   : > { %s3668_s8 = sshra.s32 %s232_s16, 4  ;;  %s3675_s12 = scalar_lea.hbm %s5379_s0, 512  ;;  %s3669_s8 = int_to_ptr.hbm [resolvable:$true] %s3668_s8 }
  0x22   : > { %s3670_s27 = scalar_lea.hbm %s3669_s8, 256  ;;  %p3672_p10 = pneg %p3908_p9 }
  0x23   : > { %p3671_p2 = scmp.ne.s32.totalorder %s3669_s8, %s3670_s27  ;;  %p3676_p0 = scmp.lt.s32.totalorder %s3669_s8, %s5379_s0 }
  0x24   : > { %p3677_p5 = scmp.lt.s32.totalorder %s3675_s12, %s3670_s27 }
  0x25   : > { %p3673_p12 = pnand %p3672_p10, %p3671_p2 }
  0x26   : > { %p3678_p7 = por %p3677_p5, %p3676_p0 }
  0x27   : > { %p3674_p13 = pneg %p3673_p12 }
  0x29   : > { %p3679_p11 = pnand %p3678_p7, %p3674_p13 }
  0x2b   : > { %3682 = shalt.err (!%p3679_p11)
}
  0x2c   : > { %s5431_s7 = smov 128   ;;  %245 = sbr.rel (%p3856_p8) target bundleno = 1021 (0x3fd), region = 40 }
  0x2d   : > { %3332 = dma.hbm_to_vmem [thread:$0]  (!%p3908_p9), %s232_s16, 4096, %s234_s23, %s221_s6, %s5431_s7, %s5431_s7, %s3780_s28  }
  0x31   : > { %s3928_s17 = sand.u32 1, %s3764_s19  }
  0x32   : > { %s2808_s27 = sshll.u32 %s3928_s17, 8  ;;  %s248_s8 = scalar_lea.sflag [#allocation3], %s3928_s17 }
  0x33   : > { %s3934_s11 = scalar_lea.vmem [#allocation2], %s2808_s27 }
  0x34   : > { %3743 = dma.done.wait (%p3843_p4), %s248_s8, 4096  }
  0x35   : > { %3745 = vsyncadd (%p3843_p4), %s248_s8, 4294963200 }
  0x36   : > { %3747 = dma.done.wait (%p44_p1), [#allocation6], 6192  }
  0x37   : > { %3749 = vsyncadd (%p44_p1), [#allocation6], 4294961104 }
  0x38   : > { %3751 = dma.done.wait (%p44_p1), [#allocation9], 2048  }
  0x39   : > { %3753 = vsyncadd (%p44_p1), [#allocation9], 4294965248  ;;  %v2963_v0 = vld [vmem:[#allocation5 + $0xa8] sm:$0xf]  ;;  %v3227_v1 = vld [vmem:[#allocation5 + $0xb0] sm:$0xf0] }
  0x3a   : > { %v3059_v2 = vld [vmem:[#allocation5 + $0x168] sm:$0xf]  ;;  %v3948_v3 = vor.u32 %v3227_v1, %v2963_v0  ;;  %v3251_v4 = vld [vmem:[#allocation5 + $0x170] sm:$0xf0]  ;;  %v2951_v5 = vld [vmem:[#allocation5 + $0x90] sm:$0xf] }
  0x3b   : > { %v3224_v6 = vld [vmem:[#allocation5 + $0x98] sm:$0xf0]  ;;  %v3950_v7 = vor.u32 %v3251_v4, %v3059_v2  ;;  %v3047_v8 = vld [vmem:[#allocation5 + $0x150] sm:$0xf]  ;;  %v3226_v10 = vld [vmem:[#allocation5 + $0xac] sm:$0xf] }
  0x3c   : > { %v3248_v9 = vld [vmem:[#allocation5 + $0x158] sm:$0xf0]  ;;  %737 = vmatpush.bf16.msra.mxu0 %v3948_v3  ;;  %v3953_v11 = vor.u32 %v3224_v6, %v2951_v5  ;;  %v2965_v12 = vld [vmem:[#allocation5 + $0xb4] sm:$0xf0]  ;;  %v3250_v13 = vld [vmem:[#allocation5 + $0x16c] sm:$0xf] }
  0x3d   : > { %v3061_v14 = vld [vmem:[#allocation5 + $0x174] sm:$0xf0]  ;;  %786 = vmatpush.bf16.msra.mxu1 %v3950_v7  ;;  %v3956_v15 = vor.u32 %v3248_v9, %v3047_v8  ;;  %v3958_v16 = vor.u32 %v3226_v10, %v2965_v12  ;;  %v3221_v19 = vld [vmem:[#allocation5 + $0x80] sm:$0xf0]  ;;  %v3223_v22 = vld [vmem:[#allocation5 + $0x94] sm:$0xf] }
  0x3e   : > { %v3960_v17 = vor.u32 %v3250_v13, %v3061_v14  ;;  %v2939_v18 = vld [vmem:[#allocation5 + $0x78] sm:$0xf]  ;;  %v3245_v21 = vld [vmem:[#allocation5 + $0x140] sm:$0xf0]  ;;  %v2953_v23 = vld [vmem:[#allocation5 + $0x9c] sm:$0xf0] }
  0x3f   : > { %v3035_v20 = vld [vmem:[#allocation5 + $0x138] sm:$0xf]  ;;  %835 = vmatpush.bf16.msra.mxu2 %v3958_v16  ;;  %v3964_v24 = vor.u32 %v3223_v22, %v2953_v23  ;;  %v3247_v25 = vld [vmem:[#allocation5 + $0x154] sm:$0xf]  ;;  %v3049_v26 = vld [vmem:[#allocation5 + $0x15c] sm:$0xf0]  ;;  %v3967_v27 = vor.u32 %v3221_v19, %v2939_v18 }
  0x40   : > { %884 = vmatpush.bf16.msra.mxu3 %v3960_v17  ;;  %738 = vmatpush.bf16.msra.mxu0 %v3953_v11  ;;  %v3969_v28 = vor.u32 %v3247_v25, %v3049_v26  ;;  %v2927_v29 = vld [vmem:[#allocation5 + $0x60] sm:$0xf]  ;;  %v3218_v30 = vld [vmem:[#allocation5 + $0x68] sm:$0xf0]  ;;  %v3972_v31 = vor.u32 %v3245_v21, %v3035_v20  ;;  %v3220_v32 = vld [vmem:[#allocation5 + $0x7c] sm:$0xf] }
  0x41   : > { %787 = vmatpush.bf16.msra.mxu1 %v3956_v15  ;;  %v2941_v33 = vld [vmem:[#allocation5 + $0x84] sm:$0xf0]  ;;  %v3244_v34 = vld [vmem:[#allocation5 + $0x13c] sm:$0xf]  ;;  %v3023_v35 = vld [vmem:[#allocation5 + $0x120] sm:$0xf]  ;;  %v3981_v41 = vor.u32 %v3218_v30, %v2927_v29 }
  0x42   : > { %v3242_v36 = vld [vmem:[#allocation5 + $0x128] sm:$0xf0]  ;;  %v3037_v37 = vld [vmem:[#allocation5 + $0x144] sm:$0xf0]  ;;  %v3976_v38 = vor.u32 %v3220_v32, %v2941_v33  ;;  %v3217_v40 = vld [vmem:[#allocation5 + $0x64] sm:$0xf] }
  0x43   : > { %836 = vmatpush.bf16.msra.mxu2 %v3964_v24  ;;  %v3978_v39 = vor.u32 %v3244_v34, %v3037_v37  ;;  %v2929_v42 = vld [vmem:[#allocation5 + $0x6c] sm:$0xf0]  ;;  %v3241_v43 = vld [vmem:[#allocation5 + $0x124] sm:$0xf]  ;;  %v3984_v45 = vor.u32 %v3242_v36, %v3023_v35  ;;  %v2915_v46 = vld [vmem:[#allocation5 + $0x48] sm:$0xf] }
  0x44   : > { %885 = vmatpush.bf16.msra.mxu3 %v3969_v28  ;;  %739 = vmatpush.bf16.msra.mxu0 %v3967_v27  ;;  %v3025_v44 = vld [vmem:[#allocation5 + $0x12c] sm:$0xf0]  ;;  %v3215_v47 = vld [vmem:[#allocation5 + $0x50] sm:$0xf0]  ;;  %v3011_v48 = vld [vmem:[#allocation5 + $0x108] sm:$0xf]  ;;  %v3988_v50 = vor.u32 %v3217_v40, %v2929_v42 }
  0x45   : > { %788 = vmatpush.bf16.msra.mxu1 %v3972_v31  ;;  %v3239_v49 = vld [vmem:[#allocation5 + $0x110] sm:$0xf0]  ;;  %v3990_v51 = vor.u32 %v3241_v43, %v3025_v44  ;;  %v3214_v52 = vld [vmem:[#allocation5 + $0x4c] sm:$0xf]  ;;  %v3993_v53 = vor.u32 %v3215_v47, %v2915_v46  ;;  %v2917_v54 = vld [vmem:[#allocation5 + $0x54] sm:$0xf0] }
  0x46   : > { %v3238_v55 = vld [vmem:[#allocation5 + $0x10c] sm:$0xf]  ;;  %v3013_v56 = vld [vmem:[#allocation5 + $0x114] sm:$0xf0]  ;;  %v3996_v57 = vor.u32 %v3239_v49, %v3011_v48  ;;  %v2903_v58 = vld [vmem:[#allocation5 + $0x30] sm:$0xf]  ;;  %v4000_v62 = vor.u32 %v3214_v52, %v2917_v54 }
  0x47   : > { %837 = vmatpush.bf16.msra.mxu2 %v3976_v38  ;;  %v3212_v59 = vld [vmem:[#allocation5 + $0x38] sm:$0xf0]  ;;  %v2999_v60 = vld [vmem:[#allocation5 + $0xf0] sm:$0xf]  ;;  %v4002_v63 = vor.u32 %v3238_v55, %v3013_v56  ;;  %v3211_v0 = vld [vmem:[#allocation5 + $0x34] sm:$0xf] }
  0x48   : > { %886 = vmatpush.bf16.msra.mxu3 %v3978_v39  ;;  %740 = vmatpush.bf16.msra.mxu0 %v3981_v41  ;;  %v3236_v61 = vld [vmem:[#allocation5 + $0xf8] sm:$0xf0]  ;;  %v4005_v1 = vor.u32 %v3212_v59, %v2903_v58  ;;  %v2905_v2 = vld [vmem:[#allocation5 + $0x3c] sm:$0xf0]  ;;  %v3235_v4 = vld [vmem:[#allocation5 + $0xf4] sm:$0xf] }
  0x49   : > { %789 = vmatpush.bf16.msra.mxu1 %v3984_v45  ;;  %v3001_v5 = vld [vmem:[#allocation5 + $0xfc] sm:$0xf0]  ;;  %v4008_v6 = vor.u32 %v3236_v61, %v2999_v60  ;;  %v2891_v8 = vld [vmem:[#allocation5 + $0x18] sm:$0xf]  ;;  %v3209_v9 = vld [vmem:[#allocation5 + $0x20] sm:$0xf0]  ;;  %v4012_v13 = vor.u32 %v3211_v0, %v2905_v2 }
  0x4a   : > { %v2987_v10 = vld [vmem:[#allocation5 + $0xd8] sm:$0xf]  ;;  %v3233_v12 = vld [vmem:[#allocation5 + $0xe0] sm:$0xf0]  ;;  %v4014_v14 = vor.u32 %v3235_v4, %v3001_v5  ;;  %v2879_v18 = vld [vmem:[#allocation5] sm:$0xf]  ;;  %v4017_v20 = vor.u32 %v3209_v9, %v2891_v8 }
  0x4b   : > { %838 = vmatpush.bf16.msra.mxu2 %v3988_v50  ;;  %v3208_v19 = vld [vmem:[#allocation5 + $0x1c] sm:$0xf]  ;;  %v2893_v21 = vld [vmem:[#allocation5 + $0x24] sm:$0xf0]  ;;  %v4020_v25 = vor.u32 %v3233_v12, %v2987_v10  ;;  %v3206_v26 = vld [vmem:[#allocation5 + $0x8] sm:$0xf0] }
  0x4c   : > { %887 = vmatpush.bf16.msra.mxu3 %v3990_v51  ;;  %741 = vmatpush.bf16.msra.mxu0 %v3993_v53  ;;  %v3232_v22 = vld [vmem:[#allocation5 + $0xdc] sm:$0xf]  ;;  %v2989_v23 = vld [vmem:[#allocation5 + $0xe4] sm:$0xf0]  ;;  %v2975_v29 = vld [vmem:[#allocation5 + $0xc0] sm:$0xf]  ;;  %v4026_v36 = vor.u32 %v3208_v19, %v2893_v21  ;;  %v4032_v44 = vor.u32 %v3206_v26, %v2879_v18 }
  0x4d   : > { %790 = vmatpush.bf16.msra.mxu1 %v3996_v57  ;;  %v3230_v30 = vld [vmem:[#allocation5 + $0xc8] sm:$0xf0]  ;;  %v2815_v32 = vld [vmem:[%s3934_s11] sm:$0xf]  ;;  %v3270_v33 = vld [vmem:[%s3934_s11 + $0x4] sm:$0xf0]  ;;  %v4029_v40 = vor.u32 %v3232_v22, %v2989_v23 }
  0x4e   : > { %v2971_v34 = vld [vmem:[#allocation5 + $0xb0] sm:$0xf]  ;;  %v3228_v35 = vld [vmem:[#allocation5 + $0xb8] sm:$0xf0]  ;;  %v3269_v37 = vld [vmem:[%s3934_s11 + $0x4] sm:$0xf]  ;;  %v4036_v49 = vor.u32 %v3230_v30, %v2975_v29  ;;  %v4043_v0 = vor.u32 %v3270_v33, %v2815_v32 }
  0x4f   : > { %839 = vmatpush.bf16.msra.mxu2 %v4000_v62  ;;  %v3067_v42 = vld [vmem:[#allocation5 + $0x170] sm:$0xf]  ;;  %v3252_v43 = vld [vmem:[#allocation5 + $0x178] sm:$0xf0]  ;;  %v2817_v46 = vld [vmem:[%s3934_s11 + $0x8] sm:$0xf0]  ;;  %v4038_v52 = vor.u32 %v3228_v35, %v2971_v34 }
  0x50   : > { %888 = vmatpush.bf16.msra.mxu3 %v4002_v63  ;;  %742 = vmatpush.bf16.msra.mxu0 %v4005_v1  ;;  %v3205_v47 = vld [vmem:[#allocation5 + $0x4] sm:$0xf]  ;;  %v2881_v48 = vld [vmem:[#allocation5 + $0xc] sm:$0xf0]  ;;  %v3127_v56 = vld [vmem:[#allocation8 + $0x70] sm:$0xf]  ;;  %v4040_v58 = vor.u32 %v3252_v43, %v3067_v42  ;;  %v4049_v8 = vor.u32 %v3269_v37, %v2817_v46 }
  0x51   : > { %791 = vmatpush.bf16.msra.mxu1 %v4008_v6  ;;  %v3229_v54 = vld [vmem:[#allocation5 + $0xc4] sm:$0xf]  ;;  %v2977_v55 = vld [vmem:[#allocation5 + $0xcc] sm:$0xf0]  ;;  %v3268_v59 = vld [vmem:[#allocation8 + $0x74] sm:$0xf0]  ;;  %v4046_v2 = vor.u32 %v3205_v47, %v2881_v48 }
  0x52   : > { %v3267_v60 = vld [vmem:[#allocation8 + $0x74] sm:$0xf]  ;;  %v3129_v61 = vld [vmem:[#allocation8 + $0x78] sm:$0xf0]  ;;  %v3225_v5 = vld [vmem:[#allocation5 + $0xa0] sm:$0xf0]  ;;  %v4051_v9 = vor.u32 %v3229_v54, %v2977_v55  ;;  %v4055_v18 = vor.u32 %v3268_v59, %v3127_v56 }
  0x53   : > { %840 = vmatpush.bf16.msra.mxu2 %v4012_v13  ;;  %v2959_v4 = vld [vmem:[#allocation5 + $0x98] sm:$0xf]  ;;  %v3249_v12 = vld [vmem:[#allocation5 + $0x160] sm:$0xf0]  ;;  %v4057_v19 = vor.u32 %v3267_v60, %v3129_v61  ;;  %v3266_v23 = vld [vmem:[#allocation8 + $0x64] sm:$0xf0] }
  0x54   : > { %889 = vmatpush.bf16.msra.mxu3 %v4014_v14  ;;  %743 = vmatpush.bf16.msra.mxu0 %v4017_v20  ;;  %v3055_v10 = vld [vmem:[#allocation5 + $0x158] sm:$0xf]  ;;  %v3119_v21 = vld [vmem:[#allocation8 + $0x60] sm:$0xf]  ;;  %v4060_v22 = vor.u32 %v3225_v5, %v2959_v4  ;;  %v3265_v26 = vld [vmem:[#allocation8 + $0x64] sm:$0xf] }
  0x55   : > { %792 = vmatpush.bf16.msra.mxu1 %v4020_v25  ;;  %v3121_v29 = vld [vmem:[#allocation8 + $0x68] sm:$0xf0]  ;;  %v4064_v30 = vor.u32 %v3249_v12, %v3055_v10  ;;  %v2947_v32 = vld [vmem:[#allocation5 + $0x80] sm:$0xf]  ;;  %v3222_v33 = vld [vmem:[#allocation5 + $0x88] sm:$0xf0]  ;;  %v4070_v35 = vor.u32 %v3266_v23, %v3119_v21 }
  0x56   : > { %v3043_v34 = vld [vmem:[#allocation5 + $0x140] sm:$0xf]  ;;  %v4072_v37 = vor.u32 %v3265_v26, %v3121_v29  ;;  %v3246_v42 = vld [vmem:[#allocation5 + $0x148] sm:$0xf0]  ;;  %v4076_v43 = vor.u32 %v3222_v33, %v2947_v32  ;;  %v3111_v47 = vld [vmem:[#allocation8 + $0x50] sm:$0xf] }
  0x57   : > { %841 = vmatpush.bf16.msra.mxu2 %v4026_v36  ;;  %v4080_v46 = vor.u32 %v3246_v42, %v3043_v34  ;;  %v3264_v48 = vld [vmem:[#allocation8 + $0x54] sm:$0xf0]  ;;  %v3263_v54 = vld [vmem:[#allocation8 + $0x54] sm:$0xf]  ;;  %v3113_v55 = vld [vmem:[#allocation8 + $0x58] sm:$0xf0] }
  0x58   : > { %890 = vmatpush.bf16.msra.mxu3 %v4029_v40  ;;  %744 = vmatpush.bf16.msra.mxu0 %v4032_v44  ;;  %v4084_v56 = vor.u32 %v3264_v48, %v3111_v47  ;;  %v4086_v59 = vor.u32 %v3263_v54, %v3113_v55  ;;  %v2823_v60 = vld [vmem:[%s3934_s11 + $0x10] sm:$0xf]  ;;  %v3272_v61 = vld [vmem:[%s3934_s11 + $0x14] sm:$0xf0]  ;;  %v3271_v4 = vld [vmem:[%s3934_s11 + $0x14] sm:$0xf] }
  0x59   : > { %793 = vmatpush.bf16.msra.mxu1 %v4036_v49  ;;  %v2825_v5 = vld [vmem:[%s3934_s11 + $0x18] sm:$0xf0]  ;;  %v4096_v10 = vor.u32 %v3272_v61, %v2823_v60  ;;  %v2935_v21 = vld [vmem:[#allocation5 + $0x68] sm:$0xf]  ;;  %v3219_v23 = vld [vmem:[#allocation5 + $0x70] sm:$0xf0] }
  0x5a   : > { %5432 = vst [vmem:[#allocation15_spill] sm:$0xff] %v4084_v56  ;;  %v4098_v12 = vor.u32 %v3271_v4, %v2825_v5  ;;  %v3031_v26 = vld [vmem:[#allocation5 + $0x128] sm:$0xf]  ;;  %v4102_v29 = vor.u32 %v3219_v23, %v2935_v21  ;;  %v3243_v32 = vld [vmem:[#allocation5 + $0x130] sm:$0xf0]  ;;  %s4872_s28 = scalar_lea.vmem [#allocation10], %s2808_s27 }
  0x5b   : > { %745 = vmatmul.bf16.vlgmr.msra.gmra.mxu0 %v4043_v0  ;;  %842 = vmatpush.bf16.msra.mxu2 %v4046_v2  ;;  %5433 = vst [vmem:[#allocation16_spill] sm:$0xff] %v4086_v59  ;;  %v4105_v33 = vor.u32 %v3243_v32, %v3031_v26  ;;  %v3103_v34 = vld [vmem:[#allocation8 + $0x40] sm:$0xf]  ;;  %v3262_v42 = vld [vmem:[#allocation8 + $0x44] sm:$0xf0]  ;;  %s3302_s16 = sshll.u32 %s3834_s22, 8 }
  0x5c   : > { %933 = vmatpush.bf16.msrb.mxu0 %v4038_v52  ;;  %794 = vmatmul.bf16.vlgmr.msra.gmra.mxu1 %v4049_v8  ;;  %v3261_v47 = vld [vmem:[#allocation8 + $0x44] sm:$0xf]  ;;  %v4110_v48 = vor.u32 %v3262_v42, %v3103_v34  ;;  %v3105_v54 = vld [vmem:[#allocation8 + $0x48] sm:$0xf0]  ;;  %v2831_v60 = vld [vmem:[%s3934_s11 + $0x20] sm:$0xf]  ;;  %s2691_s6 = scalar_lea.hbm %s5384_s5, %s3302_s16 }
  0x5d   : > { %982 = vmatpush.bf16.msrb.mxu1 %v4040_v58  ;;  %891 = vmatpush.bf16.msra.mxu3 %v4051_v9  ;;  %v4112_v55 = vor.u32 %v3261_v47, %v3105_v54  ;;  %v3274_v61 = vld [vmem:[%s3934_s11 + $0x24] sm:$0xf0]  ;;  %v3273_v4 = vld [vmem:[%s3934_s11 + $0x24] sm:$0xf]  ;;  %v2833_v5 = vld [vmem:[%s3934_s11 + $0x28] sm:$0xf0] }
  0x5e   : > { %843 = vmatmul.bf16.vlgmr.msra.gmra.mxu2 %v4043_v0  ;;  %5434 = vst [vmem:[#allocation17_spill] sm:$0xff] %v4110_v48  ;;  %v4120_v21 = vor.u32 %v3274_v61, %v2831_v60  ;;  %v4122_v23 = vor.u32 %v3273_v4, %v2833_v5  ;;  %v2923_v26 = vld [vmem:[#allocation5 + $0x50] sm:$0xf]  ;;  %v3216_v32 = vld [vmem:[#allocation5 + $0x58] sm:$0xf0]  ;;  %s2692_s13 = sshll.u32 %s4872_s28, 4  ;;  %s2693_s13 = int_to_ptr.vmem [resolvable:$true] %s2692_s13 }
  0x5f   : > { %1172 = vmatpush.bf16.msrb.mxu2 %v4055_v18  ;;  %5435 = vst [vmem:[#allocation18_spill] sm:$0xff] %v4112_v55  ;;  %v3019_v34 = vld [vmem:[#allocation5 + $0x110] sm:$0xf]  ;;  %v4126_v42 = vor.u32 %v3216_v32, %v2923_v26  ;;  %v3240_v47 = vld [vmem:[#allocation5 + $0x118] sm:$0xf0]  ;;  %s2694_s12 = sshll.u32 %s2691_s6, 4  ;;  %s2695_s12 = int_to_ptr.hbm [resolvable:$true] %s2694_s12 }
  0x60   : > { %934 = vmatpush.bf16.msrb.mxu0 %v4060_v22  ;;  %892 = vmatmul.bf16.vlgmr.msra.gmra.mxu3 %v4049_v8  ;;  %5436 = vst [vmem:[#allocation19_spill] sm:$0xff] %v4120_v21  ;;  %v4129_v54 = vor.u32 %v3240_v47, %v3019_v34  ;;  %v3095_v60 = vld [vmem:[#allocation8 + $0x30] sm:$0xf]  ;;  %v3260_v61 = vld [vmem:[#allocation8 + $0x34] sm:$0xf0]  ;;  %s2679_s22 = scalar_lea.sflag [#allocation4], %s3928_s17 }
  0x61   : > { %1221 = vmatpush.bf16.msrb.mxu3 %v4057_v19  ;;  %983 = vmatpush.bf16.msrb.mxu1 %v4064_v30  ;;  %5437 = vst [vmem:[#allocation20_spill] sm:$0xff] %v4122_v23  ;;  %v3259_v4 = vld [vmem:[#allocation8 + $0x34] sm:$0xf]  ;;  %v4134_v5 = vor.u32 %v3260_v61, %v3095_v60  ;;  %v3097_v26 = vld [vmem:[#allocation8 + $0x38] sm:$0xf0]  ;;  %s3712_s14 = sshra.s32 %s2695_s12, 4  ;;  %s3713_s14 = int_to_ptr.hbm [resolvable:$true] %s3712_s14 }
  0x62   : > { %v4136_v32 = vor.u32 %v3259_v4, %v3097_v26  ;;  %v2839_v34 = vld [vmem:[%s3934_s11 + $0x30] sm:$0xf]  ;;  %v3276_v47 = vld [vmem:[%s3934_s11 + $0x34] sm:$0xf0]  ;;  %v3213_v61 = vld [vmem:[#allocation5 + $0x40] sm:$0xf0]  ;;  %p3719_p11 = scmp.lt.s32.totalorder %s3713_s14, %s5384_s5 }
  0x63   : > { %1173 = vmatpush.bf16.msrb.mxu2 %v4070_v35  ;;  %5438 = vst [vmem:[#allocation21_spill] sm:$0xff] %v4134_v5  ;;  %v2911_v60 = vld [vmem:[#allocation5 + $0x38] sm:$0xf]  ;;  %s3714_s15 = scalar_lea.hbm %s3713_s14, 256  ;;  %s3718_s8 = scalar_lea.hbm %s5384_s5, 512 }
  0x64   : > { %935 = vmatpush.bf16.msrb.mxu0 %v4076_v43  ;;  %5439 = vst [vmem:[#allocation22_spill] sm:$0xff] %v4136_v32  ;;  %v3007_v4 = vld [vmem:[#allocation5 + $0xf8] sm:$0xf]  ;;  %v4150_v26 = vor.u32 %v3213_v61, %v2911_v60  ;;  %v3089_v60 = vld [vmem:[#allocation8 + $0x28] sm:$0xf0]  ;;  %p3715_p1 = scmp.ne.s32.totalorder %s3713_s14, %s3714_s15  ;;  %p3720_p9 = scmp.lt.s32.totalorder %s3718_s8, %s3714_s15 }
  0x65   : > { %1222 = vmatpush.bf16.msrb.mxu3 %v4072_v37  ;;  %984 = vmatpush.bf16.msrb.mxu1 %v4080_v46 }
  0x66   : > { %p3716_p4 = pnand %p3715_p1, %p3898_p3  ;;  %p3721_p2 = por %p3720_p9, %p3719_p11 }
  0x67   : > { %1174 = vmatpush.bf16.msrb.mxu2 %v4084_v56 }
  0x68   : > { %936 = vmatpush.bf16.msrb.mxu0 %v4102_v29  ;;  %p3717_p8 = pneg %p3716_p4 }
  0x69   : > { %1223 = vmatpush.bf16.msrb.mxu3 %v4086_v59  ;;  %985 = vmatpush.bf16.msrb.mxu1 %v4105_v33 }
  0x6a   : > { %p3722_p10 = pnand %p3721_p2, %p3717_p8 }
  0x6b   : > { %750 = vmatmul.bf16.gmra.mxu0 %v4096_v10  ;;  %1175 = vmatpush.bf16.msrb.mxu2 %v4110_v48 }
  0x6c   : > { %799 = vmatmul.bf16.gmra.mxu1 %v4098_v12  ;;  %937 = vmatpush.bf16.msrb.mxu0 %v4126_v42 }
  0x6d   : > { %1224 = vmatpush.bf16.msrb.mxu3 %v4112_v55  ;;  %986 = vmatpush.bf16.msrb.mxu1 %v4129_v54  ;;  %v4144_v55 = vor.u32 %v3276_v47, %v2839_v34  ;;  %v3257_v47 = vld [vmem:[#allocation8 + $0x24] sm:$0xf] }
  0x6e   : > { %848 = vmatmul.bf16.gmra.mxu2 %v4096_v10  ;;  %v4160_v61 = vor.u32 %v3257_v47, %v3089_v60  ;;  %v2995_v47 = vld [vmem:[#allocation5 + $0xe0] sm:$0xf] }
  0x6f   : > { %1176 = vmatpush.bf16.msrb.mxu2 %v4134_v5  ;;  %5440 = vst [vmem:[#allocation23_spill] sm:$0xff] %v4144_v55 }
  0x70   : > { %897 = vmatmul.bf16.gmra.mxu3 %v4098_v12  ;;  %938 = vmatpush.bf16.msrb.mxu0 %v4150_v26  ;;  %5444 = vst [vmem:[#allocation27_spill] sm:$0xff] %v4160_v61 }
  0x71   : > { %1225 = vmatpush.bf16.msrb.mxu3 %v4136_v32  ;;  %v3237_v32 = vld [vmem:[#allocation5 + $0x100] sm:$0xf0] }
  0x72   : > { %v4153_v34 = vor.u32 %v3237_v32, %v3007_v4  ;;  %v2847_v32 = vld [vmem:[%s3934_s11 + $0x40] sm:$0xf]  ;;  %v3278_v4 = vld [vmem:[%s3934_s11 + $0x44] sm:$0xf0] }
  0x73   : > { %v4168_v59 = vor.u32 %v3278_v4, %v2847_v32  ;;  %v3255_v4 = vld [vmem:[#allocation8 + $0x14] sm:$0xf] }
  0x74   : > { %5442 = vst [vmem:[#allocation25_spill] sm:$0xff] %v4153_v34  ;;  %987 = vmatpush.bf16.msrb.mxu1 %v4153_v34 }
  0x75   : > { %1226 = vmatpush.bf16.msrb.mxu3 %v4160_v61  ;;  %5445 = vst [vmem:[#allocation28_spill] sm:$0xff] %v4168_v59  ;;  %v3234_v61 = vld [vmem:[#allocation5 + $0xe8] sm:$0xf0] }
  0x76   : > { %v4177_v32 = vor.u32 %v3234_v61, %v2995_v47  ;;  %v2855_v61 = vld [vmem:[%s3934_s11 + $0x50] sm:$0xf]  ;;  %v3280_v47 = vld [vmem:[%s3934_s11 + $0x54] sm:$0xf0] }
  0x77   : > { %v4192_v34 = vor.u32 %v3280_v47, %v2855_v61  ;;  %v3281_v47 = vld [vmem:[%s3934_s11 + $0x64] sm:$0xf] }
  0x78   : > { %988 = vmatpush.bf16.msrb.mxu1 %v4177_v32 }
  0x7b   : > { %755 = vmatmul.bf16.gmra.mxu0 %v4120_v21 }
  0x7c   : > { %804 = vmatmul.bf16.gmra.mxu1 %v4122_v23 }
  0x7e   : > { %853 = vmatmul.bf16.gmra.mxu2 %v4120_v21  ;;  %v3275_v21 = vld [vmem:[%s3934_s11 + $0x34] sm:$0xf] }
  0x80   : > { %902 = vmatmul.bf16.gmra.mxu3 %v4122_v23  ;;  %v2841_v23 = vld [vmem:[%s3934_s11 + $0x38] sm:$0xf0] }
  0x81   : > { %v4146_v48 = vor.u32 %v3275_v21, %v2841_v23  ;;  %v3087_v21 = vld [vmem:[#allocation8 + $0x20] sm:$0xf]  ;;  %v3258_v23 = vld [vmem:[#allocation8 + $0x24] sm:$0xf0] }
  0x82   : > { %v4158_v5 = vor.u32 %v3258_v23, %v3087_v21  ;;  %v2899_v21 = vld [vmem:[#allocation5 + $0x20] sm:$0xf]  ;;  %v3210_v23 = vld [vmem:[#allocation5 + $0x28] sm:$0xf0] }
  0x83   : > { %5441 = vst [vmem:[#allocation24_spill] sm:$0xff] %v4146_v48  ;;  %v4174_v60 = vor.u32 %v3210_v23, %v2899_v21  ;;  %v3081_v21 = vld [vmem:[#allocation8 + $0x18] sm:$0xf0] }
  0x84   : > { %5443 = vst [vmem:[#allocation26_spill] sm:$0xff] %v4158_v5  ;;  %1177 = vmatpush.bf16.msrb.mxu2 %v4158_v5  ;;  %v4184_v23 = vor.u32 %v3255_v4, %v3081_v21  ;;  %v2983_v4 = vld [vmem:[#allocation5 + $0xc8] sm:$0xf] }
  0x85   : > { %5447 = vst [vmem:[#allocation30_spill] sm:$0xff] %v4174_v60  ;;  %939 = vmatpush.bf16.msrb.mxu0 %v4174_v60 }
  0x86   : > { %5448 = vst [vmem:[#allocation31_spill] sm:$0xff] %v4184_v23  ;;  %1227 = vmatpush.bf16.msrb.mxu3 %v4184_v23  ;;  %v3231_v23 = vld [vmem:[#allocation5 + $0xd0] sm:$0xf0] }
  0x87   : > { %v4201_v61 = vor.u32 %v3231_v23, %v2983_v4  ;;  %v3283_v4 = vld [vmem:[%s3934_s11 + $0x74] sm:$0xf] }
  0x89   : > { %989 = vmatpush.bf16.msrb.mxu1 %v4201_v61 }
  0x8b   : > { %760 = vmatmul.bf16.gmra.mxu0 %v4144_v55 }
  0x8c   : > { %809 = vmatmul.bf16.gmra.mxu1 %v4146_v48 }
  0x8d   : > { %1847 = vmatpush.bf16.msra.mxu1 %v3950_v7  ;;  %v3254_v7 = vld [vmem:[#allocation8 + $0x4] sm:$0xf0] }
  0x8e   : > { %858 = vmatmul.bf16.gmra.mxu2 %v4144_v55  ;;  %v3277_v55 = vld [vmem:[%s3934_s11 + $0x44] sm:$0xf] }
  0x90   : > { %907 = vmatmul.bf16.gmra.mxu3 %v4146_v48  ;;  %v2849_v48 = vld [vmem:[%s3934_s11 + $0x48] sm:$0xf0] }
  0x91   : > { %v4170_v56 = vor.u32 %v3277_v55, %v2849_v48  ;;  %v3079_v48 = vld [vmem:[#allocation8 + $0x10] sm:$0xf]  ;;  %v3256_v55 = vld [vmem:[#allocation8 + $0x14] sm:$0xf0]  ;;  %1848 = vmatpush.bf16.msra.mxu1 %v3956_v15 }
  0x92   : > { %v4182_v5 = vor.u32 %v3256_v55, %v3079_v48  ;;  %v2887_v48 = vld [vmem:[#allocation5 + $0x8] sm:$0xf]  ;;  %v3207_v55 = vld [vmem:[#allocation5 + $0x10] sm:$0xf0] }
  0x93   : > { %5446 = vst [vmem:[#allocation29_spill] sm:$0xff] %v4170_v56  ;;  %v4198_v21 = vor.u32 %v3207_v55, %v2887_v48  ;;  %v2865_v48 = vld [vmem:[%s3934_s11 + $0x68] sm:$0xf0] }
  0x94   : > { %1178 = vmatpush.bf16.msrb.mxu2 %v4182_v5  ;;  %v4216_v55 = vor.u32 %v3281_v47, %v2865_v48  ;;  %v5452_v47 = vld [vmem:[#allocation30_spill] sm:$0xff] }
  0x95   : > { %940 = vmatpush.bf16.msrb.mxu0 %v4198_v21  ;;  %1849 = vmatpush.bf16.msra.mxu1 %v3972_v31 }
  0x99   : > { %1798 = vmatpush.bf16.msra.mxu0 %v3948_v3  ;;  %v3071_v3 = vld [vmem:[#allocation8] sm:$0xf]  ;;  %1850 = vmatpush.bf16.msra.mxu1 %v3984_v45  ;;  %v3284_v45 = vld [vmem:[%s3934_s11 + $0x74] sm:$0xf0] }
  0x9a   : > { %v4225_v15 = vor.u32 %v3254_v7, %v3071_v3  ;;  %v5453_v3 = vld [vmem:[#allocation17_spill] sm:$0xff] }
  0x9b   : > { %765 = vmatmul.bf16.gmra.mxu0 %v4168_v59 }
  0x9c   : > { %814 = vmatmul.bf16.gmra.mxu1 %v4170_v56  ;;  %1179 = vmatpush.bf16.msrb.mxu2 %v4225_v15 }
  0x9d   : > { %1799 = vmatpush.bf16.msra.mxu0 %v3953_v11  ;;  %v3253_v11 = vld [vmem:[#allocation8 + $0x4] sm:$0xf]  ;;  %1851 = vmatpush.bf16.msra.mxu1 %v3996_v57 }
  0x9e   : > { %863 = vmatmul.bf16.gmra.mxu2 %v4168_v59  ;;  %v3279_v59 = vld [vmem:[%s3934_s11 + $0x54] sm:$0xf] }
  0xa0   : > { %912 = vmatmul.bf16.gmra.mxu3 %v4170_v56  ;;  %v2857_v56 = vld [vmem:[%s3934_s11 + $0x58] sm:$0xf0]  ;;  %1896 = vmatpush.bf16.msra.mxu2 %v3958_v16  ;;  %v4262_v16 = vld [vmem:[#allocation7] sm:$0x7] }
  0xa1   : > { %v4194_v60 = vor.u32 %v3279_v59, %v2857_v56  ;;  %v2863_v56 = vld [vmem:[%s3934_s11 + $0x60] sm:$0xf]  ;;  %v3282_v59 = vld [vmem:[%s3934_s11 + $0x64] sm:$0xf0]  ;;  %1800 = vmatpush.bf16.msra.mxu0 %v3967_v27  ;;  %v3073_v27 = vld [vmem:[#allocation8 + $0x8] sm:$0xf0]  ;;  %1852 = vmatpush.bf16.msra.mxu1 %v4008_v6 }
  0xa2   : > { %v4214_v23 = vor.u32 %v3282_v59, %v2863_v56  ;;  %v4228_v31 = vor.u32 %v3253_v11, %v3073_v27  ;;  %v2873_v56 = vld [vmem:[%s3934_s11 + $0x78] sm:$0xf0] }
  0xa3   : > { %v4246_v59 = vor.u32 %v3283_v4, %v2873_v56  ;;  %v5454_v27 = vld [vmem:[#allocation18_spill] sm:$0xff] }
  0xa4   : > { %1228 = vmatpush.bf16.msrb.mxu3 %v4228_v31  ;;  %1897 = vmatpush.bf16.msra.mxu2 %v3964_v24 }
  0xa5   : > { %1801 = vmatpush.bf16.msra.mxu0 %v3981_v41  ;;  %v2871_v41 = vld [vmem:[%s3934_s11 + $0x70] sm:$0xf]  ;;  %1853 = vmatpush.bf16.msra.mxu1 %v4020_v25 }
  0xa8   : > { %1945 = vmatpush.bf16.msra.mxu3 %v3960_v17  ;;  %1898 = vmatpush.bf16.msra.mxu2 %v3976_v38  ;;  %v4267_v17 = vperm.slane %v4262_v16, 0 }
  0xa9   : > { %1802 = vmatpush.bf16.msra.mxu0 %v3993_v53  ;;  %v4244_v53 = vor.u32 %v3284_v45, %v2871_v41  ;;  %1854 = vmatpush.bf16.msra.mxu1 %v4036_v49 }
  0xab   : > { %770 = vmatmul.bf16.gmra.mxu0 %v4192_v34 }
  0xac   : > { %819 = vmatmul.bf16.gmra.mxu1 %v4194_v60  ;;  %1946 = vmatpush.bf16.msra.mxu3 %v3969_v28 }
  0xad   : > { %1803 = vmatpush.bf16.msra.mxu0 %v4005_v1  ;;  %1899 = vmatpush.bf16.msra.mxu2 %v3988_v50 }
  0xae   : > { %868 = vmatmul.bf16.gmra.mxu2 %v4192_v34 }
  0xb0   : > { %917 = vmatmul.bf16.gmra.mxu3 %v4194_v60 }
  0xb1   : > { %1804 = vmatpush.bf16.msra.mxu0 %v4017_v20  ;;  %1947 = vmatpush.bf16.msra.mxu3 %v3978_v39  ;;  %v4278_v39 = vperm.slane %v4262_v16, 1 }
  0xb2   : > { %1900 = vmatpush.bf16.msra.mxu2 %v4000_v62 }
  0xb5   : > { %1805 = vmatpush.bf16.msra.mxu0 %v4032_v44  ;;  %1948 = vmatpush.bf16.msra.mxu3 %v3990_v51 }
  0xb6   : > { %1901 = vmatpush.bf16.msra.mxu2 %v4012_v13 }
  0xb9   : > { %1949 = vmatpush.bf16.msra.mxu3 %v4002_v63 }
  0xba   : > { %1902 = vmatpush.bf16.msra.mxu2 %v4026_v36 }
  0xbb   : > { %775 = vmatmul.bf16.gmra.mxu0 %v4214_v23 }
  0xbc   : > { %824 = vmatmul.bf16.gmra.mxu1 %v4216_v55 }
  0xbd   : > { %1950 = vmatpush.bf16.msra.mxu3 %v4014_v14 }
  0xbe   : > { %873 = vmatmul.bf16.gmra.mxu2 %v4214_v23 }
  0xbf   : > { %1903 = vmatpush.bf16.msra.mxu2 %v4046_v2 }
  0xc0   : > { %922 = vmatmul.bf16.gmra.mxu3 %v4216_v55 }
  0xc1   : > { %1951 = vmatpush.bf16.msra.mxu3 %v4029_v40 }
  0xc5   : > { %1952 = vmatpush.bf16.msra.mxu3 %v4051_v9 }
  0xcb   : > { %780 = vmatmul.bf16.gmra.mxu0 %v4244_v53 }
  0xcc   : > { %829 = vmatmul.bf16.gmra.mxu1 %v4246_v59 }
  0xce   : > { %878 = vmatmul.bf16.gmra.mxu2 %v4244_v53 }
  0xd0   : > { %927 = vmatmul.bf16.gmra.mxu3 %v4246_v59 }
  0xd8   : > { %v746_v24 = vpop.f32.mrf.mxu0 }
  0xd9   : > { %v795_v28 = vpop.f32.mrf.mxu1  ;;  %v747_v38 = vadd.f32 %v746_v24, %v4267_v17  ;;  %v5455_v24 = vld [vmem:[#allocation19_spill] sm:$0xff] }
  0xdb   : > { %941 = vmatmul.bf16.vlgmr.msrb.gmra.mxu0 %v4043_v0  ;;  %v796_v50 = vadd.f32 %v795_v28, %v747_v38  ;;  %v5456_v28 = vld [vmem:[#allocation21_spill] sm:$0xff]  ;;  %v5457_v38 = vld [vmem:[#allocation20_spill] sm:$0xff] }
  0xdc   : > { %990 = vmatmul.bf16.vlgmr.msrb.gmra.mxu1 %v4049_v8  ;;  %1994 = vmatpush.bf16.msrb.mxu0 %v4038_v52 }
  0xdd   : > { %2043 = vmatpush.bf16.msrb.mxu1 %v4040_v58  ;;  %v1047_v13 = vmul.f32 0.01, %v796_v50  ;;  %vm1031_vm0 = vcmp.gt.f32.partialorder %v796_v50, 0.0 }
  0xdf   : > { %v1063_v36 = vsel %vm1031_vm0, %v796_v50, %v1047_v13 }
  0xe0   : > { %v748_v51 = vpop.f32.mrf.mxu0  ;;  %1995 = vmatpush.bf16.msrb.mxu0 %v4060_v22 }
  0xe1   : > { %v749_v57 = vadd.f32 %v748_v51, %v4267_v17  ;;  %v797_v62 = vpop.f32.mrf.mxu1  ;;  %v844_v63 = vpop.f32.mrf.mxu2  ;;  %2044 = vmatpush.bf16.msrb.mxu1 %v4064_v30  ;;  %v5459_v51 = vld [vmem:[#allocation22_spill] sm:$0xff] }
  0xe2   : > { %v845_v1 = vadd.f32 %v844_v63, %v4278_v39 }
  0xe3   : > { %v893_v6 = vpop.f32.mrf.mxu3  ;;  %v798_v14 = vadd.f32 %v797_v62, %v749_v57  ;;  %v5460_v57 = vld [vmem:[#allocation26_spill] sm:$0xff]  ;;  %v5461_v62 = vld [vmem:[#allocation27_spill] sm:$0xff] }
  0xe4   : > { %v4285_v20 = vadd.f32 %v893_v6, %v845_v1  ;;  %1996 = vmatpush.bf16.msrb.mxu0 %v4076_v43 }
  0xe5   : > { %vm1032_vm1 = vcmp.gt.f32.partialorder %v798_v14, 0.0  ;;  %v1048_v25 = vmul.f32 0.01, %v798_v14  ;;  %2045 = vmatpush.bf16.msrb.mxu1 %v4080_v46 }
  0xe7   : > { %v1064_v40 = vsel %vm1032_vm1, %v798_v14, %v1048_v25 }
  0xe8   : > { %v751_v44 = vpop.f32.mrf.mxu0  ;;  %v1079_v49 = vpack.c.bf16 %v1064_v40, %v1063_v36  ;;  %1997 = vmatpush.bf16.msrb.mxu0 %v4102_v29 }
  0xe9   : > { %v800_v52 = vpop.f32.mrf.mxu1  ;;  %v846_v58 = vpop.f32.mrf.mxu2  ;;  %2046 = vmatpush.bf16.msrb.mxu1 %v4105_v33  ;;  %v752_v8 = vadd.f32 %v751_v44, %v4267_v17  ;;  %v5463_v44 = vld [vmem:[#allocation31_spill] sm:$0xff] }
  0xea   : > { %1180 = vmatmul.bf16.vlgmr.msrb.gmra.mxu2 %v1079_v49  ;;  %1229 = vmatmul.bf16.vlgmr.msrb.gmra.mxu3 %v1079_v49  ;;  %v847_v0 = vadd.f32 %v846_v58, %v4278_v39 }
  0xeb   : > { %v895_v2 = vpop.f32.mrf.mxu3  ;;  %946 = vmatmul.bf16.gmra.mxu0 %v4096_v10  ;;  %2148 = vmatpush.bf16.msrb.mxu2 %v4055_v18  ;;  %v801_v22 = vadd.f32 %v800_v52, %v752_v8  ;;  %v5449_v10 = vld [vmem:[#allocation25_spill] sm:$0xff] }
  0xec   : > { %995 = vmatmul.bf16.gmra.mxu1 %v4098_v12  ;;  %v4296_v9 = vadd.f32 %v895_v2, %v847_v0  ;;  %2197 = vmatpush.bf16.msrb.mxu3 %v4057_v19 }
  0xed   : > { %1998 = vmatpush.bf16.msrb.mxu0 %v4126_v42  ;;  %2047 = vmatpush.bf16.msrb.mxu1 %v4129_v54  ;;  %v1049_v29 = vmul.f32 0.01, %v801_v22  ;;  %v5450_v42 = vld [vmem:[#allocation15_spill] sm:$0xff]  ;;  %vm1033_vm2 = vcmp.gt.f32.partialorder %v801_v22, 0.0 }
  0xef   : > { %2149 = vmatpush.bf16.msrb.mxu2 %v4070_v35  ;;  %v5451_v35 = vld [vmem:[#allocation16_spill] sm:$0xff] }
  0xf0   : > { %v753_v30 = vpop.f32.mrf.mxu0  ;;  %2198 = vmatpush.bf16.msrb.mxu3 %v4072_v37 }
  0xf1   : > { %v754_v43 = vadd.f32 %v753_v30, %v4267_v17  ;;  %v802_v46 = vpop.f32.mrf.mxu1  ;;  %v849_v18 = vpop.f32.mrf.mxu2  ;;  %1999 = vmatpush.bf16.msrb.mxu0 %v4150_v26  ;;  %2048 = vmatpush.bf16.msrb.mxu1 %v5449_v10  ;;  %v1065_v26 = vsel %vm1033_vm2, %v801_v22, %v1049_v29 }
  0xf2   : > { %v850_v19 = vadd.f32 %v849_v18, %v4278_v39  ;;  %v5465_v18 = vld [vmem:[#allocation24_spill] sm:$0xff] }
  0xf3   : > { %v898_v12 = vpop.f32.mrf.mxu3  ;;  %v803_v33 = vadd.f32 %v802_v46, %v754_v43  ;;  %2150 = vmatpush.bf16.msrb.mxu2 %v5450_v42  ;;  %v5464_v46 = vld [vmem:[#allocation23_spill] sm:$0xff] }
  0xf4   : > { %v4308_v54 = vadd.f32 %v898_v12, %v850_v19  ;;  %2199 = vmatpush.bf16.msrb.mxu3 %v5451_v35 }
  0xf5   : > { %v1050_v37 = vmul.f32 0.01, %v803_v33  ;;  %vm1034_vm3 = vcmp.gt.f32.partialorder %v803_v33, 0.0  ;;  %2000 = vmatpush.bf16.msrb.mxu0 %v5452_v47  ;;  %2049 = vmatpush.bf16.msrb.mxu1 %v4177_v32 }
  0xf7   : > { %v1066_v48 = vsel %vm1034_vm3, %v803_v33, %v1050_v37  ;;  %2151 = vmatpush.bf16.msrb.mxu2 %v5453_v3 }
  0xf8   : > { %v756_v7 = vpop.f32.mrf.mxu0  ;;  %v1080_v11 = vpack.c.bf16 %v1066_v48, %v1065_v26  ;;  %2200 = vmatpush.bf16.msrb.mxu3 %v5454_v27 }
  0xf9   : > { %v805_v41 = vpop.f32.mrf.mxu1  ;;  %v851_v45 = vpop.f32.mrf.mxu2  ;;  %2001 = vmatpush.bf16.msrb.mxu0 %v4198_v21  ;;  %2050 = vmatpush.bf16.msrb.mxu1 %v4201_v61  ;;  %v757_v32 = vadd.f32 %v756_v7, %v4267_v17 }
  0xfa   : > { %1185 = vmatmul.bf16.gmra.mxu2 %v1080_v11  ;;  %1234 = vmatmul.bf16.gmra.mxu3 %v1080_v11  ;;  %v852_v4 = vadd.f32 %v851_v45, %v4278_v39 }
  0xfb   : > { %v900_v56 = vpop.f32.mrf.mxu3  ;;  %951 = vmatmul.bf16.gmra.mxu0 %v5455_v24  ;;  %2152 = vmatpush.bf16.msrb.mxu2 %v5456_v28  ;;  %v806_v21 = vadd.f32 %v805_v41, %v757_v32  ;;  %v5468_v32 = vld [vmem:[#allocation28_spill] sm:$0xff]  ;;  %v5469_v24 = vld [vmem:[#allocation29_spill] sm:$0xff] }
  0xfc   : > { %1000 = vmatmul.bf16.gmra.mxu1 %v5457_v38  ;;  %v4322_v50 = vadd.f32 %v900_v56, %v852_v4  ;;  %2201 = vmatpush.bf16.msrb.mxu3 %v5459_v51 }
  0xfd   : > { %v1051_v25 = vmul.f32 0.01, %v806_v21  ;;  %vm1035_vm4 = vcmp.gt.f32.partialorder %v806_v21, 0.0 }
  0xfe   : > { %5458 = vst [vmem:[#allocation25_spill] sm:$0xff] %v4322_v50 }
  0xff   : > { %2153 = vmatpush.bf16.msrb.mxu2 %v5460_v57  ;;  %v1067_v52 = vsel %vm1035_vm4, %v806_v21, %v1051_v25 }
 0x100   : > { %v758_v61 = vpop.f32.mrf.mxu0  ;;  %2202 = vmatpush.bf16.msrb.mxu3 %v5461_v62 }
 0x101   : > { %v759_v63 = vadd.f32 %v758_v61, %v4267_v17  ;;  %v807_v1 = vpop.f32.mrf.mxu1  ;;  %v854_v6 = vpop.f32.mrf.mxu2 }
 0x102   : > { %v855_v13 = vadd.f32 %v854_v6, %v4278_v39 }
 0x103   : > { %v903_v14 = vpop.f32.mrf.mxu3  ;;  %v808_v36 = vadd.f32 %v807_v1, %v759_v63  ;;  %2154 = vmatpush.bf16.msrb.mxu2 %v4182_v5 }
 0x104   : > { %v4330_v40 = vadd.f32 %v903_v14, %v855_v13  ;;  %2203 = vmatpush.bf16.msrb.mxu3 %v5463_v44 }
 0x105   : > { %v1052_v49 = vmul.f32 0.01, %v808_v36  ;;  %vm1036_vm5 = vcmp.gt.f32.partialorder %v808_v36, 0.0 }
 0x106   : > { %5462 = vst [vmem:[#allocation15_spill] sm:$0xff] %v4330_v40 }
 0x107   : > { %v1068_v58 = vsel %vm1036_vm5, %v808_v36, %v1052_v49  ;;  %2155 = vmatpush.bf16.msrb.mxu2 %v4225_v15 }
 0x108   : > { %v761_v0 = vpop.f32.mrf.mxu0  ;;  %v1081_v2 = vpack.c.bf16 %v1068_v58, %v1067_v52  ;;  %2204 = vmatpush.bf16.msrb.mxu3 %v4228_v31 }
 0x109   : > { %v810_v8 = vpop.f32.mrf.mxu1  ;;  %v856_v22 = vpop.f32.mrf.mxu2  ;;  %v762_v43 = vadd.f32 %v761_v0, %v4267_v17 }
 0x10a   : > { %1190 = vmatmul.bf16.gmra.mxu2 %v1081_v2  ;;  %1239 = vmatmul.bf16.gmra.mxu3 %v1081_v2  ;;  %v857_v5 = vadd.f32 %v856_v22, %v4278_v39 }
 0x10b   : > { %v905_v30 = vpop.f32.mrf.mxu3  ;;  %956 = vmatmul.bf16.gmra.mxu0 %v5464_v46  ;;  %v811_v15 = vadd.f32 %v810_v8, %v762_v43 }
 0x10c   : > { %1005 = vmatmul.bf16.gmra.mxu1 %v5465_v18  ;;  %v4339_v10 = vadd.f32 %v905_v30, %v857_v5 }
 0x10d   : > { %v1053_v35 = vmul.f32 0.01, %v811_v15  ;;  %vm1037_vm6 = vcmp.gt.f32.partialorder %v811_v15, 0.0 }
 0x10e   : > { %5466 = vst [vmem:[#allocation16_spill] sm:$0xff] %v4339_v10 }
 0x10f   : > { %v1069_v48 = vsel %vm1037_vm6, %v811_v15, %v1053_v35 }
 0x110   : > { %v763_v19 = vpop.f32.mrf.mxu0 }
 0x111   : > { %v764_v12 = vadd.f32 %v763_v19, %v4267_v17  ;;  %v812_v31 = vpop.f32.mrf.mxu1  ;;  %v859_v29 = vpop.f32.mrf.mxu2 }
 0x112   : > { %v860_v33 = vadd.f32 %v859_v29, %v4278_v39 }
 0x113   : > { %v908_v42 = vpop.f32.mrf.mxu3  ;;  %v813_v37 = vadd.f32 %v812_v31, %v764_v12 }
 0x114   : > { %v4343_v47 = vadd.f32 %v908_v42, %v860_v33 }
 0x115   : > { %v1054_v26 = vmul.f32 0.01, %v813_v37  ;;  %vm1038_vm7 = vcmp.gt.f32.partialorder %v813_v37, 0.0 }
 0x116   : > { %5467 = vst [vmem:[#allocation30_spill] sm:$0xff] %v4343_v47 }
 0x117   : > { %v1070_v3 = vsel %vm1038_vm7, %v813_v37, %v1054_v26 }
 0x118   : > { %v766_v7 = vpop.f32.mrf.mxu0  ;;  %v1082_v11 = vpack.c.bf16 %v1070_v3, %v1069_v48 }
 0x119   : > { %v815_v27 = vpop.f32.mrf.mxu1  ;;  %v861_v41 = vpop.f32.mrf.mxu2  ;;  %v767_v56 = vadd.f32 %v766_v7, %v4267_v17 }
 0x11a   : > { %1195 = vmatmul.bf16.gmra.mxu2 %v1082_v11  ;;  %1244 = vmatmul.bf16.gmra.mxu3 %v1082_v11  ;;  %v862_v45 = vadd.f32 %v861_v41, %v4278_v39 }
 0x11b   : > { %v910_v4 = vpop.f32.mrf.mxu3  ;;  %961 = vmatmul.bf16.gmra.mxu0 %v5468_v32  ;;  %v816_v38 = vadd.f32 %v815_v27, %v767_v56 }
 0x11c   : > { %1010 = vmatmul.bf16.gmra.mxu1 %v5469_v24  ;;  %v4349_v28 = vadd.f32 %v910_v4, %v862_v45 }
 0x11d   : > { %v1055_v1 = vmul.f32 0.01, %v816_v38  ;;  %vm1039_vm8 = vcmp.gt.f32.partialorder %v816_v38, 0.0 }
 0x11e   : > { %5470 = vst [vmem:[#allocation17_spill] sm:$0xff] %v4349_v28 }
 0x11f   : > { %v1071_v25 = vsel %vm1039_vm8, %v816_v38, %v1055_v1 }
 0x120   : > { %v768_v51 = vpop.f32.mrf.mxu0 }
 0x121   : > { %v769_v21 = vadd.f32 %v768_v51, %v4267_v17  ;;  %v817_v57 = vpop.f32.mrf.mxu1  ;;  %v864_v61 = vpop.f32.mrf.mxu2 }
 0x122   : > { %v865_v62 = vadd.f32 %v864_v61, %v4278_v39 }
 0x123   : > { %v913_v63 = vpop.f32.mrf.mxu3  ;;  %v818_v6 = vadd.f32 %v817_v57, %v769_v21 }
 0x124   : > { %v4353_v13 = vadd.f32 %v913_v63, %v865_v62 }
 0x125   : > { %vm1040_vm9 = vcmp.gt.f32.partialorder %v818_v6, 0.0  ;;  %v1056_v14 = vmul.f32 0.01, %v818_v6 }
 0x126   : > { %5471 = vst [vmem:[#allocation18_spill] sm:$0xff] %v4353_v13 }
 0x127   : > { %v1072_v36 = vsel %vm1040_vm9, %v818_v6, %v1056_v14 }
 0x128   : > { %v771_v44 = vpop.f32.mrf.mxu0  ;;  %v1083_v49 = vpack.c.bf16 %v1072_v36, %v1071_v25 }
 0x129   : > { %v820_v52 = vpop.f32.mrf.mxu1  ;;  %v866_v58 = vpop.f32.mrf.mxu2  ;;  %v772_v8 = vadd.f32 %v771_v44, %v4267_v17 }
 0x12a   : > { %1200 = vmatmul.bf16.gmra.mxu2 %v1083_v49  ;;  %1249 = vmatmul.bf16.gmra.mxu3 %v1083_v49  ;;  %v867_v0 = vadd.f32 %v866_v58, %v4278_v39 }
 0x12b   : > { %v915_v2 = vpop.f32.mrf.mxu3  ;;  %966 = vmatmul.bf16.gmra.mxu0 %v4192_v34  ;;  %v821_v5 = vadd.f32 %v820_v52, %v772_v8 }
 0x12c   : > { %1015 = vmatmul.bf16.gmra.mxu1 %v4194_v60  ;;  %v4359_v22 = vadd.f32 %v915_v2, %v867_v0 }
 0x12d   : > { %v1057_v12 = vmul.f32 0.01, %v821_v5  ;;  %vm1041_vm10 = vcmp.gt.f32.partialorder %v821_v5, 0.0 }
 0x12e   : > { %5472 = vst [vmem:[#allocation19_spill] sm:$0xff] %v4359_v22 }
 0x12f   : > { %v1073_v33 = vsel %vm1041_vm10, %v821_v5, %v1057_v12 }
 0x130   : > { %v773_v30 = vpop.f32.mrf.mxu0 }
 0x131   : > { %v774_v43 = vadd.f32 %v773_v30, %v4267_v17  ;;  %v822_v46 = vpop.f32.mrf.mxu1  ;;  %v869_v18 = vpop.f32.mrf.mxu2 }
 0x132   : > { %v870_v15 = vadd.f32 %v869_v18, %v4278_v39 }
 0x133   : > { %v918_v19 = vpop.f32.mrf.mxu3  ;;  %v823_v31 = vadd.f32 %v822_v46, %v774_v43  ;;  %v3135_v43 = vld [vmem:[%s3934_s11 + $0x80] sm:$0xf]  ;;  %v3286_v46 = vld [vmem:[%s3934_s11 + $0x84] sm:$0xf0] }
 0x134   : > { %v4363_v29 = vadd.f32 %v918_v19, %v870_v15  ;;  %v4389_v15 = vperm.slane %v4262_v16, 2  ;;  %v3137_v19 = vld [vmem:[%s3934_s11 + $0x88] sm:$0xf0] }
 0x135   : > { %vm1042_vm11 = vcmp.gt.f32.partialorder %v823_v31, 0.0  ;;  %v1058_v34 = vmul.f32 0.01, %v823_v31 }
 0x136   : > { %5473 = vst [vmem:[#allocation21_spill] sm:$0xff] %v4363_v29  ;;  %v3298_v29 = vld [vmem:[%s3934_s11 + $0xe4] sm:$0xf0] }
 0x137   : > { %v1074_v60 = vsel %vm1042_vm11, %v823_v31, %v1058_v34  ;;  %5478 = vst [vmem:[#allocation31_spill] sm:$0xff] %v4389_v15  ;;  %v4392_v34 = vor.u32 %v3286_v46, %v3135_v43 }
 0x138   : > { %v776_v42 = vpop.f32.mrf.mxu0  ;;  %v1084_v35 = vpack.c.bf16 %v1074_v60, %v1073_v33 }
 0x139   : > { %v825_v37 = vpop.f32.mrf.mxu1  ;;  %v871_v26 = vpop.f32.mrf.mxu2  ;;  %v777_v7 = vadd.f32 %v776_v42, %v4267_v17 }
 0x13a   : > { %1205 = vmatmul.bf16.gmra.mxu2 %v1084_v35  ;;  %1254 = vmatmul.bf16.gmra.mxu3 %v1084_v35  ;;  %v872_v48 = vadd.f32 %v871_v26, %v4278_v39 }
 0x13b   : > { %v920_v3 = vpop.f32.mrf.mxu3  ;;  %971 = vmatmul.bf16.gmra.mxu0 %v4214_v23  ;;  %v826_v27 = vadd.f32 %v825_v37, %v777_v7 }
 0x13c   : > { %1020 = vmatmul.bf16.gmra.mxu1 %v4216_v55  ;;  %v4369_v11 = vadd.f32 %v920_v3, %v872_v48 }
 0x13d   : > { %v1059_v38 = vmul.f32 0.01, %v826_v27  ;;  %vm1043_vm12 = vcmp.gt.f32.partialorder %v826_v27, 0.0 }
 0x13e   : > { %5474 = vst [vmem:[#allocation20_spill] sm:$0xff] %v4369_v11 }
 0x13f   : > { %v1075_v57 = vsel %vm1043_vm12, %v826_v27, %v1059_v38  ;;  %v3145_v38 = vld [vmem:[%s3934_s11 + $0x98] sm:$0xf0] }
 0x140   : > { %v778_v41 = vpop.f32.mrf.mxu0 }
 0x141   : > { %v779_v45 = vadd.f32 %v778_v41, %v4267_v17  ;;  %v827_v4 = vpop.f32.mrf.mxu1  ;;  %v874_v56 = vpop.f32.mrf.mxu2 }
 0x142   : > { %v875_v32 = vadd.f32 %v874_v56, %v4278_v39  ;;  %v3143_v56 = vld [vmem:[%s3934_s11 + $0x90] sm:$0xf] }
 0x143   : > { %v923_v24 = vpop.f32.mrf.mxu3  ;;  %v828_v51 = vadd.f32 %v827_v4, %v779_v45 }
 0x144   : > { %v4373_v21 = vadd.f32 %v923_v24, %v875_v32  ;;  %v3288_v32 = vld [vmem:[%s3934_s11 + $0x94] sm:$0xf0]  ;;  %v3287_v24 = vld [vmem:[%s3934_s11 + $0x94] sm:$0xf] }
 0x145   : > { %vm1044_vm13 = vcmp.gt.f32.partialorder %v828_v51, 0.0  ;;  %v1060_v23 = vmul.f32 0.01, %v828_v51 }
 0x146   : > { %5475 = vst [vmem:[#allocation22_spill] sm:$0xff] %v4373_v21 }
 0x147   : > { %v1076_v55 = vsel %vm1044_vm13, %v828_v51, %v1060_v23  ;;  %v4411_v51 = vor.u32 %v3288_v32, %v3143_v56  ;;  %v377_v23 = vld [vmem:[%s5383_s4] sm:$0x3] }
 0x148   : > { %v781_v61 = vpop.f32.mrf.mxu0  ;;  %v1085_v62 = vpack.c.bf16 %v1076_v55, %v1075_v57  ;;  %v4416_v55 = vor.u32 %v3287_v24, %v3145_v38 }
 0x149   : > { %v830_v63 = vpop.f32.mrf.mxu1  ;;  %v876_v1 = vpop.f32.mrf.mxu2  ;;  %v782_v25 = vadd.f32 %v781_v61, %v4267_v17 }
 0x14a   : > { %1210 = vmatmul.bf16.gmra.mxu2 %v1085_v62  ;;  %1259 = vmatmul.bf16.gmra.mxu3 %v1085_v62  ;;  %v877_v6 = vadd.f32 %v876_v1, %v4278_v39  ;;  %v4423_v1 = vperm.slane %v377_v23, 1 }
 0x14b   : > { %v925_v14 = vpop.f32.mrf.mxu3  ;;  %976 = vmatmul.bf16.gmra.mxu0 %v4244_v53  ;;  %v831_v44 = vadd.f32 %v830_v63, %v782_v25  ;;  %v4421_v63 = vperm.slane %v377_v23, 0 }
 0x14c   : > { %1025 = vmatmul.bf16.gmra.mxu1 %v4246_v59  ;;  %v4379_v36 = vadd.f32 %v925_v14, %v877_v6  ;;  %v3285_v59 = vld [vmem:[%s3934_s11 + $0x84] sm:$0xf] }
 0x14d   : > { %v1061_v5 = vmul.f32 0.01, %v831_v44  ;;  %vm1045_vm14 = vcmp.gt.f32.partialorder %v831_v44, 0.0  ;;  %v4394_v42 = vor.u32 %v3285_v59, %v3137_v19  ;;  %v3289_v59 = vld [vmem:[%s3934_s11 + $0xa4] sm:$0xf] }
 0x14e   : > { %5476 = vst [vmem:[#allocation26_spill] sm:$0xff] %v4379_v36  ;;  %v3295_v36 = vld [vmem:[%s3934_s11 + $0xd4] sm:$0xf] }
 0x14f   : > { %v1077_v12 = vsel %vm1045_vm14, %v831_v44, %v1061_v5  ;;  %v3151_v5 = vld [vmem:[%s3934_s11 + $0xa0] sm:$0xf] }
 0x150   : > { %v783_v49 = vpop.f32.mrf.mxu0 }
 0x151   : > { %v784_v52 = vadd.f32 %v783_v49, %v4267_v17  ;;  %v832_v58 = vpop.f32.mrf.mxu1  ;;  %v879_v0 = vpop.f32.mrf.mxu2 }
 0x152   : > { %v880_v2 = vadd.f32 %v879_v0, %v4278_v39 }
 0x153   : > { %v928_v8 = vpop.f32.mrf.mxu3  ;;  %v833_v30 = vadd.f32 %v832_v58, %v784_v52 }
 0x154   : > { %v4384_v53 = vadd.f32 %v928_v8, %v880_v2 }
 0x155   : > { %vm1046_vm15 = vcmp.gt.f32.partialorder %v833_v30, 0.0  ;;  %v1062_v18 = vmul.f32 0.01, %v833_v30 }
 0x156   : > { %5477 = vst [vmem:[#allocation27_spill] sm:$0xff] %v4384_v53 }
 0x157   : > { %v1078_v31 = vsel %vm1046_vm15, %v833_v30, %v1062_v18  ;;  %v3290_v30 = vld [vmem:[%s3934_s11 + $0xa4] sm:$0xf0]  ;;  %v3153_v18 = vld [vmem:[%s3934_s11 + $0xa8] sm:$0xf0] }
 0x158   : > { %v942_v33 = vpop.f32.mrf.mxu0  ;;  %v1086_v60 = vpack.c.bf16 %v1078_v31, %v1077_v12  ;;  %v4450_v31 = vor.u32 %v3290_v30, %v3151_v5 }
 0x159   : > { %v943_v35 = vadd.f32 %v942_v33, %v4389_v15  ;;  %v991_v37 = vpop.f32.mrf.mxu1  ;;  %v881_v26 = vpop.f32.mrf.mxu2 }
 0x15a   : > { %1215 = vmatmul.bf16.gmra.mxu2 %v1086_v60  ;;  %1264 = vmatmul.bf16.gmra.mxu3 %v1086_v60  ;;  %v882_v16 = vadd.f32 %v881_v26, %v4278_v39 }
 0x15b   : > { %v930_v48 = vpop.f32.mrf.mxu3  ;;  %v4398_v3 = vadd.f32 %v991_v37, %v943_v35  ;;  %1806 = vmatmul.bf16.vlgmr.msra.gmra.mxu0 %v4392_v34  ;;  %v4454_v35 = vor.u32 %v3289_v59, %v3153_v18 }
 0x15c   : > { %1855 = vmatmul.bf16.vlgmr.msra.gmra.mxu1 %v4394_v42  ;;  %v4402_v7 = vadd.f32 %v930_v48, %v882_v16 }
 0x15e   : > { %5479 = vst [vmem:[#allocation23_spill] sm:$0xff] %v4402_v7 }
 0x160   : > { %v944_v27 = vpop.f32.mrf.mxu0 }
 0x161   : > { %v945_v41 = vadd.f32 %v944_v27, %v4389_v15  ;;  %v993_v45 = vpop.f32.mrf.mxu1 }
 0x163   : > { %v4405_v4 = vadd.f32 %v993_v45, %v945_v41 }
 0x168   : > { %v947_v57 = vpop.f32.mrf.mxu0 }
 0x169   : > { %v948_v61 = vadd.f32 %v947_v57, %v4389_v15  ;;  %v996_v62 = vpop.f32.mrf.mxu1  ;;  %v3159_v57 = vld [vmem:[%s3934_s11 + $0xb0] sm:$0xf] }
 0x16a   : > { %1904 = vmatmul.bf16.vlgmr.msra.gmra.mxu2 %v4392_v34  ;;  %1953 = vmatmul.bf16.vlgmr.msra.gmra.mxu3 %v4394_v42 }
 0x16b   : > { %v4425_v6 = vadd.f32 %v996_v62, %v948_v61  ;;  %1811 = vmatmul.bf16.gmra.mxu0 %v4411_v51  ;;  %v3292_v61 = vld [vmem:[%s3934_s11 + $0xb4] sm:$0xf0] }
 0x16c   : > { %1860 = vmatmul.bf16.gmra.mxu1 %v4416_v55 }
 0x16d   : > { %5480 = vst [vmem:[#allocation24_spill] sm:$0xff] %v4425_v6  ;;  %v1181_v14 = vpop.f32.mrf.mxu2  ;;  %v1230_v25 = vpop.f32.mrf.mxu3 }
 0x16e   : > { %v4430_v44 = vadd.f32 %v1181_v14, %v4421_v63  ;;  %v4433_v49 = vadd.f32 %v1230_v25, %v4423_v1  ;;  %v3291_v25 = vld [vmem:[%s3934_s11 + $0xb4] sm:$0xf] }
 0x170   : > { %v949_v52 = vpop.f32.mrf.mxu0  ;;  %v1270_v58 = vmax.f32 %v4430_v44, %v4433_v49 }
 0x171   : > { %v950_v0 = vadd.f32 %v949_v52, %v4389_v15  ;;  %v998_v2 = vpop.f32.mrf.mxu1  ;;  %v3161_v52 = vld [vmem:[%s3934_s11 + $0xb8] sm:$0xf0] }
 0x172   : > { %1271 = vmax.xlane.f32.xlu0 %v1270_v58 }
 0x173   : > { %v4438_v8 = vadd.f32 %v998_v2, %v950_v0  ;;  %v4484_v2 = vor.u32 %v3292_v61, %v3159_v57  ;;  %v3294_v57 = vld [vmem:[%s3934_s11 + $0xc4] sm:$0xf0] }
 0x175   : > { %5481 = vst [vmem:[#allocation28_spill] sm:$0xff] %v4438_v8  ;;  %v1183_v43 = vpop.f32.mrf.mxu2  ;;  %v1232_v46 = vpop.f32.mrf.mxu3 }
 0x176   : > { %v4445_v19 = vadd.f32 %v1183_v43, %v4421_v63  ;;  %v4448_v12 = vadd.f32 %v1232_v46, %v4423_v1  ;;  %v4488_v43 = vor.u32 %v3291_v25, %v3161_v52  ;;  %v3169_v25 = vld [vmem:[%s3934_s11 + $0xc8] sm:$0xf0] }
 0x178   : > { %v952_v33 = vpop.f32.mrf.mxu0  ;;  %v1273_v60 = vmax.f32 %v4445_v19, %v4448_v12 }
 0x179   : > { %v953_v37 = vadd.f32 %v952_v33, %v4389_v15  ;;  %v1001_v26 = vpop.f32.mrf.mxu1 }
 0x17a   : > { %1909 = vmatmul.bf16.gmra.mxu2 %v4411_v51  ;;  %1958 = vmatmul.bf16.gmra.mxu3 %v4416_v55 }
 0x17b   : > { %v4459_v16 = vadd.f32 %v1001_v26, %v953_v37  ;;  %1274 = vmax.xlane.f32.xlu0 %v1273_v60  ;;  %1816 = vmatmul.bf16.gmra.mxu0 %v4450_v31 }
 0x17c   : > { %1865 = vmatmul.bf16.gmra.mxu1 %v4454_v35 }
 0x17d   : > { %5482 = vst [vmem:[#allocation29_spill] sm:$0xff] %v4459_v16  ;;  %v1186_v48 = vpop.f32.mrf.mxu2  ;;  %v1235_v27 = vpop.f32.mrf.mxu3 }
 0x17e   : > { %v4464_v41 = vadd.f32 %v1186_v48, %v4421_v63  ;;  %v4467_v45 = vadd.f32 %v1235_v27, %v4423_v1 }
 0x180   : > { %v954_v56 = vpop.f32.mrf.mxu0  ;;  %v1276_v32 = vmax.f32 %v4464_v41, %v4467_v45 }
 0x181   : > { %v955_v24 = vadd.f32 %v954_v56, %v4389_v15  ;;  %v1003_v38 = vpop.f32.mrf.mxu1 }
 0x182   : > { %1277 = vmax.xlane.f32.xlu1 %v1276_v32 }
 0x183   : > { %v4472_v23 = vadd.f32 %v1003_v38, %v955_v24  ;;  %v3167_v38 = vld [vmem:[%s3934_s11 + $0xc0] sm:$0xf] }
 0x185   : > { %5483 = vst [vmem:[#allocation32_spill] sm:$0xff] %v4472_v23  ;;  %v1188_v62 = vpop.f32.mrf.mxu2  ;;  %v1237_v14 = vpop.f32.mrf.mxu3  ;;  %v3299_v23 = vld [vmem:[%s3934_s11 + $0xf4] sm:$0xf] }
 0x186   : > { %v4479_v58 = vadd.f32 %v1188_v62, %v4421_v63  ;;  %v4482_v0 = vadd.f32 %v1237_v14, %v4423_v1  ;;  %v3293_v14 = vld [vmem:[%s3934_s11 + $0xc4] sm:$0xf] }
 0x188   : > { %v957_v5 = vpop.f32.mrf.mxu0  ;;  %v1279_v30 = vmax.f32 %v4479_v58, %v4482_v0 }
 0x189   : > { %v958_v46 = vadd.f32 %v957_v5, %v4389_v15  ;;  %v1006_v59 = vpop.f32.mrf.mxu1 }
 0x18a   : > { %1914 = vmatmul.bf16.gmra.mxu2 %v4450_v31  ;;  %1963 = vmatmul.bf16.gmra.mxu3 %v4454_v35 }
 0x18b   : > { %v4493_v18 = vadd.f32 %v1006_v59, %v958_v46  ;;  %1280 = vmax.xlane.f32.xlu1 %v1279_v30  ;;  %1821 = vmatmul.bf16.gmra.mxu0 %v4484_v2  ;;  %v4518_v30 = vor.u32 %v3294_v57, %v3167_v38 }
 0x18c   : > { %1870 = vmatmul.bf16.gmra.mxu1 %v4488_v43 }
 0x18d   : > { %5484 = vst [vmem:[#allocation33_spill] sm:$0xff] %v4493_v18  ;;  %v1191_v33 = vpop.f32.mrf.mxu2  ;;  %v1240_v60 = vpop.f32.mrf.mxu3 }
 0x18e   : > { %v4498_v37 = vadd.f32 %v1191_v33, %v4421_v63  ;;  %v4501_v26 = vadd.f32 %v1240_v60, %v4423_v1  ;;  %v4522_v33 = vor.u32 %v3293_v14, %v3169_v25 }
 0x190   : > { %v959_v48 = vpop.f32.mrf.mxu0  ;;  %v1282_v27 = vmax.f32 %v4498_v37, %v4501_v26 }
 0x191   : > { %v960_v56 = vadd.f32 %v959_v48, %v4389_v15  ;;  %v1008_v32 = vpop.f32.mrf.mxu1 }
 0x192   : > { %1283 = vmax.xlane.f32.xlu2 %v1282_v27 }
 0x193   : > { %v4506_v24 = vadd.f32 %v1008_v32, %v960_v56 }
 0x195   : > { %5485 = vst [vmem:[#allocation34_spill] sm:$0xff] %v4506_v24  ;;  %v1193_v61 = vpop.f32.mrf.mxu2  ;;  %v1242_v62 = vpop.f32.mrf.mxu3 }
 0x196   : > { %v4513_v52 = vadd.f32 %v1193_v61, %v4421_v63  ;;  %v4516_v5 = vadd.f32 %v1242_v62, %v4423_v1 }
 0x198   : > { %v962_v46 = vpop.f32.mrf.mxu0  ;;  %v1285_v59 = vmax.f32 %v4513_v52, %v4516_v5 }
 0x199   : > { %v963_v60 = vadd.f32 %v962_v46, %v4389_v15  ;;  %v1011_v48 = vpop.f32.mrf.mxu1 }
 0x19a   : > { %1919 = vmatmul.bf16.gmra.mxu2 %v4484_v2  ;;  %1968 = vmatmul.bf16.gmra.mxu3 %v4488_v43 }
 0x19b   : > { %v4527_v27 = vadd.f32 %v1011_v48, %v963_v60  ;;  %1286 = vmax.xlane.f32.xlu2 %v1285_v59  ;;  %1826 = vmatmul.bf16.gmra.mxu0 %v4518_v30  ;;  %v3175_v59 = vld [vmem:[%s3934_s11 + $0xd0] sm:$0xf]  ;;  %v3296_v60 = vld [vmem:[%s3934_s11 + $0xd4] sm:$0xf0] }
 0x19c   : > { %1875 = vmatmul.bf16.gmra.mxu1 %v4522_v33  ;;  %v4552_v53 = vor.u32 %v3296_v60, %v3175_v59 }
 0x19d   : > { %5486 = vst [vmem:[#allocation35_spill] sm:$0xff] %v4527_v27  ;;  %v1196_v56 = vpop.f32.mrf.mxu2  ;;  %v1245_v32 = vpop.f32.mrf.mxu3  ;;  %v3297_v27 = vld [vmem:[%s3934_s11 + $0xe4] sm:$0xf] }
 0x19e   : > { %v4532_v38 = vadd.f32 %v1196_v56, %v4421_v63  ;;  %v4535_v57 = vadd.f32 %v1245_v32, %v4423_v1  ;;  %v3177_v56 = vld [vmem:[%s3934_s11 + $0xd8] sm:$0xf0] }
 0x1a0   : > { %v964_v61 = vpop.f32.mrf.mxu0  ;;  %v1288_v62 = vmax.f32 %v4532_v38, %v4535_v57 }
 0x1a1   : > { %v965_v14 = vadd.f32 %v964_v61, %v4389_v15  ;;  %v1013_v25 = vpop.f32.mrf.mxu1 }
 0x1a2   : > { %1289 = vmax.xlane.f32.xlu0 %v1288_v62  ;;  %v4556_v62 = vor.u32 %v3295_v36, %v3177_v56 }
 0x1a3   : > { %v4540_v46 = vadd.f32 %v1013_v25, %v965_v14 }
 0x1a5   : > { %5487 = vst [vmem:[#allocation36_spill] sm:$0xff] %v4540_v46  ;;  %v1198_v48 = vpop.f32.mrf.mxu2  ;;  %v1247_v7 = vpop.f32.mrf.mxu3 }
 0x1a6   : > { %v4547_v21 = vadd.f32 %v1198_v48, %v4421_v63  ;;  %v4550_v32 = vadd.f32 %v1247_v7, %v4423_v1 }
 0x1a8   : > { %v967_v11 = vpop.f32.mrf.mxu0  ;;  %v1291_v61 = vmax.f32 %v4547_v21, %v4550_v32 }
 0x1a9   : > { %v968_v14 = vadd.f32 %v967_v11, %v4389_v15  ;;  %v1016_v25 = vpop.f32.mrf.mxu1 }
 0x1aa   : > { %1924 = vmatmul.bf16.gmra.mxu2 %v4518_v30  ;;  %1973 = vmatmul.bf16.gmra.mxu3 %v4522_v33 }
 0x1ab   : > { %v4561_v48 = vadd.f32 %v1016_v25, %v968_v14  ;;  %1292 = vmax.xlane.f32.xlu1 %v1291_v61  ;;  %1831 = vmatmul.bf16.gmra.mxu0 %v4552_v53 }
 0x1ac   : > { %1880 = vmatmul.bf16.gmra.mxu1 %v4556_v62 }
 0x1ad   : > { %5488 = vst [vmem:[#allocation37_spill] sm:$0xff] %v4561_v48  ;;  %v1201_v36 = vpop.f32.mrf.mxu2  ;;  %v1250_v7 = vpop.f32.mrf.mxu3  ;;  %v3183_v48 = vld [vmem:[%s3934_s11 + $0xe0] sm:$0xf] }
 0x1ae   : > { %v4566_v11 = vadd.f32 %v1201_v36, %v4421_v63  ;;  %v4569_v59 = vadd.f32 %v1250_v7, %v4423_v1  ;;  %v3185_v36 = vld [vmem:[%s3934_s11 + $0xe8] sm:$0xf0]  ;;  %v4586_v24 = vor.u32 %v3298_v29, %v3183_v48 }
 0x1b0   : > { %v969_v60 = vpop.f32.mrf.mxu0  ;;  %v1294_v56 = vmax.f32 %v4566_v11, %v4569_v59 }
 0x1b1   : > { %v970_v61 = vadd.f32 %v969_v60, %v4389_v15  ;;  %v1018_v14 = vpop.f32.mrf.mxu1 }
 0x1b2   : > { %1295 = vmax.xlane.f32.xlu2 %v1294_v56  ;;  %v4590_v56 = vor.u32 %v3297_v27, %v3185_v36 }
 0x1b3   : > { %v4574_v25 = vadd.f32 %v1018_v14, %v970_v61 }
 0x1b5   : > { %5489 = vst [vmem:[#allocation38_spill] sm:$0xff] %v4574_v25  ;;  %v1203_v46 = vpop.f32.mrf.mxu2  ;;  %v1252_v22 = vpop.f32.mrf.mxu3  ;;  %v3300_v25 = vld [vmem:[%s3934_s11 + $0xf4] sm:$0xf0] }
 0x1b6   : > { %v4581_v13 = vadd.f32 %v1203_v46, %v4421_v63  ;;  %v4584_v7 = vadd.f32 %v1252_v22, %v4423_v1 }
 0x1b8   : > { %v972_v28 = vpop.f32.mrf.mxu0  ;;  %v1297_v60 = vmax.f32 %v4581_v13, %v4584_v7 }
 0x1b9   : > { %v973_v61 = vadd.f32 %v972_v28, %v4389_v15  ;;  %v1021_v14 = vpop.f32.mrf.mxu1 }
 0x1ba   : > { %1929 = vmatmul.bf16.gmra.mxu2 %v4552_v53  ;;  %1978 = vmatmul.bf16.gmra.mxu3 %v4556_v62 }
 0x1bb   : > { %v4595_v46 = vadd.f32 %v1021_v14, %v973_v61  ;;  %1298 = vmax.xlane.f32.xlu0 %v1297_v60  ;;  %1836 = vmatmul.bf16.gmra.mxu0 %v4586_v24 }
 0x1bc   : > { %1885 = vmatmul.bf16.gmra.mxu1 %v4590_v56 }
 0x1bd   : > { %5490 = vst [vmem:[#allocation39_spill] sm:$0xff] %v4595_v46  ;;  %v1206_v22 = vpop.f32.mrf.mxu2  ;;  %v1255_v29 = vpop.f32.mrf.mxu3  ;;  %v3191_v46 = vld [vmem:[%s3934_s11 + $0xf0] sm:$0xf] }
 0x1be   : > { %v4600_v28 = vadd.f32 %v1206_v22, %v4421_v63  ;;  %v4603_v27 = vadd.f32 %v1255_v29, %v4423_v1  ;;  %v3193_v22 = vld [vmem:[%s3934_s11 + $0xf8] sm:$0xf0]  ;;  %v4620_v16 = vor.u32 %v3300_v25, %v3191_v46 }
 0x1c0   : > { %v974_v48 = vpop.f32.mrf.mxu0  ;;  %v1300_v36 = vmax.f32 %v4600_v28, %v4603_v27 }
 0x1c1   : > { %v975_v60 = vadd.f32 %v974_v48, %v4389_v15  ;;  %v1023_v61 = vpop.f32.mrf.mxu1 }
 0x1c2   : > { %1301 = vmax.xlane.f32.xlu1 %v1300_v36  ;;  %v4624_v36 = vor.u32 %v3299_v23, %v3193_v22 }
 0x1c3   : > { %v4608_v14 = vadd.f32 %v1023_v61, %v975_v60 }
 0x1c5   : > { %5491 = vst [vmem:[#allocation40_spill] sm:$0xff] %v4608_v14  ;;  %v1208_v18 = vpop.f32.mrf.mxu2  ;;  %v1257_v47 = vpop.f32.mrf.mxu3 }
 0x1c6   : > { %v4615_v10 = vadd.f32 %v1208_v18, %v4421_v63  ;;  %v4618_v29 = vadd.f32 %v1257_v47, %v4423_v1 }
 0x1c8   : > { %5492 = vst [vmem:[#allocation41_spill] sm:$0xff] %v4615_v10  ;;  %v977_v40 = vpop.f32.mrf.mxu0  ;;  %v1303_v48 = vmax.f32 %v4615_v10, %v4618_v29 }
 0x1c9   : > { %5493 = vst [vmem:[#allocation42_spill] sm:$0xff] %v4618_v29  ;;  %v978_v60 = vadd.f32 %v977_v40, %v4389_v15  ;;  %v1026_v61 = vpop.f32.mrf.mxu1 }
 0x1ca   : > { %1934 = vmatmul.bf16.gmra.mxu2 %v4586_v24  ;;  %1983 = vmatmul.bf16.gmra.mxu3 %v4590_v56 }
 0x1cb   : > { %v4629_v18 = vadd.f32 %v1026_v61, %v978_v60  ;;  %1304 = vmax.xlane.f32.xlu2 %v1303_v48  ;;  %1841 = vmatmul.bf16.gmra.mxu0 %v4620_v16 }
 0x1cc   : > { %1890 = vmatmul.bf16.gmra.mxu1 %v4624_v36 }
 0x1cd   : > { %5494 = vst [vmem:[#allocation43_spill] sm:$0xff] %v4629_v18  ;;  %v1211_v47 = vpop.f32.mrf.mxu2  ;;  %v1260_v25 = vpop.f32.mrf.mxu3 }
 0x1ce   : > { %v4634_v46 = vadd.f32 %v1211_v47, %v4421_v63  ;;  %v4637_v23 = vadd.f32 %v1260_v25, %v4423_v1 }
 0x1d0   : > { %5495 = vst [vmem:[#allocation44_spill] sm:$0xff] %v4634_v46  ;;  %v979_v40 = vpop.f32.mrf.mxu0  ;;  %v1306_v22 = vmax.f32 %v4634_v46, %v4637_v23 }
 0x1d1   : > { %5496 = vst [vmem:[#allocation45_spill] sm:$0xff] %v4637_v23  ;;  %v980_v60 = vadd.f32 %v979_v40, %v4389_v15  ;;  %v1028_v61 = vpop.f32.mrf.mxu1 }
 0x1d2   : > { %1307 = vmax.xlane.f32.xlu0 %v1306_v22 }
 0x1d3   : > { %v4642_v48 = vadd.f32 %v1028_v61, %v980_v60 }
 0x1d5   : > { %5497 = vst [vmem:[#allocation46_spill] sm:$0xff] %v4642_v48  ;;  %v1213_v14 = vpop.f32.mrf.mxu2  ;;  %v1262_v18 = vpop.f32.mrf.mxu3 }
 0x1d6   : > { %v4645_v29 = vadd.f32 %v1213_v14, %v4421_v63  ;;  %v4648_v47 = vadd.f32 %v1262_v18, %v4423_v1 }
 0x1d8   : > { %5498 = vst [vmem:[#allocation47_spill] sm:$0xff] %v4645_v29  ;;  %v1807_v25 = vpop.f32.mrf.mxu0  ;;  %v1309_v10 = vmax.f32 %v4645_v29, %v4648_v47 }
 0x1d9   : > { %5499 = vst [vmem:[#allocation48_spill] sm:$0xff] %v4648_v47  ;;  %v1856_v8 = vpop.f32.mrf.mxu1  ;;  %v1808_v40 = vadd.f32 %v1807_v25, %v4267_v17 }
 0x1da   : > { %1939 = vmatmul.bf16.gmra.mxu2 %v4620_v16  ;;  %1988 = vmatmul.bf16.gmra.mxu3 %v4624_v36 }
 0x1db   : > { %1310 = vmax.xlane.f32.xlu1 %v1309_v10  ;;  %2002 = vmatmul.bf16.vlgmr.msrb.gmra.mxu0 %v4392_v34  ;;  %v1857_v61 = vadd.f32 %v1856_v8, %v1808_v40 }
 0x1dc   : > { %2051 = vmatmul.bf16.vlgmr.msrb.gmra.mxu1 %v4394_v42 }
 0x1dd   : > { %v1216_v14 = vpop.f32.mrf.mxu2  ;;  %v1265_v22 = vpop.f32.mrf.mxu3  ;;  %v2108_v34 = vmul.f32 0.01, %v1857_v61  ;;  %vm2092_vm0 = vcmp.gt.f32.partialorder %v1857_v61, 0.0 }
 0x1de   : > { %v4658_v18 = vadd.f32 %v1216_v14, %v4421_v63  ;;  %v4661_v60 = vadd.f32 %v1265_v22, %v4423_v1 }
 0x1df   : > { %v2124_v22 = vsel %vm2092_vm0, %v1857_v61, %v2108_v34 }
 0x1e0   : > { %5500 = vst [vmem:[#allocation49_spill] sm:$0xff] %v4658_v18  ;;  %v1809_v15 = vpop.f32.mrf.mxu0  ;;  %v1312_v48 = vmax.f32 %v4658_v18, %v4661_v60 }
 0x1e1   : > { %5501 = vst [vmem:[#allocation50_spill] sm:$0xff] %v4661_v60  ;;  %v1810_v25 = vadd.f32 %v1809_v15, %v4267_v17  ;;  %v1858_v10 = vpop.f32.mrf.mxu1 }
 0x1e2   : > { %1313 = vmax.xlane.f32.xlu2 %v1312_v48 }
 0x1e3   : > { %v1859_v47 = vadd.f32 %v1858_v10, %v1810_v25 }
 0x1e5   : > { %vm2093_vm1 = vcmp.gt.f32.partialorder %v1859_v47, 0.0  ;;  %v2109_v42 = vmul.f32 0.01, %v1859_v47  ;;  %v1218_v29 = vpop.f32.mrf.mxu2  ;;  %v1267_v14 = vpop.f32.mrf.mxu3 }
 0x1e6   : > { %v4667_v23 = vadd.f32 %v1218_v29, %v4421_v63  ;;  %v4670_v8 = vadd.f32 %v1267_v14, %v4423_v1  ;;  %v1272_v40 = vpop.xlane.xlu0 %1271 }
 0x1e7   : > { %v2125_v60 = vsel %vm2093_vm1, %v1859_v47, %v2109_v42  ;;  %v1318_v15 = vsub.f32 %v4430_v44, %v1272_v40  ;;  %v1319_v48 = vsub.f32 %v4433_v49, %v1272_v40 }
 0x1e8   : > { %v2140_v18 = vpack.c.bf16 %v2125_v60, %v2124_v22  ;;  %v1812_v25 = vpop.f32.mrf.mxu0  ;;  %v1315_v10 = vmax.f32 %v4667_v23, %v4670_v8 }
 0x1e9   : > { %v1350_v46 = vmul.f32 1.442695, %v1318_v15  ;;  %v1352_v50 = vmul.f32 1.442695, %v1319_v48  ;;  %v1861_v6 = vpop.f32.mrf.mxu1  ;;  %v1813_v29 = vadd.f32 %v1812_v25, %v4267_v17 }
 0x1ea   : > { %2156 = vmatmul.bf16.vlgmr.msrb.gmra.mxu2 %v2140_v18  ;;  %2205 = vmatmul.bf16.vlgmr.msrb.gmra.mxu3 %v2140_v18 }
 0x1eb   : > { %3386 = vpow2.f32 %v1350_v46  ;;  %1316 = vmax.xlane.f32.xlu0 %v1315_v10  ;;  %2007 = vmatmul.bf16.gmra.mxu0 %v4411_v51  ;;  %v1862_v61 = vadd.f32 %v1861_v6, %v1813_v29 }
 0x1ec   : > { %3388 = vpow2.f32 %v1352_v50  ;;  %2056 = vmatmul.bf16.gmra.mxu1 %v4416_v55 }
 0x1ed   : > { %v1905_v44 = vpop.f32.mrf.mxu2  ;;  %v1954_v49 = vpop.f32.mrf.mxu3  ;;  %v2110_v15 = vmul.f32 0.01, %v1862_v61  ;;  %vm2094_vm2 = vcmp.gt.f32.partialorder %v1862_v61, 0.0 }
 0x1ee   : > { %v1906_v47 = vadd.f32 %v1905_v44, %v4278_v39  ;;  %v1275_v60 = vpop.xlane.xlu0 %1274 }
 0x1ef   : > { %v1320_v34 = vsub.f32 %v4445_v19, %v1275_v60  ;;  %v1321_v42 = vsub.f32 %v4448_v12, %v1275_v60 }
 0x1f0   : > { %v4682_v18 = vadd.f32 %v1954_v49, %v1906_v47  ;;  %v1814_v46 = vpop.f32.mrf.mxu0  ;;  %v2126_v47 = vsel %vm2094_vm2, %v1862_v61, %v2110_v15 }
 0x1f1   : > { %v4684_v14 = vpop.eup %3386  ;;  %v1354_v40 = vmul.f32 1.442695, %v1320_v34  ;;  %v1356_v51 = vmul.f32 1.442695, %v1321_v42  ;;  %v1815_v50 = vadd.f32 %v1814_v46, %v4267_v17  ;;  %v1863_v55 = vpop.f32.mrf.mxu1 }
 0x1f2   : > { %v4687_v22 = vpop.eup %3388 }
 0x1f3   : > { %3390 = vpow2.f32 %v1354_v40  ;;  %v1864_v48 = vadd.f32 %v1863_v55, %v1815_v50  ;;  %v1414_v6 = vadd.f32 %v4687_v22, %v4684_v14 }
 0x1f4   : > { %3392 = vpow2.f32 %v1356_v51 }
 0x1f5   : > { %vm2095_vm3 = vcmp.gt.f32.partialorder %v1864_v48, 0.0  ;;  %v2111_v19 = vmul.f32 0.01, %v1864_v48  ;;  %1415 = vadd.xlane.f32.xlu1 %v1414_v6  ;;  %v1907_v12 = vpop.f32.mrf.mxu2  ;;  %v1956_v25 = vpop.f32.mrf.mxu3 }
 0x1f6   : > { %v1908_v10 = vadd.f32 %v1907_v12, %v4278_v39  ;;  %v1278_v29 = vpop.xlane.xlu1 %1277 }
 0x1f7   : > { %v1322_v44 = vsub.f32 %v4464_v41, %v1278_v29  ;;  %v1323_v49 = vsub.f32 %v4467_v45, %v1278_v29  ;;  %v2127_v60 = vsel %vm2095_vm3, %v1864_v48, %v2111_v19 }
 0x1f8   : > { %v4694_v34 = vadd.f32 %v1956_v25, %v1908_v10  ;;  %v1817_v42 = vpop.f32.mrf.mxu0  ;;  %v2141_v46 = vpack.c.bf16 %v2127_v60, %v2126_v47 }
 0x1f9   : > { %v4696_v40 = vpop.eup %3390  ;;  %v1358_v51 = vmul.f32 1.442695, %v1322_v44  ;;  %v1360_v50 = vmul.f32 1.442695, %v1323_v49  ;;  %v1866_v55 = vpop.f32.mrf.mxu1  ;;  %v1818_v41 = vadd.f32 %v1817_v42, %v4267_v17 }
 0x1fa   : > { %v4698_v6 = vpop.eup %3392  ;;  %2161 = vmatmul.bf16.gmra.mxu2 %v2141_v46  ;;  %2210 = vmatmul.bf16.gmra.mxu3 %v2141_v46 }
 0x1fb   : > { %3394 = vpow2.f32 %v1358_v51  ;;  %v1417_v45 = vadd.f32 %v4698_v6, %v4696_v40  ;;  %2012 = vmatmul.bf16.gmra.mxu0 %v4450_v31  ;;  %v1867_v12 = vadd.f32 %v1866_v55, %v1818_v41 }
 0x1fc   : > { %3396 = vpow2.f32 %v1360_v50  ;;  %2061 = vmatmul.bf16.gmra.mxu1 %v4454_v35 }
 0x1fd   : > { %1418 = vadd.xlane.f32.xlu2 %v1417_v45  ;;  %v1910_v61 = vpop.f32.mrf.mxu2  ;;  %v1959_v15 = vpop.f32.mrf.mxu3  ;;  %v2112_v46 = vmul.f32 0.01, %v1867_v12  ;;  %vm2096_vm4 = vcmp.gt.f32.partialorder %v1867_v12, 0.0 }
 0x1fe   : > { %v1911_v48 = vadd.f32 %v1910_v61, %v4278_v39  ;;  %v1281_v19 = vpop.xlane.xlu1 %1280 }
 0x1ff   : > { %v1324_v25 = vsub.f32 %v4479_v58, %v1281_v19  ;;  %v1325_v10 = vsub.f32 %v4482_v0, %v1281_v19 }
 0x200   : > { %v4708_v29 = vadd.f32 %v1959_v15, %v1911_v48  ;;  %v1819_v44 = vpop.f32.mrf.mxu0  ;;  %v2128_v48 = vsel %vm2096_vm4, %v1867_v12, %v2112_v46 }
 0x201   : > { %v4710_v49 = vpop.eup %3394  ;;  %v1362_v31 = vmul.f32 1.442695, %v1324_v25  ;;  %v1364_v47 = vmul.f32 1.442695, %v1325_v10  ;;  %v1820_v35 = vadd.f32 %v1819_v44, %v4267_v17  ;;  %v1868_v60 = vpop.f32.mrf.mxu1 }
 0x202   : > { %v4713_v42 = vpop.eup %3396 }
 0x203   : > { %3398 = vpow2.f32 %v1362_v31  ;;  %v1869_v51 = vadd.f32 %v1868_v60, %v1820_v35  ;;  %v1420_v58 = vadd.f32 %v4713_v42, %v4710_v49 }
 0x204   : > { %3400 = vpow2.f32 %v1364_v47 }
 0x205   : > { %vm2097_vm5 = vcmp.gt.f32.partialorder %v1869_v51, 0.0  ;;  %v2113_v0 = vmul.f32 0.01, %v1869_v51  ;;  %1421 = vadd.xlane.f32.xlu0 %v1420_v58  ;;  %v1912_v50 = vpop.f32.mrf.mxu2  ;;  %v1961_v55 = vpop.f32.mrf.mxu3 }
 0x206   : > { %v1913_v41 = vadd.f32 %v1912_v50, %v4278_v39  ;;  %v1284_v45 = vpop.xlane.xlu2 %1283 }
 0x207   : > { %v1326_v61 = vsub.f32 %v4498_v37, %v1284_v45  ;;  %v1327_v15 = vsub.f32 %v4501_v26, %v1284_v45  ;;  %v2129_v19 = vsel %vm2097_vm5, %v1869_v51, %v2113_v0 }
 0x208   : > { %v4720_v25 = vadd.f32 %v1961_v55, %v1913_v41  ;;  %v1822_v10 = vpop.f32.mrf.mxu0  ;;  %v2142_v44 = vpack.c.bf16 %v2129_v19, %v2128_v48 }
 0x209   : > { %v4722_v31 = vpop.eup %3398  ;;  %v1366_v47 = vmul.f32 1.442695, %v1326_v61  ;;  %v1368_v35 = vmul.f32 1.442695, %v1327_v15  ;;  %v1871_v60 = vpop.f32.mrf.mxu1  ;;  %v1823_v37 = vadd.f32 %v1822_v10, %v4267_v17 }
 0x20a   : > { %v4724_v58 = vpop.eup %3400  ;;  %2166 = vmatmul.bf16.gmra.mxu2 %v2142_v44  ;;  %2215 = vmatmul.bf16.gmra.mxu3 %v2142_v44 }
 0x20b   : > { %3402 = vpow2.f32 %v1366_v47  ;;  %v1423_v26 = vadd.f32 %v4724_v58, %v4722_v31  ;;  %2017 = vmatmul.bf16.gmra.mxu0 %v4484_v2  ;;  %v1872_v50 = vadd.f32 %v1871_v60, %v1823_v37 }
 0x20c   : > { %3404 = vpow2.f32 %v1368_v35  ;;  %2066 = vmatmul.bf16.gmra.mxu1 %v4488_v43 }
 0x20d   : > { %1424 = vadd.xlane.f32.xlu1 %v1423_v26  ;;  %v1915_v12 = vpop.f32.mrf.mxu2  ;;  %v1964_v46 = vpop.f32.mrf.mxu3  ;;  %v2114_v44 = vmul.f32 0.01, %v1872_v50  ;;  %vm2098_vm6 = vcmp.gt.f32.partialorder %v1872_v50, 0.0 }
 0x20e   : > { %v1916_v51 = vadd.f32 %v1915_v12, %v4278_v39  ;;  %v1287_v0 = vpop.xlane.xlu2 %1286 }
 0x20f   : > { %v1328_v55 = vsub.f32 %v4513_v52, %v1287_v0  ;;  %v1329_v41 = vsub.f32 %v4516_v5, %v1287_v0 }
 0x210   : > { %v4734_v45 = vadd.f32 %v1964_v46, %v1916_v51  ;;  %v1824_v61 = vpop.f32.mrf.mxu0  ;;  %v2130_v51 = vsel %vm2098_vm6, %v1872_v50, %v2114_v44 }
 0x211   : > { %v4736_v15 = vpop.eup %3402  ;;  %v1370_v2 = vmul.f32 1.442695, %v1328_v55  ;;  %v1372_v48 = vmul.f32 1.442695, %v1329_v41  ;;  %v1825_v43 = vadd.f32 %v1824_v61, %v4267_v17  ;;  %v1873_v19 = vpop.f32.mrf.mxu1 }
 0x212   : > { %v4739_v10 = vpop.eup %3404 }
 0x213   : > { %3406 = vpow2.f32 %v1370_v2  ;;  %v1874_v47 = vadd.f32 %v1873_v19, %v1825_v43  ;;  %v1426_v52 = vadd.f32 %v4739_v10, %v4736_v15 }
 0x214   : > { %3408 = vpow2.f32 %v1372_v48 }
 0x215   : > { %vm2099_vm7 = vcmp.gt.f32.partialorder %v1874_v47, 0.0  ;;  %v2115_v5 = vmul.f32 0.01, %v1874_v47  ;;  %1427 = vadd.xlane.f32.xlu2 %v1426_v52  ;;  %v1917_v35 = vpop.f32.mrf.mxu2  ;;  %v1966_v60 = vpop.f32.mrf.mxu3 }
 0x216   : > { %v1918_v37 = vadd.f32 %v1917_v35, %v4278_v39  ;;  %v1290_v26 = vpop.xlane.xlu0 %1289 }
 0x217   : > { %v1330_v12 = vsub.f32 %v4532_v38, %v1290_v26  ;;  %v1331_v46 = vsub.f32 %v4535_v57, %v1290_v26  ;;  %v2131_v0 = vsel %vm2099_vm7, %v1874_v47, %v2115_v5 }
 0x218   : > { %v4746_v55 = vadd.f32 %v1966_v60, %v1918_v37  ;;  %v1827_v41 = vpop.f32.mrf.mxu0  ;;  %v2143_v61 = vpack.c.bf16 %v2131_v0, %v2130_v51 }
 0x219   : > { %v4748_v2 = vpop.eup %3406  ;;  %v1374_v48 = vmul.f32 1.442695, %v1330_v12  ;;  %v1376_v43 = vmul.f32 1.442695, %v1331_v46  ;;  %v1876_v19 = vpop.f32.mrf.mxu1  ;;  %v1828_v38 = vadd.f32 %v1827_v41, %v4267_v17 }
 0x21a   : > { %v4750_v52 = vpop.eup %3408  ;;  %2171 = vmatmul.bf16.gmra.mxu2 %v2143_v61  ;;  %2220 = vmatmul.bf16.gmra.mxu3 %v2143_v61 }
 0x21b   : > { %3410 = vpow2.f32 %v1374_v48  ;;  %v1429_v57 = vadd.f32 %v4750_v52, %v4748_v2  ;;  %2022 = vmatmul.bf16.gmra.mxu0 %v4518_v30  ;;  %v1877_v35 = vadd.f32 %v1876_v19, %v1828_v38 }
 0x21c   : > { %3412 = vpow2.f32 %v1376_v43  ;;  %2071 = vmatmul.bf16.gmra.mxu1 %v4522_v33 }
 0x21d   : > { %1430 = vadd.xlane.f32.xlu0 %v1429_v57  ;;  %v1920_v50 = vpop.f32.mrf.mxu2  ;;  %v1969_v44 = vpop.f32.mrf.mxu3  ;;  %v2116_v61 = vmul.f32 0.01, %v1877_v35  ;;  %vm2100_vm8 = vcmp.gt.f32.partialorder %v1877_v35, 0.0 }
 0x21e   : > { %v1921_v47 = vadd.f32 %v1920_v50, %v4278_v39  ;;  %v1293_v5 = vpop.xlane.xlu1 %1292 }
 0x21f   : > { %v1332_v60 = vsub.f32 %v4547_v21, %v1293_v5  ;;  %v1333_v37 = vsub.f32 %v4550_v32, %v1293_v5 }
 0x220   : > { %v4760_v26 = vadd.f32 %v1969_v44, %v1921_v47  ;;  %v1829_v12 = vpop.f32.mrf.mxu0  ;;  %v2132_v47 = vsel %vm2100_vm8, %v1877_v35, %v2116_v61 }
 0x221   : > { %v4762_v46 = vpop.eup %3410  ;;  %v1378_v30 = vmul.f32 1.442695, %v1332_v60  ;;  %v1380_v51 = vmul.f32 1.442695, %v1333_v37  ;;  %v1830_v33 = vadd.f32 %v1829_v12, %v4267_v17  ;;  %v1878_v0 = vpop.f32.mrf.mxu1 }
 0x222   : > { %v4765_v41 = vpop.eup %3412 }
 0x223   : > { %3414 = vpow2.f32 %v1378_v30  ;;  %v1879_v48 = vadd.f32 %v1878_v0, %v1830_v33  ;;  %v1432_v21 = vadd.f32 %v4765_v41, %v4762_v46 }
 0x224   : > { %3416 = vpow2.f32 %v1380_v51 }
 0x225   : > { %vm2101_vm9 = vcmp.gt.f32.partialorder %v1879_v48, 0.0  ;;  %v2117_v32 = vmul.f32 0.01, %v1879_v48  ;;  %1433 = vadd.xlane.f32.xlu1 %v1432_v21  ;;  %v1922_v43 = vpop.f32.mrf.mxu2  ;;  %v1971_v19 = vpop.f32.mrf.mxu3 }
 0x226   : > { %v1923_v38 = vadd.f32 %v1922_v43, %v4278_v39  ;;  %v1296_v57 = vpop.xlane.xlu2 %1295 }
 0x227   : > { %v1334_v50 = vsub.f32 %v4566_v11, %v1296_v57  ;;  %v1335_v44 = vsub.f32 %v4569_v59, %v1296_v57  ;;  %v2133_v5 = vsel %vm2101_vm9, %v1879_v48, %v2117_v32 }
 0x228   : > { %v4772_v60 = vadd.f32 %v1971_v19, %v1923_v38  ;;  %v1832_v37 = vpop.f32.mrf.mxu0  ;;  %v2144_v12 = vpack.c.bf16 %v2133_v5, %v2132_v47 }
 0x229   : > { %v4774_v30 = vpop.eup %3414  ;;  %v1382_v51 = vmul.f32 1.442695, %v1334_v50  ;;  %v1384_v33 = vmul.f32 1.442695, %v1335_v44  ;;  %v1881_v0 = vpop.f32.mrf.mxu1  ;;  %v1833_v11 = vadd.f32 %v1832_v37, %v4267_v17 }
 0x22a   : > { %v4776_v21 = vpop.eup %3416  ;;  %2176 = vmatmul.bf16.gmra.mxu2 %v2144_v12  ;;  %2225 = vmatmul.bf16.gmra.mxu3 %v2144_v12 }
 0x22b   : > { %3418 = vpow2.f32 %v1382_v51  ;;  %v1435_v59 = vadd.f32 %v4776_v21, %v4774_v30  ;;  %2027 = vmatmul.bf16.gmra.mxu0 %v4552_v53  ;;  %v1882_v43 = vadd.f32 %v1881_v0, %v1833_v11 }
 0x22c   : > { %3420 = vpow2.f32 %v1384_v33  ;;  %2076 = vmatmul.bf16.gmra.mxu1 %v4556_v62 }
 0x22d   : > { %1436 = vadd.xlane.f32.xlu2 %v1435_v59  ;;  %v1925_v35 = vpop.f32.mrf.mxu2  ;;  %v1974_v61 = vpop.f32.mrf.mxu3  ;;  %v2118_v12 = vmul.f32 0.01, %v1882_v43  ;;  %vm2102_vm10 = vcmp.gt.f32.partialorder %v1882_v43, 0.0 }
 0x22e   : > { %v1926_v48 = vadd.f32 %v1925_v35, %v4278_v39  ;;  %v1299_v32 = vpop.xlane.xlu0 %1298 }
 0x22f   : > { %v1336_v19 = vsub.f32 %v4581_v13, %v1299_v32  ;;  %v1337_v38 = vsub.f32 %v4584_v7, %v1299_v32 }
 0x230   : > { %v4786_v57 = vadd.f32 %v1974_v61, %v1926_v48  ;;  %v1834_v50 = vpop.f32.mrf.mxu0  ;;  %v2134_v48 = vsel %vm2102_vm10, %v1882_v43, %v2118_v12 }
 0x231   : > { %v4788_v44 = vpop.eup %3418  ;;  %v1386_v53 = vmul.f32 1.442695, %v1336_v19  ;;  %v1388_v47 = vmul.f32 1.442695, %v1337_v38  ;;  %v1835_v62 = vadd.f32 %v1834_v50, %v4267_v17  ;;  %v1883_v5 = vpop.f32.mrf.mxu1 }
 0x232   : > { %v4791_v37 = vpop.eup %3420 }
 0x233   : > { %3422 = vpow2.f32 %v1386_v53  ;;  %v1884_v51 = vadd.f32 %v1883_v5, %v1835_v62  ;;  %v1438_v13 = vadd.f32 %v4791_v37, %v4788_v44 }
 0x234   : > { %3424 = vpow2.f32 %v1388_v47 }
 0x235   : > { %vm2103_vm11 = vcmp.gt.f32.partialorder %v1884_v51, 0.0  ;;  %v2119_v7 = vmul.f32 0.01, %v1884_v51  ;;  %1439 = vadd.xlane.f32.xlu0 %v1438_v13  ;;  %v1927_v33 = vpop.f32.mrf.mxu2  ;;  %v1976_v0 = vpop.f32.mrf.mxu3 }
 0x236   : > { %v1928_v11 = vadd.f32 %v1927_v33, %v4278_v39  ;;  %v1302_v59 = vpop.xlane.xlu1 %1301 }
 0x237   : > { %v1338_v35 = vsub.f32 %v4600_v28, %v1302_v59  ;;  %v1339_v61 = vsub.f32 %v4603_v27, %v1302_v59  ;;  %v2135_v32 = vsel %vm2103_vm11, %v1884_v51, %v2119_v7 }
 0x238   : > { %v4798_v19 = vadd.f32 %v1976_v0, %v1928_v11  ;;  %v1837_v38 = vpop.f32.mrf.mxu0  ;;  %v2145_v50 = vpack.c.bf16 %v2135_v32, %v2134_v48 }
 0x239   : > { %v4800_v53 = vpop.eup %3422  ;;  %v1390_v47 = vmul.f32 1.442695, %v1338_v35  ;;  %v1392_v62 = vmul.f32 1.442695, %v1339_v61  ;;  %v1886_v5 = vpop.f32.mrf.mxu1  ;;  %v1838_v28 = vadd.f32 %v1837_v38, %v4267_v17 }
 0x23a   : > { %5502 = vst [vmem:[#allocation51_spill] sm:$0xff] %v4798_v19  ;;  %v4802_v13 = vpop.eup %3424  ;;  %2181 = vmatmul.bf16.gmra.mxu2 %v2145_v50  ;;  %2230 = vmatmul.bf16.gmra.mxu3 %v2145_v50 }
 0x23b   : > { %3426 = vpow2.f32 %v1390_v47  ;;  %v1441_v27 = vadd.f32 %v4802_v13, %v4800_v53  ;;  %2032 = vmatmul.bf16.gmra.mxu0 %v4586_v24  ;;  %v1887_v7 = vadd.f32 %v1886_v5, %v1838_v28 }
 0x23c   : > { %3428 = vpow2.f32 %v1392_v62  ;;  %2081 = vmatmul.bf16.gmra.mxu1 %v4590_v56 }
 0x23d   : > { %1442 = vadd.xlane.f32.xlu1 %v1441_v27  ;;  %v1930_v43 = vpop.f32.mrf.mxu2  ;;  %v1979_v12 = vpop.f32.mrf.mxu3  ;;  %v2120_v24 = vmul.f32 0.01, %v1887_v7  ;;  %vm2104_vm12 = vcmp.gt.f32.partialorder %v1887_v7, 0.0 }
 0x23e   : > { %v1931_v51 = vadd.f32 %v1930_v43, %v4278_v39 }
 0x23f   : > { %v2136_v62 = vsel %vm2104_vm12, %v1887_v7, %v2120_v24 }
 0x240   : > { %v4810_v33 = vadd.f32 %v1979_v12, %v1931_v51  ;;  %v1839_v0 = vpop.f32.mrf.mxu0 }
 0x241   : > { %v4812_v11 = vpop.eup %3426  ;;  %v1840_v59 = vadd.f32 %v1839_v0, %v4267_v17  ;;  %v1888_v35 = vpop.f32.mrf.mxu1 }
 0x242   : > { %5503 = vst [vmem:[#allocation52_spill] sm:$0xff] %v4810_v33  ;;  %v4815_v61 = vpop.eup %3428 }
 0x243   : > { %v1889_v48 = vadd.f32 %v1888_v35, %v1840_v59  ;;  %v1444_v56 = vadd.f32 %v4815_v61, %v4812_v11 }
 0x245   : > { %vm2105_vm13 = vcmp.gt.f32.partialorder %v1889_v48, 0.0  ;;  %v2121_v32 = vmul.f32 0.01, %v1889_v48  ;;  %1445 = vadd.xlane.f32.xlu2 %v1444_v56  ;;  %v1932_v38 = vpop.f32.mrf.mxu2  ;;  %v1981_v50 = vpop.f32.mrf.mxu3 }
 0x246   : > { %v1933_v47 = vadd.f32 %v1932_v38, %v4278_v39 }
 0x247   : > { %v2137_v5 = vsel %vm2105_vm13, %v1889_v48, %v2121_v32 }
 0x248   : > { %v4820_v28 = vadd.f32 %v1981_v50, %v1933_v47  ;;  %v1842_v27 = vpop.f32.mrf.mxu0  ;;  %v2146_v43 = vpack.c.bf16 %v2137_v5, %v2136_v62 }
 0x249   : > { %v1891_v12 = vpop.f32.mrf.mxu1  ;;  %v1843_v51 = vadd.f32 %v1842_v27, %v4267_v17 }
 0x24a   : > { %5504 = vst [vmem:[#allocation53_spill] sm:$0xff] %v4820_v28  ;;  %2186 = vmatmul.bf16.gmra.mxu2 %v2146_v43  ;;  %2235 = vmatmul.bf16.gmra.mxu3 %v2146_v43 }
 0x24b   : > { %2037 = vmatmul.bf16.gmra.mxu0 %v4620_v16  ;;  %v1892_v56 = vadd.f32 %v1891_v12, %v1843_v51 }
 0x24c   : > { %2086 = vmatmul.bf16.gmra.mxu1 %v4624_v36 }
 0x24d   : > { %v1935_v0 = vpop.f32.mrf.mxu2  ;;  %v1984_v59 = vpop.f32.mrf.mxu3  ;;  %v2122_v38 = vmul.f32 0.01, %v1892_v56  ;;  %vm2106_vm14 = vcmp.gt.f32.partialorder %v1892_v56, 0.0 }
 0x24e   : > { %v1936_v35 = vadd.f32 %v1935_v0, %v4278_v39 }
 0x24f   : > { %v2138_v5 = vsel %vm2106_vm14, %v1892_v56, %v2122_v38  ;;  %v4840_v38 = vpop.xlane.xlu0 %1307 }
 0x250   : > { %v4826_v7 = vadd.f32 %v1984_v59, %v1936_v35  ;;  %v1844_v24 = vpop.f32.mrf.mxu0  ;;  %v4833_v59 = vpop.xlane.xlu2 %1304 }
 0x251   : > { %v1845_v48 = vadd.f32 %v1844_v24, %v4267_v17  ;;  %v1893_v32 = vpop.f32.mrf.mxu1  ;;  %v4835_v35 = vpop.xlane.xlu1 %1310 }
 0x252   : > { %5505 = vst [vmem:[#allocation54_spill] sm:$0xff] %v4826_v7 }
 0x253   : > { %v1894_v50 = vadd.f32 %v1893_v32, %v1845_v48 }
 0x255   : > { %vm2107_vm15 = vcmp.gt.f32.partialorder %v1894_v50, 0.0  ;;  %v2123_v47 = vmul.f32 0.01, %v1894_v50  ;;  %v1937_v62 = vpop.f32.mrf.mxu2  ;;  %v1986_v16 = vpop.f32.mrf.mxu3 }
 0x256   : > { %v1938_v36 = vadd.f32 %v1937_v62, %v4278_v39 }
 0x257   : > { %v2139_v27 = vsel %vm2107_vm15, %v1894_v50, %v2123_v47 }
 0x258   : > { %v4830_v43 = vadd.f32 %v1986_v16, %v1938_v36  ;;  %v2147_v12 = vpack.c.bf16 %v2139_v27, %v2138_v5  ;;  %v4842_v50 = vpop.xlane.xlu2 %1313 }
 0x25a   : > { %5506 = vst [vmem:[#allocation55_spill] sm:$0xff] %v4830_v43  ;;  %2191 = vmatmul.bf16.gmra.mxu2 %v2147_v12  ;;  %2240 = vmatmul.bf16.gmra.mxu3 %v2147_v12 }
 0x25d   : > { %v1940_v51 = vpop.f32.mrf.mxu2  ;;  %v1989_v0 = vpop.f32.mrf.mxu3 }
 0x25e   : > { %v1941_v17 = vadd.f32 %v1940_v51, %v4278_v39  ;;  %v4852_v51 = vpop.xlane.xlu0 %1316 }
 0x260   : > { %v4837_v24 = vadd.f32 %v1989_v0, %v1941_v17 }
 0x262   : > { %5507 = vst [vmem:[#allocation56_spill] sm:$0xff] %v4837_v24 }
 0x265   : > { %v1942_v48 = vpop.f32.mrf.mxu2  ;;  %v1991_v32 = vpop.f32.mrf.mxu3 }
 0x266   : > { %v1943_v56 = vadd.f32 %v1942_v48, %v4278_v39 }
 0x268   : > { %v4844_v47 = vadd.f32 %v1991_v32, %v1943_v56  ;;  %v1416_v62 = vpop.xlane.xlu1 %1415 }
 0x269   : > { %3430 = vrcp.f32 %v1416_v62 }
 0x26a   : > { %5508 = vst [vmem:[#allocation57_spill] sm:$0xff] %v4844_v47 }
 0x26d   : > { %v2157_v16 = vpop.f32.mrf.mxu2  ;;  %v2206_v36 = vpop.f32.mrf.mxu3 }
 0x26e   : > { %v4847_v5 = vadd.f32 %v2157_v16, %v4421_v63  ;;  %v4850_v27 = vadd.f32 %v2206_v36, %v4423_v1 }
 0x26f   : > { %v3431_v12 = vpop.eup %3430 }
 0x270   : > { %v1478_v39 = vmul.f32 %v3431_v12, %v4684_v14  ;;  %v1479_v0 = vmul.f32 %v3431_v12, %v4687_v22  ;;  %v1419_v17 = vpop.xlane.xlu2 %1418  ;;  %v2246_v48 = vmax.f32 %v4847_v5, %v4850_v27 }
 0x271   : > { %3432 = vrcp.f32 %v1419_v17 }
 0x272   : > { %v1510_v32 = vadd.f32 1.0, %v1478_v39  ;;  %v1511_v56 = vadd.f32 1.0, %v1479_v0  ;;  %2247 = vmax.xlane.f32.xlu0 %v2246_v48 }
 0x274   : > { %v1542_v62 = vmul.f32 %v1510_v32, %v4285_v20  ;;  %v1543_v16 = vmul.f32 %v1511_v56, %v4398_v3 }
 0x275   : > { %v2159_v36 = vpop.f32.mrf.mxu2  ;;  %v2208_v47 = vpop.f32.mrf.mxu3 }
 0x276   : > { %vm1574_vm0 = vcmp.gt.f32.partialorder %v1542_v62, 0.0  ;;  %vm1575_vm1 = vcmp.gt.f32.partialorder %v1543_v16, 0.0  ;;  %v1606_v14 = vmul.f32 0.01, %v1542_v62  ;;  %v1607_v24 = vmul.f32 0.01, %v1543_v16 }
 0x277   : > { %v3433_v22 = vpop.eup %3432  ;;  %v4861_v12 = vadd.f32 %v2159_v36, %v4421_v63  ;;  %v4864_v17 = vadd.f32 %v2208_v47, %v4423_v1 }
 0x278   : > { %v1638_v39 = vsel %vm1574_vm0, %v1542_v62, %v1606_v14  ;;  %v1639_v0 = vsel %vm1575_vm1, %v1543_v16, %v1607_v24  ;;  %v1480_v20 = vmul.f32 %v3433_v22, %v4696_v40  ;;  %v1481_v3 = vmul.f32 %v3433_v22, %v4698_v6  ;;  %v1422_v48 = vpop.xlane.xlu0 %1421 }
 0x279   : > { %v1670_v32 = vpack.c.bf16 %v1639_v0, %v1638_v39  ;;  %3434 = vrcp.f32 %v1422_v48  ;;  %v2249_v56 = vmax.f32 %v4861_v12, %v4864_v17 }
 0x27a   : > { %v1512_v43 = vadd.f32 1.0, %v1480_v20  ;;  %v1513_v7 = vadd.f32 1.0, %v1481_v3 }
 0x27b   : > { %1686 = vst [vmem:[%s4872_s28] sm:$0xff] %v1670_v32  ;;  %2250 = vmax.xlane.f32.xlu1 %v2249_v56  ;;  %v5509_v56 = vld [vmem:[#allocation24_spill] sm:$0xff] }
 0x27c   : > { %v1544_v24 = vmul.f32 %v1512_v43, %v4296_v9  ;;  %v1545_v40 = vmul.f32 %v1513_v7, %v4405_v4 }
 0x27d   : > { %v2162_v47 = vpop.f32.mrf.mxu2  ;;  %v2211_v6 = vpop.f32.mrf.mxu3 }
 0x27e   : > { %vm1576_vm2 = vcmp.gt.f32.partialorder %v1544_v24, 0.0  ;;  %vm1577_vm3 = vcmp.gt.f32.partialorder %v1545_v40, 0.0  ;;  %v1608_v62 = vmul.f32 0.01, %v1544_v24  ;;  %v1609_v16 = vmul.f32 0.01, %v1545_v40 }
 0x27f   : > { %v3435_v36 = vpop.eup %3434  ;;  %v4878_v14 = vadd.f32 %v2162_v47, %v4421_v63  ;;  %v4881_v22 = vadd.f32 %v2211_v6, %v4423_v1 }
 0x280   : > { %v1640_v39 = vsel %vm1576_vm2, %v1544_v24, %v1608_v62  ;;  %v1641_v0 = vsel %vm1577_vm3, %v1545_v40, %v1609_v16  ;;  %v1482_v9 = vmul.f32 %v3435_v36, %v4710_v49  ;;  %v1483_v4 = vmul.f32 %v3435_v36, %v4713_v42  ;;  %v1425_v7 = vpop.xlane.xlu1 %1424 }
 0x281   : > { %v1671_v43 = vpack.c.bf16 %v1641_v0, %v1640_v39  ;;  %3436 = vrcp.f32 %v1425_v7  ;;  %v2252_v20 = vmax.f32 %v4878_v14, %v4881_v22 }
 0x282   : > { %v1514_v3 = vadd.f32 1.0, %v1482_v9  ;;  %v1515_v48 = vadd.f32 1.0, %v1483_v4 }
 0x283   : > { %1687 = vst [vmem:[%s4872_s28 + $0x8] sm:$0xff] %v1671_v43  ;;  %2253 = vmax.xlane.f32.xlu2 %v2252_v20 }
 0x284   : > { %v1546_v32 = vmul.f32 %v1514_v3, %v4308_v54  ;;  %v1547_v47 = vmul.f32 %v1515_v48, %v5509_v56  ;;  %v5510_v3 = vld [vmem:[#allocation25_spill] sm:$0xff]  ;;  %v5511_v56 = vld [vmem:[#allocation28_spill] sm:$0xff] }
 0x285   : > { %v2164_v24 = vpop.f32.mrf.mxu2  ;;  %v2213_v40 = vpop.f32.mrf.mxu3 }
 0x286   : > { %vm1578_vm4 = vcmp.gt.f32.partialorder %v1546_v32, 0.0  ;;  %vm1579_vm5 = vcmp.gt.f32.partialorder %v1547_v47, 0.0  ;;  %v1610_v49 = vmul.f32 0.01, %v1546_v32  ;;  %v1611_v42 = vmul.f32 0.01, %v1547_v47 }
 0x287   : > { %v3437_v6 = vpop.eup %3436  ;;  %v4891_v62 = vadd.f32 %v2164_v24, %v4421_v63  ;;  %v4894_v16 = vadd.f32 %v2213_v40, %v4423_v1 }
 0x288   : > { %v1642_v36 = vsel %vm1578_vm4, %v1546_v32, %v1610_v49  ;;  %v1643_v39 = vsel %vm1579_vm5, %v1547_v47, %v1611_v42  ;;  %v1484_v54 = vmul.f32 %v3437_v6, %v4722_v31  ;;  %v1485_v0 = vmul.f32 %v3437_v6, %v4724_v58  ;;  %v1428_v9 = vpop.xlane.xlu2 %1427 }
 0x289   : > { %v1672_v4 = vpack.c.bf16 %v1643_v39, %v1642_v36  ;;  %3438 = vrcp.f32 %v1428_v9  ;;  %v2255_v7 = vmax.f32 %v4891_v62, %v4894_v16 }
 0x28a   : > { %v1516_v43 = vadd.f32 1.0, %v1484_v54  ;;  %v1517_v20 = vadd.f32 1.0, %v1485_v0 }
 0x28b   : > { %1688 = vst [vmem:[%s4872_s28 + $0x10] sm:$0xff] %v1672_v4  ;;  %2256 = vmax.xlane.f32.xlu0 %v2255_v7 }
 0x28c   : > { %v1548_v48 = vmul.f32 %v1516_v43, %v5510_v3  ;;  %v1549_v24 = vmul.f32 %v1517_v20, %v5511_v56  ;;  %v5512_v20 = vld [vmem:[#allocation15_spill] sm:$0xff]  ;;  %v5513_v56 = vld [vmem:[#allocation29_spill] sm:$0xff] }
 0x28d   : > { %v2167_v32 = vpop.f32.mrf.mxu2  ;;  %v2216_v47 = vpop.f32.mrf.mxu3 }
 0x28e   : > { %vm1580_vm6 = vcmp.gt.f32.partialorder %v1548_v48, 0.0  ;;  %vm1581_vm7 = vcmp.gt.f32.partialorder %v1549_v24, 0.0  ;;  %v1612_v31 = vmul.f32 0.01, %v1548_v48  ;;  %v1613_v58 = vmul.f32 0.01, %v1549_v24 }
 0x28f   : > { %v3439_v40 = vpop.eup %3438  ;;  %v4904_v49 = vadd.f32 %v2167_v32, %v4421_v63  ;;  %v4907_v42 = vadd.f32 %v2216_v47, %v4423_v1 }
 0x290   : > { %v1644_v6 = vsel %vm1580_vm6, %v1548_v48, %v1612_v31  ;;  %v1645_v36 = vsel %vm1581_vm7, %v1549_v24, %v1613_v58  ;;  %v1486_v39 = vmul.f32 %v3439_v40, %v4736_v15  ;;  %v1487_v54 = vmul.f32 %v3439_v40, %v4739_v10  ;;  %v1431_v0 = vpop.xlane.xlu0 %1430 }
 0x291   : > { %v1673_v9 = vpack.c.bf16 %v1645_v36, %v1644_v6  ;;  %3440 = vrcp.f32 %v1431_v0  ;;  %v2258_v4 = vmax.f32 %v4904_v49, %v4907_v42 }
 0x292   : > { %v1518_v7 = vadd.f32 1.0, %v1486_v39  ;;  %v1519_v43 = vadd.f32 1.0, %v1487_v54 }
 0x293   : > { %1689 = vst [vmem:[%s4872_s28 + $0x18] sm:$0xff] %v1673_v9  ;;  %2259 = vmax.xlane.f32.xlu1 %v2258_v4 }
 0x294   : > { %v1550_v3 = vmul.f32 %v1518_v7, %v5512_v20  ;;  %v1551_v32 = vmul.f32 %v1519_v43, %v5513_v56  ;;  %v5514_v43 = vld [vmem:[#allocation16_spill] sm:$0xff] }
 0x295   : > { %v2169_v48 = vpop.f32.mrf.mxu2  ;;  %v2218_v24 = vpop.f32.mrf.mxu3  ;;  %v5515_v56 = vld [vmem:[#allocation32_spill] sm:$0xff] }
 0x296   : > { %vm1582_vm8 = vcmp.gt.f32.partialorder %v1550_v3, 0.0  ;;  %vm1583_vm9 = vcmp.gt.f32.partialorder %v1551_v32, 0.0  ;;  %v1614_v15 = vmul.f32 0.01, %v1550_v3  ;;  %v1615_v10 = vmul.f32 0.01, %v1551_v32 }
 0x297   : > { %v3441_v47 = vpop.eup %3440  ;;  %v4917_v31 = vadd.f32 %v2169_v48, %v4421_v63  ;;  %v4920_v58 = vadd.f32 %v2218_v24, %v4423_v1 }
 0x298   : > { %v1646_v40 = vsel %vm1582_vm8, %v1550_v3, %v1614_v15  ;;  %v1647_v6 = vsel %vm1583_vm9, %v1551_v32, %v1615_v10  ;;  %v1488_v36 = vmul.f32 %v3441_v47, %v4748_v2  ;;  %v1489_v39 = vmul.f32 %v3441_v47, %v4750_v52  ;;  %v1434_v54 = vpop.xlane.xlu1 %1433 }
 0x299   : > { %v1674_v0 = vpack.c.bf16 %v1647_v6, %v1646_v40  ;;  %3442 = vrcp.f32 %v1434_v54  ;;  %v2261_v9 = vmax.f32 %v4917_v31, %v4920_v58 }
 0x29a   : > { %v1520_v4 = vadd.f32 1.0, %v1488_v36  ;;  %v1521_v7 = vadd.f32 1.0, %v1489_v39 }
 0x29b   : > { %1690 = vst [vmem:[%s4872_s28 + $0x20] sm:$0xff] %v1674_v0  ;;  %2262 = vmax.xlane.f32.xlu2 %v2261_v9 }
 0x29c   : > { %v1552_v20 = vmul.f32 %v1520_v4, %v5514_v43  ;;  %v1553_v48 = vmul.f32 %v1521_v7, %v5515_v56  ;;  %v5516_v7 = vld [vmem:[#allocation30_spill] sm:$0xff]  ;;  %v5517_v56 = vld [vmem:[#allocation33_spill] sm:$0xff] }
 0x29d   : > { %v2172_v3 = vpop.f32.mrf.mxu2  ;;  %v2221_v32 = vpop.f32.mrf.mxu3 }
 0x29e   : > { %vm1584_vm10 = vcmp.gt.f32.partialorder %v1552_v20, 0.0  ;;  %vm1585_vm11 = vcmp.gt.f32.partialorder %v1553_v48, 0.0  ;;  %v1616_v2 = vmul.f32 0.01, %v1552_v20  ;;  %v1617_v52 = vmul.f32 0.01, %v1553_v48 }
 0x29f   : > { %v3443_v24 = vpop.eup %3442  ;;  %v4930_v15 = vadd.f32 %v2172_v3, %v4421_v63  ;;  %v4933_v10 = vadd.f32 %v2221_v32, %v4423_v1 }
 0x2a0   : > { %v1648_v47 = vsel %vm1584_vm10, %v1552_v20, %v1616_v2  ;;  %v1649_v40 = vsel %vm1585_vm11, %v1553_v48, %v1617_v52  ;;  %v1490_v6 = vmul.f32 %v3443_v24, %v4762_v46  ;;  %v1491_v36 = vmul.f32 %v3443_v24, %v4765_v41  ;;  %v1437_v39 = vpop.xlane.xlu2 %1436 }
 0x2a1   : > { %v1675_v54 = vpack.c.bf16 %v1649_v40, %v1648_v47  ;;  %3444 = vrcp.f32 %v1437_v39  ;;  %v2264_v0 = vmax.f32 %v4930_v15, %v4933_v10 }
 0x2a2   : > { %v1522_v9 = vadd.f32 1.0, %v1490_v6  ;;  %v1523_v4 = vadd.f32 1.0, %v1491_v36 }
 0x2a3   : > { %1691 = vst [vmem:[%s4872_s28 + $0x28] sm:$0xff] %v1675_v54  ;;  %2265 = vmax.xlane.f32.xlu0 %v2264_v0 }
 0x2a4   : > { %v1554_v43 = vmul.f32 %v1522_v9, %v5516_v7  ;;  %v1555_v3 = vmul.f32 %v1523_v4, %v5517_v56  ;;  %v5518_v4 = vld [vmem:[#allocation17_spill] sm:$0xff]  ;;  %v5519_v56 = vld [vmem:[#allocation34_spill] sm:$0xff] }
 0x2a5   : > { %v2174_v20 = vpop.f32.mrf.mxu2  ;;  %v2223_v48 = vpop.f32.mrf.mxu3 }
 0x2a6   : > { %vm1586_vm12 = vcmp.gt.f32.partialorder %v1554_v43, 0.0  ;;  %vm1587_vm13 = vcmp.gt.f32.partialorder %v1555_v3, 0.0  ;;  %v1618_v46 = vmul.f32 0.01, %v1554_v43  ;;  %v1619_v41 = vmul.f32 0.01, %v1555_v3 }
 0x2a7   : > { %v3445_v32 = vpop.eup %3444  ;;  %v4943_v2 = vadd.f32 %v2174_v20, %v4421_v63  ;;  %v4946_v52 = vadd.f32 %v2223_v48, %v4423_v1 }
 0x2a8   : > { %v1650_v24 = vsel %vm1586_vm12, %v1554_v43, %v1618_v46  ;;  %v1651_v47 = vsel %vm1587_vm13, %v1555_v3, %v1619_v41  ;;  %v1492_v40 = vmul.f32 %v3445_v32, %v4774_v30  ;;  %v1493_v6 = vmul.f32 %v3445_v32, %v4776_v21  ;;  %v1440_v36 = vpop.xlane.xlu0 %1439 }
 0x2a9   : > { %v1676_v39 = vpack.c.bf16 %v1651_v47, %v1650_v24  ;;  %3446 = vrcp.f32 %v1440_v36  ;;  %v2267_v54 = vmax.f32 %v4943_v2, %v4946_v52 }
 0x2aa   : > { %v1524_v0 = vadd.f32 1.0, %v1492_v40  ;;  %v1525_v9 = vadd.f32 1.0, %v1493_v6 }
 0x2ab   : > { %1692 = vst [vmem:[%s4872_s28 + $0x30] sm:$0xff] %v1676_v39  ;;  %2268 = vmax.xlane.f32.xlu1 %v2267_v54 }
 0x2ac   : > { %v1556_v7 = vmul.f32 %v1524_v0, %v5518_v4  ;;  %v1557_v20 = vmul.f32 %v1525_v9, %v5519_v56  ;;  %v5520_v9 = vld [vmem:[#allocation18_spill] sm:$0xff]  ;;  %v5521_v56 = vld [vmem:[#allocation35_spill] sm:$0xff] }
 0x2ad   : > { %v2177_v43 = vpop.f32.mrf.mxu2  ;;  %v2226_v3 = vpop.f32.mrf.mxu3 }
 0x2ae   : > { %vm1588_vm14 = vcmp.gt.f32.partialorder %v1556_v7, 0.0  ;;  %vm1589_vm15 = vcmp.gt.f32.partialorder %v1557_v20, 0.0  ;;  %v1620_v30 = vmul.f32 0.01, %v1556_v7  ;;  %v1621_v21 = vmul.f32 0.01, %v1557_v20 }
 0x2af   : > { %v3447_v48 = vpop.eup %3446  ;;  %v4956_v46 = vadd.f32 %v2177_v43, %v4421_v63  ;;  %v4959_v41 = vadd.f32 %v2226_v3, %v4423_v1 }
 0x2b0   : > { %v1652_v32 = vsel %vm1588_vm14, %v1556_v7, %v1620_v30  ;;  %v1653_v24 = vsel %vm1589_vm15, %v1557_v20, %v1621_v21  ;;  %v1494_v47 = vmul.f32 %v3447_v48, %v4788_v44  ;;  %v1495_v40 = vmul.f32 %v3447_v48, %v4791_v37  ;;  %v1443_v6 = vpop.xlane.xlu1 %1442 }
 0x2b1   : > { %v1677_v36 = vpack.c.bf16 %v1653_v24, %v1652_v32  ;;  %3448 = vrcp.f32 %v1443_v6  ;;  %v2270_v39 = vmax.f32 %v4956_v46, %v4959_v41 }
 0x2b2   : > { %v1526_v54 = vadd.f32 1.0, %v1494_v47  ;;  %v1527_v0 = vadd.f32 1.0, %v1495_v40 }
 0x2b3   : > { %1693 = vst [vmem:[%s4872_s28 + $0x38] sm:$0xff] %v1677_v36  ;;  %2271 = vmax.xlane.f32.xlu2 %v2270_v39 }
 0x2b4   : > { %v1558_v4 = vmul.f32 %v1526_v54, %v5520_v9  ;;  %v1559_v43 = vmul.f32 %v1527_v0, %v5521_v56  ;;  %v5522_v0 = vld [vmem:[#allocation19_spill] sm:$0xff]  ;;  %v5523_v56 = vld [vmem:[#allocation36_spill] sm:$0xff] }
 0x2b5   : > { %v2179_v7 = vpop.f32.mrf.mxu2  ;;  %v2228_v20 = vpop.f32.mrf.mxu3 }
 0x2b6   : > { %vm1590_vm0 = vcmp.gt.f32.partialorder %v1558_v4, 0.0  ;;  %vm1591_vm1 = vcmp.gt.f32.partialorder %v1559_v43, 0.0  ;;  %v1622_v44 = vmul.f32 0.01, %v1558_v4  ;;  %v1623_v37 = vmul.f32 0.01, %v1559_v43 }
 0x2b7   : > { %v3449_v3 = vpop.eup %3448  ;;  %v4969_v30 = vadd.f32 %v2179_v7, %v4421_v63  ;;  %v4972_v21 = vadd.f32 %v2228_v20, %v4423_v1 }
 0x2b8   : > { %v1654_v48 = vsel %vm1590_vm0, %v1558_v4, %v1622_v44  ;;  %v1655_v32 = vsel %vm1591_vm1, %v1559_v43, %v1623_v37  ;;  %v1496_v24 = vmul.f32 %v3449_v3, %v4800_v53  ;;  %v1497_v47 = vmul.f32 %v3449_v3, %v4802_v13  ;;  %v1446_v40 = vpop.xlane.xlu2 %1445 }
 0x2b9   : > { %v1678_v6 = vpack.c.bf16 %v1655_v32, %v1654_v48  ;;  %3450 = vrcp.f32 %v1446_v40  ;;  %v2273_v36 = vmax.f32 %v4969_v30, %v4972_v21 }
 0x2ba   : > { %v1528_v39 = vadd.f32 1.0, %v1496_v24  ;;  %v1529_v54 = vadd.f32 1.0, %v1497_v47 }
 0x2bb   : > { %1694 = vst [vmem:[%s4872_s28 + $0x40] sm:$0xff] %v1678_v6  ;;  %2274 = vmax.xlane.f32.xlu0 %v2273_v36 }
 0x2bc   : > { %v1560_v9 = vmul.f32 %v1528_v39, %v5522_v0  ;;  %v1561_v7 = vmul.f32 %v1529_v54, %v5523_v56  ;;  %v5524_v39 = vld [vmem:[#allocation21_spill] sm:$0xff] }
 0x2bd   : > { %v2182_v4 = vpop.f32.mrf.mxu2  ;;  %v2231_v43 = vpop.f32.mrf.mxu3  ;;  %v5525_v0 = vld [vmem:[#allocation37_spill] sm:$0xff] }
 0x2be   : > { %vm1592_vm2 = vcmp.gt.f32.partialorder %v1560_v9, 0.0  ;;  %vm1593_vm3 = vcmp.gt.f32.partialorder %v1561_v7, 0.0  ;;  %v1624_v53 = vmul.f32 0.01, %v1560_v9  ;;  %v1625_v13 = vmul.f32 0.01, %v1561_v7 }
 0x2bf   : > { %v3451_v20 = vpop.eup %3450  ;;  %v4982_v44 = vadd.f32 %v2182_v4, %v4421_v63  ;;  %v4985_v37 = vadd.f32 %v2231_v43, %v4423_v1 }
 0x2c0   : > { %v1656_v3 = vsel %vm1592_vm2, %v1560_v9, %v1624_v53  ;;  %v1657_v48 = vsel %vm1593_vm3, %v1561_v7, %v1625_v13  ;;  %v1498_v32 = vmul.f32 %v3451_v20, %v4812_v11  ;;  %v1499_v24 = vmul.f32 %v3451_v20, %v4815_v61 }
 0x2c1   : > { %v1679_v47 = vpack.c.bf16 %v1657_v48, %v1656_v3  ;;  %v2276_v40 = vmax.f32 %v4982_v44, %v4985_v37 }
 0x2c2   : > { %v1530_v6 = vadd.f32 1.0, %v1498_v32  ;;  %v1531_v36 = vadd.f32 1.0, %v1499_v24  ;;  %v5526_v24 = vld [vmem:[#allocation41_spill] sm:$0xff] }
 0x2c3   : > { %1695 = vst [vmem:[%s4872_s28 + $0x48] sm:$0xff] %v1679_v47  ;;  %2277 = vmax.xlane.f32.xlu1 %v2276_v40  ;;  %v1340_v47 = vsub.f32 %v5526_v24, %v4833_v59 }
 0x2c4   : > { %v1562_v54 = vmul.f32 %v1530_v6, %v5524_v39  ;;  %v1563_v56 = vmul.f32 %v1531_v36, %v5525_v0  ;;  %v5527_v36 = vld [vmem:[#allocation42_spill] sm:$0xff] }
 0x2c5   : > { %v2184_v4 = vpop.f32.mrf.mxu2  ;;  %v2233_v9 = vpop.f32.mrf.mxu3  ;;  %v1341_v39 = vsub.f32 %v5527_v36, %v4833_v59  ;;  %v1394_v0 = vmul.f32 1.442695, %v1340_v47 }
 0x2c6   : > { %vm1594_vm4 = vcmp.gt.f32.partialorder %v1562_v54, 0.0  ;;  %vm1595_vm5 = vcmp.gt.f32.partialorder %v1563_v56, 0.0  ;;  %v1626_v11 = vmul.f32 0.01, %v1562_v54  ;;  %v1627_v7 = vmul.f32 0.01, %v1563_v56 }
 0x2c7   : > { %v4995_v61 = vadd.f32 %v2184_v4, %v4421_v63  ;;  %v4998_v43 = vadd.f32 %v2233_v9, %v4423_v1  ;;  %v5528_v4 = vld [vmem:[#allocation44_spill] sm:$0xff]  ;;  %3452 = vpow2.f32 %v1394_v0 }
 0x2c8   : > { %v1658_v53 = vsel %vm1594_vm4, %v1562_v54, %v1626_v11  ;;  %v1659_v13 = vsel %vm1595_vm5, %v1563_v56, %v1627_v7  ;;  %v1396_v56 = vmul.f32 1.442695, %v1341_v39  ;;  %v1342_v9 = vsub.f32 %v5528_v4, %v4840_v38 }
 0x2c9   : > { %v1680_v20 = vpack.c.bf16 %v1659_v13, %v1658_v53  ;;  %v2279_v3 = vmax.f32 %v4995_v61, %v4998_v43  ;;  %v5529_v53 = vld [vmem:[#allocation49_spill] sm:$0xff] }
 0x2ca   : > { %v1346_v13 = vsub.f32 %v5529_v53, %v4842_v50  ;;  %3454 = vpow2.f32 %v1396_v56  ;;  %v1398_v36 = vmul.f32 1.442695, %v1342_v9  ;;  %v5532_v56 = vld [vmem:[#allocation47_spill] sm:$0xff] }
 0x2cb   : > { %1696 = vst [vmem:[%s4872_s28 + $0x50] sm:$0xff] %v1680_v20  ;;  %2280 = vmax.xlane.f32.xlu2 %v2279_v3  ;;  %v5530_v3 = vld [vmem:[#allocation50_spill] sm:$0xff] }
 0x2cc   : > { %v1406_v39 = vmul.f32 1.442695, %v1346_v13  ;;  %3456 = vpow2.f32 %v1398_v36 }
 0x2cd   : > { %v2187_v48 = vpop.f32.mrf.mxu2  ;;  %v2236_v32 = vpop.f32.mrf.mxu3 }
 0x2ce   : > { %v5006_v40 = vadd.f32 %v2187_v48, %v4421_v63  ;;  %v5009_v6 = vadd.f32 %v2236_v32, %v4423_v1  ;;  %v1347_v48 = vsub.f32 %v5530_v3, %v4842_v50  ;;  %v5531_v32 = vld [vmem:[#allocation45_spill] sm:$0xff]  ;;  %v5031_v0 = vpop.eup %3452  ;;  %3458 = vpow2.f32 %v1406_v39 }
 0x2cf   : > { %v1343_v24 = vsub.f32 %v5531_v32, %v4840_v38  ;;  %v5533_v38 = vld [vmem:[#allocation48_spill] sm:$0xff]  ;;  %v1349_v32 = vsub.f32 %v4670_v8, %v4852_v51 }
 0x2d0   : > { %v2282_v54 = vmax.f32 %v5006_v40, %v5009_v6  ;;  %v1345_v3 = vsub.f32 %v5533_v38, %v4835_v35 }
 0x2d1   : > { %v1400_v4 = vmul.f32 1.442695, %v1343_v24 }
 0x2d2   : > { %2283 = vmax.xlane.f32.xlu0 %v2282_v54  ;;  %v1408_v54 = vmul.f32 1.442695, %v1347_v48  ;;  %v1348_v48 = vsub.f32 %v4667_v23, %v4852_v51  ;;  %v1404_v36 = vmul.f32 1.442695, %v1345_v3  ;;  %v1412_v23 = vmul.f32 1.442695, %v1349_v32 }
 0x2d4   : > { %3460 = vpow2.f32 %v1408_v54  ;;  %v1410_v54 = vmul.f32 1.442695, %v1348_v48 }
 0x2d5   : > { %v2189_v11 = vpop.f32.mrf.mxu2  ;;  %v2238_v7 = vpop.f32.mrf.mxu3  ;;  %3462 = vpow2.f32 %v1400_v4 }
 0x2d6   : > { %v5020_v20 = vadd.f32 %v2189_v11, %v4421_v63  ;;  %v5023_v59 = vadd.f32 %v2238_v7, %v4423_v1  ;;  %v5033_v11 = vpop.eup %3454  ;;  %v1344_v7 = vsub.f32 %v5532_v56, %v4835_v35 }
 0x2d7   : > { %v1447_v35 = vadd.f32 %v5033_v11, %v5031_v0  ;;  %v5053_v39 = vpop.eup %3456 }
 0x2d8   : > { %v2285_v47 = vmax.f32 %v5020_v20, %v5023_v59  ;;  %v5055_v56 = vpop.eup %3458 }
 0x2da   : > { %2286 = vmax.xlane.f32.xlu1 %v2285_v47  ;;  %v1402_v47 = vmul.f32 1.442695, %v1344_v7  ;;  %v5057_v4 = vpop.eup %3460 }
 0x2dc   : > { %3464 = vpow2.f32 %v1402_v47 }
 0x2dd   : > { %v2192_v50 = vpop.f32.mrf.mxu2  ;;  %v2241_v53 = vpop.f32.mrf.mxu3  ;;  %3466 = vpow2.f32 %v1404_v36 }
 0x2de   : > { %v5040_v9 = vadd.f32 %v2192_v50, %v4421_v63  ;;  %v5043_v13 = vadd.f32 %v2241_v53, %v4423_v1  ;;  %v5059_v50 = vpop.eup %3462  ;;  %3468 = vpow2.f32 %v1410_v54 }
 0x2df   : > { %3470 = vpow2.f32 %v1412_v23 }
 0x2e0   : > { %v2288_v24 = vmax.f32 %v5040_v9, %v5043_v13 }
 0x2e2   : > { %2289 = vmax.xlane.f32.xlu2 %v2288_v24  ;;  %1448 = vadd.xlane.f32.xlu1 %v1447_v35  ;;  %v1456_v24 = vadd.f32 %v5057_v4, %v5055_v56 }
 0x2e5   : > { %v2194_v8 = vpop.f32.mrf.mxu2  ;;  %v2243_v51 = vpop.f32.mrf.mxu3 }
 0x2e6   : > { %v5062_v53 = vadd.f32 %v2194_v8, %v4421_v63  ;;  %v5065_v7 = vadd.f32 %v2243_v51, %v4423_v1  ;;  %v2248_v38 = vpop.xlane.xlu0 %2247  ;;  %v1450_v63 = vadd.f32 %v5059_v50, %v5053_v39  ;;  %v5075_v1 = vpop.eup %3464 }
 0x2e7   : > { %v2294_v3 = vsub.f32 %v4847_v5, %v2248_v38  ;;  %v2295_v48 = vsub.f32 %v4850_v27, %v2248_v38  ;;  %v5077_v5 = vpop.eup %3466 }
 0x2e8   : > { %v2291_v32 = vmax.f32 %v5062_v53, %v5065_v7  ;;  %v5079_v27 = vpop.eup %3468  ;;  %v1453_v51 = vadd.f32 %v5077_v5, %v5075_v1 }
 0x2e9   : > { %v2326_v35 = vmul.f32 1.442695, %v2294_v3  ;;  %v2328_v47 = vmul.f32 1.442695, %v2295_v48  ;;  %v5081_v36 = vpop.eup %3470 }
 0x2ea   : > { %2292 = vmax.xlane.f32.xlu0 %v2291_v32  ;;  %1457 = vadd.xlane.f32.xlu1 %v1456_v24  ;;  %v1459_v48 = vadd.f32 %v5081_v36, %v5079_v27 }
 0x2eb   : > { %1451 = vadd.xlane.f32.xlu2 %v1450_v63  ;;  %3472 = vpow2.f32 %v2326_v35 }
 0x2ec   : > { %3474 = vpow2.f32 %v2328_v47 }
 0x2ee   : > { %v2251_v54 = vpop.xlane.xlu1 %2250 }
 0x2ef   : > { %v2296_v23 = vsub.f32 %v4861_v12, %v2251_v54  ;;  %v2297_v8 = vsub.f32 %v4864_v17, %v2251_v54 }
 0x2f1   : > { %v2330_v38 = vmul.f32 1.442695, %v2296_v23  ;;  %v2332_v3 = vmul.f32 1.442695, %v2297_v8  ;;  %v5089_v32 = vpop.eup %3472 }
 0x2f2   : > { %1454 = vadd.xlane.f32.xlu0 %v1453_v51  ;;  %v5091_v24 = vpop.eup %3474 }
 0x2f3   : > { %3476 = vpow2.f32 %v2330_v38  ;;  %1460 = vadd.xlane.f32.xlu2 %v1459_v48  ;;  %v2390_v35 = vadd.f32 %v5091_v24, %v5089_v32 }
 0x2f4   : > { %3478 = vpow2.f32 %v2332_v3 }
 0x2f6   : > { %v2254_v63 = vpop.xlane.xlu2 %2253 }
 0x2f7   : > { %v2298_v12 = vsub.f32 %v4878_v14, %v2254_v63  ;;  %v2299_v17 = vsub.f32 %v4881_v22, %v2254_v63 }
 0x2f9   : > { %v5097_v47 = vpop.eup %3476  ;;  %v2334_v54 = vmul.f32 1.442695, %v2298_v12  ;;  %v2336_v23 = vmul.f32 1.442695, %v2299_v17 }
 0x2fa   : > { %v5099_v8 = vpop.eup %3478  ;;  %2391 = vadd.xlane.f32.xlu0 %v2390_v35 }
 0x2fb   : > { %3480 = vpow2.f32 %v2334_v54  ;;  %v2393_v51 = vadd.f32 %v5099_v8, %v5097_v47 }
 0x2fc   : > { %3482 = vpow2.f32 %v2336_v23 }
 0x2fd   : > { %2394 = vadd.xlane.f32.xlu1 %v2393_v51 }
 0x2fe   : > { %v2257_v38 = vpop.xlane.xlu0 %2256 }
 0x2ff   : > { %v2300_v14 = vsub.f32 %v4891_v62, %v2257_v38  ;;  %v2301_v22 = vsub.f32 %v4894_v16, %v2257_v38 }
 0x301   : > { %v5105_v3 = vpop.eup %3480  ;;  %v2338_v48 = vmul.f32 1.442695, %v2300_v14  ;;  %v2340_v63 = vmul.f32 1.442695, %v2301_v22 }
 0x302   : > { %v5107_v12 = vpop.eup %3482 }
 0x303   : > { %3484 = vpow2.f32 %v2338_v48  ;;  %v2396_v17 = vadd.f32 %v5107_v12, %v5105_v3 }
 0x304   : > { %3486 = vpow2.f32 %v2340_v63 }
 0x305   : > { %2397 = vadd.xlane.f32.xlu2 %v2396_v17 }
 0x306   : > { %v2260_v35 = vpop.xlane.xlu1 %2259 }
 0x307   : > { %v2302_v54 = vsub.f32 %v4904_v49, %v2260_v35  ;;  %v2303_v23 = vsub.f32 %v4907_v42, %v2260_v35 }
 0x309   : > { %v5113_v62 = vpop.eup %3484  ;;  %v2342_v16 = vmul.f32 1.442695, %v2302_v54  ;;  %v2344_v51 = vmul.f32 1.442695, %v2303_v23 }
 0x30a   : > { %v5115_v38 = vpop.eup %3486 }
 0x30b   : > { %3488 = vpow2.f32 %v2342_v16  ;;  %v2399_v14 = vadd.f32 %v5115_v38, %v5113_v62 }
 0x30c   : > { %3490 = vpow2.f32 %v2344_v51 }
 0x30d   : > { %2400 = vadd.xlane.f32.xlu0 %v2399_v14 }
 0x30e   : > { %v2263_v22 = vpop.xlane.xlu2 %2262 }
 0x30f   : > { %v2304_v48 = vsub.f32 %v4917_v31, %v2263_v22  ;;  %v2305_v63 = vsub.f32 %v4920_v58, %v2263_v22 }
 0x311   : > { %v5121_v49 = vpop.eup %3488  ;;  %v2346_v42 = vmul.f32 1.442695, %v2304_v48  ;;  %v2348_v17 = vmul.f32 1.442695, %v2305_v63 }
 0x312   : > { %v5123_v35 = vpop.eup %3490 }
 0x313   : > { %3492 = vpow2.f32 %v2346_v42  ;;  %v2402_v54 = vadd.f32 %v5123_v35, %v5121_v49 }
 0x314   : > { %3494 = vpow2.f32 %v2348_v17 }
 0x315   : > { %2403 = vadd.xlane.f32.xlu1 %v2402_v54 }
 0x316   : > { %v2266_v23 = vpop.xlane.xlu0 %2265 }
 0x317   : > { %v2306_v16 = vsub.f32 %v4930_v15, %v2266_v23  ;;  %v2307_v51 = vsub.f32 %v4933_v10, %v2266_v23 }
 0x319   : > { %v5129_v31 = vpop.eup %3492  ;;  %v2350_v58 = vmul.f32 1.442695, %v2306_v16  ;;  %v2352_v14 = vmul.f32 1.442695, %v2307_v51 }
 0x31a   : > { %v5131_v22 = vpop.eup %3494 }
 0x31b   : > { %3496 = vpow2.f32 %v2350_v58  ;;  %v2405_v48 = vadd.f32 %v5131_v22, %v5129_v31 }
 0x31c   : > { %3498 = vpow2.f32 %v2352_v14 }
 0x31d   : > { %2406 = vadd.xlane.f32.xlu2 %v2405_v48 }
 0x31e   : > { %v2269_v63 = vpop.xlane.xlu1 %2268 }
 0x31f   : > { %v2308_v42 = vsub.f32 %v4943_v2, %v2269_v63  ;;  %v2309_v17 = vsub.f32 %v4946_v52, %v2269_v63 }
 0x321   : > { %v5137_v15 = vpop.eup %3496  ;;  %v2354_v10 = vmul.f32 1.442695, %v2308_v42  ;;  %v2356_v54 = vmul.f32 1.442695, %v2309_v17 }
 0x322   : > { %v5139_v23 = vpop.eup %3498 }
 0x323   : > { %3500 = vpow2.f32 %v2354_v10  ;;  %v2408_v16 = vadd.f32 %v5139_v23, %v5137_v15 }
 0x324   : > { %3502 = vpow2.f32 %v2356_v54 }
 0x325   : > { %2409 = vadd.xlane.f32.xlu0 %v2408_v16 }
 0x326   : > { %v2272_v51 = vpop.xlane.xlu2 %2271 }
 0x327   : > { %v2310_v58 = vsub.f32 %v4956_v46, %v2272_v51  ;;  %v2311_v14 = vsub.f32 %v4959_v41, %v2272_v51 }
 0x329   : > { %v5145_v2 = vpop.eup %3500  ;;  %v2358_v52 = vmul.f32 1.442695, %v2310_v58  ;;  %v2360_v48 = vmul.f32 1.442695, %v2311_v14 }
 0x32a   : > { %v5147_v63 = vpop.eup %3502 }
 0x32b   : > { %3504 = vpow2.f32 %v2358_v52  ;;  %v2411_v42 = vadd.f32 %v5147_v63, %v5145_v2 }
 0x32c   : > { %3506 = vpow2.f32 %v2360_v48 }
 0x32d   : > { %2412 = vadd.xlane.f32.xlu1 %v2411_v42 }
 0x32e   : > { %v2275_v17 = vpop.xlane.xlu0 %2274 }
 0x32f   : > { %v2312_v10 = vsub.f32 %v4969_v30, %v2275_v17  ;;  %v2313_v54 = vsub.f32 %v4972_v21, %v2275_v17 }
 0x331   : > { %v5153_v46 = vpop.eup %3504  ;;  %v2362_v41 = vmul.f32 1.442695, %v2312_v10  ;;  %v2364_v16 = vmul.f32 1.442695, %v2313_v54 }
 0x332   : > { %v5155_v51 = vpop.eup %3506 }
 0x333   : > { %3508 = vpow2.f32 %v2362_v41  ;;  %v2414_v58 = vadd.f32 %v5155_v51, %v5153_v46 }
 0x334   : > { %3510 = vpow2.f32 %v2364_v16 }
 0x335   : > { %2415 = vadd.xlane.f32.xlu2 %v2414_v58 }
 0x336   : > { %v2278_v14 = vpop.xlane.xlu1 %2277 }
 0x337   : > { %v2314_v52 = vsub.f32 %v4982_v44, %v2278_v14  ;;  %v2315_v48 = vsub.f32 %v4985_v37, %v2278_v14 }
 0x339   : > { %v5161_v30 = vpop.eup %3508  ;;  %v2366_v21 = vmul.f32 1.442695, %v2314_v52  ;;  %v2368_v42 = vmul.f32 1.442695, %v2315_v48 }
 0x33a   : > { %5534 = vst [vmem:[#allocation24_spill] sm:$0xff] %v5161_v30  ;;  %v5163_v17 = vpop.eup %3510 }
 0x33b   : > { %5535 = vst [vmem:[#allocation25_spill] sm:$0xff] %v5163_v17  ;;  %3512 = vpow2.f32 %v2366_v21  ;;  %v2417_v10 = vadd.f32 %v5163_v17, %v5161_v30 }
 0x33c   : > { %3514 = vpow2.f32 %v2368_v42 }
 0x33d   : > { %2418 = vadd.xlane.f32.xlu0 %v2417_v10 }
 0x33e   : > { %v2281_v54 = vpop.xlane.xlu2 %2280 }
 0x33f   : > { %v2316_v41 = vsub.f32 %v4995_v61, %v2281_v54  ;;  %v2317_v16 = vsub.f32 %v4998_v43, %v2281_v54 }
 0x341   : > { %v5169_v44 = vpop.eup %3512  ;;  %v2370_v37 = vmul.f32 1.442695, %v2316_v41  ;;  %v2372_v58 = vmul.f32 1.442695, %v2317_v16 }
 0x342   : > { %5536 = vst [vmem:[#allocation28_spill] sm:$0xff] %v5169_v44  ;;  %v5171_v14 = vpop.eup %3514 }
 0x343   : > { %5537 = vst [vmem:[#allocation15_spill] sm:$0xff] %v5171_v14  ;;  %3516 = vpow2.f32 %v2370_v37  ;;  %v2420_v52 = vadd.f32 %v5171_v14, %v5169_v44 }
 0x344   : > { %3518 = vpow2.f32 %v2372_v58 }
 0x345   : > { %2421 = vadd.xlane.f32.xlu1 %v2420_v52  ;;  %v2284_v48 = vpop.xlane.xlu0 %2283 }
 0x346   : > { %v2318_v21 = vsub.f32 %v5006_v40, %v2284_v48  ;;  %v2319_v42 = vsub.f32 %v5009_v6, %v2284_v48  ;;  %v5185_v40 = vpop.f32.mrf.mxu0 }
 0x348   : > { %v2374_v61 = vmul.f32 1.442695, %v2318_v21  ;;  %v2376_v10 = vmul.f32 1.442695, %v2319_v42 }
 0x349   : > { %v5177_v43 = vpop.eup %3516 }
 0x34a   : > { %5538 = vst [vmem:[#allocation29_spill] sm:$0xff] %v5177_v43  ;;  %v5179_v54 = vpop.eup %3518  ;;  %3520 = vpow2.f32 %v2374_v61  ;;  %v5193_v61 = vpop.f32.mrf.mxu1 }
 0x34b   : > { %5539 = vst [vmem:[#allocation16_spill] sm:$0xff] %v5179_v54  ;;  %3522 = vpow2.f32 %v2376_v10  ;;  %v2423_v41 = vadd.f32 %v5179_v54, %v5177_v43 }
 0x34d   : > { %2424 = vadd.xlane.f32.xlu2 %v2423_v41  ;;  %v2287_v16 = vpop.xlane.xlu1 %2286 }
 0x34e   : > { %v2320_v37 = vsub.f32 %v5020_v20, %v2287_v16  ;;  %v2321_v58 = vsub.f32 %v5023_v59, %v2287_v16  ;;  %v5199_v28 = vpop.f32.mrf.mxu0 }
 0x350   : > { %v5187_v6 = vpop.eup %3520  ;;  %v2378_v52 = vmul.f32 1.442695, %v2320_v37  ;;  %v2380_v48 = vmul.f32 1.442695, %v2321_v58 }
 0x351   : > { %5540 = vst [vmem:[#allocation32_spill] sm:$0xff] %v5187_v6  ;;  %v5189_v21 = vpop.eup %3522 }
 0x352   : > { %5541 = vst [vmem:[#allocation30_spill] sm:$0xff] %v5189_v21  ;;  %3524 = vpow2.f32 %v2378_v52  ;;  %v2426_v42 = vadd.f32 %v5189_v21, %v5187_v6  ;;  %v5205_v21 = vpop.f32.mrf.mxu1 }
 0x353   : > { %3526 = vpow2.f32 %v2380_v48 }
 0x354   : > { %2427 = vadd.xlane.f32.xlu0 %v2426_v42 }
 0x355   : > { %v2290_v10 = vpop.xlane.xlu2 %2289  ;;  %v1449_v20 = vpop.xlane.xlu1 %1448 }
 0x356   : > { %v2322_v59 = vsub.f32 %v5040_v9, %v2290_v10  ;;  %v2323_v41 = vsub.f32 %v5043_v13, %v2290_v10  ;;  %3528 = vrcp.f32 %v1449_v20 }
 0x358   : > { %v5197_v16 = vpop.eup %3524  ;;  %v2382_v37 = vmul.f32 1.442695, %v2322_v59  ;;  %v2384_v58 = vmul.f32 1.442695, %v2323_v41 }
 0x359   : > { %5542 = vst [vmem:[#allocation33_spill] sm:$0xff] %v5197_v16  ;;  %v5201_v52 = vpop.eup %3526 }
 0x35a   : > { %5543 = vst [vmem:[#allocation17_spill] sm:$0xff] %v5201_v52  ;;  %3530 = vpow2.f32 %v2382_v37  ;;  %v2429_v48 = vadd.f32 %v5201_v52, %v5197_v16 }
 0x35b   : > { %3532 = vpow2.f32 %v2384_v58 }
 0x35c   : > { %v3529_v42 = vpop.eup %3528  ;;  %2430 = vadd.xlane.f32.xlu1 %v2429_v48 }
 0x35d   : > { %v1500_v9 = vmul.f32 %v3529_v42, %v5031_v0  ;;  %v1501_v13 = vmul.f32 %v3529_v42, %v5033_v11  ;;  %v1458_v10 = vpop.xlane.xlu1 %1457  ;;  %v2293_v20 = vpop.xlane.xlu0 %2292  ;;  %v5546_v0 = vld [vmem:[#allocation20_spill] sm:$0xff]  ;;  %v5547_v11 = vld [vmem:[#allocation38_spill] sm:$0xff] }
 0x35e   : > { %3534 = vrcp.f32 %v1458_v10  ;;  %v1452_v59 = vpop.xlane.xlu2 %1451  ;;  %v2324_v41 = vsub.f32 %v5062_v53, %v2293_v20  ;;  %v2325_v37 = vsub.f32 %v5065_v7, %v2293_v20  ;;  %v5219_v53 = vpop.f32.mrf.mxu0 }
 0x35f   : > { %v1532_v6 = vadd.f32 1.0, %v1500_v9  ;;  %v1533_v54 = vadd.f32 1.0, %v1501_v13  ;;  %3536 = vrcp.f32 %v1452_v59 }
 0x360   : > { %v5211_v58 = vpop.eup %3530  ;;  %v2386_v48 = vmul.f32 1.442695, %v2324_v41  ;;  %v2388_v52 = vmul.f32 1.442695, %v2325_v37 }
 0x361   : > { %5544 = vst [vmem:[#allocation34_spill] sm:$0xff] %v5211_v58  ;;  %v5213_v16 = vpop.eup %3532  ;;  %v1564_v43 = vmul.f32 %v1532_v6, %v5546_v0  ;;  %v1565_v42 = vmul.f32 %v1533_v54, %v5547_v11 }
 0x362   : > { %5545 = vst [vmem:[#allocation18_spill] sm:$0xff] %v5213_v16  ;;  %3538 = vpow2.f32 %v2386_v48  ;;  %v2432_v10 = vadd.f32 %v5213_v16, %v5211_v58  ;;  %v5225_v58 = vpop.f32.mrf.mxu1 }
 0x363   : > { %vm1596_vm6 = vcmp.gt.f32.partialorder %v1564_v43, 0.0  ;;  %vm1597_vm7 = vcmp.gt.f32.partialorder %v1565_v42, 0.0  ;;  %v1628_v7 = vmul.f32 0.01, %v1564_v43  ;;  %v1629_v9 = vmul.f32 0.01, %v1565_v42 }
 0x364   : > { %v3535_v13 = vpop.eup %3534  ;;  %3540 = vpow2.f32 %v2388_v52  ;;  %2433 = vadd.xlane.f32.xlu2 %v2432_v10 }
 0x365   : > { %v3537_v20 = vpop.eup %3536  ;;  %v1660_v59 = vsel %vm1596_vm6, %v1564_v43, %v1628_v7  ;;  %v1661_v41 = vsel %vm1597_vm7, %v1565_v42, %v1629_v9  ;;  %v1506_v6 = vmul.f32 %v3535_v13, %v5055_v56  ;;  %v1507_v54 = vmul.f32 %v3535_v13, %v5057_v4  ;;  %v1455_v37 = vpop.xlane.xlu0 %1454  ;;  %v5548_v42 = vld [vmem:[#allocation27_spill] sm:$0xff] }
 0x366   : > { %v1681_v48 = vpack.c.bf16 %v1661_v41, %v1660_v59  ;;  %v1502_v0 = vmul.f32 %v3537_v20, %v5053_v39  ;;  %v1503_v11 = vmul.f32 %v3537_v20, %v5059_v50  ;;  %v1461_v16 = vpop.xlane.xlu2 %1460  ;;  %3542 = vrcp.f32 %v1455_v37  ;;  %v5549_v7 = vld [vmem:[#allocation43_spill] sm:$0xff]  ;;  %v5550_v39 = vld [vmem:[#allocation22_spill] sm:$0xff] }
 0x367   : > { %v1538_v52 = vadd.f32 1.0, %v1506_v6  ;;  %v1539_v10 = vadd.f32 1.0, %v1507_v54  ;;  %3544 = vrcp.f32 %v1461_v16  ;;  %v5551_v20 = vld [vmem:[#allocation39_spill] sm:$0xff] }
 0x368   : > { %v5227_v33 = vpop.eup %3538  ;;  %1697 = vst [vmem:[%s4872_s28 + $0x58] sm:$0xff] %v1681_v48  ;;  %v1534_v43 = vadd.f32 1.0, %v1502_v0  ;;  %v1535_v56 = vadd.f32 1.0, %v1503_v11  ;;  %v5236_v48 = vpop.f32.mrf.mxu0 }
 0x369   : > { %v1570_v4 = vmul.f32 %v1538_v52, %v5548_v42  ;;  %v1571_v9 = vmul.f32 %v1539_v10, %v5549_v7 }
 0x36a   : > { %v5232_v13 = vpop.eup %3540  ;;  %v1566_v50 = vmul.f32 %v1534_v43, %v5550_v39  ;;  %v1567_v59 = vmul.f32 %v1535_v56, %v5551_v20 }
 0x36b   : > { %vm1602_vm8 = vcmp.gt.f32.partialorder %v1570_v4, 0.0  ;;  %vm1603_vm9 = vcmp.gt.f32.partialorder %v1571_v9, 0.0  ;;  %v1634_v41 = vmul.f32 0.01, %v1570_v4  ;;  %v1635_v6 = vmul.f32 0.01, %v1571_v9 }
 0x36c   : > { %v3543_v16 = vpop.eup %3542  ;;  %vm1598_vm10 = vcmp.gt.f32.partialorder %v1566_v50, 0.0  ;;  %vm1599_vm11 = vcmp.gt.f32.partialorder %v1567_v59, 0.0  ;;  %v1630_v54 = vmul.f32 0.01, %v1566_v50  ;;  %v1631_v37 = vmul.f32 0.01, %v1567_v59 }
 0x36d   : > { %v3545_v0 = vpop.eup %3544  ;;  %v1666_v11 = vsel %vm1602_vm8, %v1570_v4, %v1634_v41  ;;  %v1667_v52 = vsel %vm1603_vm9, %v1571_v9, %v1635_v6  ;;  %v1504_v10 = vmul.f32 %v3543_v16, %v5075_v1  ;;  %v1505_v43 = vmul.f32 %v3543_v16, %v5077_v5  ;;  %v2392_v56 = vpop.xlane.xlu0 %2391  ;;  %v5553_v41 = vld [vmem:[#allocation40_spill] sm:$0xff]  ;;  %v5554_v6 = vld [vmem:[#allocation23_spill] sm:$0xff]  ;;  %v5555_v16 = vld [vmem:[#allocation46_spill] sm:$0xff] }
 0x36e   : > { %v1684_v42 = vpack.c.bf16 %v1667_v52, %v1666_v11  ;;  %v1662_v7 = vsel %vm1598_vm10, %v1566_v50, %v1630_v54  ;;  %v1663_v39 = vsel %vm1599_vm11, %v1567_v59, %v1631_v37  ;;  %v1508_v20 = vmul.f32 %v3545_v0, %v5079_v27  ;;  %v5245_v5 = vpop.f32.mrf.mxu1  ;;  %v5552_v50 = vld [vmem:[#allocation26_spill] sm:$0xff]  ;;  %v5556_v52 = vld [vmem:[#allocation31_spill] sm:$0xff] }
 0x36f   : > { %v1682_v14 = vpack.c.bf16 %v1663_v39, %v1662_v7  ;;  %v1509_v44 = vmul.f32 %v3545_v0, %v5081_v36  ;;  %v1536_v19 = vadd.f32 1.0, %v1504_v10  ;;  %v1537_v17 = vadd.f32 1.0, %v1505_v43 }
 0x370   : > { %1700 = vst [vmem:[%s4872_s28 + $0x70] sm:$0xff] %v1684_v42  ;;  %v1540_v30 = vadd.f32 1.0, %v1508_v20  ;;  %v2435_v4 = vadd.f32 %v5232_v13, %v5227_v33  ;;  %3546 = vrcp.f32 %v2392_v56  ;;  %v2395_v1 = vpop.xlane.xlu1 %2394  ;;  %v5256_v56 = vpop.f32.mrf.mxu0 }
 0x371   : > { %1698 = vst [vmem:[%s4872_s28 + $0x60] sm:$0xff] %v1682_v14  ;;  %v1541_v9 = vadd.f32 1.0, %v1509_v44  ;;  %v1568_v59 = vmul.f32 %v1536_v19, %v5552_v50  ;;  %v1569_v27 = vmul.f32 %v1537_v17, %v5553_v41  ;;  %3548 = vrcp.f32 %v2395_v1 }
 0x372   : > { %v1572_v36 = vmul.f32 %v1540_v30, %v5554_v6  ;;  %2436 = vadd.xlane.f32.xlu0 %v2435_v4  ;;  %v2004_v14 = vadd.f32 %v5185_v40, %v5556_v52  ;;  %v2006_v30 = vadd.f32 %v5199_v28, %v5556_v52 }
 0x373   : > { %v1573_v54 = vmul.f32 %v1541_v9, %v5555_v16  ;;  %vm1600_vm12 = vcmp.gt.f32.partialorder %v1568_v59, 0.0  ;;  %vm1601_vm13 = vcmp.gt.f32.partialorder %v1569_v27, 0.0  ;;  %v1632_v37 = vmul.f32 0.01, %v1568_v59 }
 0x374   : > { %vm1604_vm14 = vcmp.gt.f32.partialorder %v1572_v36, 0.0  ;;  %v1636_v0 = vmul.f32 0.01, %v1572_v36  ;;  %v1633_v11 = vmul.f32 0.01, %v1569_v27  ;;  %v2055_v6 = vadd.f32 %v5205_v21, %v2006_v30 }
 0x375   : > { %vm1605_vm15 = vcmp.gt.f32.partialorder %v1573_v54, 0.0  ;;  %v1637_v44 = vmul.f32 0.01, %v1573_v54  ;;  %v1664_v19 = vsel %vm1600_vm12, %v1568_v59, %v1632_v37  ;;  %v2053_v59 = vadd.f32 %v5193_v61, %v2004_v14 }
 0x376   : > { %v3547_v17 = vpop.eup %3546  ;;  %v1668_v10 = vsel %vm1604_vm14, %v1572_v36, %v1636_v0  ;;  %v1665_v43 = vsel %vm1601_vm13, %v1569_v27, %v1633_v11 }
 0x377   : > { %v3549_v42 = vpop.eup %3548  ;;  %v1669_v7 = vsel %vm1605_vm15, %v1573_v54, %v1637_v44  ;;  %v1683_v39 = vpack.c.bf16 %v1665_v43, %v1664_v19  ;;  %v2454_v20 = vmul.f32 %v3547_v17, %v5089_v32  ;;  %v2455_v40 = vmul.f32 %v3547_v17, %v5091_v24  ;;  %v2062_v32 = vpop.f32.mrf.mxu1 }
 0x378   : > { %v1685_v4 = vpack.c.bf16 %v1669_v7, %v1668_v10  ;;  %v2456_v1 = vmul.f32 %v3549_v42, %v5097_v47  ;;  %v2457_v9 = vmul.f32 %v3549_v42, %v5099_v8  ;;  %v2398_v50 = vpop.xlane.xlu2 %2397  ;;  %v2009_v8 = vadd.f32 %v5219_v53, %v5556_v52  ;;  %v2015_v53 = vpop.f32.mrf.mxu0 }
 0x379   : > { %1699 = vst [vmem:[%s4872_s28 + $0x68] sm:$0xff] %v1683_v39  ;;  %v2486_v28 = vadd.f32 1.0, %v2454_v20  ;;  %v2487_v41 = vadd.f32 1.0, %v2455_v40  ;;  %3550 = vrcp.f32 %v2398_v50 }
 0x37a   : > { %1701 = vst [vmem:[%s4872_s28 + $0x78] sm:$0xff] %v1685_v4  ;;  %v2488_v27 = vadd.f32 1.0, %v2456_v1  ;;  %v2489_v36 = vadd.f32 1.0, %v2457_v9  ;;  %v2058_v30 = vadd.f32 %v5225_v58, %v2009_v8 }
 0x37b   : > { %v2518_v24 = vmul.f32 %v2486_v28, %v4682_v18  ;;  %v2519_v16 = vmul.f32 %v2487_v41, %v2053_v59 }
 0x37c   : > { %v2520_v47 = vmul.f32 %v2488_v27, %v4694_v34  ;;  %v2521_v54 = vmul.f32 %v2489_v36, %v2055_v6 }
 0x37d   : > { %vm2550_vm0 = vcmp.gt.f32.partialorder %v2518_v24, 0.0  ;;  %vm2551_vm1 = vcmp.gt.f32.partialorder %v2519_v16, 0.0  ;;  %v2582_v61 = vmul.f32 0.01, %v2518_v24  ;;  %v2583_v37 = vmul.f32 0.01, %v2519_v16 }
 0x37e   : > { %vm2552_vm2 = vcmp.gt.f32.partialorder %v2520_v47, 0.0  ;;  %vm2553_vm3 = vcmp.gt.f32.partialorder %v2521_v54, 0.0  ;;  %v2584_v0 = vmul.f32 0.01, %v2520_v47  ;;  %v2585_v21 = vmul.f32 0.01, %v2521_v54 }
 0x37f   : > { %v3551_v11 = vpop.eup %3550  ;;  %v2614_v14 = vsel %vm2550_vm0, %v2518_v24, %v2582_v61  ;;  %v2615_v18 = vsel %vm2551_vm1, %v2519_v16, %v2583_v37  ;;  %v2064_v40 = vpop.f32.mrf.mxu1 }
 0x380   : > { %v2646_v44 = vpack.c.bf16 %v2615_v18, %v2614_v14  ;;  %v2616_v19 = vsel %vm2552_vm2, %v2520_v47, %v2584_v0  ;;  %v2617_v34 = vsel %vm2553_vm3, %v2521_v54, %v2585_v21  ;;  %v2458_v17 = vmul.f32 %v3551_v11, %v5105_v3  ;;  %v2401_v10 = vpop.xlane.xlu0 %2400  ;;  %v2018_v24 = vpop.f32.mrf.mxu0 }
 0x381   : > { %v2647_v43 = vpack.c.bf16 %v2617_v34, %v2616_v19  ;;  %v2459_v42 = vmul.f32 %v3551_v11, %v5107_v12  ;;  %3552 = vrcp.f32 %v2401_v10  ;;  %v2011_v3 = vadd.f32 %v5236_v48, %v5556_v52 }
 0x382   : > { %2662 = vst [vmem:[%s4872_s28 + $0x80] sm:$0xff] %v2646_v44  ;;  %v2490_v7 = vadd.f32 1.0, %v2458_v17  ;;  %v2014_v48 = vadd.f32 %v5256_v56, %v5556_v52  ;;  %v2016_v34 = vadd.f32 %v2015_v53, %v5556_v52  ;;  %v2019_v53 = vadd.f32 %v2018_v24, %v5556_v52 }
 0x383   : > { %2663 = vst [vmem:[%s4872_s28 + $0x88] sm:$0xff] %v2647_v43  ;;  %v2491_v39 = vadd.f32 1.0, %v2459_v42  ;;  %v2060_v6 = vadd.f32 %v5245_v5, %v2011_v3 }
 0x384   : > { %v2522_v20 = vmul.f32 %v2490_v7, %v4708_v29  ;;  %v2063_v61 = vadd.f32 %v2062_v32, %v2014_v48 }
 0x385   : > { %v2523_v4 = vmul.f32 %v2491_v39, %v2058_v30 }
 0x386   : > { %vm2554_vm4 = vcmp.gt.f32.partialorder %v2522_v20, 0.0  ;;  %v2586_v1 = vmul.f32 0.01, %v2522_v20 }
 0x387   : > { %v3553_v9 = vpop.eup %3552  ;;  %vm2555_vm5 = vcmp.gt.f32.partialorder %v2523_v4, 0.0  ;;  %v2587_v58 = vmul.f32 0.01, %v2523_v4  ;;  %v2067_v54 = vpop.f32.mrf.mxu1 }
 0x388   : > { %v2618_v50 = vsel %vm2554_vm4, %v2522_v20, %v2586_v1  ;;  %v2460_v12 = vmul.f32 %v3553_v9, %v5113_v62  ;;  %v2461_v59 = vmul.f32 %v3553_v9, %v5115_v38  ;;  %v2404_v28 = vpop.xlane.xlu1 %2403  ;;  %v2020_v19 = vpop.f32.mrf.mxu0  ;;  %v2065_v20 = vadd.f32 %v2064_v40, %v2016_v34 }
 0x389   : > { %v2619_v41 = vsel %vm2555_vm5, %v2523_v4, %v2587_v58  ;;  %3554 = vrcp.f32 %v2404_v28  ;;  %v2021_v48 = vadd.f32 %v2020_v19, %v5556_v52 }
 0x38a   : > { %v2648_v29 = vpack.c.bf16 %v2619_v41, %v2618_v50  ;;  %v2492_v27 = vadd.f32 1.0, %v2460_v12  ;;  %v2493_v36 = vadd.f32 1.0, %v2461_v59  ;;  %v2068_v50 = vadd.f32 %v2067_v54, %v2019_v53 }
 0x38c   : > { %2664 = vst [vmem:[%s4872_s28 + $0x90] sm:$0xff] %v2648_v29  ;;  %v2524_v16 = vmul.f32 %v2492_v27, %v4720_v25  ;;  %v2525_v47 = vmul.f32 %v2493_v36, %v2060_v6 }
 0x38e   : > { %vm2556_vm6 = vcmp.gt.f32.partialorder %v2524_v16, 0.0  ;;  %vm2557_vm7 = vcmp.gt.f32.partialorder %v2525_v47, 0.0  ;;  %v2588_v62 = vmul.f32 0.01, %v2524_v16  ;;  %v2589_v38 = vmul.f32 0.01, %v2525_v47 }
 0x38f   : > { %v3555_v8 = vpop.eup %3554  ;;  %v2069_v7 = vpop.f32.mrf.mxu1 }
 0x390   : > { %v2620_v37 = vsel %vm2556_vm6, %v2524_v16, %v2588_v62  ;;  %v2621_v0 = vsel %vm2557_vm7, %v2525_v47, %v2589_v38  ;;  %v2462_v5 = vmul.f32 %v3555_v8, %v5121_v49  ;;  %v2463_v21 = vmul.f32 %v3555_v8, %v5123_v35  ;;  %v2407_v11 = vpop.xlane.xlu2 %2406  ;;  %v2023_v58 = vpop.f32.mrf.mxu0 }
 0x391   : > { %v2649_v56 = vpack.c.bf16 %v2621_v0, %v2620_v37  ;;  %3556 = vrcp.f32 %v2407_v11  ;;  %v2070_v0 = vadd.f32 %v2069_v7, %v2021_v48 }
 0x392   : > { %v2494_v14 = vadd.f32 1.0, %v2462_v5  ;;  %v2495_v25 = vadd.f32 1.0, %v2463_v21  ;;  %v2024_v21 = vadd.f32 %v2023_v58, %v5556_v52 }
 0x393   : > { %2665 = vst [vmem:[%s4872_s28 + $0x98] sm:$0xff] %v2649_v56 }
 0x394   : > { %v2526_v18 = vmul.f32 %v2494_v14, %v4734_v45  ;;  %v2527_v44 = vmul.f32 %v2495_v25, %v2063_v61 }
 0x396   : > { %vm2558_vm8 = vcmp.gt.f32.partialorder %v2526_v18, 0.0  ;;  %vm2559_vm9 = vcmp.gt.f32.partialorder %v2527_v44, 0.0  ;;  %v2590_v32 = vmul.f32 0.01, %v2526_v18  ;;  %v2591_v17 = vmul.f32 0.01, %v2527_v44 }
 0x397   : > { %v3557_v49 = vpop.eup %3556  ;;  %v2072_v6 = vpop.f32.mrf.mxu1 }
 0x398   : > { %v2622_v10 = vsel %vm2558_vm8, %v2526_v18, %v2590_v32  ;;  %v2623_v35 = vsel %vm2559_vm9, %v2527_v44, %v2591_v17  ;;  %v2464_v43 = vmul.f32 %v3557_v49, %v5129_v31  ;;  %v2465_v30 = vmul.f32 %v3557_v49, %v5131_v22  ;;  %v2410_v42 = vpop.xlane.xlu0 %2409  ;;  %v2025_v61 = vpop.f32.mrf.mxu0 }
 0x399   : > { %v2650_v39 = vpack.c.bf16 %v2623_v35, %v2622_v10  ;;  %3558 = vrcp.f32 %v2410_v42  ;;  %v2073_v18 = vadd.f32 %v2072_v6, %v2024_v21  ;;  %v2026_v42 = vadd.f32 %v2025_v61, %v5556_v52 }
 0x39a   : > { %v2496_v45 = vadd.f32 1.0, %v2464_v43  ;;  %v2497_v4 = vadd.f32 1.0, %v2465_v30 }
 0x39b   : > { %2666 = vst [vmem:[%s4872_s28 + $0xa0] sm:$0xff] %v2650_v39 }
 0x39c   : > { %v2528_v1 = vmul.f32 %v2496_v45, %v4746_v55  ;;  %v2529_v3 = vmul.f32 %v2497_v4, %v2065_v20  ;;  %v5557_v4 = vld [vmem:[#allocation24_spill] sm:$0xff] }
 0x39e   : > { %vm2560_vm10 = vcmp.gt.f32.partialorder %v2528_v1, 0.0  ;;  %vm2561_vm11 = vcmp.gt.f32.partialorder %v2529_v3, 0.0  ;;  %v2592_v9 = vmul.f32 0.01, %v2528_v1  ;;  %v2593_v31 = vmul.f32 0.01, %v2529_v3 }
 0x39f   : > { %v3559_v22 = vpop.eup %3558  ;;  %v2074_v14 = vpop.f32.mrf.mxu1 }
 0x3a0   : > { %v2624_v12 = vsel %vm2560_vm10, %v2528_v1, %v2592_v9  ;;  %v2625_v59 = vsel %vm2561_vm11, %v2529_v3, %v2593_v31  ;;  %v2466_v28 = vmul.f32 %v3559_v22, %v5137_v15  ;;  %v2467_v40 = vmul.f32 %v3559_v22, %v5139_v23  ;;  %v2413_v41 = vpop.xlane.xlu1 %2412  ;;  %v2028_v35 = vpop.f32.mrf.mxu0  ;;  %v5558_v1 = vld [vmem:[#allocation25_spill] sm:$0xff] }
 0x3a1   : > { %v2651_v29 = vpack.c.bf16 %v2625_v59, %v2624_v12  ;;  %3560 = vrcp.f32 %v2413_v41  ;;  %v2075_v58 = vadd.f32 %v2074_v14, %v2026_v42  ;;  %v5559_v12 = vld [vmem:[#allocation51_spill] sm:$0xff] }
 0x3a2   : > { %v2498_v27 = vadd.f32 1.0, %v2466_v28  ;;  %v2499_v55 = vadd.f32 1.0, %v2467_v40 }
 0x3a3   : > { %2667 = vst [vmem:[%s4872_s28 + $0xa8] sm:$0xff] %v2651_v29 }
 0x3a4   : > { %v2530_v36 = vmul.f32 %v2498_v27, %v4760_v26  ;;  %v2531_v24 = vmul.f32 %v2499_v55, %v2068_v50  ;;  %v2029_v50 = vadd.f32 %v2028_v35, %v5556_v52 }
 0x3a6   : > { %vm2562_vm12 = vcmp.gt.f32.partialorder %v2530_v36, 0.0  ;;  %vm2563_vm13 = vcmp.gt.f32.partialorder %v2531_v24, 0.0  ;;  %v2594_v16 = vmul.f32 0.01, %v2530_v36  ;;  %v2595_v47 = vmul.f32 0.01, %v2531_v24 }
 0x3a7   : > { %v3561_v15 = vpop.eup %3560 }
 0x3a8   : > { %v2626_v62 = vsel %vm2562_vm12, %v2530_v36, %v2594_v16  ;;  %v2627_v23 = vsel %vm2563_vm13, %v2531_v24, %v2595_v47  ;;  %v2468_v38 = vmul.f32 %v3561_v15, %v5145_v2  ;;  %v2469_v54 = vmul.f32 %v3561_v15, %v5147_v63  ;;  %v2416_v8 = vpop.xlane.xlu2 %2415  ;;  %v2030_v40 = vpop.f32.mrf.mxu0  ;;  %v5560_v24 = vld [vmem:[#allocation28_spill] sm:$0xff]  ;;  %v5561_v16 = vld [vmem:[#allocation15_spill] sm:$0xff] }
 0x3a9   : > { %v2652_v37 = vpack.c.bf16 %v2627_v23, %v2626_v62  ;;  %3562 = vrcp.f32 %v2416_v8  ;;  %v5562_v8 = vld [vmem:[#allocation52_spill] sm:$0xff] }
 0x3aa   : > { %v2500_v26 = vadd.f32 1.0, %v2468_v38  ;;  %v2501_v5 = vadd.f32 1.0, %v2469_v54 }
 0x3ab   : > { %2668 = vst [vmem:[%s4872_s28 + $0xb0] sm:$0xff] %v2652_v37 }
 0x3ac   : > { %v2532_v11 = vmul.f32 %v2500_v26, %v4772_v60  ;;  %v2533_v56 = vmul.f32 %v2501_v5, %v2070_v0  ;;  %v2031_v26 = vadd.f32 %v2030_v40, %v5556_v52 }
 0x3ae   : > { %vm2564_vm14 = vcmp.gt.f32.partialorder %v2532_v11, 0.0  ;;  %vm2565_vm15 = vcmp.gt.f32.partialorder %v2533_v56, 0.0  ;;  %v2596_v2 = vmul.f32 0.01, %v2532_v11  ;;  %v2597_v25 = vmul.f32 0.01, %v2533_v56 }
 0x3af   : > { %v3563_v63 = vpop.eup %3562 }
 0x3b0   : > { %v2628_v44 = vsel %vm2564_vm14, %v2532_v11, %v2596_v2  ;;  %v2629_v19 = vsel %vm2565_vm15, %v2533_v56, %v2597_v25  ;;  %v2470_v34 = vmul.f32 %v3563_v63, %v5153_v46  ;;  %v2471_v32 = vmul.f32 %v3563_v63, %v5155_v51  ;;  %v2419_v17 = vpop.xlane.xlu0 %2418  ;;  %v2077_v46 = vpop.f32.mrf.mxu1  ;;  %v5563_v25 = vld [vmem:[#allocation29_spill] sm:$0xff] }
 0x3b1   : > { %v2653_v49 = vpack.c.bf16 %v2629_v19, %v2628_v44  ;;  %3564 = vrcp.f32 %v2419_v17  ;;  %v2078_v55 = vadd.f32 %v2077_v46, %v2029_v50  ;;  %v2033_v21 = vpop.f32.mrf.mxu0 }
 0x3b2   : > { %v2502_v10 = vadd.f32 1.0, %v2470_v34  ;;  %v2503_v60 = vadd.f32 1.0, %v2471_v32 }
 0x3b3   : > { %2669 = vst [vmem:[%s4872_s28 + $0xb8] sm:$0xff] %v2653_v49 }
 0x3b4   : > { %v2534_v43 = vmul.f32 %v2502_v10, %v4786_v57  ;;  %v2535_v30 = vmul.f32 %v2503_v60, %v2073_v18  ;;  %v5564_v18 = vld [vmem:[#allocation16_spill] sm:$0xff]  ;;  %v2034_v10 = vadd.f32 %v2033_v21, %v5556_v52  ;;  %v5565_v60 = vld [vmem:[#allocation53_spill] sm:$0xff] }
 0x3b6   : > { %vm2566_vm0 = vcmp.gt.f32.partialorder %v2534_v43, 0.0  ;;  %vm2567_vm1 = vcmp.gt.f32.partialorder %v2535_v30, 0.0  ;;  %v2598_v7 = vmul.f32 0.01, %v2534_v43  ;;  %v2599_v39 = vmul.f32 0.01, %v2535_v30 }
 0x3b7   : > { %v3565_v45 = vpop.eup %3564 }
 0x3b8   : > { %v2630_v51 = vsel %vm2566_vm0, %v2534_v43, %v2598_v7  ;;  %v2631_v20 = vsel %vm2567_vm1, %v2535_v30, %v2599_v39  ;;  %v2472_v53 = vmul.f32 %v3565_v45, %v5557_v4  ;;  %v2473_v3 = vmul.f32 %v3565_v45, %v5558_v1  ;;  %v2422_v9 = vpop.xlane.xlu1 %2421  ;;  %v2079_v62 = vpop.f32.mrf.mxu1 }
 0x3b9   : > { %v2654_v31 = vpack.c.bf16 %v2631_v20, %v2630_v51  ;;  %3566 = vrcp.f32 %v2422_v9  ;;  %v2080_v32 = vadd.f32 %v2079_v62, %v2031_v26  ;;  %v5566_v20 = vld [vmem:[#allocation32_spill] sm:$0xff] }
 0x3ba   : > { %v2504_v57 = vadd.f32 1.0, %v2472_v53  ;;  %v2505_v22 = vadd.f32 1.0, %v2473_v3  ;;  %v5567_v53 = vld [vmem:[#allocation30_spill] sm:$0xff]  ;;  %v2035_v3 = vpop.f32.mrf.mxu0 }
 0x3bb   : > { %2670 = vst [vmem:[%s4872_s28 + $0xc0] sm:$0xff] %v2654_v31 }
 0x3bc   : > { %v2536_v59 = vmul.f32 %v2504_v57, %v5559_v12  ;;  %v2537_v28 = vmul.f32 %v2505_v22, %v2075_v58  ;;  %v5568_v58 = vld [vmem:[#allocation54_spill] sm:$0xff] }
 0x3be   : > { %vm2568_vm2 = vcmp.gt.f32.partialorder %v2536_v59, 0.0  ;;  %vm2569_vm3 = vcmp.gt.f32.partialorder %v2537_v28, 0.0  ;;  %v2600_v41 = vmul.f32 0.01, %v2536_v59  ;;  %v2601_v29 = vmul.f32 0.01, %v2537_v28 }
 0x3bf   : > { %v3567_v27 = vpop.eup %3566 }
 0x3c0   : > { %v2632_v6 = vsel %vm2568_vm2, %v2536_v59, %v2600_v41  ;;  %v2633_v36 = vsel %vm2569_vm3, %v2537_v28, %v2601_v29  ;;  %v2474_v48 = vmul.f32 %v3567_v27, %v5560_v24  ;;  %v2475_v47 = vmul.f32 %v3567_v27, %v5561_v16  ;;  %v2425_v15 = vpop.xlane.xlu2 %2424  ;;  %v2082_v49 = vpop.f32.mrf.mxu1  ;;  %v5570_v24 = vld [vmem:[#allocation17_spill] sm:$0xff] }
 0x3c1   : > { %v2655_v23 = vpack.c.bf16 %v2633_v36, %v2632_v6  ;;  %3568 = vrcp.f32 %v2425_v15  ;;  %v2083_v39 = vadd.f32 %v2082_v49, %v2034_v10  ;;  %v2036_v59 = vadd.f32 %v2035_v3, %v5556_v52  ;;  %v5569_v6 = vld [vmem:[#allocation33_spill] sm:$0xff] }
 0x3c2   : > { %v2506_v38 = vadd.f32 1.0, %v2474_v48  ;;  %v2507_v54 = vadd.f32 1.0, %v2475_v47 }
 0x3c3   : > { %2671 = vst [vmem:[%s4872_s28 + $0xc8] sm:$0xff] %v2655_v23  ;;  %v2038_v23 = vpop.f32.mrf.mxu0 }
 0x3c4   : > { %v2538_v61 = vmul.f32 %v2506_v38, %v5562_v8  ;;  %v2539_v37 = vmul.f32 %v2507_v54, %v2078_v55  ;;  %v2039_v38 = vadd.f32 %v2038_v23, %v5556_v52  ;;  %v5571_v54 = vld [vmem:[#allocation55_spill] sm:$0xff] }
 0x3c6   : > { %vm2570_vm4 = vcmp.gt.f32.partialorder %v2538_v61, 0.0  ;;  %vm2571_vm5 = vcmp.gt.f32.partialorder %v2539_v37, 0.0  ;;  %v2602_v0 = vmul.f32 0.01, %v2538_v61  ;;  %v2603_v5 = vmul.f32 0.01, %v2539_v37 }
 0x3c7   : > { %v3569_v11 = vpop.eup %3568  ;;  %v2428_v56 = vpop.xlane.xlu0 %2427 }
 0x3c8   : > { %v2634_v14 = vsel %vm2570_vm4, %v2538_v61, %v2602_v0  ;;  %v2635_v2 = vsel %vm2571_vm5, %v2539_v37, %v2603_v5  ;;  %v2476_v63 = vmul.f32 %v3569_v11, %v5563_v25  ;;  %v2477_v44 = vmul.f32 %v3569_v11, %v5564_v18  ;;  %v2084_v12 = vpop.f32.mrf.mxu1  ;;  %v5573_v25 = vld [vmem:[#allocation18_spill] sm:$0xff] }
 0x3c9   : > { %v2656_v19 = vpack.c.bf16 %v2635_v2, %v2634_v14  ;;  %3570 = vrcp.f32 %v2428_v56  ;;  %v2085_v15 = vadd.f32 %v2084_v12, %v2036_v59  ;;  %v5572_v14 = vld [vmem:[#allocation34_spill] sm:$0xff] }
 0x3ca   : > { %v2508_v34 = vadd.f32 1.0, %v2476_v63  ;;  %v2509_v17 = vadd.f32 1.0, %v2477_v44 }
 0x3cb   : > { %2672 = vst [vmem:[%s4872_s28 + $0xd0] sm:$0xff] %v2656_v19 }
 0x3cc   : > { %v2540_v35 = vmul.f32 %v2508_v34, %v5565_v60  ;;  %v2541_v43 = vmul.f32 %v2509_v17, %v2080_v32  ;;  %v5574_v34 = vld [vmem:[#allocation56_spill] sm:$0xff] }
 0x3ce   : > { %vm2572_vm6 = vcmp.gt.f32.partialorder %v2540_v35, 0.0  ;;  %vm2573_vm7 = vcmp.gt.f32.partialorder %v2541_v43, 0.0  ;;  %v2604_v30 = vmul.f32 0.01, %v2540_v35  ;;  %v2605_v42 = vmul.f32 0.01, %v2541_v43 }
 0x3cf   : > { %v3571_v7 = vpop.eup %3570  ;;  %v2431_v46 = vpop.xlane.xlu1 %2430 }
 0x3d0   : > { %v2636_v45 = vsel %vm2572_vm6, %v2540_v35, %v2604_v30  ;;  %v2637_v51 = vsel %vm2573_vm7, %v2541_v43, %v2605_v42  ;;  %v2478_v4 = vmul.f32 %v3571_v7, %v5566_v20  ;;  %v2479_v1 = vmul.f32 %v3571_v7, %v5567_v53  ;;  %v2087_v0 = vpop.f32.mrf.mxu1  ;;  %v2040_v42 = vpop.f32.mrf.mxu0 }
 0x3d1   : > { %v2657_v9 = vpack.c.bf16 %v2637_v51, %v2636_v45  ;;  %3572 = vrcp.f32 %v2431_v46  ;;  %v2088_v21 = vadd.f32 %v2087_v0, %v2039_v38  ;;  %v2041_v7 = vadd.f32 %v2040_v42, %v5556_v52 }
 0x3d2   : > { %v2510_v31 = vadd.f32 1.0, %v2478_v4  ;;  %v2511_v57 = vadd.f32 1.0, %v2479_v1  ;;  %v5575_v1 = vld [vmem:[#allocation57_spill] sm:$0xff] }
 0x3d3   : > { %2673 = vst [vmem:[%s4872_s28 + $0xd8] sm:$0xff] %v2657_v9 }
 0x3d4   : > { %v2542_v22 = vmul.f32 %v2510_v31, %v5568_v58  ;;  %v2543_v50 = vmul.f32 %v2511_v57, %v2083_v39 }
 0x3d6   : > { %vm2574_vm8 = vcmp.gt.f32.partialorder %v2542_v22, 0.0  ;;  %vm2575_vm9 = vcmp.gt.f32.partialorder %v2543_v50, 0.0  ;;  %v2606_v28 = vmul.f32 0.01, %v2542_v22  ;;  %v2607_v40 = vmul.f32 0.01, %v2543_v50 }
 0x3d7   : > { %v3573_v41 = vpop.eup %3572  ;;  %v2434_v29 = vpop.xlane.xlu2 %2433 }
 0x3d8   : > { %v2638_v27 = vsel %vm2574_vm8, %v2542_v22, %v2606_v28  ;;  %v2639_v55 = vsel %vm2575_vm9, %v2543_v50, %v2607_v40  ;;  %v2480_v36 = vmul.f32 %v3573_v41, %v5569_v6  ;;  %v2481_v48 = vmul.f32 %v3573_v41, %v5570_v24  ;;  %v2089_v46 = vpop.f32.mrf.mxu1 }
 0x3d9   : > { %v2658_v16 = vpack.c.bf16 %v2639_v55, %v2638_v27  ;;  %3574 = vrcp.f32 %v2434_v29  ;;  %v2090_v4 = vadd.f32 %v2089_v46, %v2041_v7 }
 0x3da   : > { %v2512_v47 = vadd.f32 1.0, %v2480_v36  ;;  %v2513_v62 = vadd.f32 1.0, %v2481_v48 }
 0x3db   : > { %2674 = vst [vmem:[%s4872_s28 + $0xe0] sm:$0xff] %v2658_v16 }
 0x3dc   : > { %v2544_v8 = vmul.f32 %v2512_v47, %v5571_v54  ;;  %v2545_v61 = vmul.f32 %v2513_v62, %v2085_v15 }
 0x3de   : > { %vm2576_vm10 = vcmp.gt.f32.partialorder %v2544_v8, 0.0  ;;  %vm2577_vm11 = vcmp.gt.f32.partialorder %v2545_v61, 0.0  ;;  %v2608_v37 = vmul.f32 0.01, %v2544_v8  ;;  %v2609_v26 = vmul.f32 0.01, %v2545_v61 }
 0x3df   : > { %v3575_v5 = vpop.eup %3574 }
 0x3e0   : > { %v2640_v11 = vsel %vm2576_vm10, %v2544_v8, %v2608_v37  ;;  %v2641_v56 = vsel %vm2577_vm11, %v2545_v61, %v2609_v26  ;;  %v2482_v2 = vmul.f32 %v3575_v5, %v5572_v14  ;;  %v2483_v63 = vmul.f32 %v3575_v5, %v5573_v25 }
 0x3e1   : > { %v2659_v18 = vpack.c.bf16 %v2641_v56, %v2640_v11 }
 0x3e2   : > { %v2514_v44 = vadd.f32 1.0, %v2482_v2  ;;  %v2515_v19 = vadd.f32 1.0, %v2483_v63 }
 0x3e3   : > { %2675 = vst [vmem:[%s4872_s28 + $0xe8] sm:$0xff] %v2659_v18 }
 0x3e4   : > { %v2546_v32 = vmul.f32 %v2514_v44, %v5574_v34  ;;  %v2547_v17 = vmul.f32 %v2515_v19, %v2088_v21 }
 0x3e5   : > { %v2437_v49 = vpop.xlane.xlu0 %2436 }
 0x3e6   : > { %vm2578_vm12 = vcmp.gt.f32.partialorder %v2546_v32, 0.0  ;;  %vm2579_vm13 = vcmp.gt.f32.partialorder %v2547_v17, 0.0  ;;  %v2610_v10 = vmul.f32 0.01, %v2546_v32  ;;  %v2611_v60 = vmul.f32 0.01, %v2547_v17 }
 0x3e7   : > { %3576 = vrcp.f32 %v2437_v49 }
 0x3e8   : > { %v2642_v35 = vsel %vm2578_vm12, %v2546_v32, %v2610_v10  ;;  %v2643_v43 = vsel %vm2579_vm13, %v2547_v17, %v2611_v60 }
 0x3e9   : > { %v2660_v30 = vpack.c.bf16 %v2643_v43, %v2642_v35 }
 0x3eb   : > { %2676 = vst [vmem:[%s4872_s28 + $0xf0] sm:$0xff] %v2660_v30 }
 0x3ed   : > { %v3577_v39 = vpop.eup %3576 }
 0x3ee   : > { %v2484_v45 = vmul.f32 %v3577_v39, %v5227_v33  ;;  %v2485_v51 = vmul.f32 %v3577_v39, %v5232_v13 }
 0x3f0   : > { %v2516_v20 = vadd.f32 1.0, %v2484_v45  ;;  %v2517_v53 = vadd.f32 1.0, %v2485_v51 }
 0x3f2   : > { %v2548_v3 = vmul.f32 %v2516_v20, %v5575_v1  ;;  %v2549_v9 = vmul.f32 %v2517_v53, %v2090_v4 }
 0x3f4   : > { %vm2580_vm14 = vcmp.gt.f32.partialorder %v2548_v3, 0.0  ;;  %vm2581_vm15 = vcmp.gt.f32.partialorder %v2549_v9, 0.0  ;;  %v2612_v33 = vmul.f32 0.01, %v2548_v3  ;;  %v2613_v52 = vmul.f32 0.01, %v2549_v9 }
 0x3f6   : > { %v2644_v13 = vsel %vm2580_vm14, %v2548_v3, %v2612_v33  ;;  %v2645_v31 = vsel %vm2581_vm15, %v2549_v9, %v2613_v52 }
 0x3f7   : > { %v2661_v57 = vpack.c.bf16 %v2645_v31, %v2644_v13 }
 0x3f9   : > { %2677 = vst [vmem:[%s4872_s28 + $0xf8] sm:$0xff] %v2661_v57 }
 0x3fa   : > { %3725 = shalt.err (!%p3722_p10)
}
 0x3fb   : > { %s3781_s17 = smov 128   ;;  %s3782_s29 = smov 8  }
 0x3fc   : > { %3317 = dma.vmem_to_hbm [thread:$0]  (%p3898_p3), %s2693_s13, 4096, %s2695_s12, %s2679_s22, %s3781_s17, %s3781_s17, %s3782_s29  }
 0x3fd PF: > { %s2709_s28 = sand.u32 1, %s3760_s18   ;;  %p5576_p12 = scmp.ge.s32.totalorder %s3772_s21, 2 }
 0x3fe   : > { %s2710_s16 = scalar_lea.sflag [#allocation4], %s2709_s28 }
 0x3ff   : > { %p3334_p13 = pnand %p5576_p12, %p3848_p6 }
 0x401   : > { %p3335_p0 = pneg %p3334_p13 }
 0x403   : > { %3755 = dma.done.wait (%p3335_p0), %s2710_s16, 4096  }
 0x404   : > { %3757 = vsyncadd (%p3335_p0), %s2710_s16, 4294963200  ;;  %p20_p5 = scmp.ge.s32.totalorder %s3885_s30, 4   ;;  %s5577_s18 = smov %s3764_s19 }
 0x405   : > { %s5578_s19 = smov %s3768_s20  ;;  %s5579_s20 = smov %s3894_s9 }
 0x406   : > { %s5580_s21 = smov %s3885_s30  ;;  %22 = sbr.rel (!%p20_p5) target bundleno = 7 (0x7), region = 97 }
 0x40b   :  { %2716 = vsyncpa [#allocation3], 1 }
 0x40c   :  { %2718 = vsyncpa [#allocation3 + $0x1], 1 }
 0x40d   :  { %2719 = vsyncpa [#allocation6], 1 }
 0x40e   :  { %2720 = vsyncpa [#allocation9], 1 }
 0x40f   :  { %2721 = vsyncpa [#allocation4], 1 }
 0x410   :  { %2723 = vsyncpa [#allocation4 + $0x1], 1 }

</bundles_post_ra>
